<compile_context>
chip_gen: v6e
topology: v6e:2x2x1
jax: 0.10.0
libtpu: 0.0.40
codegen_flags: <defaults>
</compile_context>

<pallas_src>
import math

import jax
import jax.numpy as jnp
from jax.experimental import pallas as pl
from jax.experimental.pallas import tpu as pltpu


PER_LAYER = ['ln1_g', 'ln1_b', 'qkv_w', 'qkv_b', 'proj_w', 'proj_b',
             'ln2_g', 'ln2_b', 'fc1_w', 'fc1_b', 'fc2_w', 'fc2_b']
GLOBAL = ['norm_g', 'norm_b']


# ----------------------------------------------------------------------------------
# shared math
# ----------------------------------------------------------------------------------
def _layernorm(x, g, b, eps=1e-5):
    mu = jnp.mean(x, axis=-1, keepdims=True)
    var = jnp.mean(jnp.square(x - mu), axis=-1, keepdims=True)
    return (x - mu) * jax.lax.rsqrt(var + eps) * g + b


def _block_forward(x, w, *, heads, head_dim, model_dim, block_b, n_tok):
    """One pre-norm transformer block on a (R, D) f32 activation (R = block_b*n_tok)."""
    D, Bb, N = model_dim, block_b, n_tok
    R = Bb * N
    bf16 = jnp.bfloat16
    scale = float(head_dim) ** -0.5

    # ---- multi-head self-attention -----------------------------------------------
    h = _layernorm(x, w['ln1_g'], w['ln1_b'])
    qkv = jnp.dot(h.astype(bf16), w['qkv_w'],
                  preferred_element_type=jnp.float32) + w['qkv_b']      # (R, 3D)
    q = qkv[:, :D].reshape(Bb, N, D)
    k = qkv[:, D:2 * D].reshape(Bb, N, D)
    v = qkv[:, 2 * D:].reshape(Bb, N, D)

    attn = None
    for hh in range(heads):
        s = hh * head_dim
        qh = q[:, :, s:s + head_dim].astype(bf16)
        kh = k[:, :, s:s + head_dim].astype(bf16)
        vh = v[:, :, s:s + head_dim].astype(bf16)
        att = jnp.einsum('bnd,bmd->bnm', qh, kh,
                         preferred_element_type=jnp.float32) * scale
        att = att - jnp.max(att, axis=-1, keepdims=True)                 # f32 softmax
        p = jnp.exp(att)
        p = p / jnp.sum(p, axis=-1, keepdims=True)                       # exact divide
        oh = jnp.einsum('bnm,bmd->bnd', p.astype(bf16), vh,
                        preferred_element_type=jnp.float32)              # (Bb, N, hd)
        # Fold this head's output straight into the projection (no concat, no long
        # live ranges): accumulate oh @ proj_w[rows of this head].
        contrib = jnp.dot(oh.reshape(R, head_dim).astype(bf16),
                          w['proj_w'][s:s + head_dim, :],
                          preferred_element_type=jnp.float32)
        attn = contrib if attn is None else attn + contrib
    x = x + attn + w['proj_b']                    # drop_path = identity (eval)

    # ---- MLP ----------------------------------------------------------------------
    h2 = _layernorm(x, w['ln2_g'], w['ln2_b'])
    h2 = jnp.dot(h2.astype(bf16), w['fc1_w'],
                 preferred_element_type=jnp.float32) + w['fc1_b']
    # TODO(synk): PyTorch nn.GELU defaults to exact erf; tanh approximation used here
    # for robust Mosaic lowering (~1e-3 level difference).
    h2 = jax.nn.gelu(h2, approximate=True)
    h2 = jnp.dot(h2.astype(bf16), w['fc2_w'],
                 preferred_element_type=jnp.float32) + w['fc2_b']
    return x + h2


# ----------------------------------------------------------------------------------
# kernels
# ----------------------------------------------------------------------------------
def _make_resident_kernel(depth, heads, head_dim, model_dim, block_b, n_tok):
    """All layer weights resident in VMEM; depth unrolled in-kernel. grid = (B//Bb,)."""

    def kernel(x0_ref,
               ln1_g, ln1_b, qkv_w, qkv_b, proj_w, proj_b,
               ln2_g, ln2_b, fc1_w, fc1_b, fc2_w, fc2_b,
               norm_g, norm_b, y_ref):
        refs = dict(ln1_g=ln1_g, ln1_b=ln1_b, qkv_w=qkv_w, qkv_b=qkv_b,
                    proj_w=proj_w, proj_b=proj_b, ln2_g=ln2_g, ln2_b=ln2_b,
                    fc1_w=fc1_w, fc1_b=fc1_b, fc2_w=fc2_w, fc2_b=fc2_b)
        x = x0_ref[...]                                        # (R, D) f32
        for l in range(depth):                                 # static unroll
            w = {name: refs[name][l] for name in PER_LAYER}
            x = _block_forward(x, w, heads=heads, head_dim=head_dim,
                               model_dim=model_dim, block_b=block_b, n_tok=n_tok)
        y_ref[...] = _layernorm(x, norm_g[...], norm_b[...]).astype(y_ref.dtype)

    return kernel


def _make_streamed_kernel(heads, head_dim, model_dim, block_b, n_tok):
    """Per-layer weight streaming over an 'arbitrary' depth axis. grid = (B//Bb, depth)."""

    def kernel(x0_ref,
               ln1_g, ln1_b, qkv_w, qkv_b, proj_w, proj_b,
               ln2_g, ln2_b, fc1_w, fc1_b, fc2_w, fc2_b,
               norm_g, norm_b, y_ref, x_scr):
        l = pl.program_id(1)
        last = pl.num_programs(1) - 1

        @pl.when(l == 0)
        def _init():
            x_scr[...] = x0_ref[...]                           # start of residual stream

        refs = dict(ln1_g=ln1_g, ln1_b=ln1_b, qkv_w=qkv_w, qkv_b=qkv_b,
                    proj_w=proj_w, proj_b=proj_b, ln2_g=ln2_g, ln2_b=ln2_b,
                    fc1_w=fc1_w, fc1_b=fc1_b, fc2_w=fc2_w, fc2_b=fc2_b)
        w = {name: refs[name][0] for name in PER_LAYER}        # this layer's block
        x = _block_forward(x_scr[...], w, heads=heads, head_dim=head_dim,
                           model_dim=model_dim, block_b=block_b, n_tok=n_tok)
        x_scr[...] = x

        @pl.when(l == last)
        def _final():
            y_ref[...] = _layernorm(x, norm_g[...], norm_b[...]).astype(y_ref.dtype)

    return kernel


# ----------------------------------------------------------------------------------
# sizing heuristics (generation-aware roofline / VMEM budget)
# ----------------------------------------------------------------------------------
def _tpu_generation():
    kind = ""
    try:
        kind = jax.devices()[0].device_kind.lower()
    except Exception:
        pass
    if '7' in kind:        # v7x: 64 MiB VMEM, 2 TCs -> prefer B//Bb >= 2
        return dict(name='v7x', target_rows=640, vmem_budget=44 << 20, prefer_split=True)
    if 'v6' in kind:       # v6e: 128 MiB VMEM, ~680 FLOP/byte roofline
        return dict(name='v6e', target_rows=640, vmem_budget=96 << 20, prefer_split=False)
    if 'v5 lite' in kind or 'v5e' in kind or 'v5lite' in kind:
        return dict(name='v5e', target_rows=256, vmem_budget=64 << 20, prefer_split=False)
    return dict(name='unknown', target_rows=256, vmem_budget=32 << 20, prefer_split=False)


def _per_layer_weight_bytes(D, hidden):
    mats = (D * 3 * D + D * D + D * hidden + hidden * D) * 2      # bf16 matrices
    vecs = (3 * D + D + hidden + D + 4 * D) * 4                   # f32 biases / LN
    return mats + vecs


def _vmem_estimate(R, D, hidden, depth, resident, plw):
    act_in = 2 * R * D * 4                       # f32 input block, double-buffered
    act_out = 2 * R * D * 2                      # bf16 output block, double-buffered
    temps = R * (3 * D + hidden + 2 * D) * 4     # qkv + mlp hidden + headroom (f32)
    if resident:
        weights, scratch = 2 * depth * plw, 0
    else:
        weights, scratch = 2 * plw, R * D * 4    # one layer double-buffered + f32 carry
    return act_in + act_out + temps + weights + scratch


def _use_resident(depth, D, hidden, gen):
    return 2 * depth * _per_layer_weight_bytes(D, hidden) <= 0.35 * gen['vmem_budget']


def _pick_block_b(B, N, D, hidden, depth, resident, gen):
    plw = _per_layer_weight_bytes(D, hidden)
    budget = int(0.75 * gen['vmem_budget'])
    best = 1
    for c in range(1, B + 1):
        if B % c:
            continue
        if gen['prefer_split'] and c == B and B > 1:
            continue                              # keep >=2 grid steps for dual-TC v7x
        R = c * N
        if R <= gen['target_rows'] and _vmem_estimate(R, D, hidden, depth,
                                                      resident, plw) <= budget:
            best = c
    return best


# ----------------------------------------------------------------------------------
# parameters
# ----------------------------------------------------------------------------------
def init_params(key, input_dim, model_dim, depth, hidden_dim):
    keys = iter(jax.random.split(key, 12))

    def w(shape):
        return (0.02 * jax.random.normal(next(keys), shape)).astype(jnp.float32)

    z = lambda s: jnp.zeros(s, jnp.float32)
    o = lambda s: jnp.ones(s, jnp.float32)

    return {
        'inproj_w': w((input_dim, model_dim)), 'inproj_b': z((1, model_dim)),
        'mask_tok': w((1, model_dim)),
        'ln1_g': o((depth, 1, model_dim)), 'ln1_b': z((depth, 1, model_dim)),
        'qkv_w': w((depth, model_dim, 3 * model_dim)), 'qkv_b': z((depth, 1, 3 * model_dim)),
        'proj_w': w((depth, model_dim, model_dim)), 'proj_b': z((depth, 1, model_dim)),
        'ln2_g': o((depth, 1, model_dim)), 'ln2_b': z((depth, 1, model_dim)),
        'fc1_w': w((depth, model_dim, hidden_dim)), 'fc1_b': z((depth, 1, hidden_dim)),
        'fc2_w': w((depth, hidden_dim, model_dim)), 'fc2_b': z((depth, 1, model_dim)),
        'norm_g': o((1, model_dim)), 'norm_b': z((1, model_dim)),
        'recon_w': w((model_dim, input_dim)), 'recon_b': z((1, input_dim)),
        'sel_w': w((model_dim, 1)), 'sel_b': z((1, 1)),
        'pose_w': w((model_dim, 7)), 'pose_b': z((1, 7)),
    }


# ----------------------------------------------------------------------------------
# forward
# ----------------------------------------------------------------------------------
def mtcm_mae_forward(params, tokens, mask_indices=None, *, heads,
                     training=False, block_b=None, force_streamed=False):
    B, N, In = tokens.shape
    depth, D = params['qkv_w'].shape[0], params['qkv_w'].shape[1]
    hidden = params['fc1_w'].shape[-1]
    assert D % heads == 0
    head_dim = D // heads

    gen = _tpu_generation()
    resident = (not force_streamed) and _use_resident(depth, D, hidden, gen)
    Bb = block_b if block_b is not None else _pick_block_b(B, N, D, hidden, depth,
                                                           resident, gen)
    assert B % Bb == 0, "block_b must divide batch size"
    R = Bb * N

    # ---- XLA prologue: input projection + mask-token replacement (review item) ----
    x0 = tokens.reshape(B * N, In).astype(jnp.float32) @ params['inproj_w'] \
        + params['inproj_b']
    if mask_indices is not None:
        m = jnp.zeros((B, N), jnp.float32)
        m = m.at[jnp.arange(B)[:, None], mask_indices].set(1.0).reshape(B * N, 1)
        x0 = x0 * (1.0 - m) + params['mask_tok'] * m          # x[b, mask_idx] = mask_token

    # bf16 weight matrices for the MXU (halves per-layer weight DMA in streamed mode).
    bf = lambda a: a.astype(jnp.bfloat16)
    w = {
        'ln1_g': params['ln1_g'], 'ln1_b': params['ln1_b'],
        'qkv_w': bf(params['qkv_w']), 'qkv_b': params['qkv_b'],
        'proj_w': bf(params['proj_w']), 'proj_b': params['proj_b'],
        'ln2_g': params['ln2_g'], 'ln2_b': params['ln2_b'],
        'fc1_w': bf(params['fc1_w']), 'fc1_b': params['fc1_b'],
        'fc2_w': bf(params['fc2_w']), 'fc2_b': params['fc2_b'],
        'norm_g': params['norm_g'], 'norm_b': params['norm_b'],
    }
    operands = [x0] + [w[k] for k in PER_LAYER] + [w[k] for k in GLOBAL]

    if resident:
        kernel = _make_resident_kernel(depth, heads, head_dim, D, Bb, N)
        grid = (B // Bb,)
        x_spec = pl.BlockSpec((R, D), lambda b: (b, 0))
        w_specs = [pl.BlockSpec(w[k].shape, lambda b, nd=w[k].ndim: (0,) * nd)
                   for k in PER_LAYER + GLOBAL]
        out_spec = pl.BlockSpec((R, D), lambda b: (b, 0))
        scratch = []
        dims = ("parallel",)
    else:
        kernel = _make_streamed_kernel(heads, head_dim, D, Bb, N)
        grid = (B // Bb, depth)                               # depth innermost, streamed
        x_spec = pl.BlockSpec((R, D), lambda b, l: (b, 0))
        w_specs = []
        for k in PER_LAYER:
            shape = w[k].shape
            blk = (1,) + shape[1:]
            idx = lambda b, l, nd=len(shape): (l,) + (0,) * (nd - 1)
            kwargs = {}
            # v6e has VMEM headroom: deepen prefetch of the big streamed weights.
            per_layer_block_bytes = 2 * math.prod(shape[1:])
            if (gen['name'] == 'v6e' and k in ('qkv_w', 'fc1_w', 'fc2_w')
                    and per_layer_block_bytes >= (4 << 20)):
                kwargs['pipeline_mode'] = pl.Buffered(3)
            w_specs.append(pl.BlockSpec(blk, idx, **kwargs))
        w_specs += [pl.BlockSpec(w[k].shape, lambda b, l, nd=w[k].ndim: (0,) * nd)
                    for k in GLOBAL]
        out_spec = pl.BlockSpec((R, D), lambda b, l: (b, 0))
        scratch = [pltpu.VMEM((R, D), jnp.float32)]           # f32 residual carry
        dims = ("parallel", "arbitrary")

    y = pl.pallas_call(
        kernel,
        out_shape=jax.ShapeDtypeStruct((B * N, D), jnp.bfloat16),   # lane-dense bf16
        grid=grid,
        in_specs=[x_spec] + w_specs,
        out_specs=out_spec,
        scratch_shapes=scratch,
        compiler_params=pltpu.CompilerParams(
            dimension_semantics=dims,
            vmem_limit_bytes=gen['vmem_budget']),
    )(*operands)

    x_norm = y.astype(jnp.float32).reshape(B, N, D)

    # ---- tiny output heads in plain XLA (keeps kernel output lane-dense) ----------
    out = {}
    if mask_indices is not None:
        x_m = jnp.take_along_axis(x_norm, mask_indices[..., None], axis=1)
        out['reconstructed_tokens'] = x_m @ params['recon_w'] + params['recon_b']
    out['selection_weights'] = (x_norm @ params['sel_w'] + params['sel_b'])[..., 0]
    raw_poses = x_norm @ params['pose_w'] + params['pose_b']
    if not training:
        # PoseRegressionHead.normalize_quaternions: L2-normalize the quaternion part.
        pos, quat = raw_poses[..., :3], raw_poses[..., 3:]
        quat = quat / jnp.maximum(jnp.linalg.norm(quat, axis=-1, keepdims=True), 1e-8)
        raw_poses = jnp.concatenate([pos, quat], axis=-1)
    out['pose_predictions'] = raw_poses
    return out
    # TODO(synk): SelectionHead / ReconstructionHead / PoseRegressionHead internals are
    # not in the reference source; they are implemented as single Linear layers.


# ----------------------------------------------------------------------------------
# pure-JAX reference (f32) for correctness checking
# ----------------------------------------------------------------------------------
def mtcm_mae_reference(params, tokens, mask_indices=None, *, heads, training=False):
    B, N, _ = tokens.shape
    depth, D = params['qkv_w'].shape[0], params['qkv_w'].shape[1]
    hd = D // heads
    x = tokens @ params['inproj_w'] + params['inproj_b']
    if mask_indices is not None:
        m = jnp.zeros((B, N), jnp.float32)
        m = m.at[jnp.arange(B)[:, None], mask_indices].set(1.0)[..., None]
        x = x * (1.0 - m) + params['mask_tok'] * m
    for l in range(depth):
        h = _layernorm(x, params['ln1_g'][l], params['ln1_b'][l])
        qkv = h @ params['qkv_w'][l] + params['qkv_b'][l]
        q, k, v = qkv[..., :D], qkv[..., D:2 * D], qkv[..., 2 * D:]
        q = q.reshape(B, N, heads, hd).transpose(0, 2, 1, 3)
        k = k.reshape(B, N, heads, hd).transpose(0, 2, 1, 3)
        v = v.reshape(B, N, heads, hd).transpose(0, 2, 1, 3)
        att = jnp.einsum('bhnd,bhmd->bhnm', q, k) * hd ** -0.5
        p = jax.nn.softmax(att, axis=-1)
        o = jnp.einsum('bhnm,bhmd->bhnd', p, v).transpose(0, 2, 1, 3).reshape(B, N, D)
        x = x + o @ params['proj_w'][l] + params['proj_b'][l]
        h2 = _layernorm(x, params['ln2_g'][l], params['ln2_b'][l])
        h2 = jax.nn.gelu(h2 @ params['fc1_w'][l] + params['fc1_b'][l], approximate=True)
        x = x + h2 @ params['fc2_w'][l] + params['fc2_b'][l]
    x = _layernorm(x, params['norm_g'], params['norm_b'])
    out = {}
    if mask_indices is not None:
        x_m = jnp.take_along_axis(x, mask_indices[..., None], axis=1)
        out['reconstructed_tokens'] = x_m @ params['recon_w'] + params['recon_b']
    out['selection_weights'] = (x @ params['sel_w'] + params['sel_b'])[..., 0]
    raw = x @ params['pose_w'] + params['pose_b']
    if not training:
        pos, quat = raw[..., :3], raw[..., 3:]
        quat = quat / jnp.maximum(jnp.linalg.norm(quat, axis=-1, keepdims=True), 1e-8)
        raw = jnp.concatenate([pos, quat], axis=-1)
    out['pose_predictions'] = raw
    return out


if __name__ == "__main__":
    B, N = 4, 8
    INPUT_DIM, MODEL_DIM, DEPTH, HEADS = 64, 128, 2, 8
    MLP_RATIO = 2.0

    key = jax.random.PRNGKey(0)
    k_tok, k_param = jax.random.split(key)
    tokens = jax.random.normal(k_tok, (B, N, INPUT_DIM), jnp.float32)
    mask_indices = jnp.array([[1, 5], [0, 7], [2, 3], [4, 6]], dtype=jnp.int32)

    params = init_params(k_param, INPUT_DIM, MODEL_DIM, DEPTH,
                         int(MODEL_DIM * MLP_RATIO))

    ref = mtcm_mae_reference(params, tokens, mask_indices, heads=HEADS)

    # Resident-weights kernel (small config -> depth folded into the kernel).
    out = mtcm_mae_forward(params, tokens, mask_indices, heads=HEADS)
    out = jax.tree_util.tree_map(jax.block_until_ready, out)

    # Streamed-weights kernel path (per-layer weight DMA over a depth grid axis).
    out_s = mtcm_mae_forward(params, tokens, mask_indices, heads=HEADS,
                             force_streamed=True)
    out_s = jax.tree_util.tree_map(jax.block_until_ready, out_s)

    assert out['reconstructed_tokens'].shape == (B, mask_indices.shape[1], INPUT_DIM)
    assert out['selection_weights'].shape == (B, N)
    assert out['pose_predictions'].shape == (B, N, 7)

    for name in ref:
        for o in (out, out_s):
            err = float(jnp.max(jnp.abs(o[name] - ref[name])))
            assert err < 5e-2, (name, err)      # bf16-matmul drift only

    print("KERNEL_OK")
</pallas_src>

<mosaic_0001>
module attributes {stable_mosaic.version = 11 : i64} {
  func.func @kernel(%arg0: i32, %arg1: memref<32x128xf32, #tpu.memory_space<vmem>>, %arg2: memref<2x1x128xf32, #tpu.memory_space<vmem>>, %arg3: memref<2x1x128xf32, #tpu.memory_space<vmem>>, %arg4: memref<2x128x384xbf16, #tpu.memory_space<vmem>>, %arg5: memref<2x1x384xf32, #tpu.memory_space<vmem>>, %arg6: memref<2x128x128xbf16, #tpu.memory_space<vmem>>, %arg7: memref<2x1x128xf32, #tpu.memory_space<vmem>>, %arg8: memref<2x1x128xf32, #tpu.memory_space<vmem>>, %arg9: memref<2x1x128xf32, #tpu.memory_space<vmem>>, %arg10: memref<2x128x256xbf16, #tpu.memory_space<vmem>>, %arg11: memref<2x1x256xf32, #tpu.memory_space<vmem>>, %arg12: memref<2x256x128xbf16, #tpu.memory_space<vmem>>, %arg13: memref<2x1x128xf32, #tpu.memory_space<vmem>>, %arg14: memref<1x128xf32, #tpu.memory_space<vmem>>, %arg15: memref<1x128xf32, #tpu.memory_space<vmem>>, %arg16: memref<32x128xbf16, #tpu.memory_space<vmem>>) attributes {dimension_semantics = [#tpu.dimension_semantics<parallel>], iteration_bounds = array<i64: 1>, scalar_prefetch = 0 : i64, scratch_operands = 0 : i64, tpu.core_type = #tpu.core_type<tc>, window_params = [{transform_indices = @transform_0, window_bounds = array<i64: 32, 128>}, {pipeline_mode = #tpu.pipeline_mode<synchronous>, transform_indices = @transform_1, window_bounds = array<i64: 2, 1, 128>}, {pipeline_mode = #tpu.pipeline_mode<synchronous>, transform_indices = @transform_2, window_bounds = array<i64: 2, 1, 128>}, {pipeline_mode = #tpu.pipeline_mode<synchronous>, transform_indices = @transform_3, window_bounds = array<i64: 2, 128, 384>}, {pipeline_mode = #tpu.pipeline_mode<synchronous>, transform_indices = @transform_4, window_bounds = array<i64: 2, 1, 384>}, {pipeline_mode = #tpu.pipeline_mode<synchronous>, transform_indices = @transform_5, window_bounds = array<i64: 2, 128, 128>}, {pipeline_mode = #tpu.pipeline_mode<synchronous>, transform_indices = @transform_6, window_bounds = array<i64: 2, 1, 128>}, {pipeline_mode = #tpu.pipeline_mode<synchronous>, transform_indices = @transform_7, window_bounds = array<i64: 2, 1, 128>}, {pipeline_mode = #tpu.pipeline_mode<synchronous>, transform_indices = @transform_8, window_bounds = array<i64: 2, 1, 128>}, {pipeline_mode = #tpu.pipeline_mode<synchronous>, transform_indices = @transform_9, window_bounds = array<i64: 2, 128, 256>}, {pipeline_mode = #tpu.pipeline_mode<synchronous>, transform_indices = @transform_10, window_bounds = array<i64: 2, 1, 256>}, {pipeline_mode = #tpu.pipeline_mode<synchronous>, transform_indices = @transform_11, window_bounds = array<i64: 2, 256, 128>}, {pipeline_mode = #tpu.pipeline_mode<synchronous>, transform_indices = @transform_12, window_bounds = array<i64: 2, 1, 128>}, {pipeline_mode = #tpu.pipeline_mode<synchronous>, transform_indices = @transform_13, window_bounds = array<i64: 1, 128>}, {pipeline_mode = #tpu.pipeline_mode<synchronous>, transform_indices = @transform_14, window_bounds = array<i64: 1, 128>}, {transform_indices = @transform_15, window_bounds = array<i64: 32, 128>}]} {
    %c0 = arith.constant 0 : index
    %c0_0 = arith.constant 0 : index
    %0 = vector.load %arg1[%c0, %c0_0] : memref<32x128xf32, #tpu.memory_space<vmem>>, vector<32x128xf32>
    %c0_1 = arith.constant 0 : index
    %c0_2 = arith.constant 0 : index
    %c0_3 = arith.constant 0 : index
    %1 = vector.load %arg2[%c0_1, %c0_2, %c0_3] : memref<2x1x128xf32, #tpu.memory_space<vmem>>, vector<1x1x128xf32>
    %2 = vector.shape_cast %1 : vector<1x1x128xf32> to vector<1x128xf32>
    %c0_4 = arith.constant 0 : index
    %c0_5 = arith.constant 0 : index
    %c0_6 = arith.constant 0 : index
    %3 = vector.load %arg3[%c0_4, %c0_5, %c0_6] : memref<2x1x128xf32, #tpu.memory_space<vmem>>, vector<1x1x128xf32>
    %4 = vector.shape_cast %3 : vector<1x1x128xf32> to vector<1x128xf32>
    %c0_7 = arith.constant 0 : index
    %c0_8 = arith.constant 0 : index
    %c0_9 = arith.constant 0 : index
    %5 = vector.load %arg4[%c0_7, %c0_8, %c0_9] : memref<2x128x384xbf16, #tpu.memory_space<vmem>>, vector<1x128x384xbf16>
    %6 = vector.shape_cast %5 : vector<1x128x384xbf16> to vector<128x384xbf16>
    %c0_10 = arith.constant 0 : index
    %c0_11 = arith.constant 0 : index
    %c0_12 = arith.constant 0 : index
    %7 = vector.load %arg5[%c0_10, %c0_11, %c0_12] : memref<2x1x384xf32, #tpu.memory_space<vmem>>, vector<1x1x384xf32>
    %8 = vector.shape_cast %7 : vector<1x1x384xf32> to vector<1x384xf32>
    %c0_13 = arith.constant 0 : index
    %c0_14 = arith.constant 0 : index
    %c0_15 = arith.constant 0 : index
    %9 = vector.load %arg6[%c0_13, %c0_14, %c0_15] : memref<2x128x128xbf16, #tpu.memory_space<vmem>>, vector<1x128x128xbf16>
    %10 = vector.shape_cast %9 : vector<1x128x128xbf16> to vector<128x128xbf16>
    %c0_16 = arith.constant 0 : index
    %c0_17 = arith.constant 0 : index
    %c0_18 = arith.constant 0 : index
    %11 = vector.load %arg7[%c0_16, %c0_17, %c0_18] : memref<2x1x128xf32, #tpu.memory_space<vmem>>, vector<1x1x128xf32>
    %12 = vector.shape_cast %11 : vector<1x1x128xf32> to vector<1x128xf32>
    %c0_19 = arith.constant 0 : index
    %c0_20 = arith.constant 0 : index
    %c0_21 = arith.constant 0 : index
    %13 = vector.load %arg8[%c0_19, %c0_20, %c0_21] : memref<2x1x128xf32, #tpu.memory_space<vmem>>, vector<1x1x128xf32>
    %14 = vector.shape_cast %13 : vector<1x1x128xf32> to vector<1x128xf32>
    %c0_22 = arith.constant 0 : index
    %c0_23 = arith.constant 0 : index
    %c0_24 = arith.constant 0 : index
    %15 = vector.load %arg9[%c0_22, %c0_23, %c0_24] : memref<2x1x128xf32, #tpu.memory_space<vmem>>, vector<1x1x128xf32>
    %16 = vector.shape_cast %15 : vector<1x1x128xf32> to vector<1x128xf32>
    %c0_25 = arith.constant 0 : index
    %c0_26 = arith.constant 0 : index
    %c0_27 = arith.constant 0 : index
    %17 = vector.load %arg10[%c0_25, %c0_26, %c0_27] : memref<2x128x256xbf16, #tpu.memory_space<vmem>>, vector<1x128x256xbf16>
    %18 = vector.shape_cast %17 : vector<1x128x256xbf16> to vector<128x256xbf16>
    %c0_28 = arith.constant 0 : index
    %c0_29 = arith.constant 0 : index
    %c0_30 = arith.constant 0 : index
    %19 = vector.load %arg11[%c0_28, %c0_29, %c0_30] : memref<2x1x256xf32, #tpu.memory_space<vmem>>, vector<1x1x256xf32>
    %20 = vector.shape_cast %19 : vector<1x1x256xf32> to vector<1x256xf32>
    %c0_31 = arith.constant 0 : index
    %c0_32 = arith.constant 0 : index
    %c0_33 = arith.constant 0 : index
    %21 = vector.load %arg12[%c0_31, %c0_32, %c0_33] : memref<2x256x128xbf16, #tpu.memory_space<vmem>>, vector<1x256x128xbf16>
    %22 = vector.shape_cast %21 : vector<1x256x128xbf16> to vector<256x128xbf16>
    %c0_34 = arith.constant 0 : index
    %c0_35 = arith.constant 0 : index
    %c0_36 = arith.constant 0 : index
    %23 = vector.load %arg13[%c0_34, %c0_35, %c0_36] : memref<2x1x128xf32, #tpu.memory_space<vmem>>, vector<1x1x128xf32>
    %24 = vector.shape_cast %23 : vector<1x1x128xf32> to vector<1x128xf32>
    %cst = arith.constant dense<0.000000e+00> : vector<32xf32>
    %25 = vector.multi_reduction <add>, %0, %cst [1] : vector<32x128xf32> to vector<32xf32>
    %26 = vector.shape_cast %25 : vector<32xf32> to vector<32x1xf32>
    %cst_37 = arith.constant 1.280000e+02 : f32
    %27 = vector.broadcast %cst_37 : f32 to vector<32x1xf32>
    %28 = arith.divf %26, %27 : vector<32x1xf32>
    %29 = vector.broadcast %28 : vector<32x1xf32> to vector<32x128xf32>
    %30 = arith.subf %0, %29 : vector<32x128xf32>
    %31 = arith.mulf %30, %30 : vector<32x128xf32>
    %cst_38 = arith.constant dense<0.000000e+00> : vector<32xf32>
    %32 = vector.multi_reduction <add>, %31, %cst_38 [1] : vector<32x128xf32> to vector<32xf32>
    %33 = vector.shape_cast %32 : vector<32xf32> to vector<32x1xf32>
    %cst_39 = arith.constant 1.280000e+02 : f32
    %34 = vector.broadcast %cst_39 : f32 to vector<32x1xf32>
    %35 = arith.divf %33, %34 : vector<32x1xf32>
    %36 = vector.broadcast %28 : vector<32x1xf32> to vector<32x128xf32>
    %37 = arith.subf %0, %36 : vector<32x128xf32>
    %cst_40 = arith.constant 9.99999974E-6 : f32
    %38 = vector.broadcast %cst_40 : f32 to vector<32x1xf32>
    %39 = arith.addf %35, %38 : vector<32x1xf32>
    %40 = math.rsqrt %39 : vector<32x1xf32>
    %41 = vector.broadcast %40 : vector<32x1xf32> to vector<32x128xf32>
    %42 = arith.mulf %37, %41 : vector<32x128xf32>
    %43 = vector.broadcast %2 : vector<1x128xf32> to vector<32x128xf32>
    %44 = arith.mulf %42, %43 : vector<32x128xf32>
    %45 = vector.broadcast %4 : vector<1x128xf32> to vector<32x128xf32>
    %46 = arith.addf %44, %45 : vector<32x128xf32>
    %47 = arith.truncf %46 : vector<32x128xf32> to vector<32x128xbf16>
    %cst_41 = arith.constant dense<0.000000e+00> : vector<32x384xf32>
    %48 = tpu.matmul %47, %6, %cst_41 {dimension_numbers = #tpu.dot_dimension_numbers<[1], [0], [0], [1], [0, 0, 1, 1], [], []>} : vector<32x128xbf16>, vector<128x384xbf16>, vector<32x384xf32> -> vector<32x384xf32>
    %49 = vector.broadcast %8 : vector<1x384xf32> to vector<32x384xf32>
    %50 = arith.addf %48, %49 : vector<32x384xf32>
    %51 = vector.extract_strided_slice %50 {offsets = [0, 0], sizes = [32, 128], strides = [1, 1]} : vector<32x384xf32> to vector<32x128xf32>
    %52 = vector.shape_cast %51 : vector<32x128xf32> to vector<4x8x128xf32>
    %53 = vector.extract_strided_slice %50 {offsets = [0, 128], sizes = [32, 128], strides = [1, 1]} : vector<32x384xf32> to vector<32x128xf32>
    %54 = vector.shape_cast %53 : vector<32x128xf32> to vector<4x8x128xf32>
    %55 = vector.extract_strided_slice %50 {offsets = [0, 256], sizes = [32, 128], strides = [1, 1]} : vector<32x384xf32> to vector<32x128xf32>
    %56 = vector.shape_cast %55 : vector<32x128xf32> to vector<4x8x128xf32>
    %57 = vector.extract_strided_slice %52 {offsets = [0, 0, 0], sizes = [4, 8, 16], strides = [1, 1, 1]} : vector<4x8x128xf32> to vector<4x8x16xf32>
    %58 = arith.truncf %57 : vector<4x8x16xf32> to vector<4x8x16xbf16>
    %59 = vector.extract_strided_slice %54 {offsets = [0, 0, 0], sizes = [4, 8, 16], strides = [1, 1, 1]} : vector<4x8x128xf32> to vector<4x8x16xf32>
    %60 = arith.truncf %59 : vector<4x8x16xf32> to vector<4x8x16xbf16>
    %61 = vector.extract_strided_slice %56 {offsets = [0, 0, 0], sizes = [4, 8, 16], strides = [1, 1, 1]} : vector<4x8x128xf32> to vector<4x8x16xf32>
    %62 = arith.truncf %61 : vector<4x8x16xf32> to vector<4x8x16xbf16>
    "tpu.trace_start"() <{level = 10 : i32, message = "bnd,bmd->bnm"}> : () -> ()
    %cst_42 = arith.constant dense<0.000000e+00> : vector<4x8x8xf32>
    %63 = tpu.matmul %58, %60, %cst_42 {dimension_numbers = #tpu.dot_dimension_numbers<[2], [2], [1], [1], [0, 0, 0, 1, 1, 1], [0], [0]>} : vector<4x8x16xbf16>, vector<4x8x16xbf16>, vector<4x8x8xf32> -> vector<4x8x8xf32>
    "tpu.trace_stop"() : () -> ()
    %cst_43 = arith.constant 2.500000e-01 : f32
    %64 = vector.broadcast %cst_43 : f32 to vector<4x8x8xf32>
    %65 = arith.mulf %63, %64 : vector<4x8x8xf32>
    %cst_44 = arith.constant dense<0xFF800000> : vector<4x8xf32>
    %66 = vector.multi_reduction <maximumf>, %65, %cst_44 [2] : vector<4x8x8xf32> to vector<4x8xf32>
    %67 = vector.shape_cast %66 : vector<4x8xf32> to vector<4x8x1xf32>
    %68 = vector.broadcast %67 : vector<4x8x1xf32> to vector<4x8x8xf32>
    %69 = arith.subf %65, %68 : vector<4x8x8xf32>
    %70 = math.exp %69 : vector<4x8x8xf32>
    %cst_45 = arith.constant dense<0.000000e+00> : vector<4x8xf32>
    %71 = vector.multi_reduction <add>, %70, %cst_45 [2] : vector<4x8x8xf32> to vector<4x8xf32>
    %72 = vector.shape_cast %71 : vector<4x8xf32> to vector<4x8x1xf32>
    %73 = vector.broadcast %72 : vector<4x8x1xf32> to vector<4x8x8xf32>
    %74 = arith.divf %70, %73 : vector<4x8x8xf32>
    %75 = arith.truncf %74 : vector<4x8x8xf32> to vector<4x8x8xbf16>
    "tpu.trace_start"() <{level = 10 : i32, message = "bnm,bmd->bnd"}> : () -> ()
    %cst_46 = arith.constant dense<0.000000e+00> : vector<4x8x16xf32>
    %76 = tpu.matmul %75, %62, %cst_46 {dimension_numbers = #tpu.dot_dimension_numbers<[2], [1], [1], [2], [0, 0, 0, 1, 1, 2], [0], [0]>} : vector<4x8x8xbf16>, vector<4x8x16xbf16>, vector<4x8x16xf32> -> vector<4x8x16xf32>
    "tpu.trace_stop"() : () -> ()
    %77 = vector.shape_cast %76 : vector<4x8x16xf32> to vector<32x16xf32>
    %78 = arith.truncf %77 : vector<32x16xf32> to vector<32x16xbf16>
    %79 = vector.extract_strided_slice %10 {offsets = [0, 0], sizes = [16, 128], strides = [1, 1]} : vector<128x128xbf16> to vector<16x128xbf16>
    %cst_47 = arith.constant dense<0.000000e+00> : vector<32x128xf32>
    %80 = tpu.matmul %78, %79, %cst_47 {dimension_numbers = #tpu.dot_dimension_numbers<[1], [0], [0], [1], [0, 0, 1, 1], [], []>} : vector<32x16xbf16>, vector<16x128xbf16>, vector<32x128xf32> -> vector<32x128xf32>
    %81 = vector.extract_strided_slice %52 {offsets = [0, 0, 16], sizes = [4, 8, 16], strides = [1, 1, 1]} : vector<4x8x128xf32> to vector<4x8x16xf32>
    %82 = arith.truncf %81 : vector<4x8x16xf32> to vector<4x8x16xbf16>
    %83 = vector.extract_strided_slice %54 {offsets = [0, 0, 16], sizes = [4, 8, 16], strides = [1, 1, 1]} : vector<4x8x128xf32> to vector<4x8x16xf32>
    %84 = arith.truncf %83 : vector<4x8x16xf32> to vector<4x8x16xbf16>
    %85 = vector.extract_strided_slice %56 {offsets = [0, 0, 16], sizes = [4, 8, 16], strides = [1, 1, 1]} : vector<4x8x128xf32> to vector<4x8x16xf32>
    %86 = arith.truncf %85 : vector<4x8x16xf32> to vector<4x8x16xbf16>
    "tpu.trace_start"() <{level = 10 : i32, message = "bnd,bmd->bnm"}> : () -> ()
    %cst_48 = arith.constant dense<0.000000e+00> : vector<4x8x8xf32>
    %87 = tpu.matmul %82, %84, %cst_48 {dimension_numbers = #tpu.dot_dimension_numbers<[2], [2], [1], [1], [0, 0, 0, 1, 1, 1], [0], [0]>} : vector<4x8x16xbf16>, vector<4x8x16xbf16>, vector<4x8x8xf32> -> vector<4x8x8xf32>
    "tpu.trace_stop"() : () -> ()
    %cst_49 = arith.constant 2.500000e-01 : f32
    %88 = vector.broadcast %cst_49 : f32 to vector<4x8x8xf32>
    %89 = arith.mulf %87, %88 : vector<4x8x8xf32>
    %cst_50 = arith.constant dense<0xFF800000> : vector<4x8xf32>
    %90 = vector.multi_reduction <maximumf>, %89, %cst_50 [2] : vector<4x8x8xf32> to vector<4x8xf32>
    %91 = vector.shape_cast %90 : vector<4x8xf32> to vector<4x8x1xf32>
    %92 = vector.broadcast %91 : vector<4x8x1xf32> to vector<4x8x8xf32>
    %93 = arith.subf %89, %92 : vector<4x8x8xf32>
    %94 = math.exp %93 : vector<4x8x8xf32>
    %cst_51 = arith.constant dense<0.000000e+00> : vector<4x8xf32>
    %95 = vector.multi_reduction <add>, %94, %cst_51 [2] : vector<4x8x8xf32> to vector<4x8xf32>
    %96 = vector.shape_cast %95 : vector<4x8xf32> to vector<4x8x1xf32>
    %97 = vector.broadcast %96 : vector<4x8x1xf32> to vector<4x8x8xf32>
    %98 = arith.divf %94, %97 : vector<4x8x8xf32>
    %99 = arith.truncf %98 : vector<4x8x8xf32> to vector<4x8x8xbf16>
    "tpu.trace_start"() <{level = 10 : i32, message = "bnm,bmd->bnd"}> : () -> ()
    %cst_52 = arith.constant dense<0.000000e+00> : vector<4x8x16xf32>
    %100 = tpu.matmul %99, %86, %cst_52 {dimension_numbers = #tpu.dot_dimension_numbers<[2], [1], [1], [2], [0, 0, 0, 1, 1, 2], [0], [0]>} : vector<4x8x8xbf16>, vector<4x8x16xbf16>, vector<4x8x16xf32> -> vector<4x8x16xf32>
    "tpu.trace_stop"() : () -> ()
    %101 = vector.shape_cast %100 : vector<4x8x16xf32> to vector<32x16xf32>
    %102 = arith.truncf %101 : vector<32x16xf32> to vector<32x16xbf16>
    %103 = vector.extract_strided_slice %10 {offsets = [16, 0], sizes = [16, 128], strides = [1, 1]} : vector<128x128xbf16> to vector<16x128xbf16>
    %cst_53 = arith.constant dense<0.000000e+00> : vector<32x128xf32>
    %104 = tpu.matmul %102, %103, %cst_53 {dimension_numbers = #tpu.dot_dimension_numbers<[1], [0], [0], [1], [0, 0, 1, 1], [], []>} : vector<32x16xbf16>, vector<16x128xbf16>, vector<32x128xf32> -> vector<32x128xf32>
    %105 = arith.addf %80, %104 : vector<32x128xf32>
    %106 = vector.extract_strided_slice %52 {offsets = [0, 0, 32], sizes = [4, 8, 16], strides = [1, 1, 1]} : vector<4x8x128xf32> to vector<4x8x16xf32>
    %107 = arith.truncf %106 : vector<4x8x16xf32> to vector<4x8x16xbf16>
    %108 = vector.extract_strided_slice %54 {offsets = [0, 0, 32], sizes = [4, 8, 16], strides = [1, 1, 1]} : vector<4x8x128xf32> to vector<4x8x16xf32>
    %109 = arith.truncf %108 : vector<4x8x16xf32> to vector<4x8x16xbf16>
    %110 = vector.extract_strided_slice %56 {offsets = [0, 0, 32], sizes = [4, 8, 16], strides = [1, 1, 1]} : vector<4x8x128xf32> to vector<4x8x16xf32>
    %111 = arith.truncf %110 : vector<4x8x16xf32> to vector<4x8x16xbf16>
    "tpu.trace_start"() <{level = 10 : i32, message = "bnd,bmd->bnm"}> : () -> ()
    %cst_54 = arith.constant dense<0.000000e+00> : vector<4x8x8xf32>
    %112 = tpu.matmul %107, %109, %cst_54 {dimension_numbers = #tpu.dot_dimension_numbers<[2], [2], [1], [1], [0, 0, 0, 1, 1, 1], [0], [0]>} : vector<4x8x16xbf16>, vector<4x8x16xbf16>, vector<4x8x8xf32> -> vector<4x8x8xf32>
    "tpu.trace_stop"() : () -> ()
    %cst_55 = arith.constant 2.500000e-01 : f32
    %113 = vector.broadcast %cst_55 : f32 to vector<4x8x8xf32>
    %114 = arith.mulf %112, %113 : vector<4x8x8xf32>
    %cst_56 = arith.constant dense<0xFF800000> : vector<4x8xf32>
    %115 = vector.multi_reduction <maximumf>, %114, %cst_56 [2] : vector<4x8x8xf32> to vector<4x8xf32>
    %116 = vector.shape_cast %115 : vector<4x8xf32> to vector<4x8x1xf32>
    %117 = vector.broadcast %116 : vector<4x8x1xf32> to vector<4x8x8xf32>
    %118 = arith.subf %114, %117 : vector<4x8x8xf32>
    %119 = math.exp %118 : vector<4x8x8xf32>
    %cst_57 = arith.constant dense<0.000000e+00> : vector<4x8xf32>
    %120 = vector.multi_reduction <add>, %119, %cst_57 [2] : vector<4x8x8xf32> to vector<4x8xf32>
    %121 = vector.shape_cast %120 : vector<4x8xf32> to vector<4x8x1xf32>
    %122 = vector.broadcast %121 : vector<4x8x1xf32> to vector<4x8x8xf32>
    %123 = arith.divf %119, %122 : vector<4x8x8xf32>
    %124 = arith.truncf %123 : vector<4x8x8xf32> to vector<4x8x8xbf16>
    "tpu.trace_start"() <{level = 10 : i32, message = "bnm,bmd->bnd"}> : () -> ()
    %cst_58 = arith.constant dense<0.000000e+00> : vector<4x8x16xf32>
    %125 = tpu.matmul %124, %111, %cst_58 {dimension_numbers = #tpu.dot_dimension_numbers<[2], [1], [1], [2], [0, 0, 0, 1, 1, 2], [0], [0]>} : vector<4x8x8xbf16>, vector<4x8x16xbf16>, vector<4x8x16xf32> -> vector<4x8x16xf32>
    "tpu.trace_stop"() : () -> ()
    %126 = vector.shape_cast %125 : vector<4x8x16xf32> to vector<32x16xf32>
    %127 = arith.truncf %126 : vector<32x16xf32> to vector<32x16xbf16>
    %128 = vector.extract_strided_slice %10 {offsets = [32, 0], sizes = [16, 128], strides = [1, 1]} : vector<128x128xbf16> to vector<16x128xbf16>
    %cst_59 = arith.constant dense<0.000000e+00> : vector<32x128xf32>
    %129 = tpu.matmul %127, %128, %cst_59 {dimension_numbers = #tpu.dot_dimension_numbers<[1], [0], [0], [1], [0, 0, 1, 1], [], []>} : vector<32x16xbf16>, vector<16x128xbf16>, vector<32x128xf32> -> vector<32x128xf32>
    %130 = arith.addf %105, %129 : vector<32x128xf32>
    %131 = vector.extract_strided_slice %52 {offsets = [0, 0, 48], sizes = [4, 8, 16], strides = [1, 1, 1]} : vector<4x8x128xf32> to vector<4x8x16xf32>
    %132 = arith.truncf %131 : vector<4x8x16xf32> to vector<4x8x16xbf16>
    %133 = vector.extract_strided_slice %54 {offsets = [0, 0, 48], sizes = [4, 8, 16], strides = [1, 1, 1]} : vector<4x8x128xf32> to vector<4x8x16xf32>
    %134 = arith.truncf %133 : vector<4x8x16xf32> to vector<4x8x16xbf16>
    %135 = vector.extract_strided_slice %56 {offsets = [0, 0, 48], sizes = [4, 8, 16], strides = [1, 1, 1]} : vector<4x8x128xf32> to vector<4x8x16xf32>
    %136 = arith.truncf %135 : vector<4x8x16xf32> to vector<4x8x16xbf16>
    "tpu.trace_start"() <{level = 10 : i32, message = "bnd,bmd->bnm"}> : () -> ()
    %cst_60 = arith.constant dense<0.000000e+00> : vector<4x8x8xf32>
    %137 = tpu.matmul %132, %134, %cst_60 {dimension_numbers = #tpu.dot_dimension_numbers<[2], [2], [1], [1], [0, 0, 0, 1, 1, 1], [0], [0]>} : vector<4x8x16xbf16>, vector<4x8x16xbf16>, vector<4x8x8xf32> -> vector<4x8x8xf32>
    "tpu.trace_stop"() : () -> ()
    %cst_61 = arith.constant 2.500000e-01 : f32
    %138 = vector.broadcast %cst_61 : f32 to vector<4x8x8xf32>
    %139 = arith.mulf %137, %138 : vector<4x8x8xf32>
    %cst_62 = arith.constant dense<0xFF800000> : vector<4x8xf32>
    %140 = vector.multi_reduction <maximumf>, %139, %cst_62 [2] : vector<4x8x8xf32> to vector<4x8xf32>
    %141 = vector.shape_cast %140 : vector<4x8xf32> to vector<4x8x1xf32>
    %142 = vector.broadcast %141 : vector<4x8x1xf32> to vector<4x8x8xf32>
    %143 = arith.subf %139, %142 : vector<4x8x8xf32>
    %144 = math.exp %143 : vector<4x8x8xf32>
    %cst_63 = arith.constant dense<0.000000e+00> : vector<4x8xf32>
    %145 = vector.multi_reduction <add>, %144, %cst_63 [2] : vector<4x8x8xf32> to vector<4x8xf32>
    %146 = vector.shape_cast %145 : vector<4x8xf32> to vector<4x8x1xf32>
    %147 = vector.broadcast %146 : vector<4x8x1xf32> to vector<4x8x8xf32>
    %148 = arith.divf %144, %147 : vector<4x8x8xf32>
    %149 = arith.truncf %148 : vector<4x8x8xf32> to vector<4x8x8xbf16>
    "tpu.trace_start"() <{level = 10 : i32, message = "bnm,bmd->bnd"}> : () -> ()
    %cst_64 = arith.constant dense<0.000000e+00> : vector<4x8x16xf32>
    %150 = tpu.matmul %149, %136, %cst_64 {dimension_numbers = #tpu.dot_dimension_numbers<[2], [1], [1], [2], [0, 0, 0, 1, 1, 2], [0], [0]>} : vector<4x8x8xbf16>, vector<4x8x16xbf16>, vector<4x8x16xf32> -> vector<4x8x16xf32>
    "tpu.trace_stop"() : () -> ()
    %151 = vector.shape_cast %150 : vector<4x8x16xf32> to vector<32x16xf32>
    %152 = arith.truncf %151 : vector<32x16xf32> to vector<32x16xbf16>
    %153 = vector.extract_strided_slice %10 {offsets = [48, 0], sizes = [16, 128], strides = [1, 1]} : vector<128x128xbf16> to vector<16x128xbf16>
    %cst_65 = arith.constant dense<0.000000e+00> : vector<32x128xf32>
    %154 = tpu.matmul %152, %153, %cst_65 {dimension_numbers = #tpu.dot_dimension_numbers<[1], [0], [0], [1], [0, 0, 1, 1], [], []>} : vector<32x16xbf16>, vector<16x128xbf16>, vector<32x128xf32> -> vector<32x128xf32>
    %155 = arith.addf %130, %154 : vector<32x128xf32>
    %156 = vector.extract_strided_slice %52 {offsets = [0, 0, 64], sizes = [4, 8, 16], strides = [1, 1, 1]} : vector<4x8x128xf32> to vector<4x8x16xf32>
    %157 = arith.truncf %156 : vector<4x8x16xf32> to vector<4x8x16xbf16>
    %158 = vector.extract_strided_slice %54 {offsets = [0, 0, 64], sizes = [4, 8, 16], strides = [1, 1, 1]} : vector<4x8x128xf32> to vector<4x8x16xf32>
    %159 = arith.truncf %158 : vector<4x8x16xf32> to vector<4x8x16xbf16>
    %160 = vector.extract_strided_slice %56 {offsets = [0, 0, 64], sizes = [4, 8, 16], strides = [1, 1, 1]} : vector<4x8x128xf32> to vector<4x8x16xf32>
    %161 = arith.truncf %160 : vector<4x8x16xf32> to vector<4x8x16xbf16>
    "tpu.trace_start"() <{level = 10 : i32, message = "bnd,bmd->bnm"}> : () -> ()
    %cst_66 = arith.constant dense<0.000000e+00> : vector<4x8x8xf32>
    %162 = tpu.matmul %157, %159, %cst_66 {dimension_numbers = #tpu.dot_dimension_numbers<[2], [2], [1], [1], [0, 0, 0, 1, 1, 1], [0], [0]>} : vector<4x8x16xbf16>, vector<4x8x16xbf16>, vector<4x8x8xf32> -> vector<4x8x8xf32>
    "tpu.trace_stop"() : () -> ()
    %cst_67 = arith.constant 2.500000e-01 : f32
    %163 = vector.broadcast %cst_67 : f32 to vector<4x8x8xf32>
    %164 = arith.mulf %162, %163 : vector<4x8x8xf32>
    %cst_68 = arith.constant dense<0xFF800000> : vector<4x8xf32>
    %165 = vector.multi_reduction <maximumf>, %164, %cst_68 [2] : vector<4x8x8xf32> to vector<4x8xf32>
    %166 = vector.shape_cast %165 : vector<4x8xf32> to vector<4x8x1xf32>
    %167 = vector.broadcast %166 : vector<4x8x1xf32> to vector<4x8x8xf32>
    %168 = arith.subf %164, %167 : vector<4x8x8xf32>
    %169 = math.exp %168 : vector<4x8x8xf32>
    %cst_69 = arith.constant dense<0.000000e+00> : vector<4x8xf32>
    %170 = vector.multi_reduction <add>, %169, %cst_69 [2] : vector<4x8x8xf32> to vector<4x8xf32>
    %171 = vector.shape_cast %170 : vector<4x8xf32> to vector<4x8x1xf32>
    %172 = vector.broadcast %171 : vector<4x8x1xf32> to vector<4x8x8xf32>
    %173 = arith.divf %169, %172 : vector<4x8x8xf32>
    %174 = arith.truncf %173 : vector<4x8x8xf32> to vector<4x8x8xbf16>
    "tpu.trace_start"() <{level = 10 : i32, message = "bnm,bmd->bnd"}> : () -> ()
    %cst_70 = arith.constant dense<0.000000e+00> : vector<4x8x16xf32>
    %175 = tpu.matmul %174, %161, %cst_70 {dimension_numbers = #tpu.dot_dimension_numbers<[2], [1], [1], [2], [0, 0, 0, 1, 1, 2], [0], [0]>} : vector<4x8x8xbf16>, vector<4x8x16xbf16>, vector<4x8x16xf32> -> vector<4x8x16xf32>
    "tpu.trace_stop"() : () -> ()
    %176 = vector.shape_cast %175 : vector<4x8x16xf32> to vector<32x16xf32>
    %177 = arith.truncf %176 : vector<32x16xf32> to vector<32x16xbf16>
    %178 = vector.extract_strided_slice %10 {offsets = [64, 0], sizes = [16, 128], strides = [1, 1]} : vector<128x128xbf16> to vector<16x128xbf16>
    %cst_71 = arith.constant dense<0.000000e+00> : vector<32x128xf32>
    %179 = tpu.matmul %177, %178, %cst_71 {dimension_numbers = #tpu.dot_dimension_numbers<[1], [0], [0], [1], [0, 0, 1, 1], [], []>} : vector<32x16xbf16>, vector<16x128xbf16>, vector<32x128xf32> -> vector<32x128xf32>
    %180 = arith.addf %155, %179 : vector<32x128xf32>
    %181 = vector.extract_strided_slice %52 {offsets = [0, 0, 80], sizes = [4, 8, 16], strides = [1, 1, 1]} : vector<4x8x128xf32> to vector<4x8x16xf32>
    %182 = arith.truncf %181 : vector<4x8x16xf32> to vector<4x8x16xbf16>
    %183 = vector.extract_strided_slice %54 {offsets = [0, 0, 80], sizes = [4, 8, 16], strides = [1, 1, 1]} : vector<4x8x128xf32> to vector<4x8x16xf32>
    %184 = arith.truncf %183 : vector<4x8x16xf32> to vector<4x8x16xbf16>
    %185 = vector.extract_strided_slice %56 {offsets = [0, 0, 80], sizes = [4, 8, 16], strides = [1, 1, 1]} : vector<4x8x128xf32> to vector<4x8x16xf32>
    %186 = arith.truncf %185 : vector<4x8x16xf32> to vector<4x8x16xbf16>
    "tpu.trace_start"() <{level = 10 : i32, message = "bnd,bmd->bnm"}> : () -> ()
    %cst_72 = arith.constant dense<0.000000e+00> : vector<4x8x8xf32>
    %187 = tpu.matmul %182, %184, %cst_72 {dimension_numbers = #tpu.dot_dimension_numbers<[2], [2], [1], [1], [0, 0, 0, 1, 1, 1], [0], [0]>} : vector<4x8x16xbf16>, vector<4x8x16xbf16>, vector<4x8x8xf32> -> vector<4x8x8xf32>
    "tpu.trace_stop"() : () -> ()
    %cst_73 = arith.constant 2.500000e-01 : f32
    %188 = vector.broadcast %cst_73 : f32 to vector<4x8x8xf32>
    %189 = arith.mulf %187, %188 : vector<4x8x8xf32>
    %cst_74 = arith.constant dense<0xFF800000> : vector<4x8xf32>
    %190 = vector.multi_reduction <maximumf>, %189, %cst_74 [2] : vector<4x8x8xf32> to vector<4x8xf32>
    %191 = vector.shape_cast %190 : vector<4x8xf32> to vector<4x8x1xf32>
    %192 = vector.broadcast %191 : vector<4x8x1xf32> to vector<4x8x8xf32>
    %193 = arith.subf %189, %192 : vector<4x8x8xf32>
    %194 = math.exp %193 : vector<4x8x8xf32>
    %cst_75 = arith.constant dense<0.000000e+00> : vector<4x8xf32>
    %195 = vector.multi_reduction <add>, %194, %cst_75 [2] : vector<4x8x8xf32> to vector<4x8xf32>
    %196 = vector.shape_cast %195 : vector<4x8xf32> to vector<4x8x1xf32>
    %197 = vector.broadcast %196 : vector<4x8x1xf32> to vector<4x8x8xf32>
    %198 = arith.divf %194, %197 : vector<4x8x8xf32>
    %199 = arith.truncf %198 : vector<4x8x8xf32> to vector<4x8x8xbf16>
    "tpu.trace_start"() <{level = 10 : i32, message = "bnm,bmd->bnd"}> : () -> ()
    %cst_76 = arith.constant dense<0.000000e+00> : vector<4x8x16xf32>
    %200 = tpu.matmul %199, %186, %cst_76 {dimension_numbers = #tpu.dot_dimension_numbers<[2], [1], [1], [2], [0, 0, 0, 1, 1, 2], [0], [0]>} : vector<4x8x8xbf16>, vector<4x8x16xbf16>, vector<4x8x16xf32> -> vector<4x8x16xf32>
    "tpu.trace_stop"() : () -> ()
    %201 = vector.shape_cast %200 : vector<4x8x16xf32> to vector<32x16xf32>
    %202 = arith.truncf %201 : vector<32x16xf32> to vector<32x16xbf16>
    %203 = vector.extract_strided_slice %10 {offsets = [80, 0], sizes = [16, 128], strides = [1, 1]} : vector<128x128xbf16> to vector<16x128xbf16>
    %cst_77 = arith.constant dense<0.000000e+00> : vector<32x128xf32>
    %204 = tpu.matmul %202, %203, %cst_77 {dimension_numbers = #tpu.dot_dimension_numbers<[1], [0], [0], [1], [0, 0, 1, 1], [], []>} : vector<32x16xbf16>, vector<16x128xbf16>, vector<32x128xf32> -> vector<32x128xf32>
    %205 = arith.addf %180, %204 : vector<32x128xf32>
    %206 = vector.extract_strided_slice %52 {offsets = [0, 0, 96], sizes = [4, 8, 16], strides = [1, 1, 1]} : vector<4x8x128xf32> to vector<4x8x16xf32>
    %207 = arith.truncf %206 : vector<4x8x16xf32> to vector<4x8x16xbf16>
    %208 = vector.extract_strided_slice %54 {offsets = [0, 0, 96], sizes = [4, 8, 16], strides = [1, 1, 1]} : vector<4x8x128xf32> to vector<4x8x16xf32>
    %209 = arith.truncf %208 : vector<4x8x16xf32> to vector<4x8x16xbf16>
    %210 = vector.extract_strided_slice %56 {offsets = [0, 0, 96], sizes = [4, 8, 16], strides = [1, 1, 1]} : vector<4x8x128xf32> to vector<4x8x16xf32>
    %211 = arith.truncf %210 : vector<4x8x16xf32> to vector<4x8x16xbf16>
    "tpu.trace_start"() <{level = 10 : i32, message = "bnd,bmd->bnm"}> : () -> ()
    %cst_78 = arith.constant dense<0.000000e+00> : vector<4x8x8xf32>
    %212 = tpu.matmul %207, %209, %cst_78 {dimension_numbers = #tpu.dot_dimension_numbers<[2], [2], [1], [1], [0, 0, 0, 1, 1, 1], [0], [0]>} : vector<4x8x16xbf16>, vector<4x8x16xbf16>, vector<4x8x8xf32> -> vector<4x8x8xf32>
    "tpu.trace_stop"() : () -> ()
    %cst_79 = arith.constant 2.500000e-01 : f32
    %213 = vector.broadcast %cst_79 : f32 to vector<4x8x8xf32>
    %214 = arith.mulf %212, %213 : vector<4x8x8xf32>
    %cst_80 = arith.constant dense<0xFF800000> : vector<4x8xf32>
    %215 = vector.multi_reduction <maximumf>, %214, %cst_80 [2] : vector<4x8x8xf32> to vector<4x8xf32>
    %216 = vector.shape_cast %215 : vector<4x8xf32> to vector<4x8x1xf32>
    %217 = vector.broadcast %216 : vector<4x8x1xf32> to vector<4x8x8xf32>
    %218 = arith.subf %214, %217 : vector<4x8x8xf32>
    %219 = math.exp %218 : vector<4x8x8xf32>
    %cst_81 = arith.constant dense<0.000000e+00> : vector<4x8xf32>
    %220 = vector.multi_reduction <add>, %219, %cst_81 [2] : vector<4x8x8xf32> to vector<4x8xf32>
    %221 = vector.shape_cast %220 : vector<4x8xf32> to vector<4x8x1xf32>
    %222 = vector.broadcast %221 : vector<4x8x1xf32> to vector<4x8x8xf32>
    %223 = arith.divf %219, %222 : vector<4x8x8xf32>
    %224 = arith.truncf %223 : vector<4x8x8xf32> to vector<4x8x8xbf16>
    "tpu.trace_start"() <{level = 10 : i32, message = "bnm,bmd->bnd"}> : () -> ()
    %cst_82 = arith.constant dense<0.000000e+00> : vector<4x8x16xf32>
    %225 = tpu.matmul %224, %211, %cst_82 {dimension_numbers = #tpu.dot_dimension_numbers<[2], [1], [1], [2], [0, 0, 0, 1, 1, 2], [0], [0]>} : vector<4x8x8xbf16>, vector<4x8x16xbf16>, vector<4x8x16xf32> -> vector<4x8x16xf32>
    "tpu.trace_stop"() : () -> ()
    %226 = vector.shape_cast %225 : vector<4x8x16xf32> to vector<32x16xf32>
    %227 = arith.truncf %226 : vector<32x16xf32> to vector<32x16xbf16>
    %228 = vector.extract_strided_slice %10 {offsets = [96, 0], sizes = [16, 128], strides = [1, 1]} : vector<128x128xbf16> to vector<16x128xbf16>
    %cst_83 = arith.constant dense<0.000000e+00> : vector<32x128xf32>
    %229 = tpu.matmul %227, %228, %cst_83 {dimension_numbers = #tpu.dot_dimension_numbers<[1], [0], [0], [1], [0, 0, 1, 1], [], []>} : vector<32x16xbf16>, vector<16x128xbf16>, vector<32x128xf32> -> vector<32x128xf32>
    %230 = arith.addf %205, %229 : vector<32x128xf32>
    %231 = vector.extract_strided_slice %52 {offsets = [0, 0, 112], sizes = [4, 8, 16], strides = [1, 1, 1]} : vector<4x8x128xf32> to vector<4x8x16xf32>
    %232 = arith.truncf %231 : vector<4x8x16xf32> to vector<4x8x16xbf16>
    %233 = vector.extract_strided_slice %54 {offsets = [0, 0, 112], sizes = [4, 8, 16], strides = [1, 1, 1]} : vector<4x8x128xf32> to vector<4x8x16xf32>
    %234 = arith.truncf %233 : vector<4x8x16xf32> to vector<4x8x16xbf16>
    %235 = vector.extract_strided_slice %56 {offsets = [0, 0, 112], sizes = [4, 8, 16], strides = [1, 1, 1]} : vector<4x8x128xf32> to vector<4x8x16xf32>
    %236 = arith.truncf %235 : vector<4x8x16xf32> to vector<4x8x16xbf16>
    "tpu.trace_start"() <{level = 10 : i32, message = "bnd,bmd->bnm"}> : () -> ()
    %cst_84 = arith.constant dense<0.000000e+00> : vector<4x8x8xf32>
    %237 = tpu.matmul %232, %234, %cst_84 {dimension_numbers = #tpu.dot_dimension_numbers<[2], [2], [1], [1], [0, 0, 0, 1, 1, 1], [0], [0]>} : vector<4x8x16xbf16>, vector<4x8x16xbf16>, vector<4x8x8xf32> -> vector<4x8x8xf32>
    "tpu.trace_stop"() : () -> ()
    %cst_85 = arith.constant 2.500000e-01 : f32
    %238 = vector.broadcast %cst_85 : f32 to vector<4x8x8xf32>
    %239 = arith.mulf %237, %238 : vector<4x8x8xf32>
    %cst_86 = arith.constant dense<0xFF800000> : vector<4x8xf32>
    %240 = vector.multi_reduction <maximumf>, %239, %cst_86 [2] : vector<4x8x8xf32> to vector<4x8xf32>
    %241 = vector.shape_cast %240 : vector<4x8xf32> to vector<4x8x1xf32>
    %242 = vector.broadcast %241 : vector<4x8x1xf32> to vector<4x8x8xf32>
    %243 = arith.subf %239, %242 : vector<4x8x8xf32>
    %244 = math.exp %243 : vector<4x8x8xf32>
    %cst_87 = arith.constant dense<0.000000e+00> : vector<4x8xf32>
    %245 = vector.multi_reduction <add>, %244, %cst_87 [2] : vector<4x8x8xf32> to vector<4x8xf32>
    %246 = vector.shape_cast %245 : vector<4x8xf32> to vector<4x8x1xf32>
    %247 = vector.broadcast %246 : vector<4x8x1xf32> to vector<4x8x8xf32>
    %248 = arith.divf %244, %247 : vector<4x8x8xf32>
    %249 = arith.truncf %248 : vector<4x8x8xf32> to vector<4x8x8xbf16>
    "tpu.trace_start"() <{level = 10 : i32, message = "bnm,bmd->bnd"}> : () -> ()
    %cst_88 = arith.constant dense<0.000000e+00> : vector<4x8x16xf32>
    %250 = tpu.matmul %249, %236, %cst_88 {dimension_numbers = #tpu.dot_dimension_numbers<[2], [1], [1], [2], [0, 0, 0, 1, 1, 2], [0], [0]>} : vector<4x8x8xbf16>, vector<4x8x16xbf16>, vector<4x8x16xf32> -> vector<4x8x16xf32>
    "tpu.trace_stop"() : () -> ()
    %251 = vector.shape_cast %250 : vector<4x8x16xf32> to vector<32x16xf32>
    %252 = arith.truncf %251 : vector<32x16xf32> to vector<32x16xbf16>
    %253 = vector.extract_strided_slice %10 {offsets = [112, 0], sizes = [16, 128], strides = [1, 1]} : vector<128x128xbf16> to vector<16x128xbf16>
    %cst_89 = arith.constant dense<0.000000e+00> : vector<32x128xf32>
    %254 = tpu.matmul %252, %253, %cst_89 {dimension_numbers = #tpu.dot_dimension_numbers<[1], [0], [0], [1], [0, 0, 1, 1], [], []>} : vector<32x16xbf16>, vector<16x128xbf16>, vector<32x128xf32> -> vector<32x128xf32>
    %255 = arith.addf %230, %254 : vector<32x128xf32>
    %256 = arith.addf %0, %255 : vector<32x128xf32>
    %257 = vector.broadcast %12 : vector<1x128xf32> to vector<32x128xf32>
    %258 = arith.addf %256, %257 : vector<32x128xf32>
    %cst_90 = arith.constant dense<0.000000e+00> : vector<32xf32>
    %259 = vector.multi_reduction <add>, %258, %cst_90 [1] : vector<32x128xf32> to vector<32xf32>
    %260 = vector.shape_cast %259 : vector<32xf32> to vector<32x1xf32>
    %cst_91 = arith.constant 1.280000e+02 : f32
    %261 = vector.broadcast %cst_91 : f32 to vector<32x1xf32>
    %262 = arith.divf %260, %261 : vector<32x1xf32>
    %263 = vector.broadcast %262 : vector<32x1xf32> to vector<32x128xf32>
    %264 = arith.subf %258, %263 : vector<32x128xf32>
    %265 = arith.mulf %264, %264 : vector<32x128xf32>
    %cst_92 = arith.constant dense<0.000000e+00> : vector<32xf32>
    %266 = vector.multi_reduction <add>, %265, %cst_92 [1] : vector<32x128xf32> to vector<32xf32>
    %267 = vector.shape_cast %266 : vector<32xf32> to vector<32x1xf32>
    %cst_93 = arith.constant 1.280000e+02 : f32
    %268 = vector.broadcast %cst_93 : f32 to vector<32x1xf32>
    %269 = arith.divf %267, %268 : vector<32x1xf32>
    %270 = vector.broadcast %262 : vector<32x1xf32> to vector<32x128xf32>
    %271 = arith.subf %258, %270 : vector<32x128xf32>
    %cst_94 = arith.constant 9.99999974E-6 : f32
    %272 = vector.broadcast %cst_94 : f32 to vector<32x1xf32>
    %273 = arith.addf %269, %272 : vector<32x1xf32>
    %274 = math.rsqrt %273 : vector<32x1xf32>
    %275 = vector.broadcast %274 : vector<32x1xf32> to vector<32x128xf32>
    %276 = arith.mulf %271, %275 : vector<32x128xf32>
    %277 = vector.broadcast %14 : vector<1x128xf32> to vector<32x128xf32>
    %278 = arith.mulf %276, %277 : vector<32x128xf32>
    %279 = vector.broadcast %16 : vector<1x128xf32> to vector<32x128xf32>
    %280 = arith.addf %278, %279 : vector<32x128xf32>
    %281 = arith.truncf %280 : vector<32x128xf32> to vector<32x128xbf16>
    %cst_95 = arith.constant dense<0.000000e+00> : vector<32x256xf32>
    %282 = tpu.matmul %281, %18, %cst_95 {dimension_numbers = #tpu.dot_dimension_numbers<[1], [0], [0], [1], [0, 0, 1, 1], [], []>} : vector<32x128xbf16>, vector<128x256xbf16>, vector<32x256xf32> -> vector<32x256xf32>
    %283 = vector.broadcast %20 : vector<1x256xf32> to vector<32x256xf32>
    %284 = arith.addf %282, %283 : vector<32x256xf32>
    %285 = arith.mulf %284, %284 : vector<32x256xf32>
    %286 = arith.mulf %284, %285 : vector<32x256xf32>
    %cst_96 = arith.constant 4.471500e-02 : f32
    %287 = vector.broadcast %cst_96 : f32 to vector<32x256xf32>
    %288 = arith.mulf %287, %286 : vector<32x256xf32>
    %289 = arith.addf %284, %288 : vector<32x256xf32>
    %cst_97 = arith.constant 0.797884583 : f32
    %290 = vector.broadcast %cst_97 : f32 to vector<32x256xf32>
    %291 = arith.mulf %290, %289 : vector<32x256xf32>
    %292 = math.tanh %291 : vector<32x256xf32>
    %cst_98 = arith.constant 1.000000e+00 : f32
    %293 = vector.broadcast %cst_98 : f32 to vector<32x256xf32>
    %294 = arith.addf %293, %292 : vector<32x256xf32>
    %cst_99 = arith.constant 5.000000e-01 : f32
    %295 = vector.broadcast %cst_99 : f32 to vector<32x256xf32>
    %296 = arith.mulf %295, %294 : vector<32x256xf32>
    %297 = arith.mulf %284, %296 : vector<32x256xf32>
    %298 = arith.truncf %297 : vector<32x256xf32> to vector<32x256xbf16>
    %cst_100 = arith.constant dense<0.000000e+00> : vector<32x128xf32>
    %299 = tpu.matmul %298, %22, %cst_100 {dimension_numbers = #tpu.dot_dimension_numbers<[1], [0], [0], [1], [0, 0, 1, 1], [], []>} : vector<32x256xbf16>, vector<256x128xbf16>, vector<32x128xf32> -> vector<32x128xf32>
    %300 = vector.broadcast %24 : vector<1x128xf32> to vector<32x128xf32>
    %301 = arith.addf %299, %300 : vector<32x128xf32>
    %302 = arith.addf %258, %301 : vector<32x128xf32>
    %c1 = arith.constant 1 : index
    %c0_101 = arith.constant 0 : index
    %c0_102 = arith.constant 0 : index
    %303 = vector.load %arg2[%c1, %c0_101, %c0_102] : memref<2x1x128xf32, #tpu.memory_space<vmem>>, vector<1x1x128xf32>
    %304 = vector.shape_cast %303 : vector<1x1x128xf32> to vector<1x128xf32>
    %c1_103 = arith.constant 1 : index
    %c0_104 = arith.constant 0 : index
    %c0_105 = arith.constant 0 : index
    %305 = vector.load %arg3[%c1_103, %c0_104, %c0_105] : memref<2x1x128xf32, #tpu.memory_space<vmem>>, vector<1x1x128xf32>
    %306 = vector.shape_cast %305 : vector<1x1x128xf32> to vector<1x128xf32>
    %c1_106 = arith.constant 1 : index
    %c0_107 = arith.constant 0 : index
    %c0_108 = arith.constant 0 : index
    %307 = vector.load %arg4[%c1_106, %c0_107, %c0_108] : memref<2x128x384xbf16, #tpu.memory_space<vmem>>, vector<1x128x384xbf16>
    %308 = vector.shape_cast %307 : vector<1x128x384xbf16> to vector<128x384xbf16>
    %c1_109 = arith.constant 1 : index
    %c0_110 = arith.constant 0 : index
    %c0_111 = arith.constant 0 : index
    %309 = vector.load %arg5[%c1_109, %c0_110, %c0_111] : memref<2x1x384xf32, #tpu.memory_space<vmem>>, vector<1x1x384xf32>
    %310 = vector.shape_cast %309 : vector<1x1x384xf32> to vector<1x384xf32>
    %c1_112 = arith.constant 1 : index
    %c0_113 = arith.constant 0 : index
    %c0_114 = arith.constant 0 : index
    %311 = vector.load %arg6[%c1_112, %c0_113, %c0_114] : memref<2x128x128xbf16, #tpu.memory_space<vmem>>, vector<1x128x128xbf16>
    %312 = vector.shape_cast %311 : vector<1x128x128xbf16> to vector<128x128xbf16>
    %c1_115 = arith.constant 1 : index
    %c0_116 = arith.constant 0 : index
    %c0_117 = arith.constant 0 : index
    %313 = vector.load %arg7[%c1_115, %c0_116, %c0_117] : memref<2x1x128xf32, #tpu.memory_space<vmem>>, vector<1x1x128xf32>
    %314 = vector.shape_cast %313 : vector<1x1x128xf32> to vector<1x128xf32>
    %c1_118 = arith.constant 1 : index
    %c0_119 = arith.constant 0 : index
    %c0_120 = arith.constant 0 : index
    %315 = vector.load %arg8[%c1_118, %c0_119, %c0_120] : memref<2x1x128xf32, #tpu.memory_space<vmem>>, vector<1x1x128xf32>
    %316 = vector.shape_cast %315 : vector<1x1x128xf32> to vector<1x128xf32>
    %c1_121 = arith.constant 1 : index
    %c0_122 = arith.constant 0 : index
    %c0_123 = arith.constant 0 : index
    %317 = vector.load %arg9[%c1_121, %c0_122, %c0_123] : memref<2x1x128xf32, #tpu.memory_space<vmem>>, vector<1x1x128xf32>
    %318 = vector.shape_cast %317 : vector<1x1x128xf32> to vector<1x128xf32>
    %c1_124 = arith.constant 1 : index
    %c0_125 = arith.constant 0 : index
    %c0_126 = arith.constant 0 : index
    %319 = vector.load %arg10[%c1_124, %c0_125, %c0_126] : memref<2x128x256xbf16, #tpu.memory_space<vmem>>, vector<1x128x256xbf16>
    %320 = vector.shape_cast %319 : vector<1x128x256xbf16> to vector<128x256xbf16>
    %c1_127 = arith.constant 1 : index
    %c0_128 = arith.constant 0 : index
    %c0_129 = arith.constant 0 : index
    %321 = vector.load %arg11[%c1_127, %c0_128, %c0_129] : memref<2x1x256xf32, #tpu.memory_space<vmem>>, vector<1x1x256xf32>
    %322 = vector.shape_cast %321 : vector<1x1x256xf32> to vector<1x256xf32>
    %c1_130 = arith.constant 1 : index
    %c0_131 = arith.constant 0 : index
    %c0_132 = arith.constant 0 : index
    %323 = vector.load %arg12[%c1_130, %c0_131, %c0_132] : memref<2x256x128xbf16, #tpu.memory_space<vmem>>, vector<1x256x128xbf16>
    %324 = vector.shape_cast %323 : vector<1x256x128xbf16> to vector<256x128xbf16>
    %c1_133 = arith.constant 1 : index
    %c0_134 = arith.constant 0 : index
    %c0_135 = arith.constant 0 : index
    %325 = vector.load %arg13[%c1_133, %c0_134, %c0_135] : memref<2x1x128xf32, #tpu.memory_space<vmem>>, vector<1x1x128xf32>
    %326 = vector.shape_cast %325 : vector<1x1x128xf32> to vector<1x128xf32>
    %cst_136 = arith.constant dense<0.000000e+00> : vector<32xf32>
    %327 = vector.multi_reduction <add>, %302, %cst_136 [1] : vector<32x128xf32> to vector<32xf32>
    %328 = vector.shape_cast %327 : vector<32xf32> to vector<32x1xf32>
    %cst_137 = arith.constant 1.280000e+02 : f32
    %329 = vector.broadcast %cst_137 : f32 to vector<32x1xf32>
    %330 = arith.divf %328, %329 : vector<32x1xf32>
    %331 = vector.broadcast %330 : vector<32x1xf32> to vector<32x128xf32>
    %332 = arith.subf %302, %331 : vector<32x128xf32>
    %333 = arith.mulf %332, %332 : vector<32x128xf32>
    %cst_138 = arith.constant dense<0.000000e+00> : vector<32xf32>
    %334 = vector.multi_reduction <add>, %333, %cst_138 [1] : vector<32x128xf32> to vector<32xf32>
    %335 = vector.shape_cast %334 : vector<32xf32> to vector<32x1xf32>
    %cst_139 = arith.constant 1.280000e+02 : f32
    %336 = vector.broadcast %cst_139 : f32 to vector<32x1xf32>
    %337 = arith.divf %335, %336 : vector<32x1xf32>
    %338 = vector.broadcast %330 : vector<32x1xf32> to vector<32x128xf32>
    %339 = arith.subf %302, %338 : vector<32x128xf32>
    %cst_140 = arith.constant 9.99999974E-6 : f32
    %340 = vector.broadcast %cst_140 : f32 to vector<32x1xf32>
    %341 = arith.addf %337, %340 : vector<32x1xf32>
    %342 = math.rsqrt %341 : vector<32x1xf32>
    %343 = vector.broadcast %342 : vector<32x1xf32> to vector<32x128xf32>
    %344 = arith.mulf %339, %343 : vector<32x128xf32>
    %345 = vector.broadcast %304 : vector<1x128xf32> to vector<32x128xf32>
    %346 = arith.mulf %344, %345 : vector<32x128xf32>
    %347 = vector.broadcast %306 : vector<1x128xf32> to vector<32x128xf32>
    %348 = arith.addf %346, %347 : vector<32x128xf32>
    %349 = arith.truncf %348 : vector<32x128xf32> to vector<32x128xbf16>
    %cst_141 = arith.constant dense<0.000000e+00> : vector<32x384xf32>
    %350 = tpu.matmul %349, %308, %cst_141 {dimension_numbers = #tpu.dot_dimension_numbers<[1], [0], [0], [1], [0, 0, 1, 1], [], []>} : vector<32x128xbf16>, vector<128x384xbf16>, vector<32x384xf32> -> vector<32x384xf32>
    %351 = vector.broadcast %310 : vector<1x384xf32> to vector<32x384xf32>
    %352 = arith.addf %350, %351 : vector<32x384xf32>
    %353 = vector.extract_strided_slice %352 {offsets = [0, 0], sizes = [32, 128], strides = [1, 1]} : vector<32x384xf32> to vector<32x128xf32>
    %354 = vector.shape_cast %353 : vector<32x128xf32> to vector<4x8x128xf32>
    %355 = vector.extract_strided_slice %352 {offsets = [0, 128], sizes = [32, 128], strides = [1, 1]} : vector<32x384xf32> to vector<32x128xf32>
    %356 = vector.shape_cast %355 : vector<32x128xf32> to vector<4x8x128xf32>
    %357 = vector.extract_strided_slice %352 {offsets = [0, 256], sizes = [32, 128], strides = [1, 1]} : vector<32x384xf32> to vector<32x128xf32>
    %358 = vector.shape_cast %357 : vector<32x128xf32> to vector<4x8x128xf32>
    %359 = vector.extract_strided_slice %354 {offsets = [0, 0, 0], sizes = [4, 8, 16], strides = [1, 1, 1]} : vector<4x8x128xf32> to vector<4x8x16xf32>
    %360 = arith.truncf %359 : vector<4x8x16xf32> to vector<4x8x16xbf16>
    %361 = vector.extract_strided_slice %356 {offsets = [0, 0, 0], sizes = [4, 8, 16], strides = [1, 1, 1]} : vector<4x8x128xf32> to vector<4x8x16xf32>
    %362 = arith.truncf %361 : vector<4x8x16xf32> to vector<4x8x16xbf16>
    %363 = vector.extract_strided_slice %358 {offsets = [0, 0, 0], sizes = [4, 8, 16], strides = [1, 1, 1]} : vector<4x8x128xf32> to vector<4x8x16xf32>
    %364 = arith.truncf %363 : vector<4x8x16xf32> to vector<4x8x16xbf16>
    "tpu.trace_start"() <{level = 10 : i32, message = "bnd,bmd->bnm"}> : () -> ()
    %cst_142 = arith.constant dense<0.000000e+00> : vector<4x8x8xf32>
    %365 = tpu.matmul %360, %362, %cst_142 {dimension_numbers = #tpu.dot_dimension_numbers<[2], [2], [1], [1], [0, 0, 0, 1, 1, 1], [0], [0]>} : vector<4x8x16xbf16>, vector<4x8x16xbf16>, vector<4x8x8xf32> -> vector<4x8x8xf32>
    "tpu.trace_stop"() : () -> ()
    %cst_143 = arith.constant 2.500000e-01 : f32
    %366 = vector.broadcast %cst_143 : f32 to vector<4x8x8xf32>
    %367 = arith.mulf %365, %366 : vector<4x8x8xf32>
    %cst_144 = arith.constant dense<0xFF800000> : vector<4x8xf32>
    %368 = vector.multi_reduction <maximumf>, %367, %cst_144 [2] : vector<4x8x8xf32> to vector<4x8xf32>
    %369 = vector.shape_cast %368 : vector<4x8xf32> to vector<4x8x1xf32>
    %370 = vector.broadcast %369 : vector<4x8x1xf32> to vector<4x8x8xf32>
    %371 = arith.subf %367, %370 : vector<4x8x8xf32>
    %372 = math.exp %371 : vector<4x8x8xf32>
    %cst_145 = arith.constant dense<0.000000e+00> : vector<4x8xf32>
    %373 = vector.multi_reduction <add>, %372, %cst_145 [2] : vector<4x8x8xf32> to vector<4x8xf32>
    %374 = vector.shape_cast %373 : vector<4x8xf32> to vector<4x8x1xf32>
    %375 = vector.broadcast %374 : vector<4x8x1xf32> to vector<4x8x8xf32>
    %376 = arith.divf %372, %375 : vector<4x8x8xf32>
    %377 = arith.truncf %376 : vector<4x8x8xf32> to vector<4x8x8xbf16>
    "tpu.trace_start"() <{level = 10 : i32, message = "bnm,bmd->bnd"}> : () -> ()
    %cst_146 = arith.constant dense<0.000000e+00> : vector<4x8x16xf32>
    %378 = tpu.matmul %377, %364, %cst_146 {dimension_numbers = #tpu.dot_dimension_numbers<[2], [1], [1], [2], [0, 0, 0, 1, 1, 2], [0], [0]>} : vector<4x8x8xbf16>, vector<4x8x16xbf16>, vector<4x8x16xf32> -> vector<4x8x16xf32>
    "tpu.trace_stop"() : () -> ()
    %379 = vector.shape_cast %378 : vector<4x8x16xf32> to vector<32x16xf32>
    %380 = arith.truncf %379 : vector<32x16xf32> to vector<32x16xbf16>
    %381 = vector.extract_strided_slice %312 {offsets = [0, 0], sizes = [16, 128], strides = [1, 1]} : vector<128x128xbf16> to vector<16x128xbf16>
    %cst_147 = arith.constant dense<0.000000e+00> : vector<32x128xf32>
    %382 = tpu.matmul %380, %381, %cst_147 {dimension_numbers = #tpu.dot_dimension_numbers<[1], [0], [0], [1], [0, 0, 1, 1], [], []>} : vector<32x16xbf16>, vector<16x128xbf16>, vector<32x128xf32> -> vector<32x128xf32>
    %383 = vector.extract_strided_slice %354 {offsets = [0, 0, 16], sizes = [4, 8, 16], strides = [1, 1, 1]} : vector<4x8x128xf32> to vector<4x8x16xf32>
    %384 = arith.truncf %383 : vector<4x8x16xf32> to vector<4x8x16xbf16>
    %385 = vector.extract_strided_slice %356 {offsets = [0, 0, 16], sizes = [4, 8, 16], strides = [1, 1, 1]} : vector<4x8x128xf32> to vector<4x8x16xf32>
    %386 = arith.truncf %385 : vector<4x8x16xf32> to vector<4x8x16xbf16>
    %387 = vector.extract_strided_slice %358 {offsets = [0, 0, 16], sizes = [4, 8, 16], strides = [1, 1, 1]} : vector<4x8x128xf32> to vector<4x8x16xf32>
    %388 = arith.truncf %387 : vector<4x8x16xf32> to vector<4x8x16xbf16>
    "tpu.trace_start"() <{level = 10 : i32, message = "bnd,bmd->bnm"}> : () -> ()
    %cst_148 = arith.constant dense<0.000000e+00> : vector<4x8x8xf32>
    %389 = tpu.matmul %384, %386, %cst_148 {dimension_numbers = #tpu.dot_dimension_numbers<[2], [2], [1], [1], [0, 0, 0, 1, 1, 1], [0], [0]>} : vector<4x8x16xbf16>, vector<4x8x16xbf16>, vector<4x8x8xf32> -> vector<4x8x8xf32>
    "tpu.trace_stop"() : () -> ()
    %cst_149 = arith.constant 2.500000e-01 : f32
    %390 = vector.broadcast %cst_149 : f32 to vector<4x8x8xf32>
    %391 = arith.mulf %389, %390 : vector<4x8x8xf32>
    %cst_150 = arith.constant dense<0xFF800000> : vector<4x8xf32>
    %392 = vector.multi_reduction <maximumf>, %391, %cst_150 [2] : vector<4x8x8xf32> to vector<4x8xf32>
    %393 = vector.shape_cast %392 : vector<4x8xf32> to vector<4x8x1xf32>
    %394 = vector.broadcast %393 : vector<4x8x1xf32> to vector<4x8x8xf32>
    %395 = arith.subf %391, %394 : vector<4x8x8xf32>
    %396 = math.exp %395 : vector<4x8x8xf32>
    %cst_151 = arith.constant dense<0.000000e+00> : vector<4x8xf32>
    %397 = vector.multi_reduction <add>, %396, %cst_151 [2] : vector<4x8x8xf32> to vector<4x8xf32>
    %398 = vector.shape_cast %397 : vector<4x8xf32> to vector<4x8x1xf32>
    %399 = vector.broadcast %398 : vector<4x8x1xf32> to vector<4x8x8xf32>
    %400 = arith.divf %396, %399 : vector<4x8x8xf32>
    %401 = arith.truncf %400 : vector<4x8x8xf32> to vector<4x8x8xbf16>
    "tpu.trace_start"() <{level = 10 : i32, message = "bnm,bmd->bnd"}> : () -> ()
    %cst_152 = arith.constant dense<0.000000e+00> : vector<4x8x16xf32>
    %402 = tpu.matmul %401, %388, %cst_152 {dimension_numbers = #tpu.dot_dimension_numbers<[2], [1], [1], [2], [0, 0, 0, 1, 1, 2], [0], [0]>} : vector<4x8x8xbf16>, vector<4x8x16xbf16>, vector<4x8x16xf32> -> vector<4x8x16xf32>
    "tpu.trace_stop"() : () -> ()
    %403 = vector.shape_cast %402 : vector<4x8x16xf32> to vector<32x16xf32>
    %404 = arith.truncf %403 : vector<32x16xf32> to vector<32x16xbf16>
    %405 = vector.extract_strided_slice %312 {offsets = [16, 0], sizes = [16, 128], strides = [1, 1]} : vector<128x128xbf16> to vector<16x128xbf16>
    %cst_153 = arith.constant dense<0.000000e+00> : vector<32x128xf32>
    %406 = tpu.matmul %404, %405, %cst_153 {dimension_numbers = #tpu.dot_dimension_numbers<[1], [0], [0], [1], [0, 0, 1, 1], [], []>} : vector<32x16xbf16>, vector<16x128xbf16>, vector<32x128xf32> -> vector<32x128xf32>
    %407 = arith.addf %382, %406 : vector<32x128xf32>
    %408 = vector.extract_strided_slice %354 {offsets = [0, 0, 32], sizes = [4, 8, 16], strides = [1, 1, 1]} : vector<4x8x128xf32> to vector<4x8x16xf32>
    %409 = arith.truncf %408 : vector<4x8x16xf32> to vector<4x8x16xbf16>
    %410 = vector.extract_strided_slice %356 {offsets = [0, 0, 32], sizes = [4, 8, 16], strides = [1, 1, 1]} : vector<4x8x128xf32> to vector<4x8x16xf32>
    %411 = arith.truncf %410 : vector<4x8x16xf32> to vector<4x8x16xbf16>
    %412 = vector.extract_strided_slice %358 {offsets = [0, 0, 32], sizes = [4, 8, 16], strides = [1, 1, 1]} : vector<4x8x128xf32> to vector<4x8x16xf32>
    %413 = arith.truncf %412 : vector<4x8x16xf32> to vector<4x8x16xbf16>
    "tpu.trace_start"() <{level = 10 : i32, message = "bnd,bmd->bnm"}> : () -> ()
    %cst_154 = arith.constant dense<0.000000e+00> : vector<4x8x8xf32>
    %414 = tpu.matmul %409, %411, %cst_154 {dimension_numbers = #tpu.dot_dimension_numbers<[2], [2], [1], [1], [0, 0, 0, 1, 1, 1], [0], [0]>} : vector<4x8x16xbf16>, vector<4x8x16xbf16>, vector<4x8x8xf32> -> vector<4x8x8xf32>
    "tpu.trace_stop"() : () -> ()
    %cst_155 = arith.constant 2.500000e-01 : f32
    %415 = vector.broadcast %cst_155 : f32 to vector<4x8x8xf32>
    %416 = arith.mulf %414, %415 : vector<4x8x8xf32>
    %cst_156 = arith.constant dense<0xFF800000> : vector<4x8xf32>
    %417 = vector.multi_reduction <maximumf>, %416, %cst_156 [2] : vector<4x8x8xf32> to vector<4x8xf32>
    %418 = vector.shape_cast %417 : vector<4x8xf32> to vector<4x8x1xf32>
    %419 = vector.broadcast %418 : vector<4x8x1xf32> to vector<4x8x8xf32>
    %420 = arith.subf %416, %419 : vector<4x8x8xf32>
    %421 = math.exp %420 : vector<4x8x8xf32>
    %cst_157 = arith.constant dense<0.000000e+00> : vector<4x8xf32>
    %422 = vector.multi_reduction <add>, %421, %cst_157 [2] : vector<4x8x8xf32> to vector<4x8xf32>
    %423 = vector.shape_cast %422 : vector<4x8xf32> to vector<4x8x1xf32>
    %424 = vector.broadcast %423 : vector<4x8x1xf32> to vector<4x8x8xf32>
    %425 = arith.divf %421, %424 : vector<4x8x8xf32>
    %426 = arith.truncf %425 : vector<4x8x8xf32> to vector<4x8x8xbf16>
    "tpu.trace_start"() <{level = 10 : i32, message = "bnm,bmd->bnd"}> : () -> ()
    %cst_158 = arith.constant dense<0.000000e+00> : vector<4x8x16xf32>
    %427 = tpu.matmul %426, %413, %cst_158 {dimension_numbers = #tpu.dot_dimension_numbers<[2], [1], [1], [2], [0, 0, 0, 1, 1, 2], [0], [0]>} : vector<4x8x8xbf16>, vector<4x8x16xbf16>, vector<4x8x16xf32> -> vector<4x8x16xf32>
    "tpu.trace_stop"() : () -> ()
    %428 = vector.shape_cast %427 : vector<4x8x16xf32> to vector<32x16xf32>
    %429 = arith.truncf %428 : vector<32x16xf32> to vector<32x16xbf16>
    %430 = vector.extract_strided_slice %312 {offsets = [32, 0], sizes = [16, 128], strides = [1, 1]} : vector<128x128xbf16> to vector<16x128xbf16>
    %cst_159 = arith.constant dense<0.000000e+00> : vector<32x128xf32>
    %431 = tpu.matmul %429, %430, %cst_159 {dimension_numbers = #tpu.dot_dimension_numbers<[1], [0], [0], [1], [0, 0, 1, 1], [], []>} : vector<32x16xbf16>, vector<16x128xbf16>, vector<32x128xf32> -> vector<32x128xf32>
    %432 = arith.addf %407, %431 : vector<32x128xf32>
    %433 = vector.extract_strided_slice %354 {offsets = [0, 0, 48], sizes = [4, 8, 16], strides = [1, 1, 1]} : vector<4x8x128xf32> to vector<4x8x16xf32>
    %434 = arith.truncf %433 : vector<4x8x16xf32> to vector<4x8x16xbf16>
    %435 = vector.extract_strided_slice %356 {offsets = [0, 0, 48], sizes = [4, 8, 16], strides = [1, 1, 1]} : vector<4x8x128xf32> to vector<4x8x16xf32>
    %436 = arith.truncf %435 : vector<4x8x16xf32> to vector<4x8x16xbf16>
    %437 = vector.extract_strided_slice %358 {offsets = [0, 0, 48], sizes = [4, 8, 16], strides = [1, 1, 1]} : vector<4x8x128xf32> to vector<4x8x16xf32>
    %438 = arith.truncf %437 : vector<4x8x16xf32> to vector<4x8x16xbf16>
    "tpu.trace_start"() <{level = 10 : i32, message = "bnd,bmd->bnm"}> : () -> ()
    %cst_160 = arith.constant dense<0.000000e+00> : vector<4x8x8xf32>
    %439 = tpu.matmul %434, %436, %cst_160 {dimension_numbers = #tpu.dot_dimension_numbers<[2], [2], [1], [1], [0, 0, 0, 1, 1, 1], [0], [0]>} : vector<4x8x16xbf16>, vector<4x8x16xbf16>, vector<4x8x8xf32> -> vector<4x8x8xf32>
    "tpu.trace_stop"() : () -> ()
    %cst_161 = arith.constant 2.500000e-01 : f32
    %440 = vector.broadcast %cst_161 : f32 to vector<4x8x8xf32>
    %441 = arith.mulf %439, %440 : vector<4x8x8xf32>
    %cst_162 = arith.constant dense<0xFF800000> : vector<4x8xf32>
    %442 = vector.multi_reduction <maximumf>, %441, %cst_162 [2] : vector<4x8x8xf32> to vector<4x8xf32>
    %443 = vector.shape_cast %442 : vector<4x8xf32> to vector<4x8x1xf32>
    %444 = vector.broadcast %443 : vector<4x8x1xf32> to vector<4x8x8xf32>
    %445 = arith.subf %441, %444 : vector<4x8x8xf32>
    %446 = math.exp %445 : vector<4x8x8xf32>
    %cst_163 = arith.constant dense<0.000000e+00> : vector<4x8xf32>
    %447 = vector.multi_reduction <add>, %446, %cst_163 [2] : vector<4x8x8xf32> to vector<4x8xf32>
    %448 = vector.shape_cast %447 : vector<4x8xf32> to vector<4x8x1xf32>
    %449 = vector.broadcast %448 : vector<4x8x1xf32> to vector<4x8x8xf32>
    %450 = arith.divf %446, %449 : vector<4x8x8xf32>
    %451 = arith.truncf %450 : vector<4x8x8xf32> to vector<4x8x8xbf16>
    "tpu.trace_start"() <{level = 10 : i32, message = "bnm,bmd->bnd"}> : () -> ()
    %cst_164 = arith.constant dense<0.000000e+00> : vector<4x8x16xf32>
    %452 = tpu.matmul %451, %438, %cst_164 {dimension_numbers = #tpu.dot_dimension_numbers<[2], [1], [1], [2], [0, 0, 0, 1, 1, 2], [0], [0]>} : vector<4x8x8xbf16>, vector<4x8x16xbf16>, vector<4x8x16xf32> -> vector<4x8x16xf32>
    "tpu.trace_stop"() : () -> ()
    %453 = vector.shape_cast %452 : vector<4x8x16xf32> to vector<32x16xf32>
    %454 = arith.truncf %453 : vector<32x16xf32> to vector<32x16xbf16>
    %455 = vector.extract_strided_slice %312 {offsets = [48, 0], sizes = [16, 128], strides = [1, 1]} : vector<128x128xbf16> to vector<16x128xbf16>
    %cst_165 = arith.constant dense<0.000000e+00> : vector<32x128xf32>
    %456 = tpu.matmul %454, %455, %cst_165 {dimension_numbers = #tpu.dot_dimension_numbers<[1], [0], [0], [1], [0, 0, 1, 1], [], []>} : vector<32x16xbf16>, vector<16x128xbf16>, vector<32x128xf32> -> vector<32x128xf32>
    %457 = arith.addf %432, %456 : vector<32x128xf32>
    %458 = vector.extract_strided_slice %354 {offsets = [0, 0, 64], sizes = [4, 8, 16], strides = [1, 1, 1]} : vector<4x8x128xf32> to vector<4x8x16xf32>
    %459 = arith.truncf %458 : vector<4x8x16xf32> to vector<4x8x16xbf16>
    %460 = vector.extract_strided_slice %356 {offsets = [0, 0, 64], sizes = [4, 8, 16], strides = [1, 1, 1]} : vector<4x8x128xf32> to vector<4x8x16xf32>
    %461 = arith.truncf %460 : vector<4x8x16xf32> to vector<4x8x16xbf16>
    %462 = vector.extract_strided_slice %358 {offsets = [0, 0, 64], sizes = [4, 8, 16], strides = [1, 1, 1]} : vector<4x8x128xf32> to vector<4x8x16xf32>
    %463 = arith.truncf %462 : vector<4x8x16xf32> to vector<4x8x16xbf16>
    "tpu.trace_start"() <{level = 10 : i32, message = "bnd,bmd->bnm"}> : () -> ()
    %cst_166 = arith.constant dense<0.000000e+00> : vector<4x8x8xf32>
    %464 = tpu.matmul %459, %461, %cst_166 {dimension_numbers = #tpu.dot_dimension_numbers<[2], [2], [1], [1], [0, 0, 0, 1, 1, 1], [0], [0]>} : vector<4x8x16xbf16>, vector<4x8x16xbf16>, vector<4x8x8xf32> -> vector<4x8x8xf32>
    "tpu.trace_stop"() : () -> ()
    %cst_167 = arith.constant 2.500000e-01 : f32
    %465 = vector.broadcast %cst_167 : f32 to vector<4x8x8xf32>
    %466 = arith.mulf %464, %465 : vector<4x8x8xf32>
    %cst_168 = arith.constant dense<0xFF800000> : vector<4x8xf32>
    %467 = vector.multi_reduction <maximumf>, %466, %cst_168 [2] : vector<4x8x8xf32> to vector<4x8xf32>
    %468 = vector.shape_cast %467 : vector<4x8xf32> to vector<4x8x1xf32>
    %469 = vector.broadcast %468 : vector<4x8x1xf32> to vector<4x8x8xf32>
    %470 = arith.subf %466, %469 : vector<4x8x8xf32>
    %471 = math.exp %470 : vector<4x8x8xf32>
    %cst_169 = arith.constant dense<0.000000e+00> : vector<4x8xf32>
    %472 = vector.multi_reduction <add>, %471, %cst_169 [2] : vector<4x8x8xf32> to vector<4x8xf32>
    %473 = vector.shape_cast %472 : vector<4x8xf32> to vector<4x8x1xf32>
    %474 = vector.broadcast %473 : vector<4x8x1xf32> to vector<4x8x8xf32>
    %475 = arith.divf %471, %474 : vector<4x8x8xf32>
    %476 = arith.truncf %475 : vector<4x8x8xf32> to vector<4x8x8xbf16>
    "tpu.trace_start"() <{level = 10 : i32, message = "bnm,bmd->bnd"}> : () -> ()
    %cst_170 = arith.constant dense<0.000000e+00> : vector<4x8x16xf32>
    %477 = tpu.matmul %476, %463, %cst_170 {dimension_numbers = #tpu.dot_dimension_numbers<[2], [1], [1], [2], [0, 0, 0, 1, 1, 2], [0], [0]>} : vector<4x8x8xbf16>, vector<4x8x16xbf16>, vector<4x8x16xf32> -> vector<4x8x16xf32>
    "tpu.trace_stop"() : () -> ()
    %478 = vector.shape_cast %477 : vector<4x8x16xf32> to vector<32x16xf32>
    %479 = arith.truncf %478 : vector<32x16xf32> to vector<32x16xbf16>
    %480 = vector.extract_strided_slice %312 {offsets = [64, 0], sizes = [16, 128], strides = [1, 1]} : vector<128x128xbf16> to vector<16x128xbf16>
    %cst_171 = arith.constant dense<0.000000e+00> : vector<32x128xf32>
    %481 = tpu.matmul %479, %480, %cst_171 {dimension_numbers = #tpu.dot_dimension_numbers<[1], [0], [0], [1], [0, 0, 1, 1], [], []>} : vector<32x16xbf16>, vector<16x128xbf16>, vector<32x128xf32> -> vector<32x128xf32>
    %482 = arith.addf %457, %481 : vector<32x128xf32>
    %483 = vector.extract_strided_slice %354 {offsets = [0, 0, 80], sizes = [4, 8, 16], strides = [1, 1, 1]} : vector<4x8x128xf32> to vector<4x8x16xf32>
    %484 = arith.truncf %483 : vector<4x8x16xf32> to vector<4x8x16xbf16>
    %485 = vector.extract_strided_slice %356 {offsets = [0, 0, 80], sizes = [4, 8, 16], strides = [1, 1, 1]} : vector<4x8x128xf32> to vector<4x8x16xf32>
    %486 = arith.truncf %485 : vector<4x8x16xf32> to vector<4x8x16xbf16>
    %487 = vector.extract_strided_slice %358 {offsets = [0, 0, 80], sizes = [4, 8, 16], strides = [1, 1, 1]} : vector<4x8x128xf32> to vector<4x8x16xf32>
    %488 = arith.truncf %487 : vector<4x8x16xf32> to vector<4x8x16xbf16>
    "tpu.trace_start"() <{level = 10 : i32, message = "bnd,bmd->bnm"}> : () -> ()
    %cst_172 = arith.constant dense<0.000000e+00> : vector<4x8x8xf32>
    %489 = tpu.matmul %484, %486, %cst_172 {dimension_numbers = #tpu.dot_dimension_numbers<[2], [2], [1], [1], [0, 0, 0, 1, 1, 1], [0], [0]>} : vector<4x8x16xbf16>, vector<4x8x16xbf16>, vector<4x8x8xf32> -> vector<4x8x8xf32>
    "tpu.trace_stop"() : () -> ()
    %cst_173 = arith.constant 2.500000e-01 : f32
    %490 = vector.broadcast %cst_173 : f32 to vector<4x8x8xf32>
    %491 = arith.mulf %489, %490 : vector<4x8x8xf32>
    %cst_174 = arith.constant dense<0xFF800000> : vector<4x8xf32>
    %492 = vector.multi_reduction <maximumf>, %491, %cst_174 [2] : vector<4x8x8xf32> to vector<4x8xf32>
    %493 = vector.shape_cast %492 : vector<4x8xf32> to vector<4x8x1xf32>
    %494 = vector.broadcast %493 : vector<4x8x1xf32> to vector<4x8x8xf32>
    %495 = arith.subf %491, %494 : vector<4x8x8xf32>
    %496 = math.exp %495 : vector<4x8x8xf32>
    %cst_175 = arith.constant dense<0.000000e+00> : vector<4x8xf32>
    %497 = vector.multi_reduction <add>, %496, %cst_175 [2] : vector<4x8x8xf32> to vector<4x8xf32>
    %498 = vector.shape_cast %497 : vector<4x8xf32> to vector<4x8x1xf32>
    %499 = vector.broadcast %498 : vector<4x8x1xf32> to vector<4x8x8xf32>
    %500 = arith.divf %496, %499 : vector<4x8x8xf32>
    %501 = arith.truncf %500 : vector<4x8x8xf32> to vector<4x8x8xbf16>
    "tpu.trace_start"() <{level = 10 : i32, message = "bnm,bmd->bnd"}> : () -> ()
    %cst_176 = arith.constant dense<0.000000e+00> : vector<4x8x16xf32>
    %502 = tpu.matmul %501, %488, %cst_176 {dimension_numbers = #tpu.dot_dimension_numbers<[2], [1], [1], [2], [0, 0, 0, 1, 1, 2], [0], [0]>} : vector<4x8x8xbf16>, vector<4x8x16xbf16>, vector<4x8x16xf32> -> vector<4x8x16xf32>
    "tpu.trace_stop"() : () -> ()
    %503 = vector.shape_cast %502 : vector<4x8x16xf32> to vector<32x16xf32>
    %504 = arith.truncf %503 : vector<32x16xf32> to vector<32x16xbf16>
    %505 = vector.extract_strided_slice %312 {offsets = [80, 0], sizes = [16, 128], strides = [1, 1]} : vector<128x128xbf16> to vector<16x128xbf16>
    %cst_177 = arith.constant dense<0.000000e+00> : vector<32x128xf32>
    %506 = tpu.matmul %504, %505, %cst_177 {dimension_numbers = #tpu.dot_dimension_numbers<[1], [0], [0], [1], [0, 0, 1, 1], [], []>} : vector<32x16xbf16>, vector<16x128xbf16>, vector<32x128xf32> -> vector<32x128xf32>
    %507 = arith.addf %482, %506 : vector<32x128xf32>
    %508 = vector.extract_strided_slice %354 {offsets = [0, 0, 96], sizes = [4, 8, 16], strides = [1, 1, 1]} : vector<4x8x128xf32> to vector<4x8x16xf32>
    %509 = arith.truncf %508 : vector<4x8x16xf32> to vector<4x8x16xbf16>
    %510 = vector.extract_strided_slice %356 {offsets = [0, 0, 96], sizes = [4, 8, 16], strides = [1, 1, 1]} : vector<4x8x128xf32> to vector<4x8x16xf32>
    %511 = arith.truncf %510 : vector<4x8x16xf32> to vector<4x8x16xbf16>
    %512 = vector.extract_strided_slice %358 {offsets = [0, 0, 96], sizes = [4, 8, 16], strides = [1, 1, 1]} : vector<4x8x128xf32> to vector<4x8x16xf32>
    %513 = arith.truncf %512 : vector<4x8x16xf32> to vector<4x8x16xbf16>
    "tpu.trace_start"() <{level = 10 : i32, message = "bnd,bmd->bnm"}> : () -> ()
    %cst_178 = arith.constant dense<0.000000e+00> : vector<4x8x8xf32>
    %514 = tpu.matmul %509, %511, %cst_178 {dimension_numbers = #tpu.dot_dimension_numbers<[2], [2], [1], [1], [0, 0, 0, 1, 1, 1], [0], [0]>} : vector<4x8x16xbf16>, vector<4x8x16xbf16>, vector<4x8x8xf32> -> vector<4x8x8xf32>
    "tpu.trace_stop"() : () -> ()
    %cst_179 = arith.constant 2.500000e-01 : f32
    %515 = vector.broadcast %cst_179 : f32 to vector<4x8x8xf32>
    %516 = arith.mulf %514, %515 : vector<4x8x8xf32>
    %cst_180 = arith.constant dense<0xFF800000> : vector<4x8xf32>
    %517 = vector.multi_reduction <maximumf>, %516, %cst_180 [2] : vector<4x8x8xf32> to vector<4x8xf32>
    %518 = vector.shape_cast %517 : vector<4x8xf32> to vector<4x8x1xf32>
    %519 = vector.broadcast %518 : vector<4x8x1xf32> to vector<4x8x8xf32>
    %520 = arith.subf %516, %519 : vector<4x8x8xf32>
    %521 = math.exp %520 : vector<4x8x8xf32>
    %cst_181 = arith.constant dense<0.000000e+00> : vector<4x8xf32>
    %522 = vector.multi_reduction <add>, %521, %cst_181 [2] : vector<4x8x8xf32> to vector<4x8xf32>
    %523 = vector.shape_cast %522 : vector<4x8xf32> to vector<4x8x1xf32>
    %524 = vector.broadcast %523 : vector<4x8x1xf32> to vector<4x8x8xf32>
    %525 = arith.divf %521, %524 : vector<4x8x8xf32>
    %526 = arith.truncf %525 : vector<4x8x8xf32> to vector<4x8x8xbf16>
    "tpu.trace_start"() <{level = 10 : i32, message = "bnm,bmd->bnd"}> : () -> ()
    %cst_182 = arith.constant dense<0.000000e+00> : vector<4x8x16xf32>
    %527 = tpu.matmul %526, %513, %cst_182 {dimension_numbers = #tpu.dot_dimension_numbers<[2], [1], [1], [2], [0, 0, 0, 1, 1, 2], [0], [0]>} : vector<4x8x8xbf16>, vector<4x8x16xbf16>, vector<4x8x16xf32> -> vector<4x8x16xf32>
    "tpu.trace_stop"() : () -> ()
    %528 = vector.shape_cast %527 : vector<4x8x16xf32> to vector<32x16xf32>
    %529 = arith.truncf %528 : vector<32x16xf32> to vector<32x16xbf16>
    %530 = vector.extract_strided_slice %312 {offsets = [96, 0], sizes = [16, 128], strides = [1, 1]} : vector<128x128xbf16> to vector<16x128xbf16>
    %cst_183 = arith.constant dense<0.000000e+00> : vector<32x128xf32>
    %531 = tpu.matmul %529, %530, %cst_183 {dimension_numbers = #tpu.dot_dimension_numbers<[1], [0], [0], [1], [0, 0, 1, 1], [], []>} : vector<32x16xbf16>, vector<16x128xbf16>, vector<32x128xf32> -> vector<32x128xf32>
    %532 = arith.addf %507, %531 : vector<32x128xf32>
    %533 = vector.extract_strided_slice %354 {offsets = [0, 0, 112], sizes = [4, 8, 16], strides = [1, 1, 1]} : vector<4x8x128xf32> to vector<4x8x16xf32>
    %534 = arith.truncf %533 : vector<4x8x16xf32> to vector<4x8x16xbf16>
    %535 = vector.extract_strided_slice %356 {offsets = [0, 0, 112], sizes = [4, 8, 16], strides = [1, 1, 1]} : vector<4x8x128xf32> to vector<4x8x16xf32>
    %536 = arith.truncf %535 : vector<4x8x16xf32> to vector<4x8x16xbf16>
    %537 = vector.extract_strided_slice %358 {offsets = [0, 0, 112], sizes = [4, 8, 16], strides = [1, 1, 1]} : vector<4x8x128xf32> to vector<4x8x16xf32>
    %538 = arith.truncf %537 : vector<4x8x16xf32> to vector<4x8x16xbf16>
    "tpu.trace_start"() <{level = 10 : i32, message = "bnd,bmd->bnm"}> : () -> ()
    %cst_184 = arith.constant dense<0.000000e+00> : vector<4x8x8xf32>
    %539 = tpu.matmul %534, %536, %cst_184 {dimension_numbers = #tpu.dot_dimension_numbers<[2], [2], [1], [1], [0, 0, 0, 1, 1, 1], [0], [0]>} : vector<4x8x16xbf16>, vector<4x8x16xbf16>, vector<4x8x8xf32> -> vector<4x8x8xf32>
    "tpu.trace_stop"() : () -> ()
    %cst_185 = arith.constant 2.500000e-01 : f32
    %540 = vector.broadcast %cst_185 : f32 to vector<4x8x8xf32>
    %541 = arith.mulf %539, %540 : vector<4x8x8xf32>
    %cst_186 = arith.constant dense<0xFF800000> : vector<4x8xf32>
    %542 = vector.multi_reduction <maximumf>, %541, %cst_186 [2] : vector<4x8x8xf32> to vector<4x8xf32>
    %543 = vector.shape_cast %542 : vector<4x8xf32> to vector<4x8x1xf32>
    %544 = vector.broadcast %543 : vector<4x8x1xf32> to vector<4x8x8xf32>
    %545 = arith.subf %541, %544 : vector<4x8x8xf32>
    %546 = math.exp %545 : vector<4x8x8xf32>
    %cst_187 = arith.constant dense<0.000000e+00> : vector<4x8xf32>
    %547 = vector.multi_reduction <add>, %546, %cst_187 [2] : vector<4x8x8xf32> to vector<4x8xf32>
    %548 = vector.shape_cast %547 : vector<4x8xf32> to vector<4x8x1xf32>
    %549 = vector.broadcast %548 : vector<4x8x1xf32> to vector<4x8x8xf32>
    %550 = arith.divf %546, %549 : vector<4x8x8xf32>
    %551 = arith.truncf %550 : vector<4x8x8xf32> to vector<4x8x8xbf16>
    "tpu.trace_start"() <{level = 10 : i32, message = "bnm,bmd->bnd"}> : () -> ()
    %cst_188 = arith.constant dense<0.000000e+00> : vector<4x8x16xf32>
    %552 = tpu.matmul %551, %538, %cst_188 {dimension_numbers = #tpu.dot_dimension_numbers<[2], [1], [1], [2], [0, 0, 0, 1, 1, 2], [0], [0]>} : vector<4x8x8xbf16>, vector<4x8x16xbf16>, vector<4x8x16xf32> -> vector<4x8x16xf32>
    "tpu.trace_stop"() : () -> ()
    %553 = vector.shape_cast %552 : vector<4x8x16xf32> to vector<32x16xf32>
    %554 = arith.truncf %553 : vector<32x16xf32> to vector<32x16xbf16>
    %555 = vector.extract_strided_slice %312 {offsets = [112, 0], sizes = [16, 128], strides = [1, 1]} : vector<128x128xbf16> to vector<16x128xbf16>
    %cst_189 = arith.constant dense<0.000000e+00> : vector<32x128xf32>
    %556 = tpu.matmul %554, %555, %cst_189 {dimension_numbers = #tpu.dot_dimension_numbers<[1], [0], [0], [1], [0, 0, 1, 1], [], []>} : vector<32x16xbf16>, vector<16x128xbf16>, vector<32x128xf32> -> vector<32x128xf32>
    %557 = arith.addf %532, %556 : vector<32x128xf32>
    %558 = arith.addf %302, %557 : vector<32x128xf32>
    %559 = vector.broadcast %314 : vector<1x128xf32> to vector<32x128xf32>
    %560 = arith.addf %558, %559 : vector<32x128xf32>
    %cst_190 = arith.constant dense<0.000000e+00> : vector<32xf32>
    %561 = vector.multi_reduction <add>, %560, %cst_190 [1] : vector<32x128xf32> to vector<32xf32>
    %562 = vector.shape_cast %561 : vector<32xf32> to vector<32x1xf32>
    %cst_191 = arith.constant 1.280000e+02 : f32
    %563 = vector.broadcast %cst_191 : f32 to vector<32x1xf32>
    %564 = arith.divf %562, %563 : vector<32x1xf32>
    %565 = vector.broadcast %564 : vector<32x1xf32> to vector<32x128xf32>
    %566 = arith.subf %560, %565 : vector<32x128xf32>
    %567 = arith.mulf %566, %566 : vector<32x128xf32>
    %cst_192 = arith.constant dense<0.000000e+00> : vector<32xf32>
    %568 = vector.multi_reduction <add>, %567, %cst_192 [1] : vector<32x128xf32> to vector<32xf32>
    %569 = vector.shape_cast %568 : vector<32xf32> to vector<32x1xf32>
    %cst_193 = arith.constant 1.280000e+02 : f32
    %570 = vector.broadcast %cst_193 : f32 to vector<32x1xf32>
    %571 = arith.divf %569, %570 : vector<32x1xf32>
    %572 = vector.broadcast %564 : vector<32x1xf32> to vector<32x128xf32>
    %573 = arith.subf %560, %572 : vector<32x128xf32>
    %cst_194 = arith.constant 9.99999974E-6 : f32
    %574 = vector.broadcast %cst_194 : f32 to vector<32x1xf32>
    %575 = arith.addf %571, %574 : vector<32x1xf32>
    %576 = math.rsqrt %575 : vector<32x1xf32>
    %577 = vector.broadcast %576 : vector<32x1xf32> to vector<32x128xf32>
    %578 = arith.mulf %573, %577 : vector<32x128xf32>
    %579 = vector.broadcast %316 : vector<1x128xf32> to vector<32x128xf32>
    %580 = arith.mulf %578, %579 : vector<32x128xf32>
    %581 = vector.broadcast %318 : vector<1x128xf32> to vector<32x128xf32>
    %582 = arith.addf %580, %581 : vector<32x128xf32>
    %583 = arith.truncf %582 : vector<32x128xf32> to vector<32x128xbf16>
    %cst_195 = arith.constant dense<0.000000e+00> : vector<32x256xf32>
    %584 = tpu.matmul %583, %320, %cst_195 {dimension_numbers = #tpu.dot_dimension_numbers<[1], [0], [0], [1], [0, 0, 1, 1], [], []>} : vector<32x128xbf16>, vector<128x256xbf16>, vector<32x256xf32> -> vector<32x256xf32>
    %585 = vector.broadcast %322 : vector<1x256xf32> to vector<32x256xf32>
    %586 = arith.addf %584, %585 : vector<32x256xf32>
    %587 = arith.mulf %586, %586 : vector<32x256xf32>
    %588 = arith.mulf %586, %587 : vector<32x256xf32>
    %cst_196 = arith.constant 4.471500e-02 : f32
    %589 = vector.broadcast %cst_196 : f32 to vector<32x256xf32>
    %590 = arith.mulf %589, %588 : vector<32x256xf32>
    %591 = arith.addf %586, %590 : vector<32x256xf32>
    %cst_197 = arith.constant 0.797884583 : f32
    %592 = vector.broadcast %cst_197 : f32 to vector<32x256xf32>
    %593 = arith.mulf %592, %591 : vector<32x256xf32>
    %594 = math.tanh %593 : vector<32x256xf32>
    %cst_198 = arith.constant 1.000000e+00 : f32
    %595 = vector.broadcast %cst_198 : f32 to vector<32x256xf32>
    %596 = arith.addf %595, %594 : vector<32x256xf32>
    %cst_199 = arith.constant 5.000000e-01 : f32
    %597 = vector.broadcast %cst_199 : f32 to vector<32x256xf32>
    %598 = arith.mulf %597, %596 : vector<32x256xf32>
    %599 = arith.mulf %586, %598 : vector<32x256xf32>
    %600 = arith.truncf %599 : vector<32x256xf32> to vector<32x256xbf16>
    %cst_200 = arith.constant dense<0.000000e+00> : vector<32x128xf32>
    %601 = tpu.matmul %600, %324, %cst_200 {dimension_numbers = #tpu.dot_dimension_numbers<[1], [0], [0], [1], [0, 0, 1, 1], [], []>} : vector<32x256xbf16>, vector<256x128xbf16>, vector<32x128xf32> -> vector<32x128xf32>
    %602 = vector.broadcast %326 : vector<1x128xf32> to vector<32x128xf32>
    %603 = arith.addf %601, %602 : vector<32x128xf32>
    %604 = arith.addf %560, %603 : vector<32x128xf32>
    %c0_201 = arith.constant 0 : index
    %c0_202 = arith.constant 0 : index
    %605 = vector.load %arg14[%c0_201, %c0_202] : memref<1x128xf32, #tpu.memory_space<vmem>>, vector<1x128xf32>
    %c0_203 = arith.constant 0 : index
    %c0_204 = arith.constant 0 : index
    %606 = vector.load %arg15[%c0_203, %c0_204] : memref<1x128xf32, #tpu.memory_space<vmem>>, vector<1x128xf32>
    %cst_205 = arith.constant dense<0.000000e+00> : vector<32xf32>
    %607 = vector.multi_reduction <add>, %604, %cst_205 [1] : vector<32x128xf32> to vector<32xf32>
    %608 = vector.shape_cast %607 : vector<32xf32> to vector<32x1xf32>
    %cst_206 = arith.constant 1.280000e+02 : f32
    %609 = vector.broadcast %cst_206 : f32 to vector<32x1xf32>
    %610 = arith.divf %608, %609 : vector<32x1xf32>
    %611 = vector.broadcast %610 : vector<32x1xf32> to vector<32x128xf32>
    %612 = arith.subf %604, %611 : vector<32x128xf32>
    %613 = arith.mulf %612, %612 : vector<32x128xf32>
    %cst_207 = arith.constant dense<0.000000e+00> : vector<32xf32>
    %614 = vector.multi_reduction <add>, %613, %cst_207 [1] : vector<32x128xf32> to vector<32xf32>
    %615 = vector.shape_cast %614 : vector<32xf32> to vector<32x1xf32>
    %cst_208 = arith.constant 1.280000e+02 : f32
    %616 = vector.broadcast %cst_208 : f32 to vector<32x1xf32>
    %617 = arith.divf %615, %616 : vector<32x1xf32>
    %618 = vector.broadcast %610 : vector<32x1xf32> to vector<32x128xf32>
    %619 = arith.subf %604, %618 : vector<32x128xf32>
    %cst_209 = arith.constant 9.99999974E-6 : f32
    %620 = vector.broadcast %cst_209 : f32 to vector<32x1xf32>
    %621 = arith.addf %617, %620 : vector<32x1xf32>
    %622 = math.rsqrt %621 : vector<32x1xf32>
    %623 = vector.broadcast %622 : vector<32x1xf32> to vector<32x128xf32>
    %624 = arith.mulf %619, %623 : vector<32x128xf32>
    %625 = vector.broadcast %605 : vector<1x128xf32> to vector<32x128xf32>
    %626 = arith.mulf %624, %625 : vector<32x128xf32>
    %627 = vector.broadcast %606 : vector<1x128xf32> to vector<32x128xf32>
    %628 = arith.addf %626, %627 : vector<32x128xf32>
    %629 = arith.truncf %628 : vector<32x128xf32> to vector<32x128xbf16>
    %c0_210 = arith.constant 0 : index
    %c0_211 = arith.constant 0 : index
    %630 = vector.load %arg16[%c0_210, %c0_211] : memref<32x128xbf16, #tpu.memory_space<vmem>>, vector<32x128xbf16>
    tpu.vector_store %arg16[%c0_210, %c0_211], %629 {strides = array<i32>} : memref<32x128xbf16, #tpu.memory_space<vmem>>, vector<32x128xbf16>,
    return
  }
  func.func @transform_0(%arg0: i32) -> (i32, i32) {
    %c0_i32 = arith.constant 0 : i32
    %c0_i32_0 = arith.constant 0 : i32
    return %arg0, %c0_i32 : i32, i32
  }
  func.func @transform_1(%arg0: i32) -> (i32, i32, i32) {
    %c0_i32 = arith.constant 0 : i32
    %c0_i32_0 = arith.constant 0 : i32
    %c0_i32_1 = arith.constant 0 : i32
    %c0_i32_2 = arith.constant 0 : i32
    return %c0_i32, %c0_i32_0, %c0_i32_1 : i32, i32, i32
  }
  func.func @transform_2(%arg0: i32) -> (i32, i32, i32) {
    %c0_i32 = arith.constant 0 : i32
    %c0_i32_0 = arith.constant 0 : i32
    %c0_i32_1 = arith.constant 0 : i32
    %c0_i32_2 = arith.constant 0 : i32
    return %c0_i32, %c0_i32_0, %c0_i32_1 : i32, i32, i32
  }
  func.func @transform_3(%arg0: i32) -> (i32, i32, i32) {
    %c0_i32 = arith.constant 0 : i32
    %c0_i32_0 = arith.constant 0 : i32
    %c0_i32_1 = arith.constant 0 : i32
    %c0_i32_2 = arith.constant 0 : i32
    return %c0_i32, %c0_i32_0, %c0_i32_1 : i32, i32, i32
  }
  func.func @transform_4(%arg0: i32) -> (i32, i32, i32) {
    %c0_i32 = arith.constant 0 : i32
    %c0_i32_0 = arith.constant 0 : i32
    %c0_i32_1 = arith.constant 0 : i32
    %c0_i32_2 = arith.constant 0 : i32
    return %c0_i32, %c0_i32_0, %c0_i32_1 : i32, i32, i32
  }
  func.func @transform_5(%arg0: i32) -> (i32, i32, i32) {
    %c0_i32 = arith.constant 0 : i32
    %c0_i32_0 = arith.constant 0 : i32
    %c0_i32_1 = arith.constant 0 : i32
    %c0_i32_2 = arith.constant 0 : i32
    return %c0_i32, %c0_i32_0, %c0_i32_1 : i32, i32, i32
  }
  func.func @transform_6(%arg0: i32) -> (i32, i32, i32) {
    %c0_i32 = arith.constant 0 : i32
    %c0_i32_0 = arith.constant 0 : i32
    %c0_i32_1 = arith.constant 0 : i32
    %c0_i32_2 = arith.constant 0 : i32
    return %c0_i32, %c0_i32_0, %c0_i32_1 : i32, i32, i32
  }
  func.func @transform_7(%arg0: i32) -> (i32, i32, i32) {
    %c0_i32 = arith.constant 0 : i32
    %c0_i32_0 = arith.constant 0 : i32
    %c0_i32_1 = arith.constant 0 : i32
    %c0_i32_2 = arith.constant 0 : i32
    return %c0_i32, %c0_i32_0, %c0_i32_1 : i32, i32, i32
  }
  func.func @transform_8(%arg0: i32) -> (i32, i32, i32) {
    %c0_i32 = arith.constant 0 : i32
    %c0_i32_0 = arith.constant 0 : i32
    %c0_i32_1 = arith.constant 0 : i32
    %c0_i32_2 = arith.constant 0 : i32
    return %c0_i32, %c0_i32_0, %c0_i32_1 : i32, i32, i32
  }
  func.func @transform_9(%arg0: i32) -> (i32, i32, i32) {
    %c0_i32 = arith.constant 0 : i32
    %c0_i32_0 = arith.constant 0 : i32
    %c0_i32_1 = arith.constant 0 : i32
    %c0_i32_2 = arith.constant 0 : i32
    return %c0_i32, %c0_i32_0, %c0_i32_1 : i32, i32, i32
  }
  func.func @transform_10(%arg0: i32) -> (i32, i32, i32) {
    %c0_i32 = arith.constant 0 : i32
    %c0_i32_0 = arith.constant 0 : i32
    %c0_i32_1 = arith.constant 0 : i32
    %c0_i32_2 = arith.constant 0 : i32
    return %c0_i32, %c0_i32_0, %c0_i32_1 : i32, i32, i32
  }
  func.func @transform_11(%arg0: i32) -> (i32, i32, i32) {
    %c0_i32 = arith.constant 0 : i32
    %c0_i32_0 = arith.constant 0 : i32
    %c0_i32_1 = arith.constant 0 : i32
    %c0_i32_2 = arith.constant 0 : i32
    return %c0_i32, %c0_i32_0, %c0_i32_1 : i32, i32, i32
  }
  func.func @transform_12(%arg0: i32) -> (i32, i32, i32) {
    %c0_i32 = arith.constant 0 : i32
    %c0_i32_0 = arith.constant 0 : i32
    %c0_i32_1 = arith.constant 0 : i32
    %c0_i32_2 = arith.constant 0 : i32
    return %c0_i32, %c0_i32_0, %c0_i32_1 : i32, i32, i32
  }
  func.func @transform_13(%arg0: i32) -> (i32, i32) {
    %c0_i32 = arith.constant 0 : i32
    %c0_i32_0 = arith.constant 0 : i32
    %c0_i32_1 = arith.constant 0 : i32
    return %c0_i32, %c0_i32_0 : i32, i32
  }
  func.func @transform_14(%arg0: i32) -> (i32, i32) {
    %c0_i32 = arith.constant 0 : i32
    %c0_i32_0 = arith.constant 0 : i32
    %c0_i32_1 = arith.constant 0 : i32
    return %c0_i32, %c0_i32_0 : i32, i32
  }
  func.func @transform_15(%arg0: i32) -> (i32, i32) {
    %c0_i32 = arith.constant 0 : i32
    %c0_i32_0 = arith.constant 0 : i32
    return %arg0, %c0_i32 : i32, i32
  }
}

</mosaic_0001>

<bundles_post_ra>
// kernel: tpu_custom_call.1
= control target key start
LH: loop header
LB: loop body
LE: loop exit
PB: predicated region body
PF: predicated region fallthrough
CT: control target
= control target key end

     0   :  { %20 = vsyncpa [#allocation3], 0  ;;  %s14370_s0 = inlined_call_operand.hbm [shape: f32[32,128], index: 0, kind: input, shape index: {}]   ;;  %s14371_s1 = inlined_call_operand.hbm [shape: f32[2,1,128], index: 1, kind: input, shape index: {}]   ;;  %s14372_s2 = inlined_call_operand.hbm [shape: f32[2,1,128], index: 2, kind: input, shape index: {}]   ;;  %s14373_s3 = inlined_call_operand.hbm [shape: bf16[2,128,384], index: 3, kind: input, shape index: {}]   ;;  %s14374_s4 = inlined_call_operand.vmem [shape: f32[2,1,384], index: 4, kind: input, shape index: {}]   ;;  %s14375_s5 = inlined_call_operand.hbm [shape: bf16[2,128,128], index: 5, kind: input, shape index: {}]   ;;  %s14376_s6 = inlined_call_operand.hbm [shape: f32[2,1,128], index: 6, kind: input, shape index: {}]   ;;  %s14377_s7 = inlined_call_operand.vmem [shape: f32[2,1,128], index: 7, kind: input, shape index: {}]   ;;  %s14378_s8 = inlined_call_operand.vmem [shape: f32[2,1,128], index: 8, kind: input, shape index: {}]   ;;  %s14379_s9 = inlined_call_operand.hbm [shape: bf16[2,128,256], index: 9, kind: input, shape index: {}]   ;;  %s14380_s10 = inlined_call_operand.vmem [shape: f32[2,1,256], index: 10, kind: input, shape index: {}]   ;;  %s14381_s11 = inlined_call_operand.hbm [shape: bf16[2,256,128], index: 11, kind: input, shape index: {}]   ;;  %s14382_s12 = inlined_call_operand.vmem [shape: f32[2,1,128], index: 12, kind: input, shape index: {}]   ;;  %s14383_s13 = inlined_call_operand.vmem [shape: f32[1,128], index: 13, kind: input, shape index: {}]   ;;  %s14384_s14 = inlined_call_operand.vmem [shape: f32[1,128], index: 14, kind: input, shape index: {}]   ;;  %s14385_s15 = inlined_call_operand.hbm [shape: bf16[32,128], index: 15, kind: output, shape index: {}]  }
   0x1   :  { %21 = vsyncpa [#allocation6], 0 }
   0x2   :  { %22 = vsyncpa [#allocation9], 0 }
   0x3   :  { %23 = vsyncpa [#allocation12], 0 }
   0x4   :  { %24 = vsyncpa [#allocation15], 0 }
   0x5   :  { %25 = vsyncpa [#allocation4], 0  ;;  %s12509_s18 = smov [#allocation5]  }
   0x6   :  { %s43_s19 = sshll.u32 %s12509_s18, 4  ;;  %s44_s19 = int_to_ptr.vmem [resolvable:$true] %s43_s19 }
   0x7   :  { %s12325_s20 = scalar_lea.vmem %s44_s19, 32  ;;  %p12330_p1 = scmp.lt.s32.totalorder %s44_s19, %s44_s19 }
   0x8   :  { %p12326_p0 = scmp.ne.s32.totalorder %s44_s19, %s12325_s20  ;;  %p12331_p2 = scmp.lt.s32.totalorder %s12325_s20, %s12325_s20 }
   0xa   :  { %p12332_p3 = por %p12331_p2, %p12330_p1 }
   0xc   :  { %p12333_p4 = pnand %p12332_p3, %p12326_p0 }
   0xe   :  { %12336 = shalt.err (!%p12333_p4)
}
   0xf   :  { %s12510_s21 = smov 16   ;;  %s12511_s22 = smov 1  }
  0x10   :  { %49 = dma.hbm_to_vmem [thread:$0]  %s14371_s1, 32, %s44_s19, [#allocation6], %s12510_s21, %s12510_s21, %s12511_s22  }
  0x11   :  { %s12512_s25 = smov [#allocation8]  }
  0x12   :  { %s67_s26 = sshll.u32 %s12512_s25, 4  ;;  %s68_s26 = int_to_ptr.vmem [resolvable:$true] %s67_s26 }
  0x13   :  { %s12345_s27 = scalar_lea.vmem %s68_s26, 6144  ;;  %p12350_p6 = scmp.lt.s32.totalorder %s68_s26, %s68_s26 }
  0x14   :  { %p12346_p5 = scmp.ne.s32.totalorder %s68_s26, %s12345_s27  ;;  %p12351_p7 = scmp.lt.s32.totalorder %s12345_s27, %s12345_s27 }
  0x16   :  { %p12352_p8 = por %p12351_p7, %p12350_p6 }
  0x18   :  { %p12353_p9 = pnand %p12352_p8, %p12346_p5 }
  0x1a   :  { %12356 = shalt.err (!%p12353_p9)
}
  0x1b   :  { %s12513_s28 = smov 192   ;;  %s12514_s29 = smov 12  }
  0x1c   :  { %73 = dma.hbm_to_vmem [thread:$0]  %s14373_s3, 6144, %s68_s26, [#allocation9], %s12513_s28, %s12513_s28, %s12514_s29  }
  0x1d   :  { %s12515_s17 = smov [#allocation11]   ;;  %s12516_s20 = smov [#allocation2]  }
  0x1e   :  { %s93_s18 = sshll.u32 %s12515_s17, 4  ;;  %s31_s1 = sshll.u32 %s12516_s20, 4  ;;  %s94_s18 = int_to_ptr.vmem [resolvable:$true] %s93_s18  ;;  %s32_s1 = int_to_ptr.vmem [resolvable:$true] %s31_s1 }
  0x1f   :  { %s12365_s19 = scalar_lea.vmem %s94_s18, 32  ;;  %p12370_p11 = scmp.lt.s32.totalorder %s94_s18, %s94_s18 }
  0x20   :  { %p12366_p10 = scmp.ne.s32.totalorder %s94_s18, %s12365_s19  ;;  %p12371_p12 = scmp.lt.s32.totalorder %s12365_s19, %s12365_s19 }
  0x22   :  { %p12372_p13 = por %p12371_p12, %p12370_p11 }
  0x24   :  { %p12373_p0 = pnand %p12372_p13, %p12366_p10 }
  0x26   :  { %12376 = shalt.err (!%p12373_p0)
}
  0x27   :  { %99 = dma.hbm_to_vmem [thread:$0]  %s14376_s6, 32, %s94_s18, [#allocation12], %s12510_s21, %s12510_s21, %s12511_s22  }
  0x28   :  { %s12385_s3 = scalar_lea.vmem %s32_s1, 512  ;;  %p12390_p2 = scmp.lt.s32.totalorder %s32_s1, %s32_s1 }
  0x29   :  { %p12386_p1 = scmp.ne.s32.totalorder %s32_s1, %s12385_s3  ;;  %p12391_p3 = scmp.lt.s32.totalorder %s12385_s3, %s12385_s3 }
  0x2b   :  { %p12392_p4 = por %p12391_p3, %p12390_p2 }
  0x2d   :  { %p12393_p5 = pnand %p12392_p4, %p12386_p1 }
  0x2f   :  { %12396 = shalt.err (!%p12393_p5)
}
  0x30   :  { %s12517_s25 = smov 128   ;;  %s12518_s26 = smov 8  }
  0x31   :  { %37 = dma.hbm_to_vmem [thread:$0]  %s14370_s0, 512, %s32_s1, [#allocation3], %s12517_s25, %s12517_s25, %s12518_s26  }
  0x32   :  { %s12519_s29 = smov [#allocation7]   ;;  %s12520_s16 = smov [#allocation10]  }
  0x33   :  { %s55_s30 = sshll.u32 %s12519_s29, 4  ;;  %s81_s6 = sshll.u32 %s12520_s16, 4  ;;  %s56_s30 = int_to_ptr.vmem [resolvable:$true] %s55_s30  ;;  %s82_s6 = int_to_ptr.vmem [resolvable:$true] %s81_s6 }
  0x34   :  { %s12405_s17 = scalar_lea.vmem %s56_s30, 32  ;;  %p12410_p7 = scmp.lt.s32.totalorder %s56_s30, %s56_s30 }
  0x35   :  { %p12406_p6 = scmp.ne.s32.totalorder %s56_s30, %s12405_s17  ;;  %p12411_p8 = scmp.lt.s32.totalorder %s12405_s17, %s12405_s17 }
  0x37   :  { %p12412_p9 = por %p12411_p8, %p12410_p7 }
  0x39   :  { %p12413_p10 = pnand %p12412_p9, %p12406_p6 }
  0x3b   :  { %12416 = shalt.err (!%p12413_p10)
}
  0x3c   :  { %61 = dma.hbm_to_vmem [thread:$0]  %s14372_s2, 32, %s56_s30, [#allocation6], %s12510_s21, %s12510_s21, %s12511_s22  }
  0x3d   :  { %s12425_s0 = scalar_lea.vmem %s82_s6, 2048  ;;  %p12430_p12 = scmp.lt.s32.totalorder %s82_s6, %s82_s6 }
  0x3e   :  { %p12426_p11 = scmp.ne.s32.totalorder %s82_s6, %s12425_s0  ;;  %p12431_p13 = scmp.lt.s32.totalorder %s12425_s0, %s12425_s0 }
  0x40   :  { %p12432_p0 = por %p12431_p13, %p12430_p12 }
  0x42   :  { %p12433_p1 = pnand %p12432_p0, %p12426_p11 }
  0x44   :  { %12436 = shalt.err (!%p12433_p1)
}
  0x45   :  { %s12521_s1 = smov 64   ;;  %s12522_s19 = smov 4  }
  0x46   :  { %87 = dma.hbm_to_vmem [thread:$0]  %s14375_s5, 2048, %s82_s6, [#allocation9], %s12521_s1, %s12521_s1, %s12522_s19  }
  0x47   :  { %s12523_s3 = smov [#allocation13]   ;;  %s12524_s28 = smov [#allocation14]  }
  0x48   :  { %s109_s27 = sshll.u32 %s12523_s3, 4  ;;  %s123_s2 = sshll.u32 %s12524_s28, 4  ;;  %s110_s27 = int_to_ptr.vmem [resolvable:$true] %s109_s27  ;;  %s124_s2 = int_to_ptr.vmem [resolvable:$true] %s123_s2 }
  0x49   :  { %s12445_s22 = scalar_lea.vmem %s110_s27, 4096  ;;  %p12450_p3 = scmp.lt.s32.totalorder %s110_s27, %s110_s27 }
  0x4a   :  { %p12446_p2 = scmp.ne.s32.totalorder %s110_s27, %s12445_s22  ;;  %p12451_p4 = scmp.lt.s32.totalorder %s12445_s22, %s12445_s22 }
  0x4c   :  { %p12452_p5 = por %p12451_p4, %p12450_p3 }
  0x4e   :  { %p12453_p6 = pnand %p12452_p5, %p12446_p2 }
  0x50   :  { %12456 = shalt.err (!%p12453_p6)
}
  0x51   :  { %115 = dma.hbm_to_vmem [thread:$0]  %s14379_s9, 4096, %s110_s27, [#allocation12], %s12517_s25, %s12517_s25, %s12518_s26  }
  0x52   :  { %s12465_s5 = scalar_lea.vmem %s124_s2, 4096  ;;  %p12470_p8 = scmp.lt.s32.totalorder %s124_s2, %s124_s2 }
  0x53   :  { %p12466_p7 = scmp.ne.s32.totalorder %s124_s2, %s12465_s5  ;;  %p12471_p9 = scmp.lt.s32.totalorder %s12465_s5, %s12465_s5 }
  0x55   :  { %p12472_p10 = por %p12471_p9, %p12470_p8 }
  0x57   :  { %p12473_p11 = pnand %p12472_p10, %p12466_p7 }
  0x59   :  { %12476 = shalt.err (!%p12473_p11)
}
  0x5a   :  { %129 = dma.hbm_to_vmem [thread:$0]  %s14381_s11, 4096, %s124_s2, [#allocation15], %s12521_s1, %s12521_s1, %s12522_s19  }
  0x5b   :  { %12497 = dma.done.wait [#allocation3], 512  }
  0x5c   :  { %12498 = vsyncadd [#allocation3], 4294966784 }
  0x5d   :  { %12499 = dma.done.wait [#allocation6], 64  }
  0x5e   :  { %12500 = vsyncadd [#allocation6], 4294967232 }
  0x5f   :  { %12501 = dma.done.wait [#allocation9], 8192  }
  0x60   :  { %12502 = vsyncadd [#allocation9], 4294959104 }
  0x61   :  { %12503 = dma.done.wait [#allocation12], 4128  }
  0x62   :  { %12504 = vsyncadd [#allocation12], 4294963168 }
  0x63   :  { %12505 = dma.done.wait [#allocation15], 4096  }
  0x64   :  { %12506 = vsyncadd [#allocation15], 4294963200  ;;  %v161_v0 = vld [vmem:[#allocation2] sm:$0xff]  ;;  %v163_v1 = vld [vmem:[#allocation2 + $0x10] sm:$0xff]  ;;  %v12525_v39 = vmov 0   ;;  %vm12527_vm0 = vmmov 0  }
  0x65   :  { %v162_v2 = vld [vmem:[#allocation2 + $0x8] sm:$0xff]  ;;  %269 = vadd.xlane.f32.xlu0 %v161_v0  ;;  %273 = vadd.xlane.f32.xlu1 %v163_v1  ;;  %v164_v3 = vld [vmem:[#allocation2 + $0x18] sm:$0xff]  ;;  %v11830_v23 = vld [vmem:[#allocation8 + $0xb0] ss:$12 sps:$4 sm:$0xff]   ;;  %vm594_vm1 = vcmask 130048   ;;  %vm835_vm2 = vcmask 1043456  }
  0x66   :  { %v11825_v4 = vld [vmem:[#allocation8 + $0xac] ss:$12 sps:$4 sm:$0xff]   ;;  %v11827_v5 = vld [vmem:[#allocation8 + $0xa8] ss:$12 sps:$4 sm:$0xff]   ;;  %v11831_v24 = vld [vmem:[#allocation8 + $0x90] ss:$12 sps:$4 sm:$0xff]   ;;  %10896 = vmatprep.subr.bf16.mxu1 %v11830_v23  ;;  %512 = vmatprep.mubr.bf16.mxu0 %v12525_v39 }
  0x67   :  { %480 = vmatprep.subr.bf16.mxu0 %v11825_v4  ;;  %v11828_v22 = vld [vmem:[#allocation8 + $0x94] ss:$12 sps:$4 sm:$0xff]   ;;  %10897 = vmatpush3.bf16.msra.mxu1 %v11830_v23  ;;  %v11832_v25 = vld [vmem:[#allocation8 + $0x7c] ss:$12 sps:$4 sm:$0xff]   ;;  %v11834_v26 = vld [vmem:[#allocation8 + $0x98] ss:$12 sps:$4 sm:$0xff]  }
  0x68   :  { %481 = vmatpush1.bf16.msra.mxu0 %v11827_v5  ;;  %v11835_v27 = vld [vmem:[#allocation8 + $0x78] ss:$12 sps:$4 sm:$0xff]   ;;  %10898 = vmatprep.subr.bf16.mxu1 %v11834_v26  ;;  %v11838_v29 = vld [vmem:[#allocation8 + $0x80] ss:$12 sps:$4 sm:$0xff]   ;;  %v11842_v32 = vld [vmem:[#allocation8 + $0x68] ss:$12 sps:$4 sm:$0xff]  }
  0x69   :  { %271 = vadd.xlane.f32.xlu0 %v162_v2  ;;  %275 = vadd.xlane.f32.xlu1 %v164_v3  ;;  %v11836_v28 = vld [vmem:[#allocation8 + $0x64] ss:$12 sps:$4 sm:$0xff]   ;;  %v11839_v30 = vld [vmem:[#allocation8 + $0x60] ss:$12 sps:$4 sm:$0xff]   ;;  %v11843_v33 = vld [vmem:[#allocation8 + $0x48] ss:$12 sps:$4 sm:$0xff]  }
  0x6a   :  { %482 = vmatprep.subr.bf16.mxu0 %v11828_v22  ;;  %v11840_v31 = vld [vmem:[#allocation8 + $0x4c] ss:$12 sps:$4 sm:$0xff]   ;;  %v11844_v34 = vld [vmem:[#allocation8 + $0x34] ss:$12 sps:$4 sm:$0xff]   ;;  %v11846_v35 = vld [vmem:[#allocation8 + $0x50] ss:$12 sps:$4 sm:$0xff]  }
  0x6b   :  { %10899 = vmatpush3.bf16.msra.mxu1 %v11834_v26  ;;  %v11847_v36 = vld [vmem:[#allocation8 + $0x30] ss:$12 sps:$4 sm:$0xff]   ;;  %v11850_v38 = vld [vmem:[#allocation8 + $0x38] ss:$12 sps:$4 sm:$0xff]   ;;  %v11854_v42 = vld [vmem:[#allocation8 + $0x20] ss:$12 sps:$4 sm:$0xff]  }
  0x6c   :  { %483 = vmatpush1.bf16.msra.mxu0 %v11831_v24  ;;  %10900 = vmatprep.subr.bf16.mxu1 %v11838_v29  ;;  %v11848_v37 = vld [vmem:[#allocation8 + $0x1c] ss:$12 sps:$4 sm:$0xff]   ;;  %v11851_v40 = vld [vmem:[#allocation8 + $0x18] ss:$12 sps:$4 sm:$0xff]   ;;  %v11855_v43 = vld [vmem:[#allocation8] ss:$12 sps:$4 sm:$0xff]  }
  0x6d   :  { %484 = vmatprep.subr.bf16.mxu0 %v11832_v25  ;;  %v11852_v41 = vld [vmem:[#allocation8 + $0x4] ss:$12 sps:$4 sm:$0xff]   ;;  %v11856_v44 = vld [vmem:[#allocation8 + $0x8] ss:$12 sps:$4 sm:$0xff]   ;;  %v10190_v59 = vld [vmem:[#allocation5] ss:$0 sm:$0xff] }
  0x6e   :  { %vm783_vm3 = vcmask 64512   ;;  %s12528_s25 = smov 112   ;;  %s12529_s26 = smov 96  }
  0x6f   :  { %10901 = vmatpush3.bf16.msra.mxu1 %v11838_v29  ;;  %s12530_s17 = smov 80   ;;  %s12531_s18 = smov 48  }
  0x70   :  { %485 = vmatpush1.bf16.msra.mxu0 %v11835_v27  ;;  %10902 = vmatprep.subr.bf16.mxu1 %v11842_v32  ;;  %s12532_s20 = smov 32  }
  0x71   :  { %486 = vmatprep.subr.bf16.mxu0 %v11836_v28 }
  0x73   :  { %10903 = vmatpush3.bf16.msra.mxu1 %v11842_v32 }
  0x74   :  { %487 = vmatpush1.bf16.msra.mxu0 %v11839_v30  ;;  %10904 = vmatprep.subr.bf16.mxu1 %v11846_v35 }
  0x75   :  { %488 = vmatprep.subr.bf16.mxu0 %v11840_v31 }
  0x77   :  { %10905 = vmatpush3.bf16.msra.mxu1 %v11846_v35 }
  0x78   :  { %489 = vmatpush1.bf16.msra.mxu0 %v11843_v33  ;;  %10906 = vmatprep.subr.bf16.mxu1 %v11850_v38 }
  0x79   :  { %490 = vmatprep.subr.bf16.mxu0 %v11844_v34 }
  0x7b   :  { %10907 = vmatpush3.bf16.msra.mxu1 %v11850_v38 }
  0x7c   :  { %491 = vmatpush1.bf16.msra.mxu0 %v11847_v36  ;;  %10908 = vmatprep.subr.bf16.mxu1 %v11854_v42 }
  0x7d   :  { %492 = vmatprep.subr.bf16.mxu0 %v11848_v37 }
  0x7f   :  { %10909 = vmatpush3.bf16.msra.mxu1 %v11854_v42 }
  0x80   :  { %493 = vmatpush1.bf16.msra.mxu0 %v11851_v40  ;;  %10910 = vmatprep.subr.bf16.mxu1 %v11856_v44 }
  0x81   :  { %494 = vmatprep.subr.bf16.mxu0 %v11852_v41 }
  0x83   :  { %10911 = vmatpush3.bf16.msra.mxu1 %v11856_v44 }
  0x84   :  { %495 = vmatpush1.bf16.msra.mxu0 %v11855_v43 }
  0xee   :  { %v270_v6 = vpop.xlane.xlu0 %269  ;;  %v274_v7 = vpop.xlane.xlu1 %273 }
  0xef   :  { %v278_v8 = vmul.f32 0.0078125, %v270_v6  ;;  %v280_v9 = vmul.f32 0.0078125, %v274_v7 }
  0xf1   :  { %v12659_v10 = vsub.f32 %v161_v0, %v278_v8  ;;  %v12661_v11 = vsub.f32 %v163_v1, %v280_v9  ;;  %v10191_v0 = vld [vmem:[#allocation7] ss:$0 sm:$0xff] }
  0xf2   :  { %v272_v12 = vpop.xlane.xlu0 %271  ;;  %v276_v13 = vpop.xlane.xlu1 %275 }
  0xf3   :  { %v279_v14 = vmul.f32 0.0078125, %v272_v12  ;;  %v286_v15 = vmul.f32 %v12659_v10, %v12659_v10  ;;  %v281_v16 = vmul.f32 0.0078125, %v276_v13  ;;  %v288_v17 = vmul.f32 %v12661_v11, %v12661_v11 }
  0xf5   :  { %290 = vadd.xlane.f32.xlu0 %v286_v15  ;;  %v12667_v18 = vsub.f32 %v162_v2, %v279_v14  ;;  %v12669_v19 = vsub.f32 %v164_v3, %v281_v16  ;;  %v12526_v14 = vmov 0.0  }
  0xf6   :  { %10916 = vmatprep.subr.bf16.mxu1 %v12526_v14  ;;  %10922 = vmatprep.subr.bf16.mxu0 %v12526_v14 }
  0xf7   :  { %v287_v20 = vmul.f32 %v12667_v18, %v12667_v18  ;;  %v289_v21 = vmul.f32 %v12669_v19, %v12669_v19 }
  0xf9   :  { %294 = vadd.xlane.f32.xlu0 %v288_v17  ;;  %292 = vadd.xlane.f32.xlu1 %v287_v20 }
  0xfd   :  { %296 = vadd.xlane.f32.xlu1 %v289_v21 }
 0x17e   :  { %v291_v45 = vpop.xlane.xlu0 %290 }
 0x17f   :  { %v298_v46 = vmul.f32 0.0078125, %v291_v45 }
 0x181   :  { %v302_v47 = vadd.f32 1e-05, %v298_v46 }
 0x182   :  { %v293_v48 = vpop.xlane.xlu1 %292  ;;  %v295_v49 = vpop.xlane.xlu0 %294 }
 0x183   :  { %11985 = vrsqrt.f32 %v302_v47  ;;  %v299_v50 = vmul.f32 0.0078125, %v293_v48  ;;  %v300_v51 = vmul.f32 0.0078125, %v295_v49 }
 0x185   :  { %v303_v52 = vadd.f32 1e-05, %v299_v50  ;;  %v304_v53 = vadd.f32 1e-05, %v300_v51 }
 0x186   :  { %v297_v54 = vpop.xlane.xlu1 %296 }
 0x187   :  { %11987 = vrsqrt.f32 %v303_v52  ;;  %v301_v55 = vmul.f32 0.0078125, %v297_v54 }
 0x188   :  { %11989 = vrsqrt.f32 %v304_v53 }
 0x189   :  { %v305_v56 = vadd.f32 1e-05, %v301_v55 }
 0x18b   :  { %11991 = vrsqrt.f32 %v305_v56 }
 0x190   :  { %v11986_v57 = vpop.eup %11985 }
 0x191   :  { %v310_v58 = vmul.f32 %v11986_v57, %v12659_v10 }
 0x193   :  { %v320_v63 = vmul.f32 %v10190_v59, %v310_v58 }
 0x194   :  { %v11988_v60 = vpop.eup %11987 }
 0x195   :  { %v11990_v61 = vpop.eup %11989  ;;  %v311_v62 = vmul.f32 %v11988_v60, %v12667_v18  ;;  %v330_v4 = vadd.f32 %v10191_v0, %v320_v63  ;;  %v199_v18 = vld [vmem:[%s14374_s4] sm:$0x7] }
 0x196   :  { %v312_v1 = vmul.f32 %v11990_v61, %v12661_v11  ;;  %v337_v11 = vlaneseq }
 0x197   :  { %v321_v2 = vmul.f32 %v10190_v59, %v311_v62 }
 0x198   :  { %v11992_v3 = vpop.eup %11991  ;;  %v322_v7 = vmul.f32 %v10190_v59, %v312_v1  ;;  %v12687_v15 = vshrl.u32 %v337_v11, 7 }
 0x199   :  { %v331_v5 = vadd.f32 %v10191_v0, %v321_v2  ;;  %v313_v6 = vmul.f32 %v11992_v3, %v12669_v19 }
 0x19a   :  { %v332_v10 = vadd.f32 %v10191_v0, %v322_v7  ;;  %v12690_v16 = vsub.s32 1, %v12687_v15  ;;  %v347_v17 = vsub.s32 2, %v12687_v15  ;;  %v12700_v22 = vsub.s32 0, %v12687_v15 }
 0x19b   :  { %v334_v8 = vpack.c.bf16 %v331_v5, %v330_v4  ;;  %v323_v9 = vmul.f32 %v10190_v59, %v313_v6 }
 0x19c   :  { %v344_v19 = vrot.slane %v199_v18, %v12690_v16  ;;  %v348_v21 = vrot.slane %v199_v18, %v347_v17  ;;  %v340_v29 = vrot.slane %v199_v18, %v12700_v22 }
 0x19d   :  { %513 = vmatmul.mubr.bf16.vlgmr.msra.gmra.mxu0 %v334_v8  ;;  %10912 = vmatprep.mubr.bf16.mxu1 %v334_v8  ;;  %v333_v12 = vadd.f32 %v10191_v0, %v323_v9 }
 0x19e   :  { %522 = vmatprep.mubr.bf16.mxu0 %v12525_v39 }
 0x19f   :  { %v335_v13 = vpack.c.bf16 %v333_v12, %v332_v10 }
 0x1a1   :  { %10913 = vmatmul.mubr.bf16.vlgmr.msra.gmra.mxu1 %v335_v13 }
 0x1a2   :  { %10918 = vmatprep.mubr.msk.bf16.mxu1 %vm12527_vm0, %v12526_v14 }
 0x1a5   :  { %523 = vmatmul.mubr.bf16.gmra.mxu0 %v335_v13 }
 0x1a6   :  { %10924 = vmatprep.mubr.msk.bf16.mxu0 %vm12527_vm0, %v12526_v14 }
 0x25d   :  { %v514_v20 = vpop.f32.mrf.mxu0 }
 0x25e   :  { %v515_v38 = vadd.f32 %v514_v20, %v340_v29 }
 0x25f   :  { %v516_v23 = vpop.f32.mrf.mxu0 }
 0x260   :  { %v517_v24 = vadd.f32 %v516_v23, %v344_v19  ;;  %v12718_v45 = vpack.c.bf16 %v515_v38, %v515_v38 }
 0x261   :  { %v518_v25 = vpop.f32.mrf.mxu0  ;;  %v10914_v26 = vpop.f32.mrf.mxu1 }
 0x262   :  { %v12702_v27 = vpack.c.bf16 %v517_v24, %v517_v24  ;;  %v12704_v28 = vadd.f32 %v10914_v26, %v348_v21  ;;  %v519_v46 = vadd.f32 %v518_v25, %v340_v29 }
 0x263   :  { %v520_v30 = vpop.f32.mrf.mxu0  ;;  %v567_v31 = vpop.f32.mrf.mxu1 }
 0x264   :  { %v521_v32 = vadd.f32 %v520_v30, %v344_v19  ;;  %v599_v35 = vsel %vm594_vm1, %v12702_v27, 0  ;;  %v568_v50 = vadd.f32 %v567_v31, %v348_v21  ;;  %v12729_v53 = vpack.c.bf16 %v519_v46, %v519_v46 }
 0x265   :  { %v524_v33 = vpop.f32.mrf.mxu0  ;;  %v10915_v34 = vpop.f32.mrf.mxu1  ;;  %10917 = vmatpush3.bf16.xpose.msra.mxu1 %v599_v35 }
 0x266   :  { %v12709_v36 = vpack.c.bf16 %v521_v32, %v521_v32  ;;  %v12711_v37 = vadd.f32 %v10915_v34, %v348_v21  ;;  %10928 = vmatprep.subr.bf16.mxu1 %v12526_v14  ;;  %v525_v54 = vadd.f32 %v524_v33, %v340_v29  ;;  %v12734_v56 = vpack.c.bf16 %v568_v50, %v568_v50 }
 0x267   :  { %v526_v40 = vpop.f32.mrf.mxu0  ;;  %v570_v51 = vpop.f32.mrf.mxu1 }
 0x268   :  { %v527_v41 = vadd.f32 %v526_v40, %v344_v19  ;;  %v645_v43 = vsel %vm594_vm1, %v12709_v36, 0  ;;  %v571_v57 = vadd.f32 %v570_v51, %v348_v21  ;;  %v12740_v58 = vpack.c.bf16 %v525_v54, %v525_v54 }
 0x269   :  { %v528_v42 = vpop.f32.mrf.mxu0  ;;  %10923 = vmatpush3.bf16.xpose.msra.mxu0 %v645_v43  ;;  %v837_v61 = vsel %vm835_vm2, %v12734_v56, 0 }
 0x26a   :  { %v12716_v44 = vpack.c.bf16 %v527_v41, %v527_v41  ;;  %10934 = vmatprep.subr.bf16.mxu0 %v12526_v14  ;;  %v529_v59 = vadd.f32 %v528_v42, %v340_v29  ;;  %v12743_v60 = vpack.c.bf16 %v571_v57, %v571_v57 }
 0x26b   :  { %v530_v47 = vpop.f32.mrf.mxu0 }
 0x26c   :  { %v531_v48 = vadd.f32 %v530_v47, %v344_v19  ;;  %v691_v49 = vsel %vm594_vm1, %v12716_v44, 0  ;;  %10919 = vmatmul.mubr.msk.bf16.vlgmr.msra.gmra.mxu1 %vm594_vm1, %v12718_v45  ;;  %v12751_v62 = vpack.c.bf16 %v529_v59, %v529_v59  ;;  %v883_v63 = vsel %vm835_vm2, %v12743_v60, 0 }
 0x26d   :  { %10929 = vmatpush3.bf16.xpose.msra.mxu1 %v691_v49  ;;  %10930 = vmatprep.mubr.msk.bf16.mxu1 %vm12527_vm0, %v12526_v14 }
 0x26e   :  { %v12725_v52 = vpack.c.bf16 %v531_v48, %v531_v48  ;;  %10940 = vmatprep.subr.bf16.mxu1 %v12526_v14 }
 0x270   :  { %v737_v55 = vsel %vm594_vm1, %v12725_v52, 0  ;;  %10925 = vmatmul.mubr.msk.bf16.vlgmr.msra.gmra.mxu0 %vm594_vm1, %v12729_v53 }
 0x271   :  { %10935 = vmatpush3.bf16.xpose.msra.mxu0 %v737_v55  ;;  %10936 = vmatprep.mubr.msk.bf16.mxu0 %vm12527_vm0, %v12526_v14 }
 0x272   :  { %10946 = vmatprep.subr.bf16.mxu0 %v12526_v14 }
 0x274   :  { %10931 = vmatmul.mubr.msk.bf16.vlgmr.msra.gmra.mxu1 %vm594_vm1, %v12740_v58 }
 0x275   :  { %10941 = vmatpush3.bf16.msra.mxu1 %v837_v61  ;;  %10942 = vmatprep.mubr.msk.bf16.mxu1 %vm12527_vm0, %v12526_v14 }
 0x276   :  { %10952 = vmatprep.subr.bf16.mxu1 %v12526_v14 }
 0x278   :  { %10937 = vmatmul.mubr.msk.bf16.vlgmr.msra.gmra.mxu0 %vm594_vm1, %v12751_v62 }
 0x279   :  { %10947 = vmatpush3.bf16.msra.mxu0 %v883_v63  ;;  %10948 = vmatprep.mubr.msk.bf16.mxu0 %vm12527_vm0, %v12526_v14 }
 0x27a   :  { %10958 = vmatprep.subr.bf16.mxu0 %v12526_v14 }
 0x32c   :  { %v635_v0 = vpop.f32.mrf.mxu1 }
 0x32d   :  { %v779_v1 = vmul.f32 0.25, %v635_v0 }
 0x32e   :  { %v10920_v2 = vpop.f32.mrf.mxu1 }
 0x32f   :  { %v784_v3 = vsel %vm783_vm3, %v779_v1, -inf  ;;  %v12787_v2 = vpack.c.bf16 %v12704_v28, %v12704_v28 }
 0x330   :  { %785 = vmax.xlane.f32.xlu0 %v784_v3  ;;  %v638_v4 = vpop.f32.mrf.mxu1  ;;  %v681_v5 = vpop.f32.mrf.mxu0 }
 0x331   :  { %v780_v6 = vmul.f32 0.25, %v681_v5 }
 0x332   :  { %v10921_v7 = vpop.f32.mrf.mxu1  ;;  %v10926_v8 = vpop.f32.mrf.mxu0 }
 0x333   :  { %v787_v9 = vsel %vm783_vm3, %v780_v6, -inf  ;;  %v929_v7 = vsel %vm835_vm2, %v12787_v2, 0 }
 0x334   :  { %788 = vmax.xlane.f32.xlu1 %v787_v9  ;;  %v684_v10 = vpop.f32.mrf.mxu0  ;;  %v727_v12 = vpop.f32.mrf.mxu1 }
 0x335   :  { %v781_v13 = vmul.f32 0.25, %v727_v12 }
 0x336   :  { %v10927_v11 = vpop.f32.mrf.mxu0  ;;  %v10932_v18 = vpop.f32.mrf.mxu1 }
 0x337   :  { %v790_v19 = vsel %vm783_vm3, %v781_v13, -inf }
 0x338   :  { %v773_v20 = vpop.f32.mrf.mxu0  ;;  %791 = vmax.xlane.f32.xlu0 %v790_v19  ;;  %v730_v21 = vpop.f32.mrf.mxu1 }
 0x339   :  { %v782_v23 = vmul.f32 0.25, %v773_v20 }
 0x33a   :  { %v10933_v24 = vpop.f32.mrf.mxu1  ;;  %v10938_v25 = vpop.f32.mrf.mxu0 }
 0x33b   :  { %v793_v26 = vsel %vm783_vm3, %v782_v23, -inf }
 0x33c   :  { %794 = vmax.xlane.f32.xlu1 %v793_v26  ;;  %v776_v29 = vpop.f32.mrf.mxu0 }
 0x33e   :  { %v10939_v30 = vpop.f32.mrf.mxu0 }
 0x3b9   :  { %v786_v31 = vpop.xlane.xlu0 %785 }
 0x3ba   :  { %v796_v32 = vsub.f32 %v779_v1, %v786_v31 }
 0x3bc   :  { %v800_v33 = vmul.f32 1.442695, %v796_v32 }
 0x3bd   :  { %v789_v34 = vpop.xlane.xlu1 %788 }
 0x3be   :  { %11993 = vpow2.f32 %v800_v33  ;;  %v797_v35 = vsub.f32 %v780_v6, %v789_v34  ;;  %v12791_v6 = vpack.c.bf16 %v12711_v37, %v12711_v37 }
 0x3c0   :  { %v802_v38 = vmul.f32 1.442695, %v797_v35  ;;  %v975_v37 = vsel %vm835_vm2, %v12791_v6, 0 }
 0x3c1   :  { %v792_v40 = vpop.xlane.xlu0 %791 }
 0x3c2   :  { %11995 = vpow2.f32 %v802_v38  ;;  %v798_v41 = vsub.f32 %v781_v13, %v792_v40 }
 0x3c4   :  { %v804_v42 = vmul.f32 1.442695, %v798_v41 }
 0x3c5   :  { %v795_v51 = vpop.xlane.xlu1 %794 }
 0x3c6   :  { %11997 = vpow2.f32 %v804_v42  ;;  %v799_v54 = vsub.f32 %v782_v23, %v795_v51 }
 0x3c8   :  { %v806_v55 = vmul.f32 1.442695, %v799_v54 }
 0x3ca   :  { %11999 = vpow2.f32 %v806_v55 }
 0x3cb   :  { %v11994_v43 = vpop.eup %11993 }
 0x3cc   :  { %v808_v46 = vsel %vm783_vm3, %v11994_v43, 0.0 }
 0x3cd   :  { %809 = vadd.xlane.f32.xlu0 %v808_v46 }
 0x3cf   :  { %v11996_v47 = vpop.eup %11995 }
 0x3d0   :  { %v811_v48 = vsel %vm783_vm3, %v11996_v47, 0.0 }
 0x3d1   :  { %812 = vadd.xlane.f32.xlu1 %v811_v48 }
 0x3d3   :  { %v11998_v49 = vpop.eup %11997 }
 0x3d4   :  { %v814_v50 = vsel %vm783_vm3, %v11998_v49, 0.0 }
 0x3d5   :  { %815 = vadd.xlane.f32.xlu0 %v814_v50 }
 0x3d7   :  { %v12000_v57 = vpop.eup %11999 }
 0x3d8   :  { %v817_v59 = vsel %vm783_vm3, %v12000_v57, 0.0 }
 0x3e2   :  { %1075 = vrot.lane.b32.xlu1 %v12709_v36, %s12528_s25 }
 0x3e6   :  { %1020 = vrot.lane.b32.xlu1 %v12718_v45, %s12528_s25 }
 0x3eb   :  { %1023 = vrot.lane.b32.xlu0 %v12702_v27, %s12528_s25 }
 0x3ef   :  { %1127 = vrot.lane.b32.xlu0 %v12716_v44, %s12528_s25 }
 0x3f3   :  { %1124 = vrot.lane.b32.xlu0 %v12740_v58, %s12528_s25 }
 0x40a   :  { %818 = vadd.xlane.f32.xlu1 %v817_v59 }
 0x41b   :  { %1072 = vrot.lane.b32.xlu1 %v12729_v53, %s12528_s25 }
 0x41f   :  { %1179 = vrot.lane.b32.xlu1 %v12725_v52, %s12528_s25 }
 0x423   :  { %1176 = vrot.lane.b32.xlu1 %v12751_v62, %s12528_s25 }
 0x456   :  { %v810_v61 = vpop.xlane.xlu0 %809 }
 0x457   :  { %12001 = vrcp.f32 %v810_v61 }
 0x45a   :  { %v813_v63 = vpop.xlane.xlu1 %812 }
 0x45b   :  { %12003 = vrcp.f32 %v813_v63 }
 0x45e   :  { %v816_v0 = vpop.xlane.xlu0 %815  ;;  %v1076_v18 = vpop.permute.xlu1 %1075 }
 0x45f   :  { %12005 = vrcp.f32 %v816_v0  ;;  %v1081_v31 = vsel %vm594_vm1, %v1076_v18, 0 }
 0x462   :  { %v1024_v12 = vpop.permute.xlu0 %1023  ;;  %v1021_v20 = vpop.permute.xlu1 %1020 }
 0x463   :  { %v1029_v11 = vsel %vm594_vm1, %v1024_v12, 0 }
 0x464   :  { %v12002_v1 = vpop.eup %12001 }
 0x465   :  { %v821_v3 = vmul.f32 %v12002_v1, %v11994_v43 }
 0x466   :  { %v1128_v19 = vpop.permute.xlu0 %1127 }
 0x467   :  { %v828_v4 = vpack.c.bf16 %v821_v3, %v821_v3  ;;  %v1133_v21 = vsel %vm594_vm1, %v1128_v19, 0 }
 0x468   :  { %v12004_v5 = vpop.eup %12003 }
 0x469   :  { %10943 = vmatmul.mubr.msk.bf16.vlgmr.msra.gmra.mxu1 %vm783_vm3, %v828_v4  ;;  %v823_v8 = vmul.f32 %v12004_v5, %v11996_v47 }
 0x46a   :  { %10953 = vmatpush3.bf16.msra.mxu1 %v929_v7  ;;  %10954 = vmatprep.mubr.msk.bf16.mxu1 %vm12527_vm0, %v12526_v14  ;;  %v1125_v23 = vpop.permute.xlu0 %1124 }
 0x46b   :  { %v829_v9 = vpack.c.bf16 %v823_v8, %v823_v8  ;;  %10964 = vmatprep.subr.bf16.mxu1 %v12526_v14 }
 0x46c   :  { %v12006_v28 = vpop.eup %12005 }
 0x46d   :  { %10949 = vmatmul.mubr.msk.bf16.vlgmr.msra.gmra.mxu0 %vm783_vm3, %v829_v9  ;;  %v825_v10 = vmul.f32 %v12006_v28, %v11998_v49 }
 0x46e   :  { %10959 = vmatpush3.bf16.msra.mxu0 %v975_v37  ;;  %10960 = vmatprep.mubr.msk.bf16.mxu0 %vm12527_vm0, %v12526_v14 }
 0x46f   :  { %v830_v13 = vpack.c.bf16 %v825_v10, %v825_v10  ;;  %10970 = vmatprep.subr.bf16.mxu0 %v12526_v14 }
 0x471   :  { %10955 = vmatmul.mubr.msk.bf16.vlgmr.msra.gmra.mxu1 %vm783_vm3, %v830_v13 }
 0x472   :  { %10965 = vmatpush3.bf16.xpose.msra.mxu1 %v1029_v11  ;;  %10966 = vmatprep.mubr.msk.bf16.mxu1 %vm12527_vm0, %v12526_v14 }
 0x473   :  { %10976 = vmatprep.subr.bf16.mxu1 %v12526_v14 }
 0x479   :  { %10967 = vmatmul.mubr.msk.bf16.vlgmr.msra.gmra.mxu1 %vm594_vm1, %v1021_v20 }
 0x47a   :  { %10977 = vmatpush3.bf16.xpose.msra.mxu1 %v1133_v21  ;;  %10978 = vmatprep.mubr.msk.bf16.mxu1 %vm12527_vm0, %v12526_v14 }
 0x47b   :  { %10988 = vmatprep.subr.bf16.mxu1 %v12526_v14 }
 0x481   :  { %10979 = vmatmul.mubr.msk.bf16.vlgmr.msra.gmra.mxu1 %vm594_vm1, %v1125_v23 }
 0x482   :  { %10990 = vmatprep.mubr.msk.bf16.mxu1 %vm12527_vm0, %v12526_v14 }
 0x493   :  { %v819_v24 = vpop.xlane.xlu1 %818 }
 0x494   :  { %12007 = vrcp.f32 %v819_v24 }
 0x497   :  { %v1073_v30 = vpop.permute.xlu1 %1072 }
 0x49b   :  { %v1180_v32 = vpop.permute.xlu1 %1179 }
 0x49c   :  { %v1185_v33 = vsel %vm594_vm1, %v1180_v32, 0 }
 0x49f   :  { %v1177_v34 = vpop.permute.xlu1 %1176 }
 0x4a1   :  { %v12008_v25 = vpop.eup %12007 }
 0x4a2   :  { %v827_v26 = vmul.f32 %v12008_v25, %v12000_v57 }
 0x4a4   :  { %v831_v29 = vpack.c.bf16 %v827_v26, %v827_v26 }
 0x4a6   :  { %10961 = vmatmul.mubr.msk.bf16.vlgmr.msra.gmra.mxu0 %vm783_vm3, %v831_v29 }
 0x4a7   :  { %10971 = vmatpush3.bf16.xpose.msra.mxu0 %v1081_v31  ;;  %10972 = vmatprep.mubr.msk.bf16.mxu0 %vm12527_vm0, %v12526_v14 }
 0x4a8   :  { %10982 = vmatprep.subr.bf16.mxu0 %v12526_v14 }
 0x4ae   :  { %10973 = vmatmul.mubr.msk.bf16.vlgmr.msra.gmra.mxu0 %vm594_vm1, %v1073_v30 }
 0x4af   :  { %10983 = vmatpush3.bf16.xpose.msra.mxu0 %v1185_v33  ;;  %10984 = vmatprep.mubr.msk.bf16.mxu0 %vm12527_vm0, %v12526_v14 }
 0x4b0   :  { %10994 = vmatprep.subr.bf16.mxu0 %v12526_v14 }
 0x4b6   :  { %10985 = vmatmul.mubr.msk.bf16.vlgmr.msra.gmra.mxu0 %vm594_vm1, %v1177_v34 }
 0x4b7   :  { %10996 = vmatprep.mubr.msk.bf16.mxu0 %vm12527_vm0, %v12526_v14 }
 0x529   :  { %v12831_v35 = vpop.f32.mrf.mxu1 }
 0x52b   :  { %v10944_v38 = vpop.f32.mrf.mxu1 }
 0x52d   :  { %v876_v40 = vpop.f32.mrf.mxu1  ;;  %v12833_v41 = vpop.f32.mrf.mxu0 }
 0x52e   :  { %v1017_v42 = vpack.c.bf16 %v12833_v41, %v12831_v35  ;;  %v11858_v41 = vld [vmem:[#allocation10 + $0x8] sm:$0xff]  }
 0x52f   :  { %v10945_v43 = vpop.f32.mrf.mxu1  ;;  %v10950_v46 = vpop.f32.mrf.mxu0 }
 0x531   :  { %v922_v47 = vpop.f32.mrf.mxu0  ;;  %v12837_v48 = vpop.f32.mrf.mxu1 }
 0x533   :  { %v10951_v49 = vpop.f32.mrf.mxu0  ;;  %v10956_v50 = vpop.f32.mrf.mxu1 }
 0x535   :  { %v968_v51 = vpop.f32.mrf.mxu1 }
 0x537   :  { %v10957_v54 = vpop.f32.mrf.mxu1 }
 0x539   :  { %v1065_v55 = vpop.f32.mrf.mxu1 }
 0x53a   :  { %v1227_v57 = vmul.f32 0.25, %v1065_v55 }
 0x53b   :  { %v10968_v59 = vpop.f32.mrf.mxu1 }
 0x53c   :  { %v1231_v61 = vsel %vm783_vm3, %v1227_v57, -inf }
 0x53d   :  { %1232 = vmax.xlane.f32.xlu0 %v1231_v61  ;;  %v1068_v63 = vpop.f32.mrf.mxu1 }
 0x53f   :  { %v10969_v0 = vpop.f32.mrf.mxu1 }
 0x541   :  { %v1169_v1 = vpop.f32.mrf.mxu1 }
 0x542   :  { %v1229_v3 = vmul.f32 0.25, %v1169_v1 }
 0x543   :  { %v10980_v4 = vpop.f32.mrf.mxu1 }
 0x544   :  { %v1237_v5 = vsel %vm783_vm3, %v1229_v3, -inf }
 0x545   :  { %1238 = vmax.xlane.f32.xlu0 %v1237_v5  ;;  %v1172_v7 = vpop.f32.mrf.mxu1 }
 0x547   :  { %v10981_v8 = vpop.f32.mrf.mxu1 }
 0x566   :  { %v12841_v9 = vpop.f32.mrf.mxu0 }
 0x567   :  { %v1018_v28 = vpack.c.bf16 %v12841_v9, %v12837_v48 }
 0x568   :  { %v10962_v37 = vpop.f32.mrf.mxu0 }
 0x56a   :  { %v1014_v10 = vpop.f32.mrf.mxu0 }
 0x56c   :  { %v10963_v12 = vpop.f32.mrf.mxu0 }
 0x56e   :  { %v1117_v13 = vpop.f32.mrf.mxu0 }
 0x56f   :  { %v1228_v11 = vmul.f32 0.25, %v1117_v13 }
 0x570   :  { %v10974_v18 = vpop.f32.mrf.mxu0 }
 0x571   :  { %v1234_v19 = vsel %vm783_vm3, %v1228_v11, -inf }
 0x572   :  { %1235 = vmax.xlane.f32.xlu1 %v1234_v19  ;;  %v1120_v20 = vpop.f32.mrf.mxu0 }
 0x574   :  { %v10975_v21 = vpop.f32.mrf.mxu0 }
 0x576   :  { %v1221_v23 = vpop.f32.mrf.mxu0 }
 0x577   :  { %v1230_v24 = vmul.f32 0.25, %v1221_v23 }
 0x578   :  { %v10986_v25 = vpop.f32.mrf.mxu0 }
 0x579   :  { %v1240_v26 = vsel %vm783_vm3, %v1230_v24, -inf }
 0x57a   :  { %v1224_v29 = vpop.f32.mrf.mxu0  ;;  %1241 = vmax.xlane.f32.xlu0 %v1240_v26 }
 0x57c   :  { %v10987_v30 = vpop.f32.mrf.mxu0 }
 0x57d   :  { %v11857_v30 = vld [vmem:[#allocation10] sm:$0xff]  }
 0x5c6   :  { %v1233_v31 = vpop.xlane.xlu0 %1232 }
 0x5c7   :  { %v1243_v32 = vsub.f32 %v1227_v57, %v1233_v31 }
 0x5c9   :  { %v1247_v33 = vmul.f32 1.442695, %v1243_v32 }
 0x5cb   :  { %12009 = vpow2.f32 %v1247_v33 }
 0x5ce   :  { %v1239_v34 = vpop.xlane.xlu0 %1238 }
 0x5cf   :  { %v1245_v38 = vsub.f32 %v1229_v3, %v1239_v34 }
 0x5d1   :  { %v1251_v40 = vmul.f32 1.442695, %v1245_v38 }
 0x5d3   :  { %12011 = vpow2.f32 %v1251_v40 }
 0x5d8   :  { %v12010_v43 = vpop.eup %12009 }
 0x5d9   :  { %v1255_v46 = vsel %vm783_vm3, %v12010_v43, 0.0 }
 0x5da   :  { %1256 = vadd.xlane.f32.xlu0 %v1255_v46 }
 0x5e0   :  { %v12012_v47 = vpop.eup %12011 }
 0x5e1   :  { %v1261_v49 = vsel %vm783_vm3, %v12012_v47, 0.0 }
 0x5e2   :  { %1262 = vadd.xlane.f32.xlu0 %v1261_v49 }
 0x5f8   :  { %1280 = vrot.lane.b32.xlu0 %v12734_v56, %s12528_s25 }
 0x5fb   :  { %v1236_v50 = vpop.xlane.xlu1 %1235 }
 0x5fc   :  { %v1244_v51 = vsub.f32 %v1228_v11, %v1236_v50  ;;  %1601 = vrot.lane.b32.xlu0 %v12702_v27, %s12529_s26 }
 0x5fe   :  { %v1249_v54 = vmul.f32 1.442695, %v1244_v51 }
 0x600   :  { %12013 = vpow2.f32 %v1249_v54  ;;  %1599 = vrot.lane.b32.xlu0 %v12718_v45, %s12529_s26 }
 0x603   :  { %v1242_v59 = vpop.xlane.xlu0 %1241 }
 0x604   :  { %1701 = vrot.lane.b32.xlu0 %v12716_v44, %s12529_s26  ;;  %v1246_v61 = vsub.f32 %v1230_v24, %v1242_v59 }
 0x606   :  { %v1253_v63 = vmul.f32 1.442695, %v1246_v61 }
 0x608   :  { %1699 = vrot.lane.b32.xlu0 %v12740_v58, %s12529_s26  ;;  %12015 = vpow2.f32 %v1253_v63 }
 0x60d   :  { %v12014_v55 = vpop.eup %12013 }
 0x60e   :  { %v1258_v57 = vsel %vm783_vm3, %v12014_v55, 0.0 }
 0x60f   :  { %1259 = vadd.xlane.f32.xlu1 %v1258_v57 }
 0x615   :  { %v12016_v0 = vpop.eup %12015 }
 0x616   :  { %v1264_v1 = vsel %vm783_vm3, %v12016_v0, 0.0 }
 0x620   :  { %1329 = vrot.lane.b32.xlu1 %v12743_v60, %s12528_s25 }
 0x624   :  { %1378 = vrot.lane.b32.xlu1 %v12787_v2, %s12528_s25 }
 0x648   :  { %1265 = vadd.xlane.f32.xlu1 %v1264_v1 }
 0x659   :  { %1427 = vrot.lane.b32.xlu1 %v12791_v6, %s12528_s25 }
 0x65d   :  { %1651 = vrot.lane.b32.xlu1 %v12709_v36, %s12529_s26 }
 0x661   :  { %1649 = vrot.lane.b32.xlu1 %v12729_v53, %s12529_s26 }
 0x663   :  { %v1257_v3 = vpop.xlane.xlu0 %1256 }
 0x664   :  { %12017 = vrcp.f32 %v1257_v3 }
 0x665   :  { %1751 = vrot.lane.b32.xlu1 %v12725_v52, %s12529_s26 }
 0x669   :  { %1749 = vrot.lane.b32.xlu1 %v12751_v62, %s12529_s26 }
 0x66b   :  { %v1263_v4 = vpop.xlane.xlu0 %1262 }
 0x66c   :  { %12019 = vrcp.f32 %v1263_v4 }
 0x66f   :  { %v1281_v5 = vpop.permute.xlu0 %1280 }
 0x670   :  { %v1286_v7 = vsel %vm835_vm2, %v1281_v5, 0 }
 0x671   :  { %v12018_v8 = vpop.eup %12017  ;;  %10989 = vmatpush3.bf16.msra.mxu1 %v1286_v7 }
 0x672   :  { %v1268_v37 = vmul.f32 %v12018_v8, %v12010_v43  ;;  %11000 = vmatprep.subr.bf16.mxu1 %v12526_v14 }
 0x673   :  { %v1602_v1 = vpop.permute.xlu0 %1601 }
 0x674   :  { %v1275_v10 = vpack.c.bf16 %v1268_v37, %v1268_v37  ;;  %v1607_v8 = vsel %vm594_vm1, %v1602_v1, 0 }
 0x676   :  { %10991 = vmatmul.mubr.msk.bf16.vlgmr.msra.gmra.mxu1 %vm783_vm3, %v1275_v10 }
 0x677   :  { %11002 = vmatprep.mubr.msk.bf16.mxu1 %vm12527_vm0, %v12526_v14  ;;  %v1600_v5 = vpop.permute.xlu0 %1599 }
 0x679   :  { %v12020_v13 = vpop.eup %12019 }
 0x67a   :  { %v1272_v19 = vmul.f32 %v12020_v13, %v12012_v47 }
 0x67c   :  { %v1277_v23 = vpack.c.bf16 %v1272_v19, %v1272_v19 }
 0x698   :  { %v1260_v12 = vpop.xlane.xlu1 %1259 }
 0x699   :  { %12021 = vrcp.f32 %v1260_v12  ;;  %v1702_v12 = vpop.permute.xlu0 %1701 }
 0x69c   :  { %v1330_v11 = vpop.permute.xlu1 %1329 }
 0x69d   :  { %v1335_v18 = vsel %vm835_vm2, %v1330_v11, 0 }
 0x69e   :  { %10995 = vmatpush3.bf16.msra.mxu0 %v1335_v18  ;;  %v1707_v18 = vsel %vm594_vm1, %v1702_v12, 0 }
 0x69f   :  { %11006 = vmatprep.subr.bf16.mxu0 %v12526_v14 }
 0x6a0   :  { %v1379_v20 = vpop.permute.xlu1 %1378 }
 0x6a1   :  { %v1384_v21 = vsel %vm835_vm2, %v1379_v20, 0 }
 0x6a2   :  { %11001 = vmatpush3.bf16.msra.mxu1 %v1384_v21 }
 0x6a3   :  { %11012 = vmatprep.subr.bf16.mxu1 %v11858_v41 }
 0x6a5   :  { %11003 = vmatmul.mubr.msk.bf16.vlgmr.msra.gmra.mxu1 %vm783_vm3, %v1277_v23 }
 0x6a6   :  { %v12022_v24 = vpop.eup %12021  ;;  %11013 = vmatpush3.bf16.msra.mxu1 %v11858_v41 }
 0x6a7   :  { %v1270_v25 = vmul.f32 %v12022_v24, %v12014_v55  ;;  %11024 = vmatprep.subr.bf16.mxu1 %v12526_v14  ;;  %v1700_v24 = vpop.permute.xlu0 %1699 }
 0x6a9   :  { %v1276_v26 = vpack.c.bf16 %v1270_v25, %v1270_v25 }
 0x6ab   :  { %10997 = vmatmul.mubr.msk.bf16.vlgmr.msra.gmra.mxu0 %vm783_vm3, %v1276_v26 }
 0x6ac   :  { %11008 = vmatprep.mubr.msk.bf16.mxu0 %vm12527_vm0, %v12526_v14 }
 0x6d1   :  { %v1266_v29 = vpop.xlane.xlu1 %1265 }
 0x6d2   :  { %12023 = vrcp.f32 %v1266_v29 }
 0x6d5   :  { %v1428_v31 = vpop.permute.xlu1 %1427 }
 0x6d6   :  { %v1433_v32 = vsel %vm835_vm2, %v1428_v31, 0 }
 0x6d7   :  { %11007 = vmatpush3.bf16.msra.mxu0 %v1433_v32 }
 0x6d8   :  { %11018 = vmatprep.subr.bf16.mxu0 %v11857_v30 }
 0x6d9   :  { %v1652_v40 = vpop.permute.xlu1 %1651 }
 0x6da   :  { %v1657_v46 = vsel %vm594_vm1, %v1652_v40, 0 }
 0x6dd   :  { %v1650_v43 = vpop.permute.xlu1 %1649 }
 0x6df   :  { %v12024_v33 = vpop.eup %12023 }
 0x6e0   :  { %v1274_v34 = vmul.f32 %v12024_v33, %v12016_v0 }
 0x6e1   :  { %v1752_v35 = vpop.permute.xlu1 %1751 }
 0x6e2   :  { %v1278_v38 = vpack.c.bf16 %v1274_v34, %v1274_v34 }
 0x6e4   :  { %11009 = vmatmul.mubr.msk.bf16.vlgmr.msra.gmra.mxu0 %vm783_vm3, %v1278_v38 }
 0x6e5   :  { %11020 = vmatprep.mubr.msk.bf16.mxu0 %vm594_vm1, %v1017_v42  ;;  %11019 = vmatpush3.bf16.msra.mxu0 %v11857_v30  ;;  %v1757_v42 = vsel %vm594_vm1, %v1752_v35, 0  ;;  %v1750_v48 = vpop.permute.xlu1 %1749 }
 0x6e6   :  { %11030 = vmatprep.subr.bf16.mxu0 %v12526_v14 }
 0x6ec   :  { %11021 = vmatmul.mubr.msk.bf16.vlgmr.msra.gmra.mxu0 %vm594_vm1, %v1018_v28 }
 0x6ed   :  { %11031 = vmatpush3.bf16.xpose.msra.mxu0 %v1657_v46  ;;  %11032 = vmatprep.mubr.msk.bf16.mxu0 %vm12527_vm0, %v12526_v14 }
 0x6ee   :  { %11042 = vmatprep.subr.bf16.mxu0 %v12526_v14 }
 0x6f4   :  { %11033 = vmatmul.mubr.msk.bf16.vlgmr.msra.gmra.mxu0 %vm594_vm1, %v1650_v43 }
 0x6f5   :  { %11043 = vmatpush3.bf16.xpose.msra.mxu0 %v1757_v42  ;;  %11044 = vmatprep.mubr.msk.bf16.mxu0 %vm12527_vm0, %v12526_v14 }
 0x6f6   :  { %11054 = vmatprep.subr.bf16.mxu0 %v12526_v14 }
 0x6fc   :  { %11045 = vmatmul.mubr.msk.bf16.vlgmr.msra.gmra.mxu0 %vm594_vm1, %v1750_v48 }
 0x6fd   :  { %11056 = vmatprep.mubr.msk.bf16.mxu0 %vm12527_vm0, %v12526_v14 }
 0x736   :  { %v1322_v9 = vpop.f32.mrf.mxu1 }
 0x738   :  { %v10992_v28 = vpop.f32.mrf.mxu1 }
 0x73a   :  { %v1325_v47 = vpop.f32.mrf.mxu1 }
 0x73c   :  { %v10993_v49 = vpop.f32.mrf.mxu1 }
 0x765   :  { %v1420_v50 = vpop.f32.mrf.mxu1 }
 0x767   :  { %v11004_v51 = vpop.f32.mrf.mxu1 }
 0x769   :  { %v1423_v54 = vpop.f32.mrf.mxu1 }
 0x76b   :  { %v1371_v55 = vpop.f32.mrf.mxu0  ;;  %v11005_v57 = vpop.f32.mrf.mxu1 }
 0x76c   :  { %v1475_v59 = vpack.c.bf16 %v1371_v55, %v1322_v9 }
 0x76d   :  { %v10998_v61 = vpop.f32.mrf.mxu0 }
 0x76e   :  { %11014 = vmatprep.mubr.msk.bf16.mxu1 %vm594_vm1, %v1475_v59 }
 0x76f   :  { %v1374_v63 = vpop.f32.mrf.mxu0 }
 0x771   :  { %v10999_v0 = vpop.f32.mrf.mxu0 }
 0x7a4   :  { %v1469_v3 = vpop.f32.mrf.mxu0 }
 0x7a5   :  { %v1476_v4 = vpack.c.bf16 %v1469_v3, %v1420_v50 }
 0x7a6   :  { %v11010_v7 = vpop.f32.mrf.mxu0 }
 0x7a7   :  { %11015 = vmatmul.mubr.msk.bf16.vlgmr.msra.gmra.mxu1 %vm594_vm1, %v1476_v4 }
 0x7a8   :  { %11025 = vmatpush3.bf16.xpose.msra.mxu1 %v1607_v8  ;;  %v1472_v37 = vpop.f32.mrf.mxu0  ;;  %11026 = vmatprep.mubr.msk.bf16.mxu1 %vm12527_vm0, %v12526_v14 }
 0x7a9   :  { %11036 = vmatprep.subr.bf16.mxu1 %v12526_v14 }
 0x7aa   :  { %v11011_v10 = vpop.f32.mrf.mxu0 }
 0x7ac   :  { %v12917_v13 = vpop.f32.mrf.mxu0 }
 0x7ae   :  { %v12919_v11 = vpop.f32.mrf.mxu0 }
 0x7af   :  { %11027 = vmatmul.mubr.msk.bf16.vlgmr.msra.gmra.mxu1 %vm594_vm1, %v1600_v5 }
 0x7b0   :  { %11037 = vmatpush3.bf16.xpose.msra.mxu1 %v1707_v18  ;;  %v12923_v19 = vpop.f32.mrf.mxu0  ;;  %11038 = vmatprep.mubr.msk.bf16.mxu1 %vm12527_vm0, %v12526_v14 }
 0x7b1   :  { %11048 = vmatprep.subr.bf16.mxu1 %v12526_v14 }
 0x7b2   :  { %v12928_v20 = vpop.f32.mrf.mxu0 }
 0x7b4   :  { %v1693_v21 = vpop.f32.mrf.mxu0 }
 0x7b5   :  { %v1800_v23 = vmul.f32 0.25, %v1693_v21 }
 0x7b6   :  { %v11034_v25 = vpop.f32.mrf.mxu0 }
 0x7b7   :  { %11039 = vmatmul.mubr.msk.bf16.vlgmr.msra.gmra.mxu1 %vm594_vm1, %v1700_v24  ;;  %v1806_v26 = vsel %vm783_vm3, %v1800_v23, -inf }
 0x7b8   :  { %1807 = vmax.xlane.f32.xlu1 %v1806_v26  ;;  %v1696_v29 = vpop.f32.mrf.mxu0  ;;  %11050 = vmatprep.mubr.msk.bf16.mxu1 %vm12527_vm0, %v12526_v14 }
 0x7ba   :  { %v11035_v30 = vpop.f32.mrf.mxu0 }
 0x7bc   :  { %v1793_v31 = vpop.f32.mrf.mxu0 }
 0x7bd   :  { %v1802_v61 = vmul.f32 0.25, %v1793_v31 }
 0x7be   :  { %v11046_v32 = vpop.f32.mrf.mxu0 }
 0x7bf   :  { %v1812_v3 = vsel %vm783_vm3, %v1802_v61, -inf }
 0x7c0   :  { %v1796_v33 = vpop.f32.mrf.mxu0 }
 0x7c2   :  { %v11047_v34 = vpop.f32.mrf.mxu0 }
 0x841   :  { %v1808_v38 = vpop.xlane.xlu1 %1807 }
 0x842   :  { %v1816_v40 = vsub.f32 %v1800_v23, %v1808_v38 }
 0x844   :  { %v1821_v43 = vmul.f32 1.442695, %v1816_v40 }
 0x846   :  { %12025 = vpow2.f32 %v1821_v43 }
 0x853   :  { %v12934_v46 = vpop.eup %12025 }
 0x854   :  { %v1830_v35 = vsel %vm783_vm3, %v12934_v46, 0.0 }
 0x855   :  { %1831 = vadd.xlane.f32.xlu1 %v1830_v35 }
 0x867   :  { %v12938_v41 = vpop.f32.mrf.mxu1 }
 0x869   :  { %v12940_v42 = vpop.f32.mrf.mxu1 }
 0x86b   :  { %v12942_v48 = vpop.f32.mrf.mxu1 }
 0x86d   :  { %v12944_v9 = vpop.f32.mrf.mxu1 }
 0x86f   :  { %v1643_v28 = vpop.f32.mrf.mxu1 }
 0x870   :  { %v1799_v47 = vmul.f32 0.25, %v1643_v28 }
 0x871   :  { %v11028_v49 = vpop.f32.mrf.mxu1 }
 0x872   :  { %v1803_v50 = vsel %vm783_vm3, %v1799_v47, -inf }
 0x873   :  { %1804 = vmax.xlane.f32.xlu0 %v1803_v50  ;;  %v1646_v51 = vpop.f32.mrf.mxu1 }
 0x875   :  { %v11029_v54 = vpop.f32.mrf.mxu1 }
 0x877   :  { %v1743_v55 = vpop.f32.mrf.mxu1 }
 0x878   :  { %v1801_v57 = vmul.f32 0.25, %v1743_v55 }
 0x879   :  { %v11040_v59 = vpop.f32.mrf.mxu1 }
 0x87a   :  { %v1809_v63 = vsel %vm783_vm3, %v1801_v57, -inf }
 0x87b   :  { %1810 = vmax.xlane.f32.xlu0 %v1809_v63  ;;  %v1746_v0 = vpop.f32.mrf.mxu1 }
 0x87d   :  { %v11041_v1 = vpop.f32.mrf.mxu1 }
 0x87f   :  { %1813 = vmax.xlane.f32.xlu0 %v1812_v3 }
 0x8de   :  { %v1832_v31 = vpop.xlane.xlu1 %1831 }
 0x8fc   :  { %v1805_v4 = vpop.xlane.xlu0 %1804 }
 0x8fd   :  { %v1815_v5 = vsub.f32 %v1799_v47, %v1805_v4 }
 0x8ff   :  { %v1819_v7 = vmul.f32 1.442695, %v1815_v5 }
 0x901   :  { %12027 = vpow2.f32 %v1819_v7 }
 0x904   :  { %v1811_v8 = vpop.xlane.xlu0 %1810 }
 0x905   :  { %v1817_v37 = vsub.f32 %v1801_v57, %v1811_v8 }
 0x907   :  { %v1823_v10 = vmul.f32 1.442695, %v1817_v37 }
 0x908   :  { %v1814_v12 = vpop.xlane.xlu0 %1813 }
 0x909   :  { %12029 = vpow2.f32 %v1823_v10  ;;  %v1818_v18 = vsub.f32 %v1802_v61, %v1814_v12 }
 0x90b   :  { %v1825_v21 = vmul.f32 1.442695, %v1818_v18  ;;  %v11859_v18 = vld [vmem:[#allocation10 + $0x10] sm:$0xff]  }
 0x90d   :  { %12031 = vpow2.f32 %v1825_v21 }
 0x90e   :  { %v12028_v23 = vpop.eup %12027  ;;  %12033 = vrcp.f32 %v1832_v31 }
 0x90f   :  { %v1827_v24 = vsel %vm783_vm3, %v12028_v23, 0.0 }
 0x910   :  { %1828 = vadd.xlane.f32.xlu0 %v1827_v24 }
 0x916   :  { %v12030_v25 = vpop.eup %12029 }
 0x917   :  { %v1833_v26 = vsel %vm783_vm3, %v12030_v25, 0.0 }
 0x918   :  { %1834 = vadd.xlane.f32.xlu0 %v1833_v26 }
 0x91a   :  { %v12032_v29 = vpop.eup %12031 }
 0x91b   :  { %v1836_v30 = vsel %vm783_vm3, %v12032_v29, 0.0  ;;  %v12034_v34 = vpop.eup %12033 }
 0x91c   :  { %1837 = vadd.xlane.f32.xlu1 %v1836_v30  ;;  %v1842_v47 = vmul.f32 %v12034_v34, %v12934_v46 }
 0x91e   :  { %v1848_v54 = vpack.c.bf16 %v1842_v47, %v1842_v47 }
 0x92d   :  { %1899 = vrot.lane.b32.xlu1 %v12743_v60, %s12529_s26 }
 0x92e   :  { %1851 = vrot.lane.b32.xlu0 %v12734_v56, %s12529_s26 }
 0x931   :  { %1947 = vrot.lane.b32.xlu1 %v12787_v2, %s12529_s26 }
 0x932   :  { %2112 = vrot.lane.b32.xlu0 %v12702_v27, %s12530_s17 }
 0x935   :  { %1995 = vrot.lane.b32.xlu1 %v12791_v6, %s12529_s26 }
 0x936   :  { %2110 = vrot.lane.b32.xlu0 %v12718_v45, %s12530_s17 }
 0x939   :  { %2162 = vrot.lane.b32.xlu1 %v12709_v36, %s12530_s17 }
 0x93a   :  { %2212 = vrot.lane.b32.xlu0 %v12716_v44, %s12530_s17 }
 0x93d   :  { %2160 = vrot.lane.b32.xlu1 %v12729_v53, %s12530_s17 }
 0x93e   :  { %2210 = vrot.lane.b32.xlu0 %v12740_v58, %s12530_s17 }
 0x941   :  { %2262 = vrot.lane.b32.xlu1 %v12725_v52, %s12530_s17 }
 0x945   :  { %2260 = vrot.lane.b32.xlu1 %v12751_v62, %s12530_s17 }
 0x999   :  { %v1829_v32 = vpop.xlane.xlu0 %1828 }
 0x99a   :  { %12035 = vrcp.f32 %v1829_v32 }
 0x9a1   :  { %v1835_v33 = vpop.xlane.xlu0 %1834 }
 0x9a2   :  { %12037 = vrcp.f32 %v1835_v33 }
 0x9a5   :  { %v1838_v38 = vpop.xlane.xlu1 %1837  ;;  %v1852_v40 = vpop.permute.xlu0 %1851 }
 0x9a6   :  { %12039 = vrcp.f32 %v1838_v38  ;;  %v1857_v43 = vsel %vm835_vm2, %v1852_v40, 0 }
 0x9a7   :  { %v12036_v35 = vpop.eup %12035  ;;  %11049 = vmatpush3.bf16.msra.mxu1 %v1857_v43 }
 0x9a8   :  { %v1840_v28 = vmul.f32 %v12036_v35, %v12028_v23  ;;  %11060 = vmatprep.subr.bf16.mxu1 %v12526_v14 }
 0x9a9   :  { %v1900_v49 = vpop.permute.xlu1 %1899  ;;  %v2113_v61 = vpop.permute.xlu0 %2112 }
 0x9aa   :  { %v1905_v50 = vsel %vm835_vm2, %v1900_v49, 0  ;;  %v1847_v51 = vpack.c.bf16 %v1840_v28, %v1840_v28  ;;  %v2118_v8 = vsel %vm594_vm1, %v2113_v61, 0 }
 0x9ab   :  { %11055 = vmatpush3.bf16.msra.mxu0 %v1905_v50 }
 0x9ac   :  { %11051 = vmatmul.mubr.msk.bf16.vlgmr.msra.gmra.mxu1 %vm783_vm3, %v1847_v51  ;;  %11066 = vmatprep.subr.bf16.mxu0 %v12526_v14 }
 0x9ad   :  { %v1948_v55 = vpop.permute.xlu1 %1947  ;;  %11062 = vmatprep.mubr.msk.bf16.mxu1 %vm12527_vm0, %v12526_v14  ;;  %v2111_v7 = vpop.permute.xlu0 %2110 }
 0x9ae   :  { %v1953_v57 = vsel %vm835_vm2, %v1948_v55, 0  ;;  %11057 = vmatmul.mubr.msk.bf16.vlgmr.msra.gmra.mxu0 %vm783_vm3, %v1848_v54 }
 0x9af   :  { %v12038_v46 = vpop.eup %12037  ;;  %11061 = vmatpush3.bf16.msra.mxu1 %v1953_v57  ;;  %11068 = vmatprep.mubr.msk.bf16.mxu0 %vm12527_vm0, %v12526_v14 }
 0x9b0   :  { %v1844_v59 = vmul.f32 %v12038_v46, %v12030_v25  ;;  %11072 = vmatprep.subr.bf16.mxu1 %v11859_v18 }
 0x9b1   :  { %v1996_v63 = vpop.permute.xlu1 %1995  ;;  %v2213_v37 = vpop.permute.xlu0 %2212 }
 0x9b2   :  { %v2001_v0 = vsel %vm835_vm2, %v1996_v63, 0  ;;  %v1849_v1 = vpack.c.bf16 %v1844_v59, %v1844_v59  ;;  %v2218_v10 = vsel %vm594_vm1, %v2213_v37, 0 }
 0x9b3   :  { %v12040_v3 = vpop.eup %12039  ;;  %11067 = vmatpush3.bf16.msra.mxu0 %v2001_v0 }
 0x9b4   :  { %11063 = vmatmul.mubr.msk.bf16.vlgmr.msra.gmra.mxu1 %vm783_vm3, %v1849_v1  ;;  %11078 = vmatprep.subr.bf16.mxu0 %v12526_v14  ;;  %v1846_v4 = vmul.f32 %v12040_v3, %v12032_v29 }
 0x9b5   :  { %v2211_v12 = vpop.permute.xlu0 %2210  ;;  %11073 = vmatpush3.bf16.msra.mxu1 %v11859_v18  ;;  %v2163_v32 = vpop.permute.xlu1 %2162  ;;  %v1593_v18 = vadd.f32 %v12917_v13, %v12938_v41 }
 0x9b6   :  { %v1850_v5 = vpack.c.bf16 %v1846_v4, %v1846_v4  ;;  %11084 = vmatprep.subr.bf16.mxu1 %v12526_v14  ;;  %v2168_v50 = vsel %vm594_vm1, %v2163_v32, 0 }
 0x9b8   :  { %11069 = vmatmul.mubr.msk.bf16.vlgmr.msra.gmra.mxu0 %vm783_vm3, %v1850_v5 }
 0x9b9   :  { %11079 = vmatpush3.bf16.xpose.msra.mxu0 %v2118_v8  ;;  %11080 = vmatprep.mubr.msk.bf16.mxu0 %vm12527_vm0, %v12526_v14  ;;  %v2161_v35 = vpop.permute.xlu1 %2160 }
 0x9ba   :  { %11090 = vmatprep.subr.bf16.mxu0 %v12526_v14 }
 0x9bd   :  { %v2263_v55 = vpop.permute.xlu1 %2262 }
 0x9be   :  { %v2268_v61 = vsel %vm594_vm1, %v2263_v55, 0 }
 0x9c0   :  { %11081 = vmatmul.mubr.msk.bf16.vlgmr.msra.gmra.mxu0 %vm594_vm1, %v2111_v7 }
 0x9c1   :  { %11091 = vmatpush3.bf16.xpose.msra.mxu0 %v2218_v10  ;;  %11092 = vmatprep.mubr.msk.bf16.mxu0 %vm12527_vm0, %v12526_v14  ;;  %v2261_v5 = vpop.permute.xlu1 %2260 }
 0x9c2   :  { %11102 = vmatprep.subr.bf16.mxu0 %v12526_v14 }
 0x9c8   :  { %11093 = vmatmul.mubr.msk.bf16.vlgmr.msra.gmra.mxu0 %vm594_vm1, %v2211_v12 }
 0x9c9   :  { %11104 = vmatprep.mubr.msk.bf16.mxu0 %vm12527_vm0, %v12526_v14 }
 0xa6c   :  { %v1893_v21 = vpop.f32.mrf.mxu1 }
 0xa6e   :  { %v11052_v23 = vpop.f32.mrf.mxu1  ;;  %v1941_v24 = vpop.f32.mrf.mxu0 }
 0xa6f   :  { %v2043_v25 = vpack.c.bf16 %v1941_v24, %v1893_v21 }
 0xa70   :  { %v1896_v26 = vpop.f32.mrf.mxu1  ;;  %v11058_v29 = vpop.f32.mrf.mxu0 }
 0xa71   :  { %11074 = vmatprep.mubr.msk.bf16.mxu1 %vm594_vm1, %v2043_v25  ;;  %v1585_v25 = vadd.f32 %v12919_v11, %v12940_v42 }
 0xa72   :  { %v11053_v30 = vpop.f32.mrf.mxu1  ;;  %v1944_v31 = vpop.f32.mrf.mxu0 }
 0xa73   :  { %v1596_v30 = vadd.f32 %v12923_v19, %v12942_v48 }
 0xa74   :  { %v11059_v33 = vpop.f32.mrf.mxu0  ;;  %v1989_v34 = vpop.f32.mrf.mxu1 }
 0xa76   :  { %v11064_v38 = vpop.f32.mrf.mxu1 }
 0xa78   :  { %v1992_v40 = vpop.f32.mrf.mxu1  ;;  %v2037_v43 = vpop.f32.mrf.mxu0 }
 0xa79   :  { %v2044_v28 = vpack.c.bf16 %v2037_v43, %v1989_v34 }
 0xa7a   :  { %v11065_v47 = vpop.f32.mrf.mxu1  ;;  %v11070_v49 = vpop.f32.mrf.mxu0 }
 0xa7b   :  { %11075 = vmatmul.mubr.msk.bf16.vlgmr.msra.gmra.mxu1 %vm594_vm1, %v2044_v28 }
 0xa7c   :  { %11085 = vmatpush3.bf16.xpose.msra.mxu1 %v2168_v50  ;;  %v2040_v51 = vpop.f32.mrf.mxu0  ;;  %11086 = vmatprep.mubr.msk.bf16.mxu1 %vm12527_vm0, %v12526_v14 }
 0xa7d   :  { %11096 = vmatprep.subr.bf16.mxu1 %v12526_v14 }
 0xa7e   :  { %v11071_v54 = vpop.f32.mrf.mxu0 }
 0xa80   :  { %v2154_v57 = vpop.f32.mrf.mxu0 }
 0xa81   :  { %v2310_v46 = vmul.f32 0.25, %v2154_v57 }
 0xa82   :  { %v11082_v59 = vpop.f32.mrf.mxu0 }
 0xa83   :  { %11087 = vmatmul.mubr.msk.bf16.vlgmr.msra.gmra.mxu1 %vm594_vm1, %v2161_v35  ;;  %v2314_v63 = vsel %vm783_vm3, %v2310_v46, -inf }
 0xa84   :  { %11097 = vmatpush3.bf16.xpose.msra.mxu1 %v2268_v61  ;;  %2315 = vmax.xlane.f32.xlu0 %v2314_v63  ;;  %v2157_v0 = vpop.f32.mrf.mxu0 }
 0xa85   :  { %11098 = vmatprep.mubr.msk.bf16.mxu1 %vm12527_vm0, %v12526_v14  ;;  %11108 = vmatprep.subr.bf16.mxu1 %v12526_v14 }
 0xa86   :  { %v11083_v1 = vpop.f32.mrf.mxu0 }
 0xa88   :  { %v2254_v3 = vpop.f32.mrf.mxu0 }
 0xa89   :  { %v2312_v4 = vmul.f32 0.25, %v2254_v3 }
 0xa8a   :  { %v11094_v7 = vpop.f32.mrf.mxu0 }
 0xa8b   :  { %11099 = vmatmul.mubr.msk.bf16.vlgmr.msra.gmra.mxu1 %vm594_vm1, %v2261_v5  ;;  %v2320_v8 = vsel %vm783_vm3, %v2312_v4, -inf }
 0xa8c   :  { %2321 = vmax.xlane.f32.xlu0 %v2320_v8  ;;  %v2257_v37 = vpop.f32.mrf.mxu0  ;;  %11110 = vmatprep.mubr.msk.bf16.mxu1 %vm12527_vm0, %v12526_v14 }
 0xa8e   :  { %v11095_v10 = vpop.f32.mrf.mxu0 }
 0xb0d   :  { %v2316_v12 = vpop.xlane.xlu0 %2315 }
 0xb0e   :  { %v2326_v21 = vsub.f32 %v2310_v46, %v2316_v12 }
 0xb10   :  { %v2330_v31 = vmul.f32 1.442695, %v2326_v21 }
 0xb12   :  { %12041 = vpow2.f32 %v2330_v31 }
 0xb15   :  { %v2322_v23 = vpop.xlane.xlu0 %2321 }
 0xb16   :  { %v2328_v32 = vsub.f32 %v2312_v4, %v2322_v23 }
 0xb18   :  { %v2334_v41 = vmul.f32 1.442695, %v2328_v32 }
 0xb1a   :  { %12043 = vpow2.f32 %v2334_v41 }
 0xb1f   :  { %v12042_v50 = vpop.eup %12041 }
 0xb20   :  { %v2338_v55 = vsel %vm783_vm3, %v12042_v50, 0.0 }
 0xb27   :  { %v12044_v57 = vpop.eup %12043 }
 0xb28   :  { %v2344_v46 = vsel %vm783_vm3, %v12044_v57, 0.0 }
 0xb3b   :  { %v11076_v24 = vpop.f32.mrf.mxu1 }
 0xb3c   :  { %v13025_v26 = vadd.f32 %v11076_v24, %v1593_v18 }
 0xb3d   :  { %v2091_v29 = vpop.f32.mrf.mxu1 }
 0xb3e   :  { %v13029_v33 = vadd.f32 %v2091_v29, %v1585_v25 }
 0xb3f   :  { %v11077_v34 = vpop.f32.mrf.mxu1 }
 0xb40   :  { %v13031_v38 = vadd.f32 %v11077_v34, %v1596_v30 }
 0xb41   :  { %v13033_v13 = vpop.f32.mrf.mxu1 }
 0xb43   :  { %v2204_v40 = vpop.f32.mrf.mxu1 }
 0xb44   :  { %v2311_v43 = vmul.f32 0.25, %v2204_v40 }
 0xb45   :  { %v11088_v11 = vpop.f32.mrf.mxu1 }
 0xb46   :  { %v2317_v42 = vsel %vm783_vm3, %v2311_v43, -inf }
 0xb47   :  { %2318 = vmax.xlane.f32.xlu1 %v2317_v42  ;;  %v2207_v35 = vpop.f32.mrf.mxu1 }
 0xb49   :  { %v11089_v19 = vpop.f32.mrf.mxu1 }
 0xb4b   :  { %v2304_v48 = vpop.f32.mrf.mxu1 }
 0xb4c   :  { %v2313_v28 = vmul.f32 0.25, %v2304_v48 }
 0xb4d   :  { %v11100_v47 = vpop.f32.mrf.mxu1 }
 0xb4e   :  { %v2323_v49 = vsel %vm783_vm3, %v2313_v28, -inf }
 0xb4f   :  { %2324 = vmax.xlane.f32.xlu0 %v2323_v49  ;;  %v2307_v51 = vpop.f32.mrf.mxu1 }
 0xb51   :  { %v11101_v54 = vpop.f32.mrf.mxu1 }
 0xb53   :  { %2339 = vadd.xlane.f32.xlu0 %v2338_v55 }
 0xb57   :  { %2345 = vadd.xlane.f32.xlu0 %v2344_v46 }
 0xb58   :  { %2410 = vrot.lane.b32.xlu1 %v12743_v60, %s12530_s17 }
 0xb5c   :  { %2458 = vrot.lane.b32.xlu1 %v12787_v2, %s12530_s17 }
 0xb6d   :  { %2362 = vrot.lane.b32.xlu0 %v12734_v56, %s12530_s17 }
 0xb71   :  { %2623 = vrot.lane.b32.xlu0 %v12702_v27, %s12521_s1 }
 0xb75   :  { %2621 = vrot.lane.b32.xlu0 %v12718_v45, %s12521_s1 }
 0xb79   :  { %2723 = vrot.lane.b32.xlu0 %v12716_v44, %s12521_s1 }
 0xb7d   :  { %2721 = vrot.lane.b32.xlu0 %v12740_v58, %s12521_s1 }
 0xbd0   :  { %v2319_v59 = vpop.xlane.xlu1 %2318 }
 0xbd1   :  { %v2327_v61 = vsub.f32 %v2311_v43, %v2319_v59 }
 0xbd3   :  { %v2332_v63 = vmul.f32 1.442695, %v2327_v61 }
 0xbd4   :  { %v2411_v0 = vpop.permute.xlu1 %2410 }
 0xbd5   :  { %12045 = vpow2.f32 %v2332_v63  ;;  %v2416_v1 = vsel %vm835_vm2, %v2411_v0, 0 }
 0xbd6   :  { %11109 = vmatpush3.bf16.msra.mxu1 %v2416_v1 }
 0xbd7   :  { %11120 = vmatprep.subr.bf16.mxu1 %v12526_v14 }
 0xbd8   :  { %v2325_v3 = vpop.xlane.xlu0 %2324  ;;  %v2459_v29 = vpop.permute.xlu1 %2458 }
 0xbd9   :  { %v2329_v4 = vsub.f32 %v2313_v28, %v2325_v3  ;;  %v2464_v32 = vsel %vm835_vm2, %v2459_v29, 0 }
 0xbdb   :  { %v2336_v5 = vmul.f32 1.442695, %v2329_v4 }
 0xbdc   :  { %v2340_v7 = vpop.xlane.xlu0 %2339 }
 0xbdd   :  { %12047 = vpow2.f32 %v2336_v5 }
 0xbde   :  { %12049 = vrcp.f32 %v2340_v7  ;;  %v11860_v7 = vld [vmem:[#allocation10 + $0x18] sm:$0xff]  }
 0xbe0   :  { %v2346_v8 = vpop.xlane.xlu0 %2345 }
 0xbe1   :  { %12051 = vrcp.f32 %v2346_v8 }
 0xbe2   :  { %v12046_v37 = vpop.eup %12045 }
 0xbe3   :  { %v2341_v10 = vsel %vm783_vm3, %v12046_v37, 0.0 }
 0xbe4   :  { %2342 = vadd.xlane.f32.xlu1 %v2341_v10  ;;  %v2363_v12 = vpop.permute.xlu0 %2362 }
 0xbe5   :  { %v2368_v18 = vsel %vm835_vm2, %v2363_v12, 0 }
 0xbe6   :  { %11103 = vmatpush3.bf16.msra.mxu0 %v2368_v18 }
 0xbe7   :  { %11114 = vmatprep.subr.bf16.mxu0 %v12526_v14 }
 0xbe8   :  { %v2624_v28 = vpop.permute.xlu0 %2623 }
 0xbe9   :  { %v2629_v54 = vsel %vm594_vm1, %v2624_v28, 0 }
 0xbea   :  { %v12048_v21 = vpop.eup %12047 }
 0xbeb   :  { %v12050_v23 = vpop.eup %12049  ;;  %v2347_v24 = vsel %vm783_vm3, %v12048_v21, 0.0 }
 0xbec   :  { %2348 = vadd.xlane.f32.xlu1 %v2347_v24  ;;  %v2351_v25 = vmul.f32 %v12050_v23, %v12042_v50  ;;  %v2622_v51 = vpop.permute.xlu0 %2621 }
 0xbee   :  { %v2358_v30 = vpack.c.bf16 %v2351_v25, %v2351_v25  ;;  %v12052_v31 = vpop.eup %12051 }
 0xbef   :  { %v2355_v34 = vmul.f32 %v12052_v31, %v12044_v57 }
 0xbf0   :  { %11105 = vmatmul.mubr.msk.bf16.vlgmr.msra.gmra.mxu0 %vm783_vm3, %v2358_v30  ;;  %v2724_v55 = vpop.permute.xlu0 %2723 }
 0xbf1   :  { %11115 = vmatpush3.bf16.msra.mxu0 %v2464_v32  ;;  %11116 = vmatprep.mubr.msk.bf16.mxu0 %vm12527_vm0, %v12526_v14  ;;  %v2360_v41 = vpack.c.bf16 %v2355_v34, %v2355_v34  ;;  %v2729_v57 = vsel %vm594_vm1, %v2724_v55, 0 }
 0xbf2   :  { %11126 = vmatprep.subr.bf16.mxu0 %v11860_v7 }
 0xbf4   :  { %v2722_v46 = vpop.permute.xlu0 %2721 }
 0xbf8   :  { %11117 = vmatmul.mubr.msk.bf16.vlgmr.msra.gmra.mxu0 %vm783_vm3, %v2360_v41 }
 0xbf9   :  { %11127 = vmatpush3.bf16.msra.mxu0 %v11860_v7 }
 0xbfa   :  { %11138 = vmatprep.subr.bf16.mxu0 %v12526_v14 }
 0xbfd   :  { %2506 = vrot.lane.b32.xlu1 %v12791_v6, %s12530_s17 }
 0xc01   :  { %2673 = vrot.lane.b32.xlu1 %v12709_v36, %s12521_s1 }
 0xc05   :  { %2671 = vrot.lane.b32.xlu1 %v12729_v53, %s12521_s1 }
 0xc09   :  { %2773 = vrot.lane.b32.xlu1 %v12725_v52, %s12521_s1 }
 0xc0d   :  { %2771 = vrot.lane.b32.xlu1 %v12751_v62, %s12521_s1 }
 0xc6d   :  { %v2343_v40 = vpop.xlane.xlu1 %2342 }
 0xc6e   :  { %12053 = vrcp.f32 %v2343_v40 }
 0xc75   :  { %v2349_v43 = vpop.xlane.xlu1 %2348 }
 0xc76   :  { %12055 = vrcp.f32 %v2349_v43 }
 0xc79   :  { %v2507_v35 = vpop.permute.xlu1 %2506 }
 0xc7a   :  { %v2512_v48 = vsel %vm835_vm2, %v2507_v35, 0 }
 0xc7b   :  { %v12054_v11 = vpop.eup %12053 }
 0xc7c   :  { %v2353_v42 = vmul.f32 %v12054_v11, %v12046_v37 }
 0xc7d   :  { %v2674_v12 = vpop.permute.xlu1 %2673 }
 0xc7e   :  { %v2359_v19 = vpack.c.bf16 %v2353_v42, %v2353_v42  ;;  %v2679_v30 = vsel %vm594_vm1, %v2674_v12, 0 }
 0xc80   :  { %11111 = vmatmul.mubr.msk.bf16.vlgmr.msra.gmra.mxu1 %vm783_vm3, %v2359_v19 }
 0xc81   :  { %11121 = vmatpush3.bf16.msra.mxu1 %v2512_v48  ;;  %11122 = vmatprep.mubr.msk.bf16.mxu1 %vm12527_vm0, %v12526_v14  ;;  %v2672_v25 = vpop.permute.xlu1 %2671 }
 0xc82   :  { %11132 = vmatprep.subr.bf16.mxu1 %v12526_v14 }
 0xc83   :  { %v12056_v47 = vpop.eup %12055 }
 0xc84   :  { %v2357_v49 = vmul.f32 %v12056_v47, %v12048_v21 }
 0xc85   :  { %v2774_v34 = vpop.permute.xlu1 %2773 }
 0xc86   :  { %v2361_v50 = vpack.c.bf16 %v2357_v49, %v2357_v49  ;;  %v2779_v11 = vsel %vm594_vm1, %v2774_v34, 0 }
 0xc88   :  { %11123 = vmatmul.mubr.msk.bf16.vlgmr.msra.gmra.mxu1 %vm783_vm3, %v2361_v50 }
 0xc89   :  { %11133 = vmatpush3.bf16.xpose.msra.mxu1 %v2629_v54  ;;  %11134 = vmatprep.mubr.msk.bf16.mxu1 %vm12527_vm0, %v12526_v14  ;;  %v2772_v47 = vpop.permute.xlu1 %2771 }
 0xc8a   :  { %11144 = vmatprep.subr.bf16.mxu1 %v12526_v14 }
 0xc90   :  { %11135 = vmatmul.mubr.msk.bf16.vlgmr.msra.gmra.mxu1 %vm594_vm1, %v2622_v51 }
 0xc91   :  { %11145 = vmatpush3.bf16.xpose.msra.mxu1 %v2729_v57  ;;  %11146 = vmatprep.mubr.msk.bf16.mxu1 %vm12527_vm0, %v12526_v14 }
 0xc92   :  { %11156 = vmatprep.subr.bf16.mxu1 %v12526_v14 }
 0xc98   :  { %11147 = vmatmul.mubr.msk.bf16.vlgmr.msra.gmra.mxu1 %vm594_vm1, %v2722_v46 }
 0xc99   :  { %11158 = vmatprep.mubr.msk.bf16.mxu1 %vm12527_vm0, %v12526_v14 }
 0xcb0   :  { %v2404_v59 = vpop.f32.mrf.mxu0 }
 0xcb2   :  { %v11106_v61 = vpop.f32.mrf.mxu0 }
 0xcb4   :  { %v2407_v63 = vpop.f32.mrf.mxu0 }
 0xcb6   :  { %v11107_v0 = vpop.f32.mrf.mxu0 }
 0xcb8   :  { %v2500_v1 = vpop.f32.mrf.mxu0 }
 0xcba   :  { %v11118_v3 = vpop.f32.mrf.mxu0 }
 0xcbc   :  { %v2503_v4 = vpop.f32.mrf.mxu0 }
 0xcbe   :  { %v11119_v5 = vpop.f32.mrf.mxu0 }
 0xd40   :  { %v2452_v8 = vpop.f32.mrf.mxu1 }
 0xd41   :  { %v2554_v37 = vpack.c.bf16 %v2452_v8, %v2404_v59 }
 0xd42   :  { %v11112_v10 = vpop.f32.mrf.mxu1 }
 0xd43   :  { %11128 = vmatprep.mubr.msk.bf16.mxu0 %vm594_vm1, %v2554_v37 }
 0xd44   :  { %v2455_v18 = vpop.f32.mrf.mxu1 }
 0xd46   :  { %v11113_v21 = vpop.f32.mrf.mxu1 }
 0xd48   :  { %v2548_v23 = vpop.f32.mrf.mxu1 }
 0xd49   :  { %v2555_v24 = vpack.c.bf16 %v2548_v23, %v2500_v1 }
 0xd4a   :  { %v11124_v29 = vpop.f32.mrf.mxu1 }
 0xd4b   :  { %11129 = vmatmul.mubr.msk.bf16.vlgmr.msra.gmra.mxu0 %vm594_vm1, %v2555_v24 }
 0xd4c   :  { %11139 = vmatpush3.bf16.xpose.msra.mxu0 %v2679_v30  ;;  %v2551_v31 = vpop.f32.mrf.mxu1  ;;  %11140 = vmatprep.mubr.msk.bf16.mxu0 %vm12527_vm0, %v12526_v14 }
 0xd4d   :  { %11150 = vmatprep.subr.bf16.mxu0 %v12526_v14 }
 0xd4e   :  { %v11125_v32 = vpop.f32.mrf.mxu1 }
 0xd50   :  { %v2665_v41 = vpop.f32.mrf.mxu1 }
 0xd51   :  { %v2821_v40 = vmul.f32 0.25, %v2665_v41 }
 0xd52   :  { %v11136_v43 = vpop.f32.mrf.mxu1 }
 0xd53   :  { %11141 = vmatmul.mubr.msk.bf16.vlgmr.msra.gmra.mxu0 %vm594_vm1, %v2672_v25  ;;  %v2825_v42 = vsel %vm783_vm3, %v2821_v40, -inf }
 0xd54   :  { %11151 = vmatpush3.bf16.xpose.msra.mxu0 %v2779_v11  ;;  %2826 = vmax.xlane.f32.xlu0 %v2825_v42  ;;  %v2668_v35 = vpop.f32.mrf.mxu1 }
 0xd55   :  { %11152 = vmatprep.mubr.msk.bf16.mxu0 %vm12527_vm0, %v12526_v14  ;;  %11162 = vmatprep.subr.bf16.mxu0 %v12526_v14 }
 0xd56   :  { %v11137_v19 = vpop.f32.mrf.mxu1 }
 0xd58   :  { %v2765_v48 = vpop.f32.mrf.mxu1 }
 0xd59   :  { %v2823_v28 = vmul.f32 0.25, %v2765_v48 }
 0xd5a   :  { %v11148_v49 = vpop.f32.mrf.mxu1 }
 0xd5b   :  { %11153 = vmatmul.mubr.msk.bf16.vlgmr.msra.gmra.mxu0 %vm594_vm1, %v2772_v47  ;;  %v2831_v50 = vsel %vm783_vm3, %v2823_v28, -inf }
 0xd5c   :  { %2832 = vmax.xlane.f32.xlu0 %v2831_v50  ;;  %v2768_v51 = vpop.f32.mrf.mxu1  ;;  %11164 = vmatprep.mubr.msk.bf16.mxu0 %vm12527_vm0, %v12526_v14 }
 0xd5e   :  { %v11149_v54 = vpop.f32.mrf.mxu1 }
 0xddd   :  { %v2827_v55 = vpop.xlane.xlu0 %2826 }
 0xdde   :  { %v2837_v57 = vsub.f32 %v2821_v40, %v2827_v55 }
 0xde0   :  { %v2841_v0 = vmul.f32 1.442695, %v2837_v57 }
 0xde2   :  { %12057 = vpow2.f32 %v2841_v0 }
 0xde5   :  { %v2833_v46 = vpop.xlane.xlu0 %2832 }
 0xde6   :  { %v2839_v1 = vsub.f32 %v2823_v28, %v2833_v46 }
 0xde8   :  { %v2845_v8 = vmul.f32 1.442695, %v2839_v1 }
 0xdea   :  { %12059 = vpow2.f32 %v2845_v8 }
 0xe0b   :  { %v11130_v59 = vpop.f32.mrf.mxu0 }
 0xe0c   :  { %v13110_v61 = vadd.f32 %v11130_v59, %v13025_v26 }
 0xe0d   :  { %v2602_v63 = vpop.f32.mrf.mxu0 }
 0xe0e   :  { %v13113_v3 = vadd.f32 %v2602_v63, %v13029_v33 }
 0xe0f   :  { %v11131_v4 = vpop.f32.mrf.mxu0 }
 0xe10   :  { %v13116_v5 = vadd.f32 %v11131_v4, %v13031_v38  ;;  %v12058_v38 = vpop.eup %12057 }
 0xe11   :  { %v13118_v7 = vpop.f32.mrf.mxu0  ;;  %v2849_v31 = vsel %vm783_vm3, %v12058_v38, 0.0  ;;  %v12060_v32 = vpop.eup %12059 }
 0xe12   :  { %v2855_v34 = vsel %vm783_vm3, %v12060_v32, 0.0 }
 0xe13   :  { %v2715_v37 = vpop.f32.mrf.mxu0 }
 0xe14   :  { %v2822_v10 = vmul.f32 0.25, %v2715_v37 }
 0xe15   :  { %v11142_v12 = vpop.f32.mrf.mxu0 }
 0xe16   :  { %v2828_v26 = vsel %vm783_vm3, %v2822_v10, -inf }
 0xe17   :  { %2829 = vmax.xlane.f32.xlu1 %v2828_v26  ;;  %v2718_v18 = vpop.f32.mrf.mxu0 }
 0xe19   :  { %v11143_v21 = vpop.f32.mrf.mxu0 }
 0xe1b   :  { %v2815_v23 = vpop.f32.mrf.mxu0 }
 0xe1c   :  { %v2824_v33 = vmul.f32 0.25, %v2815_v23 }
 0xe1d   :  { %v11154_v24 = vpop.f32.mrf.mxu0 }
 0xe1e   :  { %v2834_v25 = vsel %vm783_vm3, %v2824_v33, -inf }
 0xe1f   :  { %v2818_v29 = vpop.f32.mrf.mxu0  ;;  %2835 = vmax.xlane.f32.xlu0 %v2834_v25 }
 0xe21   :  { %v11155_v30 = vpop.f32.mrf.mxu0 }
 0xe23   :  { %2850 = vadd.xlane.f32.xlu0 %v2849_v31 }
 0xe27   :  { %2856 = vadd.xlane.f32.xlu0 %v2855_v34 }
 0xe28   :  { %2921 = vrot.lane.b32.xlu1 %v12743_v60, %s12521_s1 }
 0xe2c   :  { %2969 = vrot.lane.b32.xlu1 %v12787_v2, %s12521_s1 }
 0xe3d   :  { %2873 = vrot.lane.b32.xlu0 %v12734_v56, %s12521_s1 }
 0xe41   :  { %3134 = vrot.lane.b32.xlu0 %v12702_v27, %s12531_s18 }
 0xe45   :  { %3132 = vrot.lane.b32.xlu0 %v12718_v45, %s12531_s18 }
 0xe49   :  { %3234 = vrot.lane.b32.xlu0 %v12716_v44, %s12531_s18 }
 0xe4d   :  { %3232 = vrot.lane.b32.xlu0 %v12740_v58, %s12531_s18 }
 0xea0   :  { %v2830_v41 = vpop.xlane.xlu1 %2829 }
 0xea1   :  { %v2838_v40 = vsub.f32 %v2822_v10, %v2830_v41 }
 0xea3   :  { %v2843_v43 = vmul.f32 1.442695, %v2838_v40 }
 0xea4   :  { %v2922_v11 = vpop.permute.xlu1 %2921 }
 0xea5   :  { %12061 = vpow2.f32 %v2843_v43  ;;  %v2927_v42 = vsel %vm835_vm2, %v2922_v11, 0 }
 0xea6   :  { %11163 = vmatpush3.bf16.msra.mxu0 %v2927_v42 }
 0xea7   :  { %11174 = vmatprep.subr.bf16.mxu0 %v12526_v14 }
 0xea8   :  { %v2836_v35 = vpop.xlane.xlu0 %2835  ;;  %v2970_v63 = vpop.permute.xlu1 %2969 }
 0xea9   :  { %v2840_v19 = vsub.f32 %v2824_v33, %v2836_v35  ;;  %v2975_v4 = vsel %vm835_vm2, %v2970_v63, 0 }
 0xeab   :  { %v2847_v48 = vmul.f32 1.442695, %v2840_v19 }
 0xeac   :  { %v2851_v28 = vpop.xlane.xlu0 %2850 }
 0xead   :  { %12063 = vpow2.f32 %v2847_v48 }
 0xeae   :  { %12065 = vrcp.f32 %v2851_v28 }
 0xeb0   :  { %v2857_v47 = vpop.xlane.xlu0 %2856 }
 0xeb1   :  { %12067 = vrcp.f32 %v2857_v47  ;;  %v11861_v47 = vld [vmem:[#allocation10 + $0x20] sm:$0xff]  }
 0xeb2   :  { %v12062_v49 = vpop.eup %12061 }
 0xeb3   :  { %v2852_v50 = vsel %vm783_vm3, %v12062_v49, 0.0 }
 0xeb4   :  { %2853 = vadd.xlane.f32.xlu1 %v2852_v50  ;;  %v2874_v51 = vpop.permute.xlu0 %2873 }
 0xeb5   :  { %v2879_v54 = vsel %vm835_vm2, %v2874_v51, 0 }
 0xeb6   :  { %11157 = vmatpush3.bf16.msra.mxu1 %v2879_v54 }
 0xeb7   :  { %11168 = vmatprep.subr.bf16.mxu1 %v12526_v14 }
 0xeb8   :  { %v3135_v24 = vpop.permute.xlu0 %3134 }
 0xeb9   :  { %v3140_v31 = vsel %vm594_vm1, %v3135_v24, 0 }
 0xeba   :  { %v12064_v55 = vpop.eup %12063 }
 0xebb   :  { %v12066_v57 = vpop.eup %12065  ;;  %v2858_v46 = vsel %vm783_vm3, %v12064_v55, 0.0 }
 0xebc   :  { %2859 = vadd.xlane.f32.xlu1 %v2858_v46  ;;  %v2862_v59 = vmul.f32 %v12066_v57, %v12058_v38  ;;  %v3133_v30 = vpop.permute.xlu0 %3132 }
 0xebe   :  { %v2869_v0 = vpack.c.bf16 %v2862_v59, %v2862_v59  ;;  %v12068_v1 = vpop.eup %12067 }
 0xebf   :  { %v2866_v8 = vmul.f32 %v12068_v1, %v12060_v32 }
 0xec0   :  { %11159 = vmatmul.mubr.msk.bf16.vlgmr.msra.gmra.mxu1 %vm783_vm3, %v2869_v0  ;;  %v3235_v32 = vpop.permute.xlu0 %3234 }
 0xec1   :  { %11169 = vmatpush3.bf16.msra.mxu1 %v2975_v4  ;;  %11170 = vmatprep.mubr.msk.bf16.mxu1 %vm12527_vm0, %v12526_v14  ;;  %v2871_v37 = vpack.c.bf16 %v2866_v8, %v2866_v8  ;;  %v3240_v34 = vsel %vm594_vm1, %v3235_v32, 0 }
 0xec2   :  { %11180 = vmatprep.subr.bf16.mxu1 %v11861_v47 }
 0xec4   :  { %v3233_v41 = vpop.permute.xlu0 %3232 }
 0xec8   :  { %11171 = vmatmul.mubr.msk.bf16.vlgmr.msra.gmra.mxu1 %vm783_vm3, %v2871_v37 }
 0xec9   :  { %11181 = vmatpush3.bf16.msra.mxu1 %v11861_v47 }
 0xeca   :  { %11192 = vmatprep.subr.bf16.mxu1 %v12526_v14 }
 0xecd   :  { %3017 = vrot.lane.b32.xlu1 %v12791_v6, %s12521_s1 }
 0xed1   :  { %3184 = vrot.lane.b32.xlu1 %v12709_v36, %s12531_s18 }
 0xed5   :  { %3182 = vrot.lane.b32.xlu1 %v12729_v53, %s12531_s18 }
 0xed9   :  { %3284 = vrot.lane.b32.xlu1 %v12725_v52, %s12531_s18 }
 0xedd   :  { %3282 = vrot.lane.b32.xlu1 %v12751_v62, %s12531_s18 }
 0xf3d   :  { %v2854_v10 = vpop.xlane.xlu1 %2853 }
 0xf3e   :  { %12069 = vrcp.f32 %v2854_v10 }
 0xf45   :  { %v2860_v12 = vpop.xlane.xlu1 %2859 }
 0xf46   :  { %12071 = vrcp.f32 %v2860_v12 }
 0xf49   :  { %v3018_v21 = vpop.permute.xlu1 %3017 }
 0xf4a   :  { %v3023_v33 = vsel %vm835_vm2, %v3018_v21, 0 }
 0xf4b   :  { %v12070_v26 = vpop.eup %12069 }
 0xf4c   :  { %v2864_v18 = vmul.f32 %v12070_v26, %v12062_v49 }
 0xf4d   :  { %v3185_v54 = vpop.permute.xlu1 %3184 }
 0xf4e   :  { %v2870_v23 = vpack.c.bf16 %v2864_v18, %v2864_v18  ;;  %v3190_v1 = vsel %vm594_vm1, %v3185_v54, 0 }
 0xf50   :  { %11165 = vmatmul.mubr.msk.bf16.vlgmr.msra.gmra.mxu0 %vm783_vm3, %v2870_v23 }
 0xf51   :  { %11175 = vmatpush3.bf16.msra.mxu0 %v3023_v33  ;;  %11176 = vmatprep.mubr.msk.bf16.mxu0 %vm12527_vm0, %v12526_v14  ;;  %v3183_v63 = vpop.permute.xlu1 %3182 }
 0xf52   :  { %11186 = vmatprep.subr.bf16.mxu0 %v12526_v14 }
 0xf53   :  { %v12072_v25 = vpop.eup %12071 }
 0xf54   :  { %v2868_v38 = vmul.f32 %v12072_v25, %v12064_v55 }
 0xf55   :  { %v3285_v37 = vpop.permute.xlu1 %3284 }
 0xf56   :  { %v2872_v29 = vpack.c.bf16 %v2868_v38, %v2868_v38  ;;  %v3290_v18 = vsel %vm594_vm1, %v3285_v37, 0 }
 0xf58   :  { %11177 = vmatmul.mubr.msk.bf16.vlgmr.msra.gmra.mxu0 %vm783_vm3, %v2872_v29 }
 0xf59   :  { %11187 = vmatpush3.bf16.xpose.msra.mxu0 %v3140_v31  ;;  %11188 = vmatprep.mubr.msk.bf16.mxu0 %vm12527_vm0, %v12526_v14  ;;  %v3283_v38 = vpop.permute.xlu1 %3282 }
 0xf5a   :  { %11198 = vmatprep.subr.bf16.mxu0 %v12526_v14 }
 0xf60   :  { %11189 = vmatmul.mubr.msk.bf16.vlgmr.msra.gmra.mxu0 %vm594_vm1, %v3133_v30 }
 0xf61   :  { %11199 = vmatpush3.bf16.xpose.msra.mxu0 %v3240_v34  ;;  %11200 = vmatprep.mubr.msk.bf16.mxu0 %vm12527_vm0, %v12526_v14 }
 0xf62   :  { %11210 = vmatprep.subr.bf16.mxu0 %v12526_v14 }
 0xf68   :  { %11201 = vmatmul.mubr.msk.bf16.vlgmr.msra.gmra.mxu0 %vm594_vm1, %v3233_v41 }
 0xf69   :  { %11212 = vmatprep.mubr.msk.bf16.mxu0 %vm12527_vm0, %v12526_v14 }
 0xf80   :  { %v2915_v40 = vpop.f32.mrf.mxu1 }
 0xf82   :  { %v11160_v43 = vpop.f32.mrf.mxu1 }
 0xf84   :  { %v2918_v11 = vpop.f32.mrf.mxu1 }
 0xf86   :  { %v11161_v42 = vpop.f32.mrf.mxu1 }
 0xf88   :  { %v3011_v35 = vpop.f32.mrf.mxu1 }
 0xf8a   :  { %v11172_v19 = vpop.f32.mrf.mxu1 }
 0xf8c   :  { %v3014_v48 = vpop.f32.mrf.mxu1 }
 0xf8e   :  { %v11173_v28 = vpop.f32.mrf.mxu1 }
0x1010   :  { %v2963_v49 = vpop.f32.mrf.mxu0 }
0x1011   :  { %v3065_v50 = vpack.c.bf16 %v2963_v49, %v2915_v40 }
0x1012   :  { %v11166_v51 = vpop.f32.mrf.mxu0 }
0x1013   :  { %11182 = vmatprep.mubr.msk.bf16.mxu1 %vm594_vm1, %v3065_v50 }
0x1014   :  { %v2966_v55 = vpop.f32.mrf.mxu0 }
0x1016   :  { %v11167_v57 = vpop.f32.mrf.mxu0 }
0x1018   :  { %v3059_v46 = vpop.f32.mrf.mxu0 }
0x1019   :  { %v3066_v59 = vpack.c.bf16 %v3059_v46, %v3011_v35 }
0x101a   :  { %v11178_v0 = vpop.f32.mrf.mxu0 }
0x101b   :  { %11183 = vmatmul.mubr.msk.bf16.vlgmr.msra.gmra.mxu1 %vm594_vm1, %v3066_v59 }
0x101c   :  { %11193 = vmatpush3.bf16.xpose.msra.mxu1 %v3190_v1  ;;  %v3062_v4 = vpop.f32.mrf.mxu0  ;;  %11194 = vmatprep.mubr.msk.bf16.mxu1 %vm12527_vm0, %v12526_v14 }
0x101d   :  { %11204 = vmatprep.subr.bf16.mxu1 %v12526_v14 }
0x101e   :  { %v11179_v8 = vpop.f32.mrf.mxu0 }
0x1020   :  { %v3176_v10 = vpop.f32.mrf.mxu0 }
0x1021   :  { %v3332_v12 = vmul.f32 0.25, %v3176_v10 }
0x1022   :  { %v11190_v26 = vpop.f32.mrf.mxu0 }
0x1023   :  { %11195 = vmatmul.mubr.msk.bf16.vlgmr.msra.gmra.mxu1 %vm594_vm1, %v3183_v63  ;;  %v3336_v21 = vsel %vm783_vm3, %v3332_v12, -inf }
0x1024   :  { %11205 = vmatpush3.bf16.xpose.msra.mxu1 %v3290_v18  ;;  %3337 = vmax.xlane.f32.xlu0 %v3336_v21  ;;  %v3179_v23 = vpop.f32.mrf.mxu0 }
0x1025   :  { %11206 = vmatprep.mubr.msk.bf16.mxu1 %vm12527_vm0, %v12526_v14  ;;  %11216 = vmatprep.subr.bf16.mxu1 %v12526_v14 }
0x1026   :  { %v11191_v33 = vpop.f32.mrf.mxu0 }
0x1028   :  { %v3276_v24 = vpop.f32.mrf.mxu0 }
0x1029   :  { %v3334_v25 = vmul.f32 0.25, %v3276_v24 }
0x102a   :  { %v11202_v29 = vpop.f32.mrf.mxu0 }
0x102b   :  { %11207 = vmatmul.mubr.msk.bf16.vlgmr.msra.gmra.mxu1 %vm594_vm1, %v3283_v38  ;;  %v3342_v30 = vsel %vm783_vm3, %v3334_v25, -inf }
0x102c   :  { %3343 = vmax.xlane.f32.xlu0 %v3342_v30  ;;  %v3279_v31 = vpop.f32.mrf.mxu0  ;;  %11218 = vmatprep.mubr.msk.bf16.mxu1 %vm12527_vm0, %v12526_v14 }
0x102e   :  { %v11203_v32 = vpop.f32.mrf.mxu0 }
0x10ad   :  { %v3338_v34 = vpop.xlane.xlu0 %3337 }
0x10ae   :  { %v3348_v41 = vsub.f32 %v3332_v12, %v3338_v34 }
0x10b0   :  { %v3352_v35 = vmul.f32 1.442695, %v3348_v41 }
0x10b2   :  { %12073 = vpow2.f32 %v3352_v35 }
0x10b5   :  { %v3344_v40 = vpop.xlane.xlu0 %3343 }
0x10b6   :  { %v3350_v19 = vsub.f32 %v3334_v25, %v3344_v40 }
0x10b8   :  { %v3356_v50 = vmul.f32 1.442695, %v3350_v19 }
0x10ba   :  { %12075 = vpow2.f32 %v3356_v50 }
0x10db   :  { %v11184_v43 = vpop.f32.mrf.mxu1 }
0x10dc   :  { %v13195_v11 = vadd.f32 %v11184_v43, %v13110_v61 }
0x10dd   :  { %v3113_v42 = vpop.f32.mrf.mxu1 }
0x10de   :  { %v13198_v48 = vadd.f32 %v3113_v42, %v13113_v3 }
0x10df   :  { %v11185_v28 = vpop.f32.mrf.mxu1 }
0x10e0   :  { %v13201_v47 = vadd.f32 %v11185_v28, %v13116_v5  ;;  %v12074_v5 = vpop.eup %12073 }
0x10e1   :  { %v13203_v49 = vpop.f32.mrf.mxu1  ;;  %v3360_v8 = vsel %vm783_vm3, %v12074_v5, 0.0  ;;  %v12076_v37 = vpop.eup %12075 }
0x10e2   :  { %v3366_v10 = vsel %vm783_vm3, %v12076_v37, 0.0 }
0x10e3   :  { %v3226_v51 = vpop.f32.mrf.mxu1 }
0x10e4   :  { %v3333_v54 = vmul.f32 0.25, %v3226_v51 }
0x10e5   :  { %v11196_v55 = vpop.f32.mrf.mxu1 }
0x10e6   :  { %v3339_v61 = vsel %vm783_vm3, %v3333_v54, -inf }
0x10e7   :  { %3340 = vmax.xlane.f32.xlu1 %v3339_v61  ;;  %v3229_v57 = vpop.f32.mrf.mxu1 }
0x10e9   :  { %v11197_v46 = vpop.f32.mrf.mxu1 }
0x10eb   :  { %v3326_v59 = vpop.f32.mrf.mxu1 }
0x10ec   :  { %v3335_v3 = vmul.f32 0.25, %v3326_v59 }
0x10ed   :  { %v11208_v63 = vpop.f32.mrf.mxu1 }
0x10ee   :  { %v3345_v0 = vsel %vm783_vm3, %v3335_v3, -inf }
0x10ef   :  { %3346 = vmax.xlane.f32.xlu0 %v3345_v0  ;;  %v3329_v1 = vpop.f32.mrf.mxu1 }
0x10f1   :  { %v11209_v4 = vpop.f32.mrf.mxu1 }
0x10f3   :  { %3361 = vadd.xlane.f32.xlu0 %v3360_v8 }
0x10f7   :  { %3367 = vadd.xlane.f32.xlu0 %v3366_v10 }
0x10f8   :  { %3432 = vrot.lane.b32.xlu1 %v12743_v60, %s12531_s18 }
0x10fc   :  { %3480 = vrot.lane.b32.xlu1 %v12787_v2, %s12531_s18 }
0x110d   :  { %3384 = vrot.lane.b32.xlu0 %v12734_v56, %s12531_s18 }
0x1111   :  { %3645 = vrot.lane.b32.xlu0 %v12702_v27, %s12532_s20 }
0x1115   :  { %3643 = vrot.lane.b32.xlu0 %v12718_v45, %s12532_s20 }
0x1119   :  { %3745 = vrot.lane.b32.xlu0 %v12716_v44, %s12532_s20 }
0x111d   :  { %3743 = vrot.lane.b32.xlu0 %v12740_v58, %s12532_s20 }
0x1170   :  { %v3341_v12 = vpop.xlane.xlu1 %3340 }
0x1171   :  { %v3349_v26 = vsub.f32 %v3333_v54, %v3341_v12 }
0x1173   :  { %v3354_v18 = vmul.f32 1.442695, %v3349_v26 }
0x1174   :  { %v3433_v21 = vpop.permute.xlu1 %3432 }
0x1175   :  { %12077 = vpow2.f32 %v3354_v18  ;;  %v3438_v23 = vsel %vm835_vm2, %v3433_v21, 0 }
0x1176   :  { %11217 = vmatpush3.bf16.msra.mxu1 %v3438_v23 }
0x1177   :  { %11228 = vmatprep.subr.bf16.mxu1 %v12526_v14 }
0x1178   :  { %v3347_v33 = vpop.xlane.xlu0 %3346  ;;  %v3481_v35 = vpop.permute.xlu1 %3480 }
0x1179   :  { %v3351_v24 = vsub.f32 %v3335_v3, %v3347_v33  ;;  %v3486_v50 = vsel %vm835_vm2, %v3481_v35, 0 }
0x117b   :  { %v3358_v25 = vmul.f32 1.442695, %v3351_v24 }
0x117c   :  { %v3362_v38 = vpop.xlane.xlu0 %3361 }
0x117d   :  { %12079 = vpow2.f32 %v3358_v25 }
0x117e   :  { %12081 = vrcp.f32 %v3362_v38 }
0x1180   :  { %v3368_v29 = vpop.xlane.xlu0 %3367 }
0x1181   :  { %12083 = vrcp.f32 %v3368_v29 }
0x1182   :  { %v12078_v30 = vpop.eup %12077 }
0x1183   :  { %v3363_v31 = vsel %vm783_vm3, %v12078_v30, 0.0 }
0x1184   :  { %3364 = vadd.xlane.f32.xlu1 %v3363_v31  ;;  %v3385_v32 = vpop.permute.xlu0 %3384 }
0x1185   :  { %v3390_v34 = vsel %vm835_vm2, %v3385_v32, 0 }
0x1186   :  { %11211 = vmatpush3.bf16.msra.mxu0 %v3390_v34 }
0x1187   :  { %11222 = vmatprep.subr.bf16.mxu0 %v12526_v14 }
0x1188   :  { %v3646_v0 = vpop.permute.xlu0 %3645 }
0x118a   :  { %v12080_v41 = vpop.eup %12079 }
0x118b   :  { %v12082_v40 = vpop.eup %12081  ;;  %v3369_v43 = vsel %vm783_vm3, %v12080_v41, 0.0 }
0x118c   :  { %3370 = vadd.xlane.f32.xlu1 %v3369_v43  ;;  %v3373_v42 = vmul.f32 %v12082_v40, %v12074_v5  ;;  %v3644_v8 = vpop.permute.xlu0 %3643 }
0x118e   :  { %v3380_v19 = vpack.c.bf16 %v3373_v42, %v3373_v42  ;;  %v12084_v28 = vpop.eup %12083 }
0x118f   :  { %v3377_v51 = vmul.f32 %v12084_v28, %v12076_v37  ;;  %v3651_v37 = vsel %vm594_vm1, %v3646_v0, 0 }
0x1190   :  { %11213 = vmatmul.mubr.msk.bf16.vlgmr.msra.gmra.mxu0 %vm783_vm3, %v3380_v19  ;;  %v3746_v10 = vpop.permute.xlu0 %3745 }
0x1191   :  { %11223 = vmatpush3.bf16.msra.mxu0 %v3486_v50  ;;  %11224 = vmatprep.mubr.msk.bf16.mxu0 %vm12527_vm0, %v12526_v14  ;;  %v3382_v54 = vpack.c.bf16 %v3377_v51, %v3377_v51  ;;  %v3751_v12 = vsel %vm594_vm1, %v3746_v10, 0 }
0x1194   :  { %v3744_v26 = vpop.permute.xlu0 %3743 }
0x1198   :  { %11225 = vmatmul.mubr.msk.bf16.vlgmr.msra.gmra.mxu0 %vm783_vm3, %v3382_v54 }
0x119d   :  { %3528 = vrot.lane.b32.xlu1 %v12791_v6, %s12531_s18 }
0x11a1   :  { %3695 = vrot.lane.b32.xlu1 %v12709_v36, %s12532_s20 }
0x11a5   :  { %3693 = vrot.lane.b32.xlu1 %v12729_v53, %s12532_s20 }
0x11a9   :  { %3795 = vrot.lane.b32.xlu1 %v12725_v52, %s12532_s20 }
0x11ad   :  { %3793 = vrot.lane.b32.xlu1 %v12751_v62, %s12532_s20 }
0x120d   :  { %v3365_v55 = vpop.xlane.xlu1 %3364 }
0x120e   :  { %12085 = vrcp.f32 %v3365_v55 }
0x1215   :  { %v3371_v61 = vpop.xlane.xlu1 %3370 }
0x1216   :  { %12087 = vrcp.f32 %v3371_v61 }
0x1219   :  { %v3529_v59 = vpop.permute.xlu1 %3528 }
0x121a   :  { %v3534_v63 = vsel %vm835_vm2, %v3529_v59, 0 }
0x121b   :  { %v12086_v57 = vpop.eup %12085 }
0x121c   :  { %v3375_v46 = vmul.f32 %v12086_v57, %v12078_v30  ;;  %v11862_v30 = vld [vmem:[#allocation10 + $0x28] sm:$0xff]  }
0x121d   :  { %11234 = vmatprep.subr.bf16.mxu0 %v11862_v30 }
0x121e   :  { %v3381_v3 = vpack.c.bf16 %v3375_v46, %v3375_v46  ;;  %11235 = vmatpush3.bf16.msra.mxu0 %v11862_v30 }
0x121f   :  { %11246 = vmatprep.subr.bf16.mxu0 %v12526_v14 }
0x1220   :  { %11219 = vmatmul.mubr.msk.bf16.vlgmr.msra.gmra.mxu1 %vm783_vm3, %v3381_v3 }
0x1221   :  { %11229 = vmatpush3.bf16.msra.mxu1 %v3534_v63  ;;  %11230 = vmatprep.mubr.msk.bf16.mxu1 %vm12527_vm0, %v12526_v14 }
0x1222   :  { %11240 = vmatprep.subr.bf16.mxu1 %v12526_v14 }
0x1223   :  { %v12088_v5 = vpop.eup %12087 }
0x1224   :  { %v3379_v1 = vmul.f32 %v12088_v5, %v12080_v41  ;;  %v3696_v41 = vpop.permute.xlu1 %3695 }
0x1225   :  { %v3701_v50 = vsel %vm594_vm1, %v3696_v41, 0 }
0x1226   :  { %v3383_v4 = vpack.c.bf16 %v3379_v1, %v3379_v1 }
0x1228   :  { %11231 = vmatmul.mubr.msk.bf16.vlgmr.msra.gmra.mxu1 %vm783_vm3, %v3383_v4  ;;  %v3694_v19 = vpop.permute.xlu1 %3693 }
0x1229   :  { %11241 = vmatpush3.bf16.xpose.msra.mxu1 %v3651_v37  ;;  %11242 = vmatprep.mubr.msk.bf16.mxu1 %vm12527_vm0, %v12526_v14 }
0x122a   :  { %11252 = vmatprep.subr.bf16.mxu1 %v12526_v14 }
0x122c   :  { %v3796_v55 = vpop.permute.xlu1 %3795 }
0x122d   :  { %v3801_v59 = vsel %vm594_vm1, %v3796_v55, 0 }
0x1230   :  { %11243 = vmatmul.mubr.msk.bf16.vlgmr.msra.gmra.mxu1 %vm594_vm1, %v3644_v8  ;;  %v3794_v4 = vpop.permute.xlu1 %3793 }
0x1231   :  { %11253 = vmatpush3.bf16.xpose.msra.mxu1 %v3751_v12  ;;  %11254 = vmatprep.mubr.msk.bf16.mxu1 %vm12527_vm0, %v12526_v14 }
0x1232   :  { %11264 = vmatprep.subr.bf16.mxu1 %v12526_v14 }
0x1238   :  { %11255 = vmatmul.mubr.msk.bf16.vlgmr.msra.gmra.mxu1 %vm594_vm1, %v3744_v26 }
0x1239   :  { %11266 = vmatprep.mubr.msk.bf16.mxu1 %vm12527_vm0, %v12526_v14 }
0x1250   :  { %v3426_v18 = vpop.f32.mrf.mxu0 }
0x1252   :  { %v11214_v21 = vpop.f32.mrf.mxu0 }
0x1254   :  { %v3429_v23 = vpop.f32.mrf.mxu0 }
0x1256   :  { %v11215_v33 = vpop.f32.mrf.mxu0 }
0x1258   :  { %v3522_v24 = vpop.f32.mrf.mxu0 }
0x125a   :  { %v11226_v25 = vpop.f32.mrf.mxu0 }
0x125c   :  { %v3525_v38 = vpop.f32.mrf.mxu0 }
0x125e   :  { %v11227_v29 = vpop.f32.mrf.mxu0 }
0x12e0   :  { %v3474_v31 = vpop.f32.mrf.mxu1 }
0x12e1   :  { %v3576_v32 = vpack.c.bf16 %v3474_v31, %v3426_v18 }
0x12e2   :  { %v11220_v34 = vpop.f32.mrf.mxu1 }
0x12e3   :  { %11236 = vmatprep.mubr.msk.bf16.mxu0 %vm594_vm1, %v3576_v32 }
0x12e4   :  { %v3477_v40 = vpop.f32.mrf.mxu1 }
0x12e6   :  { %v11221_v43 = vpop.f32.mrf.mxu1 }
0x12e8   :  { %v3570_v42 = vpop.f32.mrf.mxu1 }
0x12e9   :  { %v3577_v35 = vpack.c.bf16 %v3570_v42, %v3522_v24 }
0x12ea   :  { %v11232_v28 = vpop.f32.mrf.mxu1 }
0x12eb   :  { %11237 = vmatmul.mubr.msk.bf16.vlgmr.msra.gmra.mxu0 %vm594_vm1, %v3577_v35 }
0x12ec   :  { %11247 = vmatpush3.bf16.xpose.msra.mxu0 %v3701_v50  ;;  %v3573_v51 = vpop.f32.mrf.mxu1  ;;  %11248 = vmatprep.mubr.msk.bf16.mxu0 %vm12527_vm0, %v12526_v14 }
0x12ed   :  { %11258 = vmatprep.subr.bf16.mxu0 %v12526_v14 }
0x12ee   :  { %v11233_v54 = vpop.f32.mrf.mxu1 }
0x12f0   :  { %v3687_v61 = vpop.f32.mrf.mxu1 }
0x12f1   :  { %v3843_v57 = vmul.f32 0.25, %v3687_v61 }
0x12f2   :  { %v11244_v46 = vpop.f32.mrf.mxu1 }
0x12f3   :  { %11249 = vmatmul.mubr.msk.bf16.vlgmr.msra.gmra.mxu0 %vm594_vm1, %v3694_v19  ;;  %v3847_v3 = vsel %vm783_vm3, %v3843_v57, -inf }
0x12f4   :  { %11259 = vmatpush3.bf16.xpose.msra.mxu0 %v3801_v59  ;;  %3848 = vmax.xlane.f32.xlu0 %v3847_v3  ;;  %v3690_v63 = vpop.f32.mrf.mxu1 }
0x12f5   :  { %11260 = vmatprep.mubr.msk.bf16.mxu0 %vm12527_vm0, %v12526_v14  ;;  %11270 = vmatprep.subr.bf16.mxu0 %v12526_v14 }
0x12f6   :  { %v11245_v0 = vpop.f32.mrf.mxu1 }
0x12f8   :  { %v3787_v5 = vpop.f32.mrf.mxu1 }
0x12f9   :  { %v3845_v1 = vmul.f32 0.25, %v3787_v5 }
0x12fa   :  { %v11256_v8 = vpop.f32.mrf.mxu1 }
0x12fb   :  { %11261 = vmatmul.mubr.msk.bf16.vlgmr.msra.gmra.mxu0 %vm594_vm1, %v3794_v4  ;;  %v3853_v37 = vsel %vm783_vm3, %v3845_v1, -inf }
0x12fc   :  { %3854 = vmax.xlane.f32.xlu0 %v3853_v37  ;;  %v3790_v10 = vpop.f32.mrf.mxu1  ;;  %11272 = vmatprep.mubr.msk.bf16.mxu0 %vm12527_vm0, %v12526_v14 }
0x12fe   :  { %v11257_v12 = vpop.f32.mrf.mxu1 }
0x137d   :  { %v3849_v26 = vpop.xlane.xlu0 %3848 }
0x137e   :  { %v3859_v18 = vsub.f32 %v3843_v57, %v3849_v26 }
0x1380   :  { %v3863_v25 = vmul.f32 1.442695, %v3859_v18 }
0x1382   :  { %12089 = vpow2.f32 %v3863_v25 }
0x1385   :  { %v3855_v21 = vpop.xlane.xlu0 %3854 }
0x1386   :  { %v3861_v38 = vsub.f32 %v3845_v1, %v3855_v21 }
0x1388   :  { %v3867_v34 = vmul.f32 1.442695, %v3861_v38 }
0x138a   :  { %12091 = vpow2.f32 %v3867_v34 }
0x13ab   :  { %v11238_v23 = vpop.f32.mrf.mxu0 }
0x13ac   :  { %v13280_v33 = vadd.f32 %v11238_v23, %v13195_v11 }
0x13ad   :  { %v3624_v24 = vpop.f32.mrf.mxu0 }
0x13ae   :  { %v13283_v29 = vadd.f32 %v3624_v24, %v13198_v48 }
0x13af   :  { %v11239_v30 = vpop.f32.mrf.mxu0 }
0x13b0   :  { %v13286_v31 = vadd.f32 %v11239_v30, %v13201_v47  ;;  %v12090_v47 = vpop.eup %12089 }
0x13b1   :  { %v13288_v32 = vpop.f32.mrf.mxu0  ;;  %v3871_v55 = vsel %vm783_vm3, %v12090_v47, 0.0  ;;  %v12092_v61 = vpop.eup %12091 }
0x13b2   :  { %v3877_v57 = vsel %vm783_vm3, %v12092_v61, 0.0 }
0x13b3   :  { %v3737_v41 = vpop.f32.mrf.mxu0 }
0x13b4   :  { %v3844_v40 = vmul.f32 0.25, %v3737_v41 }
0x13b5   :  { %v11250_v43 = vpop.f32.mrf.mxu0 }
0x13b6   :  { %v3850_v11 = vsel %vm783_vm3, %v3844_v40, -inf }
0x13b7   :  { %3851 = vmax.xlane.f32.xlu1 %v3850_v11  ;;  %v3740_v42 = vpop.f32.mrf.mxu0 }
0x13b9   :  { %v11251_v35 = vpop.f32.mrf.mxu0 }
0x13bb   :  { %v3837_v19 = vpop.f32.mrf.mxu0 }
0x13bc   :  { %v3846_v48 = vmul.f32 0.25, %v3837_v19 }
0x13bd   :  { %v11262_v28 = vpop.f32.mrf.mxu0 }
0x13be   :  { %v3856_v50 = vsel %vm783_vm3, %v3846_v48, -inf }
0x13bf   :  { %v3840_v51 = vpop.f32.mrf.mxu0  ;;  %3857 = vmax.xlane.f32.xlu0 %v3856_v50 }
0x13c1   :  { %v11263_v54 = vpop.f32.mrf.mxu0 }
0x13c3   :  { %3872 = vadd.xlane.f32.xlu0 %v3871_v55 }
0x13c7   :  { %3878 = vadd.xlane.f32.xlu0 %v3877_v57 }
0x13c8   :  { %3943 = vrot.lane.b32.xlu1 %v12743_v60, %s12532_s20 }
0x13cc   :  { %3991 = vrot.lane.b32.xlu1 %v12787_v2, %s12532_s20 }
0x13dd   :  { %3895 = vrot.lane.b32.xlu0 %v12734_v56, %s12532_s20 }
0x13e1   :  { %4156 = vrot.lane.b32.xlu0 %v12702_v27, %s12510_s21 }
0x13e5   :  { %4154 = vrot.lane.b32.xlu0 %v12718_v45, %s12510_s21 }
0x13e9   :  { %4256 = vrot.lane.b32.xlu0 %v12716_v44, %s12510_s21 }
0x13ed   :  { %4254 = vrot.lane.b32.xlu0 %v12740_v58, %s12510_s21 }
0x1440   :  { %v3852_v46 = vpop.xlane.xlu1 %3851 }
0x1441   :  { %v3860_v59 = vsub.f32 %v3844_v40, %v3852_v46 }
0x1443   :  { %v3865_v3 = vmul.f32 1.442695, %v3860_v59 }
0x1444   :  { %v3944_v63 = vpop.permute.xlu1 %3943 }
0x1445   :  { %12093 = vpow2.f32 %v3865_v3  ;;  %v3949_v0 = vsel %vm835_vm2, %v3944_v63, 0  ;;  %v11863_v63 = vld [vmem:[#allocation10 + $0x30] sm:$0xff]  }
0x1446   :  { %11271 = vmatpush3.bf16.msra.mxu0 %v3949_v0 }
0x1447   :  { %11282 = vmatprep.subr.bf16.mxu0 %v12526_v14 }
0x1448   :  { %v3858_v27 = vpop.xlane.xlu0 %3857  ;;  %v3992_v21 = vpop.permute.xlu1 %3991 }
0x1449   :  { %v3862_v5 = vsub.f32 %v3846_v48, %v3858_v27  ;;  %v3997_v25 = vsel %vm835_vm2, %v3992_v21, 0 }
0x144b   :  { %v3869_v1 = vmul.f32 1.442695, %v3862_v5 }
0x144c   :  { %v3873_v45 = vpop.xlane.xlu0 %3872 }
0x144d   :  { %12095 = vpow2.f32 %v3869_v1 }
0x144e   :  { %12097 = vrcp.f32 %v3873_v45 }
0x1450   :  { %v3879_v44 = vpop.xlane.xlu0 %3878 }
0x1451   :  { %12099 = vrcp.f32 %v3879_v44 }
0x1452   :  { %v12094_v4 = vpop.eup %12093 }
0x1453   :  { %v3874_v58 = vsel %vm783_vm3, %v12094_v4, 0.0 }
0x1454   :  { %3875 = vadd.xlane.f32.xlu1 %v3874_v58  ;;  %v3896_v8 = vpop.permute.xlu0 %3895 }
0x1455   :  { %v3901_v37 = vsel %vm835_vm2, %v3896_v8, 0 }
0x1456   :  { %11265 = vmatpush3.bf16.msra.mxu1 %v3901_v37 }
0x1457   :  { %11276 = vmatprep.subr.bf16.mxu1 %v12526_v14 }
0x145a   :  { %v12096_v10 = vpop.eup %12095 }
0x145b   :  { %v12098_v12 = vpop.eup %12097  ;;  %v3880_v26 = vsel %vm783_vm3, %v12096_v10, 0.0 }
0x145c   :  { %v3884_v18 = vmul.f32 %v12098_v12, %v12090_v47  ;;  %3881 = vadd.xlane.f32.xlu1 %v3880_v26 }
0x145e   :  { %v3891_v23 = vpack.c.bf16 %v3884_v18, %v3884_v18  ;;  %v12100_v24 = vpop.eup %12099 }
0x145f   :  { %v3888_v38 = vmul.f32 %v12100_v24, %v12092_v61 }
0x1460   :  { %11267 = vmatmul.mubr.msk.bf16.vlgmr.msra.gmra.mxu1 %vm783_vm3, %v3891_v23 }
0x1461   :  { %11277 = vmatpush3.bf16.msra.mxu1 %v3997_v25  ;;  %11278 = vmatprep.mubr.msk.bf16.mxu1 %vm12527_vm0, %v12526_v14  ;;  %v3893_v30 = vpack.c.bf16 %v3888_v38, %v3888_v38 }
0x1462   :  { %11288 = vmatprep.subr.bf16.mxu1 %v11863_v63 }
0x1468   :  { %11279 = vmatmul.mubr.msk.bf16.vlgmr.msra.gmra.mxu1 %vm783_vm3, %v3893_v30 }
0x1469   :  { %11289 = vmatpush3.bf16.msra.mxu1 %v11863_v63 }
0x146a   :  { %11300 = vmatprep.subr.bf16.mxu1 %v12526_v14 }
0x146d   :  { %4039 = vrot.lane.b32.xlu1 %v12791_v6, %s12532_s20 }
0x1471   :  { %4206 = vrot.lane.b32.xlu1 %v12709_v36, %s12510_s21  ;;  %v4157_v36 = vpop.permute.xlu0 %4156 }
0x1472   :  { %v4162_v48 = vsel %vm594_vm1, %v4157_v36, 0 }
0x1475   :  { %4204 = vrot.lane.b32.xlu1 %v12729_v53, %s12510_s21  ;;  %v4155_v19 = vpop.permute.xlu0 %4154 }
0x1479   :  { %4306 = vrot.lane.b32.xlu1 %v12725_v52, %s12510_s21  ;;  %v4257_v28 = vpop.permute.xlu0 %4256 }
0x147a   :  { %v4262_v50 = vsel %vm594_vm1, %v4257_v28, 0 }
0x147d   :  { %4304 = vrot.lane.b32.xlu1 %v12751_v62, %s12510_s21  ;;  %v4255_v47 = vpop.permute.xlu0 %4254 }
0x14dd   :  { %v3876_v34 = vpop.xlane.xlu1 %3875 }
0x14de   :  { %12101 = vrcp.f32 %v3876_v34 }
0x14e5   :  { %v3882_v41 = vpop.xlane.xlu1 %3881 }
0x14e6   :  { %12103 = vrcp.f32 %v3882_v41 }
0x14e9   :  { %v4040_v11 = vpop.permute.xlu1 %4039 }
0x14ea   :  { %v4045_v35 = vsel %vm835_vm2, %v4040_v11, 0 }
0x14eb   :  { %v12102_v40 = vpop.eup %12101 }
0x14ec   :  { %v3886_v43 = vmul.f32 %v12102_v40, %v12094_v4 }
0x14ed   :  { %v4207_v1 = vpop.permute.xlu1 %4206 }
0x14ee   :  { %v3892_v42 = vpack.c.bf16 %v3886_v43, %v3886_v43 }
0x14f0   :  { %11273 = vmatmul.mubr.msk.bf16.vlgmr.msra.gmra.mxu0 %vm783_vm3, %v3892_v42 }
0x14f1   :  { %11283 = vmatpush3.bf16.msra.mxu0 %v4045_v35  ;;  %11284 = vmatprep.mubr.msk.bf16.mxu0 %vm12527_vm0, %v12526_v14  ;;  %v4205_v8 = vpop.permute.xlu1 %4204 }
0x14f2   :  { %11294 = vmatprep.subr.bf16.mxu0 %v12526_v14 }
0x14f3   :  { %v12104_v52 = vpop.eup %12103 }
0x14f4   :  { %v3890_v53 = vmul.f32 %v12104_v52, %v12096_v10  ;;  %v4212_v10 = vsel %vm594_vm1, %v4207_v1, 0 }
0x14f5   :  { %v4307_v18 = vpop.permute.xlu1 %4306 }
0x14f6   :  { %v3894_v62 = vpack.c.bf16 %v3890_v53, %v3890_v53  ;;  %v4312_v25 = vsel %vm594_vm1, %v4307_v18, 0 }
0x14f8   :  { %11285 = vmatmul.mubr.msk.bf16.vlgmr.msra.gmra.mxu0 %vm783_vm3, %v3894_v62 }
0x14f9   :  { %11295 = vmatpush3.bf16.xpose.msra.mxu0 %v4162_v48  ;;  %11296 = vmatprep.mubr.msk.bf16.mxu0 %vm12527_vm0, %v12526_v14  ;;  %v4305_v43 = vpop.permute.xlu1 %4304 }
0x14fa   :  { %11306 = vmatprep.subr.bf16.mxu0 %v12526_v14 }
0x1500   :  { %11297 = vmatmul.mubr.msk.bf16.vlgmr.msra.gmra.mxu0 %vm594_vm1, %v4155_v19 }
0x1501   :  { %11307 = vmatpush3.bf16.xpose.msra.mxu0 %v4262_v50  ;;  %11308 = vmatprep.mubr.msk.bf16.mxu0 %vm12527_vm0, %v12526_v14 }
0x1502   :  { %11318 = vmatprep.subr.bf16.mxu0 %v12526_v14 }
0x1508   :  { %11309 = vmatmul.mubr.msk.bf16.vlgmr.msra.gmra.mxu0 %vm594_vm1, %v4255_v47 }
0x1509   :  { %11320 = vmatprep.mubr.msk.bf16.mxu0 %vm12527_vm0, %v12526_v14 }
0x1520   :  { %v3937_v51 = vpop.f32.mrf.mxu1 }
0x1522   :  { %v11268_v54 = vpop.f32.mrf.mxu1 }
0x1524   :  { %v3940_v55 = vpop.f32.mrf.mxu1 }
0x1526   :  { %v11269_v61 = vpop.f32.mrf.mxu1 }
0x1528   :  { %v4033_v57 = vpop.f32.mrf.mxu1 }
0x152a   :  { %v11280_v46 = vpop.f32.mrf.mxu1 }
0x152c   :  { %v4036_v59 = vpop.f32.mrf.mxu1 }
0x152e   :  { %v11281_v3 = vpop.f32.mrf.mxu1 }
0x15b0   :  { %v3985_v0 = vpop.f32.mrf.mxu0 }
0x15b1   :  { %v4087_v27 = vpack.c.bf16 %v3985_v0, %v3937_v51 }
0x15b2   :  { %v11274_v5 = vpop.f32.mrf.mxu0 }
0x15b3   :  { %11290 = vmatprep.mubr.msk.bf16.mxu1 %vm594_vm1, %v4087_v27 }
0x15b4   :  { %v3988_v45 = vpop.f32.mrf.mxu0 }
0x15b6   :  { %v11275_v44 = vpop.f32.mrf.mxu0 }
0x15b8   :  { %v4081_v4 = vpop.f32.mrf.mxu0 }
0x15b9   :  { %v4088_v58 = vpack.c.bf16 %v4081_v4, %v4033_v57 }
0x15ba   :  { %v11286_v37 = vpop.f32.mrf.mxu0 }
0x15bb   :  { %11291 = vmatmul.mubr.msk.bf16.vlgmr.msra.gmra.mxu1 %vm594_vm1, %v4088_v58 }
0x15bc   :  { %11301 = vmatpush3.bf16.xpose.msra.mxu1 %v4212_v10  ;;  %v4084_v12 = vpop.f32.mrf.mxu0  ;;  %11302 = vmatprep.mubr.msk.bf16.mxu1 %vm12527_vm0, %v12526_v14 }
0x15bd   :  { %11312 = vmatprep.subr.bf16.mxu1 %v12526_v14 }
0x15be   :  { %v11287_v26 = vpop.f32.mrf.mxu0 }
0x15c0   :  { %v4198_v21 = vpop.f32.mrf.mxu0 }
0x15c1   :  { %v4354_v23 = vmul.f32 0.25, %v4198_v21 }
0x15c2   :  { %v11298_v24 = vpop.f32.mrf.mxu0 }
0x15c3   :  { %11303 = vmatmul.mubr.msk.bf16.vlgmr.msra.gmra.mxu1 %vm594_vm1, %v4205_v8  ;;  %v4358_v38 = vsel %vm783_vm3, %v4354_v23, -inf }
0x15c4   :  { %11313 = vmatpush3.bf16.xpose.msra.mxu1 %v4312_v25  ;;  %4359 = vmax.xlane.f32.xlu0 %v4358_v38  ;;  %v4201_v30 = vpop.f32.mrf.mxu0 }
0x15c5   :  { %11314 = vmatprep.mubr.msk.bf16.mxu1 %vm12527_vm0, %v12526_v14  ;;  %11324 = vmatprep.subr.bf16.mxu1 %v12526_v14 }
0x15c6   :  { %v11299_v34 = vpop.f32.mrf.mxu0 }
0x15c8   :  { %v4298_v41 = vpop.f32.mrf.mxu0 }
0x15c9   :  { %v4356_v40 = vmul.f32 0.25, %v4298_v41 }
0x15ca   :  { %v11310_v11 = vpop.f32.mrf.mxu0 }
0x15cb   :  { %11315 = vmatmul.mubr.msk.bf16.vlgmr.msra.gmra.mxu1 %vm594_vm1, %v4305_v43  ;;  %v4364_v42 = vsel %vm783_vm3, %v4356_v40, -inf }
0x15cc   :  { %4365 = vmax.xlane.f32.xlu0 %v4364_v42  ;;  %v4301_v35 = vpop.f32.mrf.mxu0  ;;  %11326 = vmatprep.mubr.msk.bf16.mxu1 %vm12527_vm0, %v12526_v14 }
0x15ce   :  { %v11311_v36 = vpop.f32.mrf.mxu0 }
0x164d   :  { %v4360_v52 = vpop.xlane.xlu0 %4359 }
0x164e   :  { %v4370_v53 = vsub.f32 %v4354_v23, %v4360_v52 }
0x1650   :  { %v4374_v50 = vmul.f32 1.442695, %v4370_v53 }
0x1652   :  { %12105 = vpow2.f32 %v4374_v50 }
0x1655   :  { %v4366_v62 = vpop.xlane.xlu0 %4365 }
0x1656   :  { %v4372_v47 = vsub.f32 %v4356_v40, %v4366_v62 }
0x1658   :  { %v4378_v57 = vmul.f32 1.442695, %v4372_v47 }
0x165a   :  { %12107 = vpow2.f32 %v4378_v57 }
0x167b   :  { %v11292_v19 = vpop.f32.mrf.mxu1 }
0x167c   :  { %v13365_v48 = vadd.f32 %v11292_v19, %v13280_v33 }
0x167d   :  { %v4135_v28 = vpop.f32.mrf.mxu1 }
0x167e   :  { %v13368_v51 = vadd.f32 %v4135_v28, %v13283_v29 }
0x167f   :  { %v11293_v54 = vpop.f32.mrf.mxu1 }
0x1680   :  { %v13371_v55 = vadd.f32 %v11293_v54, %v13286_v31  ;;  %v12106_v31 = vpop.eup %12105 }
0x1681   :  { %v13373_v61 = vpop.f32.mrf.mxu1  ;;  %v4382_v4 = vsel %vm783_vm3, %v12106_v31, 0.0  ;;  %v12108_v58 = vpop.eup %12107 }
0x1682   :  { %v4388_v8 = vsel %vm783_vm3, %v12108_v58, 0.0 }
0x1683   :  { %v4248_v46 = vpop.f32.mrf.mxu1 }
0x1684   :  { %v4355_v59 = vmul.f32 0.25, %v4248_v46 }
0x1685   :  { %v11304_v3 = vpop.f32.mrf.mxu1 }
0x1686   :  { %v4361_v33 = vsel %vm783_vm3, %v4355_v59, -inf }
0x1687   :  { %4362 = vmax.xlane.f32.xlu1 %v4361_v33  ;;  %v4251_v63 = vpop.f32.mrf.mxu1 }
0x1689   :  { %v11305_v0 = vpop.f32.mrf.mxu1 }
0x168b   :  { %v4348_v27 = vpop.f32.mrf.mxu1 }
0x168c   :  { %v4357_v29 = vmul.f32 0.25, %v4348_v27 }
0x168d   :  { %v11316_v5 = vpop.f32.mrf.mxu1 }
0x168e   :  { %v4367_v1 = vsel %vm783_vm3, %v4357_v29, -inf }
0x168f   :  { %4368 = vmax.xlane.f32.xlu0 %v4367_v1  ;;  %v4351_v45 = vpop.f32.mrf.mxu1 }
0x1691   :  { %v11317_v44 = vpop.f32.mrf.mxu1 }
0x1693   :  { %4383 = vadd.xlane.f32.xlu0 %v4382_v4 }
0x1697   :  { %4389 = vadd.xlane.f32.xlu0 %v4388_v8 }
0x1698   :  { %4454 = vrot.lane.b32.xlu1 %v12743_v60, %s12510_s21 }
0x169c   :  { %4502 = vrot.lane.b32.xlu1 %v12787_v2, %s12510_s21 }
0x16ad   :  { %4406 = vrot.lane.b32.xlu0 %v12734_v56, %s12510_s21 }
0x1710   :  { %v4363_v37 = vpop.xlane.xlu1 %4362 }
0x1711   :  { %v4371_v10 = vsub.f32 %v4355_v59, %v4363_v37 }
0x1713   :  { %v4376_v12 = vmul.f32 1.442695, %v4371_v10 }
0x1714   :  { %v4455_v26 = vpop.permute.xlu1 %4454 }
0x1715   :  { %12109 = vpow2.f32 %v4376_v12  ;;  %v4460_v18 = vsel %vm835_vm2, %v4455_v26, 0 }
0x1716   :  { %11325 = vmatpush3.bf16.msra.mxu1 %v4460_v18 }
0x1717   :  { %11336 = vmatprep.subr.bf16.mxu1 %v12526_v14 }
0x1718   :  { %v4369_v21 = vpop.xlane.xlu0 %4368  ;;  %v4503_v11 = vpop.permute.xlu1 %4502 }
0x1719   :  { %v4373_v23 = vsub.f32 %v4357_v29, %v4369_v21  ;;  %v4508_v36 = vsel %vm835_vm2, %v4503_v11, 0  ;;  %v1588_v21 = vadd.f32 %v12928_v20, %v12944_v9  ;;  %v10304_v9 = vld [vmem:[#allocation11] ss:$0 sm:$0xff] }
0x171b   :  { %v4380_v24 = vmul.f32 1.442695, %v4373_v23  ;;  %v2107_v23 = vadd.f32 %v13033_v13, %v1588_v21  ;;  %v12314_v13 = vld [vmem:[#allocation2 + $0x10] sm:$0xff] }
0x171c   :  { %v4384_v60 = vpop.xlane.xlu0 %4383  ;;  %v11886_v21 = vld [vmem:[#allocation13] ss:$8 sps:$4 sm:$0xff]  }
0x171d   :  { %12111 = vpow2.f32 %v4380_v24  ;;  %v2618_v24 = vadd.f32 %v13118_v7, %v2107_v23 }
0x171e   :  { %12113 = vrcp.f32 %v4384_v60 }
0x1720   :  { %v4390_v2 = vpop.xlane.xlu0 %4389 }
0x1721   :  { %12115 = vrcp.f32 %v4390_v2  ;;  %v3129_v2 = vadd.f32 %v13203_v49, %v2618_v24 }
0x1722   :  { %v12110_v25 = vpop.eup %12109 }
0x1723   :  { %v4385_v56 = vsel %vm783_vm3, %v12110_v25, 0.0 }
0x1724   :  { %4386 = vadd.xlane.f32.xlu1 %v4385_v56  ;;  %v4407_v38 = vpop.permute.xlu0 %4406  ;;  %v3640_v56 = vadd.f32 %v13288_v32, %v3129_v2 }
0x1725   :  { %v4412_v30 = vsel %vm835_vm2, %v4407_v38, 0 }
0x1726   :  { %11319 = vmatpush3.bf16.msra.mxu0 %v4412_v30 }
0x1727   :  { %11330 = vmatprep.subr.bf16.mxu0 %v12526_v14 }
0x172a   :  { %v12112_v34 = vpop.eup %12111 }
0x172b   :  { %v12114_v41 = vpop.eup %12113  ;;  %v4391_v40 = vsel %vm783_vm3, %v12112_v34, 0.0 }
0x172c   :  { %v4395_v43 = vmul.f32 %v12114_v41, %v12106_v31  ;;  %4392 = vadd.xlane.f32.xlu1 %v4391_v40  ;;  %v11864_v31 = vld [vmem:[#allocation10 + $0x38] sm:$0xff]   ;;  %v4151_v41 = vadd.f32 %v13373_v61, %v3640_v56 }
0x172d   :  { %v12313_v40 = vld [vmem:[#allocation2] sm:$0xff] }
0x172e   :  { %v4402_v42 = vpack.c.bf16 %v4395_v43, %v4395_v43  ;;  %v12116_v35 = vpop.eup %12115 }
0x172f   :  { %v4399_v52 = vmul.f32 %v12116_v35, %v12108_v58  ;;  %v12315_v35 = vld [vmem:[#allocation2 + $0x8] sm:$0xff] }
0x1730   :  { %11321 = vmatmul.mubr.msk.bf16.vlgmr.msra.gmra.mxu0 %vm783_vm3, %v4402_v42 }
0x1731   :  { %11331 = vmatpush3.bf16.msra.mxu0 %v4508_v36  ;;  %11332 = vmatprep.mubr.msk.bf16.mxu0 %vm12527_vm0, %v12526_v14  ;;  %v4404_v53 = vpack.c.bf16 %v4399_v52, %v4399_v52 }
0x1732   :  { %11342 = vmatprep.subr.bf16.mxu0 %v11864_v31 }
0x1738   :  { %11333 = vmatmul.mubr.msk.bf16.vlgmr.msra.gmra.mxu0 %vm783_vm3, %v4404_v53  ;;  %v11867_v53 = vld [vmem:[#allocation13 + $0x74] ss:$8 sps:$4 sm:$0xff]  }
0x1739   :  { %11343 = vmatpush3.bf16.msra.mxu0 %v11864_v31  ;;  %v11873_v31 = vld [vmem:[#allocation13 + $0x54] ss:$8 sps:$4 sm:$0xff]  }
0x173d   :  { %4550 = vrot.lane.b32.xlu1 %v12791_v6, %s12510_s21 }
0x17ad   :  { %v4387_v62 = vpop.xlane.xlu1 %4386 }
0x17ae   :  { %12117 = vrcp.f32 %v4387_v62 }
0x17b5   :  { %v4393_v19 = vpop.xlane.xlu1 %4392 }
0x17b6   :  { %12119 = vrcp.f32 %v4393_v19 }
0x17b9   :  { %v4551_v47 = vpop.permute.xlu1 %4550 }
0x17ba   :  { %v4556_v57 = vsel %vm835_vm2, %v4551_v47, 0 }
0x17bb   :  { %v12118_v28 = vpop.eup %12117 }
0x17bc   :  { %v4397_v50 = vmul.f32 %v12118_v28, %v12110_v25 }
0x17be   :  { %v4403_v54 = vpack.c.bf16 %v4397_v50, %v4397_v50 }
0x17c0   :  { %11327 = vmatmul.mubr.msk.bf16.vlgmr.msra.gmra.mxu1 %vm783_vm3, %v4403_v54 }
0x17c1   :  { %11337 = vmatpush3.bf16.msra.mxu1 %v4556_v57  ;;  %11338 = vmatprep.mubr.msk.bf16.mxu1 %vm12527_vm0, %v12526_v14 }
0x17c2   :  { %4836 = vmatprep.subr.bf16.mxu1 %v11867_v53 }
0x17c3   :  { %v12120_v46 = vpop.eup %12119 }
0x17c4   :  { %v4401_v59 = vmul.f32 %v12120_v46, %v12112_v34 }
0x17c6   :  { %v4405_v3 = vpack.c.bf16 %v4401_v59, %v4401_v59 }
0x17c8   :  { %11339 = vmatmul.mubr.msk.bf16.vlgmr.msra.gmra.mxu1 %vm783_vm3, %v4405_v3 }
0x17c9   :  { %4868 = vmatprep.mubr.bf16.mxu1 %v12525_v39 }
0x17f0   :  { %v4448_v6 = vpop.f32.mrf.mxu0 }
0x17f2   :  { %v11322_v33 = vpop.f32.mrf.mxu0 }
0x17f4   :  { %v4451_v63 = vpop.f32.mrf.mxu0 }
0x17f6   :  { %v11323_v0 = vpop.f32.mrf.mxu0 }
0x17f8   :  { %v4544_v27 = vpop.f32.mrf.mxu0 }
0x17fa   :  { %v11334_v29 = vpop.f32.mrf.mxu0 }
0x17fc   :  { %v4547_v5 = vpop.f32.mrf.mxu0 }
0x17fd   :  { %v11870_v5 = vld [vmem:[#allocation13 + $0x64] ss:$8 sps:$4 sm:$0xff]  }
0x17fe   :  { %v11335_v1 = vpop.f32.mrf.mxu0 }
0x17ff   :  { %v11868_v1 = vld [vmem:[#allocation13 + $0x60] ss:$8 sps:$4 sm:$0xff]  }
0x1880   :  { %v4496_v45 = vpop.f32.mrf.mxu1 }
0x1881   :  { %v4598_v44 = vpack.c.bf16 %v4496_v45, %v4448_v6  ;;  %v11871_v45 = vld [vmem:[#allocation13 + $0x50] ss:$8 sps:$4 sm:$0xff]  }
0x1882   :  { %v11328_v4 = vpop.f32.mrf.mxu1 }
0x1883   :  { %11344 = vmatprep.mubr.msk.bf16.mxu0 %vm594_vm1, %v4598_v44  ;;  %v11876_v44 = vld [vmem:[#allocation13 + $0x44] ss:$8 sps:$4 sm:$0xff]   ;;  %v11874_v4 = vld [vmem:[#allocation13 + $0x40] ss:$8 sps:$4 sm:$0xff]  }
0x1884   :  { %v4499_v58 = vpop.f32.mrf.mxu1 }
0x1885   :  { %v11879_v58 = vld [vmem:[#allocation13 + $0x34] ss:$8 sps:$4 sm:$0xff]  }
0x1886   :  { %v11329_v8 = vpop.f32.mrf.mxu1 }
0x1887   :  { %v11877_v8 = vld [vmem:[#allocation13 + $0x30] ss:$8 sps:$4 sm:$0xff]  }
0x1888   :  { %v4592_v37 = vpop.f32.mrf.mxu1 }
0x1889   :  { %v4599_v10 = vpack.c.bf16 %v4592_v37, %v4544_v27  ;;  %v11882_v37 = vld [vmem:[#allocation13 + $0x24] ss:$8 sps:$4 sm:$0xff]  }
0x188a   :  { %v11340_v12 = vpop.f32.mrf.mxu1 }
0x188b   :  { %11345 = vmatmul.mubr.msk.bf16.vlgmr.msra.gmra.mxu0 %vm594_vm1, %v4599_v10  ;;  %v11880_v10 = vld [vmem:[#allocation13 + $0x20] ss:$8 sps:$4 sm:$0xff]   ;;  %v11885_v12 = vld [vmem:[#allocation13 + $0x14] ss:$8 sps:$4 sm:$0xff]  }
0x188c   :  { %v4595_v26 = vpop.f32.mrf.mxu1 }
0x188d   :  { %v11883_v26 = vld [vmem:[#allocation13 + $0x10] ss:$8 sps:$4 sm:$0xff]  }
0x188e   :  { %v11341_v18 = vpop.f32.mrf.mxu1 }
0x188f   :  { %v11888_v18 = vld [vmem:[#allocation13 + $0x4] ss:$8 sps:$4 sm:$0xff]  }
0x194b   :  { %v11346_v60 = vpop.f32.mrf.mxu0 }
0x194c   :  { %v4663_v38 = vadd.f32 %v11346_v60, %v13365_v48  ;;  %v12316_v48 = vld [vmem:[#allocation2 + $0x18] sm:$0xff] }
0x194d   :  { %v4646_v25 = vpop.f32.mrf.mxu0 }
0x194e   :  { %v4661_v30 = vadd.f32 %v4646_v25, %v13368_v51  ;;  %v4667_v11 = vadd.f32 %v12314_v13, %v4663_v38  ;;  %v10305_v13 = vld [vmem:[%s14377_s7] ss:$0 sm:$0xff] }
0x194f   :  { %v11347_v34 = vpop.f32.mrf.mxu0 }
0x1950   :  { %v4665_v43 = vadd.f32 %v12313_v40, %v4661_v30  ;;  %v4664_v7 = vadd.f32 %v11347_v34, %v13371_v55  ;;  %v13419_v36 = vadd.f32 %v10304_v9, %v4667_v11  ;;  %v11865_v55 = vld [vmem:[#allocation13 + $0x70] ss:$8 sps:$4 sm:$0xff]  }
0x1951   :  { %v4649_v20 = vpop.f32.mrf.mxu0  ;;  %4837 = vmatpush1.bf16.msra.mxu1 %v11865_v55 }
0x1952   :  { %v4662_v42 = vadd.f32 %v4649_v20, %v4151_v41  ;;  %v13416_v49 = vadd.f32 %v10304_v9, %v4665_v43  ;;  %v4668_v51 = vadd.f32 %v12316_v48, %v4664_v7  ;;  %4838 = vmatprep.subr.bf16.mxu1 %v11870_v5  ;;  %v11897_v5 = vld [vmem:[#allocation14 + $0x58] sm:$0xff]  }
0x1954   :  { %v4666_v32 = vadd.f32 %v12315_v35, %v4662_v42  ;;  %4679 = vadd.xlane.f32.xlu0 %v13416_v49  ;;  %v13425_v52 = vadd.f32 %v10304_v9, %v4668_v51 }
0x1955   :  { %4839 = vmatpush1.bf16.msra.mxu1 %v11868_v1  ;;  %v11898_v1 = vld [vmem:[#allocation14 + $0x18] sm:$0xff]  }
0x1956   :  { %v13421_v61 = vadd.f32 %v10304_v9, %v4666_v32  ;;  %4840 = vmatprep.subr.bf16.mxu1 %v11873_v31  ;;  %v10306_v32 = vld [vmem:[%s14378_s8] ss:$0 sm:$0xff]  ;;  %v11899_v31 = vld [vmem:[#allocation14 + $0x50] sm:$0xff]  }
0x1958   :  { %4683 = vadd.xlane.f32.xlu0 %v13419_v36  ;;  %4681 = vadd.xlane.f32.xlu1 %v13421_v61 }
0x1959   :  { %4841 = vmatpush1.bf16.msra.mxu1 %v11871_v45  ;;  %v11900_v45 = vld [vmem:[#allocation14 + $0x10] sm:$0xff]  }
0x195a   :  { %4842 = vmatprep.subr.bf16.mxu1 %v11876_v44  ;;  %v11901_v44 = vld [vmem:[#allocation14 + $0x48] sm:$0xff]  }
0x195c   :  { %4685 = vadd.xlane.f32.xlu0 %v13425_v52 }
0x195d   :  { %4843 = vmatpush1.bf16.msra.mxu1 %v11874_v4  ;;  %v11902_v4 = vld [vmem:[#allocation14 + $0x8] sm:$0xff]  }
0x195e   :  { %4844 = vmatprep.subr.bf16.mxu1 %v11879_v58  ;;  %v11903_v58 = vld [vmem:[#allocation14 + $0x40] sm:$0xff]  }
0x1961   :  { %4845 = vmatpush1.bf16.msra.mxu1 %v11877_v8  ;;  %v11904_v8 = vld [vmem:[#allocation14] sm:$0xff]  }
0x1962   :  { %4846 = vmatprep.subr.bf16.mxu1 %v11882_v37  ;;  %v235_v37 = vld [vmem:[%s14380_s10] sm:$0x3] }
0x1965   :  { %4847 = vmatpush1.bf16.msra.mxu1 %v11880_v10  ;;  %v4749_v10 = vrot.slane %v235_v37, %v12700_v22 }
0x1966   :  { %4848 = vmatprep.subr.bf16.mxu1 %v11885_v12  ;;  %v4753_v12 = vrot.slane %v235_v37, %v12690_v16 }
0x1969   :  { %4849 = vmatpush1.bf16.msra.mxu1 %v11883_v26 }
0x196a   :  { %4850 = vmatprep.subr.bf16.mxu1 %v11888_v18 }
0x196d   :  { %4851 = vmatpush1.bf16.msra.mxu1 %v11886_v21 }
0x19dd   :  { %v4680_v62 = vpop.xlane.xlu0 %4679 }
0x19de   :  { %v4687_v19 = vmul.f32 0.0078125, %v4680_v62 }
0x19e0   :  { %v13429_v28 = vsub.f32 %v13416_v49, %v4687_v19 }
0x19e1   :  { %v4684_v50 = vpop.xlane.xlu0 %4683  ;;  %v4682_v47 = vpop.xlane.xlu1 %4681 }
0x19e2   :  { %v4689_v54 = vmul.f32 0.0078125, %v4684_v50  ;;  %v4688_v57 = vmul.f32 0.0078125, %v4682_v47  ;;  %v4695_v46 = vmul.f32 %v13429_v28, %v13429_v28 }
0x19e4   :  { %v13434_v59 = vsub.f32 %v13419_v36, %v4689_v54  ;;  %v4692_v3 = vsub.f32 %v13421_v61, %v4688_v57  ;;  %4699 = vadd.xlane.f32.xlu0 %v4695_v46 }
0x19e5   :  { %v4686_v6 = vpop.xlane.xlu0 %4685 }
0x19e6   :  { %v4690_v33 = vmul.f32 0.0078125, %v4686_v6  ;;  %v4697_v63 = vmul.f32 %v13434_v59, %v13434_v59  ;;  %v4696_v0 = vmul.f32 %v4692_v3, %v4692_v3  ;;  %v11890_v6 = vld [vmem:[#allocation14 + $0x38] sm:$0xff]  }
0x19e8   :  { %v4694_v27 = vsub.f32 %v13425_v52, %v4690_v33  ;;  %4703 = vadd.xlane.f32.xlu0 %v4697_v63  ;;  %4701 = vadd.xlane.f32.xlu1 %v4696_v0  ;;  %v11891_v33 = vld [vmem:[#allocation14 + $0x70] sm:$0xff]   ;;  %v11894_v0 = vld [vmem:[#allocation14 + $0x28] sm:$0xff]  }
0x19e9   :  { %v11892_v63 = vld [vmem:[#allocation14 + $0x30] sm:$0xff]  }
0x19ea   :  { %v4698_v29 = vmul.f32 %v4694_v27, %v4694_v27 }
0x19ec   :  { %4705 = vadd.xlane.f32.xlu1 %v4698_v29  ;;  %v11896_v29 = vld [vmem:[#allocation14 + $0x20] sm:$0xff]  }
0x1a6d   :  { %v4700_v23 = vpop.xlane.xlu0 %4699 }
0x1a6e   :  { %v4707_v24 = vmul.f32 0.0078125, %v4700_v23 }
0x1a70   :  { %v4711_v60 = vadd.f32 1e-05, %v4707_v24 }
0x1a71   :  { %v4704_v2 = vpop.xlane.xlu0 %4703  ;;  %v4702_v25 = vpop.xlane.xlu1 %4701 }
0x1a72   :  { %12121 = vrsqrt.f32 %v4711_v60  ;;  %v4709_v56 = vmul.f32 0.0078125, %v4704_v2  ;;  %v4708_v38 = vmul.f32 0.0078125, %v4702_v25 }
0x1a74   :  { %v4712_v30 = vadd.f32 1e-05, %v4708_v38  ;;  %v4713_v34 = vadd.f32 1e-05, %v4709_v56 }
0x1a75   :  { %v4706_v41 = vpop.xlane.xlu1 %4705 }
0x1a76   :  { %v4710_v40 = vmul.f32 0.0078125, %v4706_v41  ;;  %12123 = vrsqrt.f32 %v4712_v30 }
0x1a77   :  { %12125 = vrsqrt.f32 %v4713_v34 }
0x1a78   :  { %v4714_v43 = vadd.f32 1e-05, %v4710_v40 }
0x1a7a   :  { %12127 = vrsqrt.f32 %v4714_v43 }
0x1a7f   :  { %v12122_v20 = vpop.eup %12121 }
0x1a80   :  { %v4719_v9 = vmul.f32 %v12122_v20, %v13429_v28 }
0x1a82   :  { %v4729_v42 = vmul.f32 %v10305_v13, %v4719_v9 }
0x1a83   :  { %v12124_v11 = vpop.eup %12123 }
0x1a84   :  { %v4720_v7 = vmul.f32 %v12124_v11, %v4692_v3  ;;  %v12126_v35 = vpop.eup %12125  ;;  %v4739_v53 = vadd.f32 %v10306_v32, %v4729_v42  ;;  %v11889_v3 = vld [vmem:[#allocation14 + $0x78] sm:$0xff]  }
0x1a85   :  { %v4721_v19 = vmul.f32 %v12126_v35, %v13434_v59  ;;  %10678 = vmatprep.subr.bf16.mxu0 %v11889_v3  ;;  %v11893_v59 = vld [vmem:[#allocation14 + $0x68] sm:$0xff]  }
0x1a86   :  { %v4730_v51 = vmul.f32 %v10305_v13, %v4720_v7  ;;  %10679 = vmatpush3.bf16.msra.mxu0 %v11890_v6 }
0x1a87   :  { %v12128_v48 = vpop.eup %12127  ;;  %v4731_v47 = vmul.f32 %v10305_v13, %v4721_v19  ;;  %10680 = vmatprep.subr.bf16.mxu0 %v11891_v33 }
0x1a88   :  { %v4722_v55 = vmul.f32 %v12128_v48, %v4694_v27  ;;  %v4740_v62 = vadd.f32 %v10306_v32, %v4730_v51  ;;  %v11895_v27 = vld [vmem:[#allocation14 + $0x60] sm:$0xff]  }
0x1a89   :  { %v4741_v57 = vadd.f32 %v10306_v32, %v4731_v47 }
0x1a8a   :  { %v4743_v28 = vpack.c.bf16 %v4740_v62, %v4739_v53  ;;  %v4732_v50 = vmul.f32 %v10305_v13, %v4722_v55  ;;  %10681 = vmatpush3.bf16.msra.mxu0 %v11892_v63 }
0x1a8b   :  { %10682 = vmatprep.subr.bf16.mxu0 %v11893_v59 }
0x1a8c   :  { %4869 = vmatmul.mubr.bf16.vlgmr.msra.gmra.mxu1 %v4743_v28  ;;  %v4742_v54 = vadd.f32 %v10306_v32, %v4732_v50 }
0x1a8d   :  { %4878 = vmatprep.mubr.bf16.mxu1 %v12525_v39 }
0x1a8e   :  { %v4744_v46 = vpack.c.bf16 %v4742_v54, %v4741_v57  ;;  %10683 = vmatpush3.bf16.msra.mxu0 %v11894_v0 }
0x1a8f   :  { %10684 = vmatprep.subr.bf16.mxu0 %v11895_v27 }
0x1a92   :  { %10685 = vmatpush3.bf16.msra.mxu0 %v11896_v29 }
0x1a93   :  { %10686 = vmatprep.subr.bf16.mxu0 %v11897_v5 }
0x1a94   :  { %4879 = vmatmul.mubr.bf16.gmra.mxu1 %v4744_v46 }
0x1a95   :  { %5478 = vmatprep.mubr.bf16.mxu1 %v12525_v39 }
0x1a96   :  { %10687 = vmatpush3.bf16.msra.mxu0 %v11898_v1 }
0x1a97   :  { %10688 = vmatprep.subr.bf16.mxu0 %v11899_v31 }
0x1a9a   :  { %10689 = vmatpush3.bf16.msra.mxu0 %v11900_v45 }
0x1a9b   :  { %10690 = vmatprep.subr.bf16.mxu0 %v11901_v44 }
0x1a9e   :  { %10691 = vmatpush3.bf16.msra.mxu0 %v11902_v4 }
0x1a9f   :  { %10692 = vmatprep.subr.bf16.mxu0 %v11903_v58 }
0x1aa2   :  { %10693 = vmatpush3.bf16.msra.mxu0 %v11904_v8 }
0x1b4c   :  { %v4870_v26 = vpop.f32.mrf.mxu1 }
0x1b4d   :  { %v13455_v18 = vadd.f32 %v4870_v26, %v4749_v10 }
0x1b4e   :  { %v4872_v21 = vpop.f32.mrf.mxu1 }
0x1b4f   :  { %v4889_v23 = vmul.f32 %v13455_v18, %v13455_v18  ;;  %v13459_v24 = vadd.f32 %v4872_v21, %v4753_v12 }
0x1b50   :  { %v4874_v60 = vpop.f32.mrf.mxu1 }
0x1b51   :  { %v4897_v2 = vmul.f32 %v4889_v23, %v13455_v18  ;;  %v4890_v25 = vmul.f32 %v13459_v24, %v13459_v24  ;;  %v13464_v56 = vadd.f32 %v4874_v60, %v4749_v10 }
0x1b52   :  { %v4876_v38 = vpop.f32.mrf.mxu1 }
0x1b53   :  { %v4905_v30 = vmul.f32 0.044715, %v4897_v2  ;;  %v4898_v34 = vmul.f32 %v4890_v25, %v13459_v24  ;;  %v4891_v41 = vmul.f32 %v13464_v56, %v13464_v56  ;;  %v13469_v40 = vadd.f32 %v4876_v38, %v4753_v12 }
0x1b54   :  { %v4880_v43 = vpop.f32.mrf.mxu1 }
0x1b55   :  { %v4913_v20 = vadd.f32 %v4905_v30, %v13455_v18  ;;  %v4906_v9 = vmul.f32 0.044715, %v4898_v34  ;;  %v4899_v13 = vmul.f32 %v4891_v41, %v13464_v56  ;;  %v4892_v11 = vmul.f32 %v13469_v40, %v13469_v40 }
0x1b56   :  { %v13475_v7 = vadd.f32 %v4880_v43, %v4749_v10  ;;  %v4882_v42 = vpop.f32.mrf.mxu1 }
0x1b57   :  { %v4921_v35 = vmul.f32 0.7978846, %v4913_v20  ;;  %v4914_v32 = vadd.f32 %v4906_v9, %v13459_v24  ;;  %v4907_v48 = vmul.f32 0.044715, %v4899_v13  ;;  %v4900_v51 = vmul.f32 %v4892_v11, %v13469_v40 }
0x1b58   :  { %v4893_v55 = vmul.f32 %v13475_v7, %v13475_v7  ;;  %v13481_v53 = vadd.f32 %v4882_v42, %v4753_v12  ;;  %v4884_v62 = vpop.f32.mrf.mxu1 }
0x1b59   :  { %v4922_v19 = vmul.f32 0.7978846, %v4914_v32  ;;  %v4915_v28 = vadd.f32 %v4907_v48, %v13464_v56  ;;  %v4908_v50 = vmul.f32 0.044715, %v4900_v51  ;;  %12129 = vtanh.f32 %v4921_v35 }
0x1b5a   :  { %v4901_v47 = vmul.f32 %v4893_v55, %v13475_v7  ;;  %v4894_v54 = vmul.f32 %v13481_v53, %v13481_v53  ;;  %v4885_v57 = vadd.f32 %v4884_v62, %v4749_v10  ;;  %v4886_v46 = vpop.f32.mrf.mxu1 }
0x1b5b   :  { %12131 = vtanh.f32 %v4922_v19  ;;  %v4923_v3 = vmul.f32 0.7978846, %v4915_v28  ;;  %v4916_v6 = vadd.f32 %v4908_v50, %v13469_v40  ;;  %v4887_v33 = vadd.f32 %v4886_v46, %v4753_v12 }
0x1b5c   :  { %v4909_v63 = vmul.f32 0.044715, %v4901_v47  ;;  %v4902_v59 = vmul.f32 %v4894_v54, %v13481_v53  ;;  %v4895_v0 = vmul.f32 %v4885_v57, %v4885_v57 }
0x1b5d   :  { %12133 = vtanh.f32 %v4923_v3  ;;  %v4924_v27 = vmul.f32 0.7978846, %v4916_v6  ;;  %v4896_v29 = vmul.f32 %v4887_v33, %v4887_v33 }
0x1b5e   :  { %v4917_v5 = vadd.f32 %v4909_v63, %v13475_v7  ;;  %v4910_v1 = vmul.f32 0.044715, %v4902_v59  ;;  %v4903_v31 = vmul.f32 %v4895_v0, %v4885_v57 }
0x1b5f   :  { %12135 = vtanh.f32 %v4924_v27  ;;  %v4904_v45 = vmul.f32 %v4896_v29, %v4887_v33 }
0x1b60   :  { %v4925_v44 = vmul.f32 0.7978846, %v4917_v5  ;;  %v4918_v4 = vadd.f32 %v4910_v1, %v13481_v53  ;;  %v4911_v58 = vmul.f32 0.044715, %v4903_v31  ;;  %v10323_v5 = vld [vmem:[%s14382_s12] ss:$0 sm:$0xff] }
0x1b61   :  { %v4912_v8 = vmul.f32 0.044715, %v4904_v45 }
0x1b62   :  { %12137 = vtanh.f32 %v4925_v44  ;;  %v4926_v37 = vmul.f32 0.7978846, %v4918_v4  ;;  %v4919_v10 = vadd.f32 %v4911_v58, %v4885_v57 }
0x1b63   :  { %v4920_v12 = vadd.f32 %v4912_v8, %v4887_v33 }
0x1b64   :  { %12139 = vtanh.f32 %v4926_v37  ;;  %v4927_v26 = vmul.f32 0.7978846, %v4919_v10 }
0x1b65   :  { %v4928_v21 = vmul.f32 0.7978846, %v4920_v12 }
0x1b66   :  { %12141 = vtanh.f32 %v4927_v26  ;;  %v12130_v23 = vpop.eup %12129 }
0x1b67   :  { %12143 = vtanh.f32 %v4928_v21  ;;  %v4937_v38 = vadd.f32 1.0, %v12130_v23 }
0x1b68   :  { %v12132_v60 = vpop.eup %12131 }
0x1b69   :  { %v4938_v2 = vadd.f32 1.0, %v12132_v60  ;;  %v4945_v9 = vmul.f32 0.5, %v4937_v38 }
0x1b6a   :  { %v12134_v25 = vpop.eup %12133 }
0x1b6b   :  { %v4939_v30 = vadd.f32 1.0, %v12134_v25  ;;  %v4946_v20 = vmul.f32 0.5, %v4938_v2  ;;  %v4953_v51 = vmul.f32 %v4945_v9, %v13455_v18  ;;  %v11905_v2 = vld [vmem:[#allocation8 + $0x168] ss:$12 sps:$4 sm:$0xff]  }
0x1b6c   :  { %v12136_v34 = vpop.eup %12135 }
0x1b6d   :  { %v4947_v41 = vmul.f32 0.5, %v4939_v30  ;;  %v4940_v43 = vadd.f32 1.0, %v12136_v34  ;;  %v4954_v32 = vmul.f32 %v4946_v20, %v13459_v24 }
0x1b6f   :  { %v12138_v13 = vpop.eup %12137  ;;  %v4948_v11 = vmul.f32 0.5, %v4940_v43  ;;  %v4955_v42 = vmul.f32 %v4947_v41, %v13464_v56 }
0x1b70   :  { %v4941_v55 = vadd.f32 1.0, %v12138_v13 }
0x1b71   :  { %v12140_v35 = vpop.eup %12139  ;;  %v4956_v48 = vmul.f32 %v4948_v11, %v13469_v40  ;;  %v4961_v47 = vpack.c.bf16 %v4955_v42, %v4953_v51  ;;  %v11910_v51 = vld [vmem:[#allocation8 + $0x154] ss:$12 sps:$4 sm:$0xff]  }
0x1b72   :  { %v4942_v62 = vadd.f32 1.0, %v12140_v35  ;;  %v4949_v6 = vmul.f32 0.5, %v4941_v55  ;;  %v11908_v55 = vld [vmem:[#allocation8 + $0x150] ss:$12 sps:$4 sm:$0xff]  }
0x1b73   :  { %v12142_v19 = vpop.eup %12141  ;;  %v4962_v28 = vpack.c.bf16 %v4956_v48, %v4954_v32 }
0x1b74   :  { %v12144_v50 = vpop.eup %12143  ;;  %v4943_v54 = vadd.f32 1.0, %v12142_v19  ;;  %v4950_v3 = vmul.f32 0.5, %v4942_v62  ;;  %v4957_v18 = vmul.f32 %v4949_v6, %v13475_v7  ;;  %v11913_v62 = vld [vmem:[#allocation8 + $0x13c] ss:$12 sps:$4 sm:$0xff]  }
0x1b75   :  { %5099 = vmatprep.mubr.bf16.mxu0 %v4962_v28  ;;  %v4944_v46 = vadd.f32 1.0, %v12144_v50  ;;  %v11914_v19 = vld [vmem:[#allocation8 + $0x170] ss:$12 sps:$4 sm:$0xff]   ;;  %v11911_v28 = vld [vmem:[#allocation8 + $0x138] ss:$12 sps:$4 sm:$0xff]  }
0x1b76   :  { %v4951_v63 = vmul.f32 0.5, %v4943_v54  ;;  %5100 = vmatmul.mubr.bf16.vlgmr.msra.gmra.mxu0 %v4961_v47  ;;  %v4958_v24 = vmul.f32 %v4950_v3, %v13481_v53  ;;  %11348 = vmatprep.subr.bf16.mxu0 %v11914_v19  ;;  %v11917_v50 = vld [vmem:[#allocation8 + $0x124] ss:$12 sps:$4 sm:$0xff]   ;;  %v11915_v54 = vld [vmem:[#allocation8 + $0x120] ss:$12 sps:$4 sm:$0xff]  }
0x1b77   :  { %v4952_v56 = vmul.f32 0.5, %v4944_v46  ;;  %11349 = vmatpush3.bf16.msra.mxu0 %v11914_v19  ;;  %v11918_v47 = vld [vmem:[#allocation8 + $0x158] ss:$12 sps:$4 sm:$0xff]   ;;  %v11922_v3 = vld [vmem:[#allocation8 + $0x140] ss:$12 sps:$4 sm:$0xff]  }
0x1b78   :  { %v4959_v59 = vmul.f32 %v4951_v63, %v4885_v57  ;;  %11350 = vmatprep.subr.bf16.mxu0 %v11918_v47  ;;  %v11921_v46 = vld [vmem:[#allocation8 + $0x10c] ss:$12 sps:$4 sm:$0xff]   ;;  %v11919_v6 = vld [vmem:[#allocation8 + $0x108] ss:$12 sps:$4 sm:$0xff]  }
0x1b79   :  { %v4960_v40 = vmul.f32 %v4952_v56, %v4887_v33  ;;  %v11925_v63 = vld [vmem:[#allocation8 + $0xf4] ss:$12 sps:$4 sm:$0xff]  }
0x1b7a   :  { %v4963_v27 = vpack.c.bf16 %v4959_v59, %v4957_v18  ;;  %v11926_v56 = vld [vmem:[#allocation8 + $0x128] ss:$12 sps:$4 sm:$0xff]   ;;  %v11923_v59 = vld [vmem:[#allocation8 + $0xf0] ss:$12 sps:$4 sm:$0xff]   ;;  %v11927_v18 = vld [vmem:[#allocation8 + $0xd8] ss:$12 sps:$4 sm:$0xff]  }
0x1b7b   :  { %v4964_v0 = vpack.c.bf16 %v4960_v40, %v4958_v24  ;;  %11351 = vmatpush3.bf16.msra.mxu0 %v11918_v47  ;;  %v11929_v24 = vld [vmem:[#allocation8 + $0xdc] ss:$12 sps:$4 sm:$0xff]  }
0x1b7c   :  { %11352 = vmatprep.subr.bf16.mxu0 %v11922_v3  ;;  %v11930_v40 = vld [vmem:[#allocation8 + $0x110] ss:$12 sps:$4 sm:$0xff]  }
0x1b7d   :  { %5107 = vmatprep.mubr.bf16.mxu0 %v4964_v0  ;;  %v11931_v0 = vld [vmem:[#allocation8 + $0xc0] ss:$12 sps:$4 sm:$0xff]  }
0x1b7e   :  { %5108 = vmatmul.mubr.bf16.gmra.mxu0 %v4963_v27  ;;  %v11933_v27 = vld [vmem:[#allocation8 + $0xc4] ss:$12 sps:$4 sm:$0xff]  }
0x1b7f   :  { %11353 = vmatpush3.bf16.msra.mxu0 %v11922_v3 }
0x1b80   :  { %11354 = vmatprep.subr.bf16.mxu0 %v11926_v56 }
0x1b83   :  { %11355 = vmatpush3.bf16.msra.mxu0 %v11926_v56 }
0x1b84   :  { %11356 = vmatprep.subr.bf16.mxu0 %v11930_v40 }
0x1b87   :  { %11357 = vmatpush3.bf16.msra.mxu0 %v11930_v40 }
0x1c36   :  { %v10694_v29 = vpop.f32.mrf.mxu0 }
0x1c38   :  { %v10695_v1 = vpop.f32.mrf.mxu0 }
0x1c39   :  { %v10696_v31 = vadd.f32 %v10695_v1, %v10694_v29  ;;  %v11934_v29 = vld [vmem:[#allocation8 + $0xf8] ss:$12 sps:$4 sm:$0xff]   ;;  %v11936_v1 = vld [vmem:[#allocation8 + $0xc8] ss:$12 sps:$4 sm:$0xff]  }
0x1c3a   :  { %v10697_v45 = vpop.f32.mrf.mxu0  ;;  %11358 = vmatprep.subr.bf16.mxu0 %v11934_v29 }
0x1c3b   :  { %v5102_v44 = vadd.f32 %v10696_v31, %v10323_v5  ;;  %11359 = vmatpush3.bf16.msra.mxu0 %v11934_v29 }
0x1c3c   :  { %v10698_v4 = vpop.f32.mrf.mxu0 }
0x1c3d   :  { %v10699_v57 = vadd.f32 %v10698_v4, %v10697_v45  ;;  %v13501_v53 = vadd.f32 %v5102_v44, %v13416_v49 }
0x1c3e   :  { %v10700_v33 = vpop.f32.mrf.mxu0 }
0x1c3f   :  { %v5105_v7 = vadd.f32 %v10699_v57, %v10323_v5  ;;  %5236 = vadd.xlane.f32.xlu0 %v13501_v53 }
0x1c40   :  { %v10701_v58 = vpop.f32.mrf.mxu0 }
0x1c41   :  { %v10702_v8 = vadd.f32 %v10701_v58, %v10700_v33  ;;  %v13505_v37 = vadd.f32 %v5105_v7, %v13421_v61  ;;  %v11907_v61 = vld [vmem:[#allocation8 + $0x16c] ss:$12 sps:$4 sm:$0xff]  }
0x1c42   :  { %v10703_v10 = vpop.f32.mrf.mxu0  ;;  %5446 = vmatprep.subr.bf16.mxu1 %v11907_v61 }
0x1c43   :  { %v5110_v12 = vadd.f32 %v10702_v8, %v10323_v5  ;;  %5238 = vadd.xlane.f32.xlu1 %v13505_v37  ;;  %5447 = vmatpush1.bf16.msra.mxu1 %v11905_v2  ;;  %v10345_v2 = vld [vmem:[#allocation5 + $0x1] ss:$0 sm:$0xff] }
0x1c44   :  { %v10704_v26 = vpop.f32.mrf.mxu0  ;;  %5448 = vmatprep.subr.bf16.mxu1 %v11910_v51 }
0x1c45   :  { %v10705_v21 = vadd.f32 %v10704_v26, %v10703_v10  ;;  %v13509_v23 = vadd.f32 %v5110_v12, %v13419_v36 }
0x1c47   :  { %v5113_v49 = vadd.f32 %v10705_v21, %v10323_v5  ;;  %5240 = vadd.xlane.f32.xlu0 %v13509_v23  ;;  %5449 = vmatpush1.bf16.msra.mxu1 %v11908_v55  ;;  %v11935_v5 = vld [vmem:[#allocation8 + $0xe0] ss:$12 sps:$4 sm:$0xff]  }
0x1c48   :  { %5450 = vmatprep.subr.bf16.mxu1 %v11913_v62  ;;  %11360 = vmatprep.subr.bf16.mxu0 %v11935_v5 }
0x1c49   :  { %v13513_v60 = vadd.f32 %v5113_v49, %v13425_v52  ;;  %11361 = vmatpush3.bf16.msra.mxu0 %v11935_v5 }
0x1c4a   :  { %11362 = vmatprep.subr.bf16.mxu0 %v11936_v1 }
0x1c4b   :  { %5242 = vadd.xlane.f32.xlu1 %v13513_v60  ;;  %5451 = vmatpush1.bf16.msra.mxu1 %v11911_v28 }
0x1c4c   :  { %5452 = vmatprep.subr.bf16.mxu1 %v11917_v50 }
0x1c4d   :  { %11363 = vmatpush3.bf16.msra.mxu0 %v11936_v1 }
0x1c4e   :  { %11368 = vmatprep.subr.bf16.mxu0 %v12526_v14 }
0x1c4f   :  { %5453 = vmatpush1.bf16.msra.mxu1 %v11915_v54 }
0x1c50   :  { %5454 = vmatprep.subr.bf16.mxu1 %v11921_v46 }
0x1c53   :  { %5455 = vmatpush1.bf16.msra.mxu1 %v11919_v6 }
0x1c54   :  { %5456 = vmatprep.subr.bf16.mxu1 %v11925_v63 }
0x1c57   :  { %5457 = vmatpush1.bf16.msra.mxu1 %v11923_v59 }
0x1c58   :  { %5458 = vmatprep.subr.bf16.mxu1 %v11929_v24 }
0x1c5b   :  { %5459 = vmatpush1.bf16.msra.mxu1 %v11927_v18 }
0x1c5c   :  { %5460 = vmatprep.subr.bf16.mxu1 %v11933_v27 }
0x1c5f   :  { %5461 = vmatpush1.bf16.msra.mxu1 %v11931_v0 }
0x1c60   :  { %11374 = vmatprep.subr.bf16.mxu1 %v12526_v14 }
0x1cc8   :  { %v5237_v25 = vpop.xlane.xlu0 %5236 }
0x1cc9   :  { %v5244_v38 = vmul.f32 0.0078125, %v5237_v25 }
0x1ccb   :  { %v13517_v30 = vsub.f32 %v13501_v53, %v5244_v38 }
0x1ccc   :  { %v5239_v34 = vpop.xlane.xlu1 %5238 }
0x1ccd   :  { %v5245_v36 = vmul.f32 0.0078125, %v5239_v34  ;;  %v5252_v41 = vmul.f32 %v13517_v30, %v13517_v30  ;;  %v10346_v34 = vld [vmem:[#allocation7 + $0x1] ss:$0 sm:$0xff] }
0x1ccf   :  { %v13522_v43 = vsub.f32 %v13505_v37, %v5245_v36  ;;  %5256 = vadd.xlane.f32.xlu0 %v5252_v41 }
0x1cd0   :  { %v5241_v52 = vpop.xlane.xlu0 %5240 }
0x1cd1   :  { %v5246_v20 = vmul.f32 0.0078125, %v5241_v52  ;;  %v5253_v9 = vmul.f32 %v13522_v43, %v13522_v43 }
0x1cd3   :  { %v13527_v13 = vsub.f32 %v13509_v23, %v5246_v20  ;;  %5258 = vadd.xlane.f32.xlu1 %v5253_v9 }
0x1cd4   :  { %v5243_v11 = vpop.xlane.xlu1 %5242 }
0x1cd5   :  { %v5247_v42 = vmul.f32 0.0078125, %v5243_v11  ;;  %v5254_v35 = vmul.f32 %v13527_v13, %v13527_v13 }
0x1cd7   :  { %v13532_v32 = vsub.f32 %v13513_v60, %v5247_v42  ;;  %5260 = vadd.xlane.f32.xlu0 %v5254_v35 }
0x1cd9   :  { %v5255_v48 = vmul.f32 %v13532_v32, %v13532_v32 }
0x1cdb   :  { %5262 = vadd.xlane.f32.xlu1 %v5255_v48 }
0x1d58   :  { %v5257_v31 = vpop.xlane.xlu0 %5256 }
0x1d59   :  { %v5264_v45 = vmul.f32 0.0078125, %v5257_v31 }
0x1d5b   :  { %v5268_v44 = vadd.f32 1e-05, %v5264_v45 }
0x1d5c   :  { %v5259_v4 = vpop.xlane.xlu1 %5258 }
0x1d5d   :  { %12145 = vrsqrt.f32 %v5268_v44  ;;  %v5265_v57 = vmul.f32 0.0078125, %v5259_v4 }
0x1d5f   :  { %v5269_v33 = vadd.f32 1e-05, %v5265_v57 }
0x1d60   :  { %v5261_v7 = vpop.xlane.xlu0 %5260 }
0x1d61   :  { %12147 = vrsqrt.f32 %v5269_v33  ;;  %v5266_v58 = vmul.f32 0.0078125, %v5261_v7 }
0x1d63   :  { %v5270_v8 = vadd.f32 1e-05, %v5266_v58 }
0x1d64   :  { %v5263_v10 = vpop.xlane.xlu1 %5262 }
0x1d65   :  { %12149 = vrsqrt.f32 %v5270_v8  ;;  %v5267_v12 = vmul.f32 0.0078125, %v5263_v10 }
0x1d67   :  { %v5271_v26 = vadd.f32 1e-05, %v5267_v12 }
0x1d69   :  { %12151 = vrsqrt.f32 %v5271_v26 }
0x1d6a   :  { %v12146_v21 = vpop.eup %12145 }
0x1d6b   :  { %v5276_v49 = vmul.f32 %v12146_v21, %v13517_v30 }
0x1d6d   :  { %v5286_v25 = vmul.f32 %v10345_v2, %v5276_v49 }
0x1d6e   :  { %v12148_v61 = vpop.eup %12147 }
0x1d6f   :  { %v5277_v38 = vmul.f32 %v12148_v61, %v13522_v43  ;;  %v5296_v52 = vadd.f32 %v10346_v34, %v5286_v25 }
0x1d71   :  { %v5287_v36 = vmul.f32 %v10345_v2, %v5277_v38 }
0x1d72   :  { %v12150_v41 = vpop.eup %12149 }
0x1d73   :  { %v5297_v20 = vadd.f32 %v10346_v34, %v5287_v36  ;;  %v5278_v9 = vmul.f32 %v12150_v41, %v13527_v13  ;;  %v10340_v13 = vld [vmem:[%s14374_s4 + $0x3] sm:$0x7] }
0x1d74   :  { %v5306_v47 = vrot.slane %v10340_v13, %v12700_v22  ;;  %v5314_v46 = vrot.slane %v10340_v13, %v347_v17 }
0x1d75   :  { %v5300_v11 = vpack.c.bf16 %v5297_v20, %v5296_v52  ;;  %v5288_v48 = vmul.f32 %v10345_v2, %v5278_v9 }
0x1d76   :  { %v12152_v42 = vpop.eup %12151 }
0x1d77   :  { %5479 = vmatmul.mubr.bf16.vlgmr.msra.gmra.mxu1 %v5300_v11  ;;  %11364 = vmatprep.mubr.bf16.mxu0 %v5300_v11  ;;  %v5279_v35 = vmul.f32 %v12152_v42, %v13532_v32  ;;  %v5298_v51 = vadd.f32 %v10346_v34, %v5288_v48  ;;  %v5310_v32 = vrot.slane %v10340_v13, %v12690_v16 }
0x1d78   :  { %5488 = vmatprep.mubr.bf16.mxu1 %v12525_v39 }
0x1d79   :  { %v5289_v30 = vmul.f32 %v10345_v2, %v5279_v35 }
0x1d7b   :  { %v5299_v55 = vadd.f32 %v10346_v34, %v5289_v30 }
0x1d7d   :  { %v5301_v43 = vpack.c.bf16 %v5299_v55, %v5298_v51 }
0x1d7f   :  { %5489 = vmatmul.mubr.bf16.gmra.mxu1 %v5301_v43  ;;  %11365 = vmatmul.mubr.bf16.vlgmr.msra.gmra.mxu0 %v5301_v43 }
0x1d80   :  { %11370 = vmatprep.mubr.msk.bf16.mxu0 %vm12527_vm0, %v12526_v14  ;;  %11376 = vmatprep.mubr.msk.bf16.mxu1 %vm12527_vm0, %v12526_v14 }
0x1e37   :  { %v5480_v62 = vpop.f32.mrf.mxu1 }
0x1e38   :  { %v5481_v24 = vadd.f32 %v5480_v62, %v5306_v47 }
0x1e39   :  { %v5482_v19 = vpop.f32.mrf.mxu1 }
0x1e3a   :  { %v5483_v28 = vadd.f32 %v5482_v19, %v5310_v32  ;;  %v13565_v1 = vpack.c.bf16 %v5481_v24, %v5481_v24 }
0x1e3b   :  { %v5484_v50 = vpop.f32.mrf.mxu1 }
0x1e3c   :  { %v13552_v54 = vpack.c.bf16 %v5483_v28, %v5483_v28  ;;  %v5485_v44 = vadd.f32 %v5484_v50, %v5306_v47 }
0x1e3d   :  { %v5486_v3 = vpop.f32.mrf.mxu1 }
0x1e3e   :  { %v5487_v6 = vadd.f32 %v5486_v3, %v5310_v32  ;;  %v5564_v63 = vsel %vm594_vm1, %v13552_v54, 0  ;;  %v13580_v10 = vpack.c.bf16 %v5485_v44, %v5485_v44 }
0x1e3f   :  { %v5490_v56 = vpop.f32.mrf.mxu1  ;;  %v11366_v59 = vpop.f32.mrf.mxu0  ;;  %11369 = vmatpush3.bf16.xpose.msra.mxu0 %v5564_v63 }
0x1e40   :  { %v13558_v40 = vpack.c.bf16 %v5487_v6, %v5487_v6  ;;  %v13560_v18 = vadd.f32 %v11366_v59, %v5314_v46  ;;  %11380 = vmatprep.subr.bf16.mxu0 %v12526_v14  ;;  %v5491_v12 = vadd.f32 %v5490_v56, %v5306_v47 }
0x1e41   :  { %v5492_v0 = vpop.f32.mrf.mxu1  ;;  %v5533_v27 = vpop.f32.mrf.mxu0 }
0x1e42   :  { %v5493_v29 = vadd.f32 %v5492_v0, %v5310_v32  ;;  %v5610_v5 = vsel %vm594_vm1, %v13558_v40, 0  ;;  %v5534_v33 = vadd.f32 %v5533_v27, %v5314_v46  ;;  %v13591_v2 = vpack.c.bf16 %v5491_v12, %v5491_v12 }
0x1e43   :  { %v5494_v15 = vpop.f32.mrf.mxu1  ;;  %v11367_v17 = vpop.f32.mrf.mxu0  ;;  %11375 = vmatpush3.bf16.xpose.msra.mxu1 %v5610_v5 }
0x1e44   :  { %v13567_v31 = vpack.c.bf16 %v5493_v29, %v5493_v29  ;;  %v13569_v45 = vadd.f32 %v11367_v17, %v5314_v46  ;;  %11386 = vmatprep.subr.bf16.mxu1 %v12526_v14  ;;  %v13585_v21 = vpack.c.bf16 %v5534_v33, %v5534_v33  ;;  %v5495_v61 = vadd.f32 %v5494_v15, %v5306_v47 }
0x1e45   :  { %v5496_v4 = vpop.f32.mrf.mxu1  ;;  %v5536_v8 = vpop.f32.mrf.mxu0 }
0x1e46   :  { %v5497_v57 = vadd.f32 %v5496_v4, %v5310_v32  ;;  %11371 = vmatmul.mubr.msk.bf16.vlgmr.msra.gmra.mxu0 %vm594_vm1, %v13565_v1  ;;  %v5656_v7 = vsel %vm594_vm1, %v13567_v31, 0  ;;  %v5537_v49 = vadd.f32 %v5536_v8, %v5314_v46  ;;  %v5800_v38 = vsel %vm835_vm2, %v13585_v21, 0 }
0x1e47   :  { %11382 = vmatprep.mubr.msk.bf16.mxu0 %vm12527_vm0, %v12526_v14  ;;  %11381 = vmatpush3.bf16.xpose.msra.mxu0 %v5656_v7  ;;  %v13602_v34 = vpack.c.bf16 %v5495_v61, %v5495_v61 }
0x1e48   :  { %v13578_v58 = vpack.c.bf16 %v5497_v57, %v5497_v57  ;;  %11392 = vmatprep.subr.bf16.mxu0 %v12526_v14  ;;  %v13594_v25 = vpack.c.bf16 %v5537_v49, %v5537_v49 }
0x1e4a   :  { %v5702_v26 = vsel %vm594_vm1, %v13578_v58, 0  ;;  %11377 = vmatmul.mubr.msk.bf16.vlgmr.msra.gmra.mxu1 %vm594_vm1, %v13580_v10  ;;  %v5846_v36 = vsel %vm835_vm2, %v13594_v25, 0 }
0x1e4b   :  { %11387 = vmatpush3.bf16.xpose.msra.mxu1 %v5702_v26  ;;  %11388 = vmatprep.mubr.msk.bf16.mxu1 %vm12527_vm0, %v12526_v14 }
0x1e4c   :  { %11398 = vmatprep.subr.bf16.mxu1 %v12526_v14 }
0x1e4e   :  { %11383 = vmatmul.mubr.msk.bf16.vlgmr.msra.gmra.mxu0 %vm594_vm1, %v13591_v2 }
0x1e4f   :  { %11393 = vmatpush3.bf16.msra.mxu0 %v5800_v38  ;;  %11394 = vmatprep.mubr.msk.bf16.mxu0 %vm12527_vm0, %v12526_v14 }
0x1e50   :  { %11404 = vmatprep.subr.bf16.mxu0 %v12526_v14 }
0x1e52   :  { %11389 = vmatmul.mubr.msk.bf16.vlgmr.msra.gmra.mxu1 %vm594_vm1, %v13602_v34 }
0x1e53   :  { %11399 = vmatpush3.bf16.msra.mxu1 %v5846_v36  ;;  %11400 = vmatprep.mubr.msk.bf16.mxu1 %vm12527_vm0, %v12526_v14 }
0x1e54   :  { %11410 = vmatprep.subr.bf16.mxu1 %v12526_v14 }
0x1f06   :  { %v5600_v41 = vpop.f32.mrf.mxu0 }
0x1f07   :  { %v5744_v52 = vmul.f32 0.25, %v5600_v41 }
0x1f08   :  { %v11372_v20 = vpop.f32.mrf.mxu0 }
0x1f09   :  { %v5748_v9 = vsel %vm783_vm3, %v5744_v52, -inf }
0x1f0a   :  { %5749 = vmax.xlane.f32.xlu0 %v5748_v9  ;;  %v5603_v11 = vpop.f32.mrf.mxu0  ;;  %v5646_v42 = vpop.f32.mrf.mxu1 }
0x1f0b   :  { %v5745_v35 = vmul.f32 0.25, %v5646_v42  ;;  %v13638_v11 = vpack.c.bf16 %v13560_v18, %v13560_v18 }
0x1f0c   :  { %v11373_v48 = vpop.f32.mrf.mxu0  ;;  %v11378_v30 = vpop.f32.mrf.mxu1 }
0x1f0d   :  { %v5751_v51 = vsel %vm783_vm3, %v5745_v35, -inf  ;;  %v5892_v30 = vsel %vm835_vm2, %v13638_v11, 0 }
0x1f0e   :  { %5752 = vmax.xlane.f32.xlu1 %v5751_v51  ;;  %v5649_v55 = vpop.f32.mrf.mxu1  ;;  %v5692_v43 = vpop.f32.mrf.mxu0  ;;  %v13645_v51 = vpack.c.bf16 %v13569_v45, %v13569_v45 }
0x1f0f   :  { %v5746_v13 = vmul.f32 0.25, %v5692_v43 }
0x1f10   :  { %v11379_v32 = vpop.f32.mrf.mxu1  ;;  %v11384_v62 = vpop.f32.mrf.mxu0 }
0x1f11   :  { %v5754_v19 = vsel %vm783_vm3, %v5746_v13, -inf  ;;  %v5938_v32 = vsel %vm835_vm2, %v13645_v51, 0 }
0x1f12   :  { %v5738_v28 = vpop.f32.mrf.mxu1  ;;  %5755 = vmax.xlane.f32.xlu0 %v5754_v19  ;;  %v5695_v50 = vpop.f32.mrf.mxu0 }
0x1f13   :  { %v5747_v47 = vmul.f32 0.25, %v5738_v28 }
0x1f14   :  { %v11385_v46 = vpop.f32.mrf.mxu0  ;;  %v11390_v3 = vpop.f32.mrf.mxu1 }
0x1f15   :  { %v5757_v6 = vsel %vm783_vm3, %v5747_v47, -inf }
0x1f16   :  { %5758 = vmax.xlane.f32.xlu1 %v5757_v6  ;;  %v5741_v63 = vpop.f32.mrf.mxu1 }
0x1f18   :  { %v11391_v56 = vpop.f32.mrf.mxu1 }
0x1f93   :  { %v5750_v59 = vpop.xlane.xlu0 %5749 }
0x1f94   :  { %v5760_v24 = vsub.f32 %v5744_v52, %v5750_v59 }
0x1f96   :  { %v5764_v0 = vmul.f32 1.442695, %v5760_v24 }
0x1f97   :  { %v5753_v27 = vpop.xlane.xlu1 %5752 }
0x1f98   :  { %12153 = vpow2.f32 %v5764_v0  ;;  %v5761_v29 = vsub.f32 %v5745_v35, %v5753_v27 }
0x1f9a   :  { %v5766_v15 = vmul.f32 1.442695, %v5761_v29 }
0x1f9b   :  { %v5756_v17 = vpop.xlane.xlu0 %5755 }
0x1f9c   :  { %12155 = vpow2.f32 %v5766_v15  ;;  %v5762_v5 = vsub.f32 %v5746_v13, %v5756_v17 }
0x1f9e   :  { %v5768_v44 = vmul.f32 1.442695, %v5762_v5 }
0x1f9f   :  { %v5759_v26 = vpop.xlane.xlu1 %5758 }
0x1fa0   :  { %12157 = vpow2.f32 %v5768_v44  ;;  %v5763_v49 = vsub.f32 %v5747_v47, %v5759_v26 }
0x1fa2   :  { %v5770_v61 = vmul.f32 1.442695, %v5763_v49 }
0x1fa4   :  { %12159 = vpow2.f32 %v5770_v61 }
0x1fa5   :  { %v12154_v4 = vpop.eup %12153 }
0x1fa6   :  { %v5772_v57 = vsel %vm783_vm3, %v12154_v4, 0.0 }
0x1fa7   :  { %5773 = vadd.xlane.f32.xlu0 %v5772_v57 }
0x1fa9   :  { %v12156_v33 = vpop.eup %12155 }
0x1faa   :  { %v5775_v7 = vsel %vm783_vm3, %v12156_v33, 0.0 }
0x1fab   :  { %5776 = vadd.xlane.f32.xlu1 %v5775_v7 }
0x1fad   :  { %v12158_v8 = vpop.eup %12157 }
0x1fae   :  { %v5778_v12 = vsel %vm783_vm3, %v12158_v8, 0.0 }
0x1faf   :  { %5779 = vadd.xlane.f32.xlu0 %v5778_v12 }
0x1fb1   :  { %v12160_v38 = vpop.eup %12159 }
0x1fb2   :  { %v5781_v36 = vsel %vm783_vm3, %v12160_v38, 0.0 }
0x1fbc   :  { %6038 = vrot.lane.b32.xlu1 %v13558_v40, %s12528_s25 }
0x1fc0   :  { %5983 = vrot.lane.b32.xlu1 %v13565_v1, %s12528_s25 }
0x1fc5   :  { %5986 = vrot.lane.b32.xlu0 %v13552_v54, %s12528_s25 }
0x1fc9   :  { %6090 = vrot.lane.b32.xlu0 %v13567_v31, %s12528_s25 }
0x1fcd   :  { %6087 = vrot.lane.b32.xlu0 %v13591_v2, %s12528_s25 }
0x1fe4   :  { %5782 = vadd.xlane.f32.xlu1 %v5781_v36 }
0x1ff5   :  { %6035 = vrot.lane.b32.xlu1 %v13580_v10, %s12528_s25 }
0x1ff9   :  { %6142 = vrot.lane.b32.xlu1 %v13578_v58, %s12528_s25 }
0x1ffd   :  { %6139 = vrot.lane.b32.xlu1 %v13602_v34, %s12528_s25 }
0x2030   :  { %v5774_v41 = vpop.xlane.xlu0 %5773 }
0x2031   :  { %12161 = vrcp.f32 %v5774_v41 }
0x2034   :  { %v5777_v52 = vpop.xlane.xlu1 %5776 }
0x2035   :  { %12163 = vrcp.f32 %v5777_v52 }
0x2038   :  { %v5780_v20 = vpop.xlane.xlu0 %5779  ;;  %v6039_v28 = vpop.permute.xlu1 %6038 }
0x2039   :  { %12165 = vrcp.f32 %v5780_v20  ;;  %v6044_v0 = vsel %vm594_vm1, %v6039_v28, 0 }
0x203c   :  { %v5987_v62 = vpop.permute.xlu0 %5986  ;;  %v5984_v47 = vpop.permute.xlu1 %5983 }
0x203d   :  { %v5992_v19 = vsel %vm594_vm1, %v5987_v62, 0 }
0x203e   :  { %v12162_v9 = vpop.eup %12161 }
0x203f   :  { %v5785_v42 = vmul.f32 %v12162_v9, %v12154_v4 }
0x2040   :  { %v6091_v50 = vpop.permute.xlu0 %6090 }
0x2041   :  { %v5792_v35 = vpack.c.bf16 %v5785_v42, %v5785_v42  ;;  %v6096_v46 = vsel %vm594_vm1, %v6091_v50, 0 }
0x2042   :  { %v12164_v48 = vpop.eup %12163 }
0x2043   :  { %11395 = vmatmul.mubr.msk.bf16.vlgmr.msra.gmra.mxu0 %vm783_vm3, %v5792_v35  ;;  %v5787_v55 = vmul.f32 %v12164_v48, %v12156_v33 }
0x2044   :  { %11405 = vmatpush3.bf16.msra.mxu0 %v5892_v30  ;;  %11406 = vmatprep.mubr.msk.bf16.mxu0 %vm12527_vm0, %v12526_v14  ;;  %v6088_v3 = vpop.permute.xlu0 %6087 }
0x2045   :  { %11416 = vmatprep.subr.bf16.mxu0 %v12526_v14  ;;  %v5793_v18 = vpack.c.bf16 %v5787_v55, %v5787_v55 }
0x2046   :  { %v12166_v43 = vpop.eup %12165 }
0x2047   :  { %v5789_v13 = vmul.f32 %v12166_v43, %v12158_v8  ;;  %11401 = vmatmul.mubr.msk.bf16.vlgmr.msra.gmra.mxu1 %vm783_vm3, %v5793_v18 }
0x2048   :  { %11411 = vmatpush3.bf16.msra.mxu1 %v5938_v32  ;;  %11412 = vmatprep.mubr.msk.bf16.mxu1 %vm12527_vm0, %v12526_v14 }
0x2049   :  { %v5794_v45 = vpack.c.bf16 %v5789_v13, %v5789_v13  ;;  %11422 = vmatprep.subr.bf16.mxu1 %v12526_v14 }
0x204b   :  { %11407 = vmatmul.mubr.msk.bf16.vlgmr.msra.gmra.mxu0 %vm783_vm3, %v5794_v45 }
0x204c   :  { %11417 = vmatpush3.bf16.xpose.msra.mxu0 %v5992_v19  ;;  %11418 = vmatprep.mubr.msk.bf16.mxu0 %vm12527_vm0, %v12526_v14 }
0x204d   :  { %11428 = vmatprep.subr.bf16.mxu0 %v12526_v14 }
0x2053   :  { %11419 = vmatmul.mubr.msk.bf16.vlgmr.msra.gmra.mxu0 %vm594_vm1, %v5984_v47 }
0x2054   :  { %11429 = vmatpush3.bf16.xpose.msra.mxu0 %v6096_v46  ;;  %11430 = vmatprep.mubr.msk.bf16.mxu0 %vm12527_vm0, %v12526_v14 }
0x2055   :  { %11440 = vmatprep.subr.bf16.mxu0 %v12526_v14 }
0x205b   :  { %11431 = vmatmul.mubr.msk.bf16.vlgmr.msra.gmra.mxu0 %vm594_vm1, %v6088_v3 }
0x205c   :  { %11442 = vmatprep.mubr.msk.bf16.mxu0 %vm12527_vm0, %v12526_v14 }
0x206d   :  { %v5783_v6 = vpop.xlane.xlu1 %5782 }
0x206e   :  { %12167 = vrcp.f32 %v5783_v6 }
0x2071   :  { %v6036_v24 = vpop.permute.xlu1 %6035 }
0x2075   :  { %v6143_v27 = vpop.permute.xlu1 %6142 }
0x2076   :  { %v6148_v29 = vsel %vm594_vm1, %v6143_v27, 0 }
0x2079   :  { %v6140_v15 = vpop.permute.xlu1 %6139 }
0x207b   :  { %v12168_v63 = vpop.eup %12167 }
0x207c   :  { %v5791_v56 = vmul.f32 %v12168_v63, %v12160_v38 }
0x207e   :  { %v5795_v59 = vpack.c.bf16 %v5791_v56, %v5791_v56 }
0x2080   :  { %11413 = vmatmul.mubr.msk.bf16.vlgmr.msra.gmra.mxu1 %vm783_vm3, %v5795_v59 }
0x2081   :  { %11423 = vmatpush3.bf16.xpose.msra.mxu1 %v6044_v0  ;;  %11424 = vmatprep.mubr.msk.bf16.mxu1 %vm12527_vm0, %v12526_v14 }
0x2082   :  { %11434 = vmatprep.subr.bf16.mxu1 %v12526_v14 }
0x2088   :  { %11425 = vmatmul.mubr.msk.bf16.vlgmr.msra.gmra.mxu1 %vm594_vm1, %v6036_v24 }
0x2089   :  { %11435 = vmatpush3.bf16.xpose.msra.mxu1 %v6148_v29  ;;  %11436 = vmatprep.mubr.msk.bf16.mxu1 %vm12527_vm0, %v12526_v14 }
0x208a   :  { %11446 = vmatprep.subr.bf16.mxu1 %v12526_v14 }
0x2090   :  { %11437 = vmatmul.mubr.msk.bf16.vlgmr.msra.gmra.mxu1 %vm594_vm1, %v6140_v15 }
0x2091   :  { %11448 = vmatprep.mubr.msk.bf16.mxu1 %vm12527_vm0, %v12526_v14 }
0x2103   :  { %v13682_v17 = vpop.f32.mrf.mxu0 }
0x2105   :  { %v11396_v5 = vpop.f32.mrf.mxu0 }
0x2107   :  { %v5839_v44 = vpop.f32.mrf.mxu0  ;;  %v13684_v4 = vpop.f32.mrf.mxu1 }
0x2108   :  { %v5980_v57 = vpack.c.bf16 %v13684_v4, %v13682_v17  ;;  %v11938_v4 = vld [vmem:[#allocation10 + $0x48] sm:$0xff]  }
0x2109   :  { %v11397_v33 = vpop.f32.mrf.mxu0  ;;  %v11402_v7 = vpop.f32.mrf.mxu1 }
0x210b   :  { %v5885_v8 = vpop.f32.mrf.mxu1  ;;  %v13688_v12 = vpop.f32.mrf.mxu0 }
0x210d   :  { %v11403_v26 = vpop.f32.mrf.mxu1  ;;  %v11408_v49 = vpop.f32.mrf.mxu0 }
0x210f   :  { %v5931_v61 = vpop.f32.mrf.mxu0 }
0x2111   :  { %v11409_v38 = vpop.f32.mrf.mxu0 }
0x2113   :  { %v6028_v36 = vpop.f32.mrf.mxu0 }
0x2114   :  { %v6190_v41 = vmul.f32 0.25, %v6028_v36 }
0x2115   :  { %v11420_v52 = vpop.f32.mrf.mxu0 }
0x2116   :  { %v6194_v20 = vsel %vm783_vm3, %v6190_v41, -inf }
0x2117   :  { %6195 = vmax.xlane.f32.xlu0 %v6194_v20  ;;  %v6031_v9 = vpop.f32.mrf.mxu0 }
0x2119   :  { %v11421_v42 = vpop.f32.mrf.mxu0 }
0x211b   :  { %v6132_v35 = vpop.f32.mrf.mxu0 }
0x211c   :  { %v6192_v48 = vmul.f32 0.25, %v6132_v35 }
0x211d   :  { %v11432_v30 = vpop.f32.mrf.mxu0 }
0x211e   :  { %v6200_v55 = vsel %vm783_vm3, %v6192_v48, -inf }
0x211f   :  { %6201 = vmax.xlane.f32.xlu0 %v6200_v55  ;;  %v6135_v18 = vpop.f32.mrf.mxu0 }
0x2121   :  { %v11433_v43 = vpop.f32.mrf.mxu0 }
0x2140   :  { %v13692_v13 = vpop.f32.mrf.mxu1 }
0x2141   :  { %v5981_v32 = vpack.c.bf16 %v13692_v13, %v13688_v12 }
0x2142   :  { %v11414_v62 = vpop.f32.mrf.mxu1 }
0x2144   :  { %v5977_v45 = vpop.f32.mrf.mxu1 }
0x2146   :  { %v11415_v19 = vpop.f32.mrf.mxu1 }
0x2148   :  { %v6080_v28 = vpop.f32.mrf.mxu1 }
0x2149   :  { %v6191_v50 = vmul.f32 0.25, %v6080_v28 }
0x214a   :  { %v11426_v47 = vpop.f32.mrf.mxu1 }
0x214b   :  { %v6197_v46 = vsel %vm783_vm3, %v6191_v50, -inf }
0x214c   :  { %6198 = vmax.xlane.f32.xlu1 %v6197_v46  ;;  %v6083_v3 = vpop.f32.mrf.mxu1 }
0x214e   :  { %v11427_v6 = vpop.f32.mrf.mxu1 }
0x2150   :  { %v6184_v63 = vpop.f32.mrf.mxu1 }
0x2151   :  { %v6193_v56 = vmul.f32 0.25, %v6184_v63 }
0x2152   :  { %v11438_v59 = vpop.f32.mrf.mxu1 }
0x2153   :  { %v6203_v24 = vsel %vm783_vm3, %v6193_v56, -inf }
0x2154   :  { %v6187_v0 = vpop.f32.mrf.mxu1  ;;  %6204 = vmax.xlane.f32.xlu0 %v6203_v24 }
0x2156   :  { %v11439_v27 = vpop.f32.mrf.mxu1 }
0x21a0   :  { %v6196_v29 = vpop.xlane.xlu0 %6195 }
0x21a1   :  { %v6206_v15 = vsub.f32 %v6190_v41, %v6196_v29 }
0x21a3   :  { %v6210_v5 = vmul.f32 1.442695, %v6206_v15  ;;  %v11937_v15 = vld [vmem:[#allocation10 + $0x40] sm:$0xff]  }
0x21a5   :  { %12169 = vpow2.f32 %v6210_v5 }
0x21a8   :  { %v6202_v44 = vpop.xlane.xlu0 %6201 }
0x21a9   :  { %v6208_v33 = vsub.f32 %v6192_v48, %v6202_v44 }
0x21ab   :  { %v6214_v7 = vmul.f32 1.442695, %v6208_v33 }
0x21ad   :  { %12171 = vpow2.f32 %v6214_v7 }
0x21b2   :  { %v12170_v8 = vpop.eup %12169 }
0x21b3   :  { %v6218_v26 = vsel %vm783_vm3, %v12170_v8, 0.0 }
0x21b4   :  { %6219 = vadd.xlane.f32.xlu0 %v6218_v26 }
0x21ba   :  { %v12172_v49 = vpop.eup %12171 }
0x21bb   :  { %v6224_v61 = vsel %vm783_vm3, %v12172_v49, 0.0 }
0x21bc   :  { %6225 = vadd.xlane.f32.xlu0 %v6224_v61 }
0x21d2   :  { %6243 = vrot.lane.b32.xlu0 %v13585_v21, %s12528_s25 }
0x21d5   :  { %v6199_v38 = vpop.xlane.xlu1 %6198 }
0x21d6   :  { %v6207_v36 = vsub.f32 %v6191_v50, %v6199_v38  ;;  %6564 = vrot.lane.b32.xlu0 %v13552_v54, %s12529_s26 }
0x21d8   :  { %v6212_v41 = vmul.f32 1.442695, %v6207_v36 }
0x21da   :  { %12173 = vpow2.f32 %v6212_v41  ;;  %6562 = vrot.lane.b32.xlu0 %v13565_v1, %s12529_s26 }
0x21dd   :  { %v6205_v9 = vpop.xlane.xlu0 %6204 }
0x21de   :  { %6664 = vrot.lane.b32.xlu0 %v13567_v31, %s12529_s26  ;;  %v6209_v42 = vsub.f32 %v6193_v56, %v6205_v9 }
0x21e0   :  { %v6216_v35 = vmul.f32 1.442695, %v6209_v42 }
0x21e2   :  { %6662 = vrot.lane.b32.xlu0 %v13591_v2, %s12529_s26  ;;  %12175 = vpow2.f32 %v6216_v35 }
0x21e7   :  { %v12174_v52 = vpop.eup %12173 }
0x21e8   :  { %v6221_v20 = vsel %vm783_vm3, %v12174_v52, 0.0 }
0x21e9   :  { %6222 = vadd.xlane.f32.xlu1 %v6221_v20 }
0x21ef   :  { %v12176_v48 = vpop.eup %12175 }
0x21f0   :  { %v6227_v30 = vsel %vm783_vm3, %v12176_v48, 0.0 }
0x21fa   :  { %6292 = vrot.lane.b32.xlu1 %v13594_v25, %s12528_s25 }
0x21fe   :  { %6341 = vrot.lane.b32.xlu1 %v13638_v11, %s12528_s25 }
0x2222   :  { %6228 = vadd.xlane.f32.xlu1 %v6227_v30 }
0x2233   :  { %6390 = vrot.lane.b32.xlu1 %v13645_v51, %s12528_s25 }
0x2237   :  { %6614 = vrot.lane.b32.xlu1 %v13558_v40, %s12529_s26 }
0x223b   :  { %6612 = vrot.lane.b32.xlu1 %v13580_v10, %s12529_s26 }
0x223d   :  { %v6220_v55 = vpop.xlane.xlu0 %6219 }
0x223e   :  { %12177 = vrcp.f32 %v6220_v55 }
0x223f   :  { %6714 = vrot.lane.b32.xlu1 %v13578_v58, %s12529_s26 }
0x2243   :  { %6712 = vrot.lane.b32.xlu1 %v13602_v34, %s12529_s26 }
0x2245   :  { %v6226_v18 = vpop.xlane.xlu0 %6225 }
0x2246   :  { %12179 = vrcp.f32 %v6226_v18 }
0x2249   :  { %v6244_v43 = vpop.permute.xlu0 %6243 }
0x224a   :  { %v6249_v62 = vsel %vm835_vm2, %v6244_v43, 0 }
0x224b   :  { %v12178_v45 = vpop.eup %12177  ;;  %11441 = vmatpush3.bf16.msra.mxu0 %v6249_v62 }
0x224c   :  { %v6231_v19 = vmul.f32 %v12178_v45, %v12170_v8  ;;  %11452 = vmatprep.subr.bf16.mxu0 %v12526_v14 }
0x224d   :  { %v6565_v18 = vpop.permute.xlu0 %6564 }
0x224e   :  { %v6238_v28 = vpack.c.bf16 %v6231_v19, %v6231_v19 }
0x2250   :  { %11443 = vmatmul.mubr.msk.bf16.vlgmr.msra.gmra.mxu0 %vm783_vm3, %v6238_v28  ;;  %v6570_v28 = vsel %vm594_vm1, %v6565_v18, 0 }
0x2251   :  { %11454 = vmatprep.mubr.msk.bf16.mxu0 %vm12527_vm0, %v12526_v14  ;;  %v6563_v45 = vpop.permute.xlu0 %6562 }
0x2253   :  { %v12180_v47 = vpop.eup %12179 }
0x2254   :  { %v6235_v6 = vmul.f32 %v12180_v47, %v12172_v49 }
0x2256   :  { %v6240_v59 = vpack.c.bf16 %v6235_v6, %v6235_v6 }
0x2272   :  { %v6223_v50 = vpop.xlane.xlu1 %6222 }
0x2273   :  { %12181 = vrcp.f32 %v6223_v50 }
0x2276   :  { %v6293_v46 = vpop.permute.xlu1 %6292 }
0x2277   :  { %v6298_v3 = vsel %vm835_vm2, %v6293_v46, 0  ;;  %v6665_v46 = vpop.permute.xlu0 %6664 }
0x2278   :  { %11447 = vmatpush3.bf16.msra.mxu1 %v6298_v3 }
0x2279   :  { %11458 = vmatprep.subr.bf16.mxu1 %v12526_v14 }
0x227a   :  { %v6342_v63 = vpop.permute.xlu1 %6341 }
0x227b   :  { %v6347_v56 = vsel %vm835_vm2, %v6342_v63, 0  ;;  %v6670_v63 = vsel %vm594_vm1, %v6665_v46, 0 }
0x227c   :  { %11453 = vmatpush3.bf16.msra.mxu0 %v6347_v56 }
0x227d   :  { %11464 = vmatprep.subr.bf16.mxu0 %v11938_v4 }
0x227f   :  { %11455 = vmatmul.mubr.msk.bf16.vlgmr.msra.gmra.mxu0 %vm783_vm3, %v6240_v59 }
0x2280   :  { %v12182_v24 = vpop.eup %12181  ;;  %11465 = vmatpush3.bf16.msra.mxu0 %v11938_v4 }
0x2281   :  { %v6233_v0 = vmul.f32 %v12182_v24, %v12174_v52  ;;  %11476 = vmatprep.subr.bf16.mxu0 %v12526_v14 }
0x2283   :  { %v6239_v27 = vpack.c.bf16 %v6233_v0, %v6233_v0 }
0x2285   :  { %11449 = vmatmul.mubr.msk.bf16.vlgmr.msra.gmra.mxu1 %vm783_vm3, %v6239_v27  ;;  %v6663_v27 = vpop.permute.xlu0 %6662 }
0x2286   :  { %11460 = vmatprep.mubr.msk.bf16.mxu1 %vm12527_vm0, %v12526_v14 }
0x22ab   :  { %v6229_v29 = vpop.xlane.xlu1 %6228 }
0x22ac   :  { %12183 = vrcp.f32 %v6229_v29 }
0x22af   :  { %v6391_v5 = vpop.permute.xlu1 %6390 }
0x22b0   :  { %v6396_v44 = vsel %vm835_vm2, %v6391_v5, 0 }
0x22b1   :  { %11459 = vmatpush3.bf16.msra.mxu1 %v6396_v44 }
0x22b2   :  { %11470 = vmatprep.subr.bf16.mxu1 %v11937_v15 }
0x22b3   :  { %v6615_v26 = vpop.permute.xlu1 %6614 }
0x22b4   :  { %v6620_v61 = vsel %vm594_vm1, %v6615_v26, 0 }
0x22b7   :  { %v6613_v49 = vpop.permute.xlu1 %6612 }
0x22b9   :  { %v12184_v33 = vpop.eup %12183 }
0x22ba   :  { %v6237_v7 = vmul.f32 %v12184_v33, %v12176_v48 }
0x22bb   :  { %v6715_v17 = vpop.permute.xlu1 %6714 }
0x22bc   :  { %v6241_v8 = vpack.c.bf16 %v6237_v7, %v6237_v7 }
0x22be   :  { %11461 = vmatmul.mubr.msk.bf16.vlgmr.msra.gmra.mxu1 %vm783_vm3, %v6241_v8 }
0x22bf   :  { %11472 = vmatprep.mubr.msk.bf16.mxu1 %vm594_vm1, %v5980_v57  ;;  %11471 = vmatpush3.bf16.msra.mxu1 %v11937_v15  ;;  %v6720_v57 = vsel %vm594_vm1, %v6715_v17, 0  ;;  %v6713_v12 = vpop.permute.xlu1 %6712 }
0x22c0   :  { %11482 = vmatprep.subr.bf16.mxu1 %v12526_v14 }
0x22c6   :  { %11473 = vmatmul.mubr.msk.bf16.vlgmr.msra.gmra.mxu1 %vm594_vm1, %v5981_v32 }
0x22c7   :  { %11483 = vmatpush3.bf16.xpose.msra.mxu1 %v6620_v61  ;;  %11484 = vmatprep.mubr.msk.bf16.mxu1 %vm12527_vm0, %v12526_v14 }
0x22c8   :  { %11494 = vmatprep.subr.bf16.mxu1 %v12526_v14 }
0x22ce   :  { %11485 = vmatmul.mubr.msk.bf16.vlgmr.msra.gmra.mxu1 %vm594_vm1, %v6613_v49 }
0x22cf   :  { %11495 = vmatpush3.bf16.xpose.msra.mxu1 %v6720_v57  ;;  %11496 = vmatprep.mubr.msk.bf16.mxu1 %vm12527_vm0, %v12526_v14 }
0x22d0   :  { %11506 = vmatprep.subr.bf16.mxu1 %v12526_v14 }
0x22d6   :  { %11497 = vmatmul.mubr.msk.bf16.vlgmr.msra.gmra.mxu1 %vm594_vm1, %v6713_v12 }
0x22d7   :  { %11508 = vmatprep.mubr.msk.bf16.mxu1 %vm12527_vm0, %v12526_v14 }
0x2310   :  { %v6285_v13 = vpop.f32.mrf.mxu0 }
0x2312   :  { %v11444_v32 = vpop.f32.mrf.mxu0 }
0x2314   :  { %v6288_v38 = vpop.f32.mrf.mxu0 }
0x2316   :  { %v11445_v36 = vpop.f32.mrf.mxu0 }
0x233f   :  { %v6383_v41 = vpop.f32.mrf.mxu0 }
0x2341   :  { %v11456_v52 = vpop.f32.mrf.mxu0 }
0x2343   :  { %v6386_v20 = vpop.f32.mrf.mxu0 }
0x2345   :  { %v6334_v9 = vpop.f32.mrf.mxu1  ;;  %v11457_v42 = vpop.f32.mrf.mxu0 }
0x2346   :  { %v6438_v35 = vpack.c.bf16 %v6334_v9, %v6285_v13 }
0x2347   :  { %v11450_v48 = vpop.f32.mrf.mxu1 }
0x2348   :  { %11466 = vmatprep.mubr.msk.bf16.mxu0 %vm594_vm1, %v6438_v35 }
0x2349   :  { %v6337_v30 = vpop.f32.mrf.mxu1 }
0x234b   :  { %v11451_v55 = vpop.f32.mrf.mxu1 }
0x237e   :  { %v6432_v43 = vpop.f32.mrf.mxu1 }
0x237f   :  { %v6439_v62 = vpack.c.bf16 %v6432_v43, %v6383_v41 }
0x2380   :  { %v11462_v19 = vpop.f32.mrf.mxu1 }
0x2381   :  { %11467 = vmatmul.mubr.msk.bf16.vlgmr.msra.gmra.mxu0 %vm594_vm1, %v6439_v62 }
0x2382   :  { %11477 = vmatpush3.bf16.xpose.msra.mxu0 %v6570_v28  ;;  %v6435_v50 = vpop.f32.mrf.mxu1  ;;  %11478 = vmatprep.mubr.msk.bf16.mxu0 %vm12527_vm0, %v12526_v14 }
0x2383   :  { %11488 = vmatprep.subr.bf16.mxu0 %v12526_v14 }
0x2384   :  { %v11463_v47 = vpop.f32.mrf.mxu1 }
0x2386   :  { %v13768_v3 = vpop.f32.mrf.mxu1 }
0x2388   :  { %v13770_v6 = vpop.f32.mrf.mxu1 }
0x2389   :  { %11479 = vmatmul.mubr.msk.bf16.vlgmr.msra.gmra.mxu0 %vm594_vm1, %v6563_v45 }
0x238a   :  { %11489 = vmatpush3.bf16.xpose.msra.mxu0 %v6670_v63  ;;  %v13774_v56 = vpop.f32.mrf.mxu1  ;;  %11490 = vmatprep.mubr.msk.bf16.mxu0 %vm12527_vm0, %v12526_v14 }
0x238b   :  { %11500 = vmatprep.subr.bf16.mxu0 %v12526_v14 }
0x238c   :  { %v13779_v59 = vpop.f32.mrf.mxu1 }
0x238e   :  { %v6656_v24 = vpop.f32.mrf.mxu1 }
0x238f   :  { %v6763_v0 = vmul.f32 0.25, %v6656_v24 }
0x2390   :  { %v11486_v29 = vpop.f32.mrf.mxu1 }
0x2391   :  { %11491 = vmatmul.mubr.msk.bf16.vlgmr.msra.gmra.mxu0 %vm594_vm1, %v6663_v27  ;;  %v6769_v15 = vsel %vm783_vm3, %v6763_v0, -inf }
0x2392   :  { %6770 = vmax.xlane.f32.xlu1 %v6769_v15  ;;  %v6659_v5 = vpop.f32.mrf.mxu1  ;;  %11502 = vmatprep.mubr.msk.bf16.mxu0 %vm12527_vm0, %v12526_v14 }
0x2394   :  { %v11487_v44 = vpop.f32.mrf.mxu1 }
0x2396   :  { %v6756_v33 = vpop.f32.mrf.mxu1 }
0x2397   :  { %v6765_v55 = vmul.f32 0.25, %v6756_v33 }
0x2398   :  { %v11498_v7 = vpop.f32.mrf.mxu1 }
0x2399   :  { %v6775_v45 = vsel %vm783_vm3, %v6765_v55, -inf }
0x239a   :  { %v6759_v8 = vpop.f32.mrf.mxu1 }
0x239c   :  { %v11499_v26 = vpop.f32.mrf.mxu1 }
0x241b   :  { %v6771_v49 = vpop.xlane.xlu1 %6770 }
0x241c   :  { %v6779_v61 = vsub.f32 %v6763_v0, %v6771_v49 }
0x241e   :  { %v6784_v17 = vmul.f32 1.442695, %v6779_v61 }
0x2420   :  { %12185 = vpow2.f32 %v6784_v17 }
0x242d   :  { %v13785_v4 = vpop.eup %12185 }
0x242e   :  { %v6793_v57 = vsel %vm783_vm3, %v13785_v4, 0.0 }
0x242f   :  { %6794 = vadd.xlane.f32.xlu1 %v6793_v57 }
0x2441   :  { %v13789_v12 = vpop.f32.mrf.mxu0 }
0x2443   :  { %v13791_v13 = vpop.f32.mrf.mxu0 }
0x2445   :  { %v13793_v32 = vpop.f32.mrf.mxu0 }
0x2447   :  { %v13795_v38 = vpop.f32.mrf.mxu0 }
0x2449   :  { %v6606_v36 = vpop.f32.mrf.mxu0 }
0x244a   :  { %v6762_v41 = vmul.f32 0.25, %v6606_v36 }
0x244b   :  { %v11480_v52 = vpop.f32.mrf.mxu0 }
0x244c   :  { %v6766_v20 = vsel %vm783_vm3, %v6762_v41, -inf }
0x244d   :  { %6767 = vmax.xlane.f32.xlu0 %v6766_v20  ;;  %v6609_v9 = vpop.f32.mrf.mxu0 }
0x244f   :  { %v11481_v42 = vpop.f32.mrf.mxu0 }
0x2451   :  { %v6706_v35 = vpop.f32.mrf.mxu0 }
0x2452   :  { %v6764_v48 = vmul.f32 0.25, %v6706_v35 }
0x2453   :  { %v11492_v30 = vpop.f32.mrf.mxu0 }
0x2454   :  { %v6772_v18 = vsel %vm783_vm3, %v6764_v48, -inf }
0x2455   :  { %6773 = vmax.xlane.f32.xlu0 %v6772_v18  ;;  %v6709_v43 = vpop.f32.mrf.mxu0 }
0x2457   :  { %v11493_v62 = vpop.f32.mrf.mxu0 }
0x2459   :  { %6776 = vmax.xlane.f32.xlu0 %v6775_v45 }
0x24b8   :  { %v6795_v8 = vpop.xlane.xlu1 %6794 }
0x24d6   :  { %v6768_v19 = vpop.xlane.xlu0 %6767 }
0x24d7   :  { %v6778_v28 = vsub.f32 %v6762_v41, %v6768_v19 }
0x24d9   :  { %v6782_v50 = vmul.f32 1.442695, %v6778_v28 }
0x24db   :  { %12187 = vpow2.f32 %v6782_v50 }
0x24de   :  { %v6774_v47 = vpop.xlane.xlu0 %6773 }
0x24df   :  { %v6780_v46 = vsub.f32 %v6764_v48, %v6774_v47 }
0x24e1   :  { %v6786_v63 = vmul.f32 1.442695, %v6780_v46 }
0x24e2   :  { %v6777_v24 = vpop.xlane.xlu0 %6776 }
0x24e3   :  { %12189 = vpow2.f32 %v6786_v63  ;;  %v6781_v0 = vsub.f32 %v6765_v55, %v6777_v24 }
0x24e5   :  { %v6788_v27 = vmul.f32 1.442695, %v6781_v0 }
0x24e7   :  { %12191 = vpow2.f32 %v6788_v27 }
0x24e8   :  { %v12188_v29 = vpop.eup %12187  ;;  %12193 = vrcp.f32 %v6795_v8 }
0x24e9   :  { %v6790_v15 = vsel %vm783_vm3, %v12188_v29, 0.0 }
0x24ea   :  { %6791 = vadd.xlane.f32.xlu0 %v6790_v15 }
0x24f0   :  { %v12190_v5 = vpop.eup %12189 }
0x24f1   :  { %v6796_v44 = vsel %vm783_vm3, %v12190_v5, 0.0 }
0x24f2   :  { %6797 = vadd.xlane.f32.xlu0 %v6796_v44 }
0x24f4   :  { %v12192_v33 = vpop.eup %12191 }
0x24f5   :  { %v6799_v7 = vsel %vm783_vm3, %v12192_v33, 0.0  ;;  %v12194_v61 = vpop.eup %12193 }
0x24f6   :  { %6800 = vadd.xlane.f32.xlu1 %v6799_v7  ;;  %v6805_v52 = vmul.f32 %v12194_v61, %v13785_v4 }
0x24f8   :  { %v6811_v48 = vpack.c.bf16 %v6805_v52, %v6805_v52 }
0x2507   :  { %6862 = vrot.lane.b32.xlu1 %v13594_v25, %s12529_s26 }
0x2508   :  { %6814 = vrot.lane.b32.xlu0 %v13585_v21, %s12529_s26 }
0x250b   :  { %6910 = vrot.lane.b32.xlu1 %v13638_v11, %s12529_s26 }
0x250c   :  { %7075 = vrot.lane.b32.xlu0 %v13552_v54, %s12530_s17 }
0x250f   :  { %6958 = vrot.lane.b32.xlu1 %v13645_v51, %s12529_s26  ;;  %s12533_s26 = smov [#allocation16]  }
0x2510   :  { %7073 = vrot.lane.b32.xlu0 %v13565_v1, %s12530_s17 }
0x2513   :  { %7125 = vrot.lane.b32.xlu1 %v13558_v40, %s12530_s17 }
0x2514   :  { %7175 = vrot.lane.b32.xlu0 %v13567_v31, %s12530_s17 }
0x2517   :  { %7123 = vrot.lane.b32.xlu1 %v13580_v10, %s12530_s17 }
0x2518   :  { %7173 = vrot.lane.b32.xlu0 %v13591_v2, %s12530_s17 }
0x251b   :  { %7225 = vrot.lane.b32.xlu1 %v13578_v58, %s12530_s17 }
0x251f   :  { %7223 = vrot.lane.b32.xlu1 %v13602_v34, %s12530_s17 }
0x2573   :  { %v6792_v26 = vpop.xlane.xlu0 %6791 }
0x2574   :  { %12195 = vrcp.f32 %v6792_v26 }
0x257b   :  { %v6798_v49 = vpop.xlane.xlu0 %6797 }
0x257c   :  { %12197 = vrcp.f32 %v6798_v49 }
0x257f   :  { %v6801_v17 = vpop.xlane.xlu1 %6800  ;;  %v6815_v57 = vpop.permute.xlu0 %6814 }
0x2580   :  { %12199 = vrcp.f32 %v6801_v17  ;;  %v6820_v36 = vsel %vm835_vm2, %v6815_v57, 0 }
0x2581   :  { %v12196_v41 = vpop.eup %12195  ;;  %11501 = vmatpush3.bf16.msra.mxu0 %v6820_v36 }
0x2582   :  { %v6803_v20 = vmul.f32 %v12196_v41, %v12188_v29  ;;  %11512 = vmatprep.subr.bf16.mxu0 %v12526_v14  ;;  %v11939_v29 = vld [vmem:[#allocation10 + $0x50] sm:$0xff]  }
0x2583   :  { %v6863_v9 = vpop.permute.xlu1 %6862  ;;  %v7076_v43 = vpop.permute.xlu0 %7075 }
0x2584   :  { %v6810_v42 = vpack.c.bf16 %v6803_v20, %v6803_v20  ;;  %v6868_v35 = vsel %vm835_vm2, %v6863_v9, 0  ;;  %v7081_v63 = vsel %vm594_vm1, %v7076_v43, 0 }
0x2585   :  { %11507 = vmatpush3.bf16.msra.mxu1 %v6868_v35 }
0x2586   :  { %11503 = vmatmul.mubr.msk.bf16.vlgmr.msra.gmra.mxu0 %vm783_vm3, %v6810_v42  ;;  %11518 = vmatprep.subr.bf16.mxu1 %v12526_v14 }
0x2587   :  { %v6911_v30 = vpop.permute.xlu1 %6910  ;;  %11514 = vmatprep.mubr.msk.bf16.mxu0 %vm12527_vm0, %v12526_v14  ;;  %v7074_v46 = vpop.permute.xlu0 %7073 }
0x2588   :  { %v6916_v55 = vsel %vm835_vm2, %v6911_v30, 0  ;;  %11509 = vmatmul.mubr.msk.bf16.vlgmr.msra.gmra.mxu1 %vm783_vm3, %v6811_v48 }
0x2589   :  { %v12198_v4 = vpop.eup %12197  ;;  %11513 = vmatpush3.bf16.msra.mxu0 %v6916_v55  ;;  %11520 = vmatprep.mubr.msk.bf16.mxu1 %vm12527_vm0, %v12526_v14 }
0x258a   :  { %v6807_v18 = vmul.f32 %v12198_v4, %v12190_v5  ;;  %11524 = vmatprep.subr.bf16.mxu0 %v11939_v29 }
0x258b   :  { %v6959_v62 = vpop.permute.xlu1 %6958  ;;  %v7176_v24 = vpop.permute.xlu0 %7175 }
0x258c   :  { %v6812_v45 = vpack.c.bf16 %v6807_v18, %v6807_v18  ;;  %v6964_v19 = vsel %vm835_vm2, %v6959_v62, 0  ;;  %v7181_v0 = vsel %vm594_vm1, %v7176_v24, 0 }
0x258d   :  { %v12200_v28 = vpop.eup %12199  ;;  %11519 = vmatpush3.bf16.msra.mxu1 %v6964_v19 }
0x258e   :  { %v6809_v50 = vmul.f32 %v12200_v28, %v12192_v33  ;;  %11515 = vmatmul.mubr.msk.bf16.vlgmr.msra.gmra.mxu0 %vm783_vm3, %v6812_v45  ;;  %11530 = vmatprep.subr.bf16.mxu1 %v12526_v14 }
0x258f   :  { %v7174_v27 = vpop.permute.xlu0 %7173  ;;  %11525 = vmatpush3.bf16.msra.mxu0 %v11939_v29  ;;  %v7126_v61 = vpop.permute.xlu1 %7125 }
0x2590   :  { %v6813_v47 = vpack.c.bf16 %v6809_v50, %v6809_v50  ;;  %11536 = vmatprep.subr.bf16.mxu0 %v12526_v14  ;;  %v7131_v48 = vsel %vm594_vm1, %v7126_v61, 0  ;;  %v6559_v61 = vadd.f32 %v13774_v56, %v13793_v32 }
0x2592   :  { %11521 = vmatmul.mubr.msk.bf16.vlgmr.msra.gmra.mxu1 %vm783_vm3, %v6813_v47 }
0x2593   :  { %11531 = vmatpush3.bf16.xpose.msra.mxu1 %v7081_v63  ;;  %11532 = vmatprep.mubr.msk.bf16.mxu1 %vm12527_vm0, %v12526_v14  ;;  %v7124_v20 = vpop.permute.xlu1 %7123 }
0x2594   :  { %11542 = vmatprep.subr.bf16.mxu1 %v12526_v14 }
0x2597   :  { %v7226_v4 = vpop.permute.xlu1 %7225 }
0x2598   :  { %v7231_v45 = vsel %vm594_vm1, %v7226_v4, 0 }
0x259a   :  { %11533 = vmatmul.mubr.msk.bf16.vlgmr.msra.gmra.mxu1 %vm594_vm1, %v7074_v46 }
0x259b   :  { %11543 = vmatpush3.bf16.xpose.msra.mxu1 %v7181_v0  ;;  %11544 = vmatprep.mubr.msk.bf16.mxu1 %vm12527_vm0, %v12526_v14  ;;  %v7224_v63 = vpop.permute.xlu1 %7223 }
0x259c   :  { %11554 = vmatprep.subr.bf16.mxu1 %v12526_v14 }
0x25a2   :  { %11545 = vmatmul.mubr.msk.bf16.vlgmr.msra.gmra.mxu1 %vm594_vm1, %v7174_v27 }
0x25a3   :  { %11556 = vmatprep.mubr.msk.bf16.mxu1 %vm12527_vm0, %v12526_v14 }
0x2646   :  { %v6856_v15 = vpop.f32.mrf.mxu0 }
0x2648   :  { %v11504_v5 = vpop.f32.mrf.mxu0  ;;  %v6904_v44 = vpop.f32.mrf.mxu1 }
0x2649   :  { %v7006_v33 = vpack.c.bf16 %v6904_v44, %v6856_v15  ;;  %v6556_v5 = vadd.f32 %v13768_v3, %v13789_v12 }
0x264a   :  { %v6859_v7 = vpop.f32.mrf.mxu0  ;;  %v11510_v8 = vpop.f32.mrf.mxu1 }
0x264b   :  { %11526 = vmatprep.mubr.msk.bf16.mxu0 %vm594_vm1, %v7006_v33  ;;  %v6548_v8 = vadd.f32 %v13770_v6, %v13791_v13 }
0x264c   :  { %v11505_v26 = vpop.f32.mrf.mxu0  ;;  %v6907_v49 = vpop.f32.mrf.mxu1 }
0x264e   :  { %v11511_v17 = vpop.f32.mrf.mxu1  ;;  %v6952_v57 = vpop.f32.mrf.mxu0 }
0x2650   :  { %v11516_v36 = vpop.f32.mrf.mxu0 }
0x2652   :  { %v6955_v41 = vpop.f32.mrf.mxu0  ;;  %v7000_v52 = vpop.f32.mrf.mxu1 }
0x2653   :  { %v7007_v9 = vpack.c.bf16 %v7000_v52, %v6952_v57 }
0x2654   :  { %v11517_v42 = vpop.f32.mrf.mxu0  ;;  %v11522_v35 = vpop.f32.mrf.mxu1 }
0x2655   :  { %11527 = vmatmul.mubr.msk.bf16.vlgmr.msra.gmra.mxu0 %vm594_vm1, %v7007_v9 }
0x2656   :  { %11537 = vmatpush3.bf16.xpose.msra.mxu0 %v7131_v48  ;;  %v7003_v30 = vpop.f32.mrf.mxu1  ;;  %11538 = vmatprep.mubr.msk.bf16.mxu0 %vm12527_vm0, %v12526_v14 }
0x2657   :  { %11548 = vmatprep.subr.bf16.mxu0 %v12526_v14 }
0x2658   :  { %v11523_v55 = vpop.f32.mrf.mxu1 }
0x265a   :  { %v7117_v18 = vpop.f32.mrf.mxu1 }
0x265b   :  { %v7273_v43 = vmul.f32 0.25, %v7117_v18 }
0x265c   :  { %v11534_v62 = vpop.f32.mrf.mxu1 }
0x265d   :  { %11539 = vmatmul.mubr.msk.bf16.vlgmr.msra.gmra.mxu0 %vm594_vm1, %v7124_v20  ;;  %v7277_v19 = vsel %vm783_vm3, %v7273_v43, -inf }
0x265e   :  { %11549 = vmatpush3.bf16.xpose.msra.mxu0 %v7231_v45  ;;  %7278 = vmax.xlane.f32.xlu0 %v7277_v19  ;;  %v7120_v28 = vpop.f32.mrf.mxu1 }
0x265f   :  { %11550 = vmatprep.mubr.msk.bf16.mxu0 %vm12527_vm0, %v12526_v14  ;;  %11560 = vmatprep.subr.bf16.mxu0 %v12526_v14 }
0x2660   :  { %v11535_v50 = vpop.f32.mrf.mxu1 }
0x2662   :  { %v7217_v47 = vpop.f32.mrf.mxu1 }
0x2663   :  { %v7275_v46 = vmul.f32 0.25, %v7217_v47 }
0x2664   :  { %v11546_v24 = vpop.f32.mrf.mxu1 }
0x2665   :  { %11551 = vmatmul.mubr.msk.bf16.vlgmr.msra.gmra.mxu0 %vm594_vm1, %v7224_v63  ;;  %v7283_v0 = vsel %vm783_vm3, %v7275_v46, -inf }
0x2666   :  { %7284 = vmax.xlane.f32.xlu0 %v7283_v0  ;;  %v7220_v27 = vpop.f32.mrf.mxu1  ;;  %11562 = vmatprep.mubr.msk.bf16.mxu0 %vm12527_vm0, %v12526_v14 }
0x2668   :  { %v11547_v29 = vpop.f32.mrf.mxu1 }
0x26e7   :  { %v7279_v15 = vpop.xlane.xlu0 %7278 }
0x26e8   :  { %v7289_v44 = vsub.f32 %v7273_v43, %v7279_v15 }
0x26ea   :  { %v7293_v17 = vmul.f32 1.442695, %v7289_v44 }
0x26ec   :  { %12201 = vpow2.f32 %v7293_v17 }
0x26ef   :  { %v7285_v33 = vpop.xlane.xlu0 %7284 }
0x26f0   :  { %v7291_v57 = vsub.f32 %v7275_v46, %v7285_v33 }
0x26f2   :  { %v7297_v12 = vmul.f32 1.442695, %v7291_v57 }
0x26f4   :  { %12203 = vpow2.f32 %v7297_v12 }
0x26f9   :  { %v12202_v55 = vpop.eup %12201 }
0x26fa   :  { %v7301_v43 = vsel %vm783_vm3, %v12202_v55, 0.0 }
0x2701   :  { %v12204_v62 = vpop.eup %12203 }
0x2702   :  { %v7307_v45 = vsel %vm783_vm3, %v12204_v62, 0.0 }
0x2715   :  { %v11528_v7 = vpop.f32.mrf.mxu0 }
0x2716   :  { %v13876_v26 = vadd.f32 %v11528_v7, %v6556_v5 }
0x2717   :  { %v7054_v49 = vpop.f32.mrf.mxu0 }
0x2718   :  { %v13880_v36 = vadd.f32 %v7054_v49, %v6548_v8 }
0x2719   :  { %v11529_v41 = vpop.f32.mrf.mxu0 }
0x271a   :  { %v13882_v52 = vadd.f32 %v11529_v41, %v6559_v61 }
0x271b   :  { %v13884_v3 = vpop.f32.mrf.mxu0 }
0x271d   :  { %v7167_v20 = vpop.f32.mrf.mxu0 }
0x271e   :  { %v7274_v9 = vmul.f32 0.25, %v7167_v20 }
0x271f   :  { %v11540_v6 = vpop.f32.mrf.mxu0 }
0x2720   :  { %v7280_v13 = vsel %vm783_vm3, %v7274_v9, -inf }
0x2721   :  { %7281 = vmax.xlane.f32.xlu1 %v7280_v13  ;;  %v7170_v42 = vpop.f32.mrf.mxu0 }
0x2723   :  { %v11541_v56 = vpop.f32.mrf.mxu0 }
0x2725   :  { %v7267_v32 = vpop.f32.mrf.mxu0 }
0x2726   :  { %v7276_v35 = vmul.f32 0.25, %v7267_v32 }
0x2727   :  { %v11552_v48 = vpop.f32.mrf.mxu0 }
0x2728   :  { %v7286_v30 = vsel %vm783_vm3, %v7276_v35, -inf }
0x2729   :  { %7287 = vmax.xlane.f32.xlu0 %v7286_v30  ;;  %v7270_v4 = vpop.f32.mrf.mxu0 }
0x272b   :  { %v11553_v18 = vpop.f32.mrf.mxu0 }
0x272d   :  { %7302 = vadd.xlane.f32.xlu0 %v7301_v43 }
0x2731   :  { %7308 = vadd.xlane.f32.xlu0 %v7307_v45 }
0x2732   :  { %7373 = vrot.lane.b32.xlu1 %v13594_v25, %s12530_s17 }
0x2736   :  { %7421 = vrot.lane.b32.xlu1 %v13638_v11, %s12530_s17 }
0x2747   :  { %7325 = vrot.lane.b32.xlu0 %v13585_v21, %s12530_s17 }
0x274b   :  { %7586 = vrot.lane.b32.xlu0 %v13552_v54, %s12521_s1 }
0x274f   :  { %7584 = vrot.lane.b32.xlu0 %v13565_v1, %s12521_s1 }
0x2753   :  { %7686 = vrot.lane.b32.xlu0 %v13567_v31, %s12521_s1 }
0x2757   :  { %7684 = vrot.lane.b32.xlu0 %v13591_v2, %s12521_s1 }
0x27aa   :  { %v7282_v19 = vpop.xlane.xlu1 %7281 }
0x27ab   :  { %v7290_v28 = vsub.f32 %v7274_v9, %v7282_v19 }
0x27ad   :  { %v7295_v50 = vmul.f32 1.442695, %v7290_v28 }
0x27ae   :  { %v7374_v47 = vpop.permute.xlu1 %7373 }
0x27af   :  { %12205 = vpow2.f32 %v7295_v50  ;;  %v7379_v46 = vsel %vm835_vm2, %v7374_v47, 0 }
0x27b0   :  { %11561 = vmatpush3.bf16.msra.mxu0 %v7379_v46 }
0x27b1   :  { %11572 = vmatprep.subr.bf16.mxu0 %v12526_v14 }
0x27b2   :  { %v7288_v63 = vpop.xlane.xlu0 %7287  ;;  %v7422_v17 = vpop.permute.xlu1 %7421 }
0x27b3   :  { %v7292_v24 = vsub.f32 %v7276_v35, %v7288_v63  ;;  %v7427_v12 = vsel %vm835_vm2, %v7422_v17, 0 }
0x27b5   :  { %v7299_v0 = vmul.f32 1.442695, %v7292_v24 }
0x27b6   :  { %v7303_v27 = vpop.xlane.xlu0 %7302 }
0x27b7   :  { %12207 = vpow2.f32 %v7299_v0 }
0x27b8   :  { %12209 = vrcp.f32 %v7303_v27 }
0x27ba   :  { %v7309_v29 = vpop.xlane.xlu0 %7308 }
0x27bb   :  { %12211 = vrcp.f32 %v7309_v29 }
0x27bc   :  { %v12206_v15 = vpop.eup %12205 }
0x27bd   :  { %v7304_v5 = vsel %vm783_vm3, %v12206_v15, 0.0 }
0x27be   :  { %7305 = vadd.xlane.f32.xlu1 %v7304_v5  ;;  %v7326_v44 = vpop.permute.xlu0 %7325 }
0x27bf   :  { %v7331_v33 = vsel %vm835_vm2, %v7326_v44, 0 }
0x27c0   :  { %11555 = vmatpush3.bf16.msra.mxu1 %v7331_v33 }
0x27c1   :  { %11566 = vmatprep.subr.bf16.mxu1 %v12526_v14 }
0x27c2   :  { %v7587_v30 = vpop.permute.xlu0 %7586 }
0x27c4   :  { %v12208_v7 = vpop.eup %12207 }
0x27c5   :  { %v12210_v8 = vpop.eup %12209  ;;  %v7310_v49 = vsel %vm783_vm3, %v12208_v7, 0.0 }
0x27c6   :  { %v7314_v61 = vmul.f32 %v12210_v8, %v12202_v55  ;;  %7311 = vadd.xlane.f32.xlu1 %v7310_v49  ;;  %v7585_v43 = vpop.permute.xlu0 %7584 }
0x27c8   :  { %v7321_v57 = vpack.c.bf16 %v7314_v61, %v7314_v61  ;;  %v12212_v41 = vpop.eup %12211 }
0x27c9   :  { %v7318_v20 = vmul.f32 %v12212_v41, %v12204_v62  ;;  %v7592_v62 = vsel %vm594_vm1, %v7587_v30, 0 }
0x27ca   :  { %11557 = vmatmul.mubr.msk.bf16.vlgmr.msra.gmra.mxu1 %vm783_vm3, %v7321_v57  ;;  %v7687_v45 = vpop.permute.xlu0 %7686 }
0x27cb   :  { %11567 = vmatpush3.bf16.msra.mxu1 %v7427_v12  ;;  %11568 = vmatprep.mubr.msk.bf16.mxu1 %vm12527_vm0, %v12526_v14  ;;  %v7323_v9 = vpack.c.bf16 %v7318_v20, %v7318_v20  ;;  %v7692_v19 = vsel %vm594_vm1, %v7687_v45, 0 }
0x27ce   :  { %v7685_v28 = vpop.permute.xlu0 %7684 }
0x27d2   :  { %11569 = vmatmul.mubr.msk.bf16.vlgmr.msra.gmra.mxu1 %vm783_vm3, %v7323_v9 }
0x27d7   :  { %7469 = vrot.lane.b32.xlu1 %v13645_v51, %s12530_s17 }
0x27db   :  { %7636 = vrot.lane.b32.xlu1 %v13558_v40, %s12521_s1 }
0x27df   :  { %7634 = vrot.lane.b32.xlu1 %v13580_v10, %s12521_s1 }
0x27e3   :  { %7736 = vrot.lane.b32.xlu1 %v13578_v58, %s12521_s1 }
0x27e7   :  { %7734 = vrot.lane.b32.xlu1 %v13602_v34, %s12521_s1 }
0x2847   :  { %v7306_v6 = vpop.xlane.xlu1 %7305 }
0x2848   :  { %12213 = vrcp.f32 %v7306_v6 }
0x284f   :  { %v7312_v13 = vpop.xlane.xlu1 %7311 }
0x2850   :  { %12215 = vrcp.f32 %v7312_v13 }
0x2853   :  { %v7470_v32 = vpop.permute.xlu1 %7469 }
0x2854   :  { %v7475_v48 = vsel %vm835_vm2, %v7470_v32, 0 }
0x2855   :  { %v12214_v42 = vpop.eup %12213 }
0x2856   :  { %v7316_v56 = vmul.f32 %v12214_v42, %v12206_v15  ;;  %v11940_v15 = vld [vmem:[#allocation10 + $0x58] sm:$0xff]  }
0x2857   :  { %11578 = vmatprep.subr.bf16.mxu1 %v11940_v15 }
0x2858   :  { %v7322_v35 = vpack.c.bf16 %v7316_v56, %v7316_v56  ;;  %11579 = vmatpush3.bf16.msra.mxu1 %v11940_v15 }
0x2859   :  { %11590 = vmatprep.subr.bf16.mxu1 %v12526_v14 }
0x285a   :  { %11563 = vmatmul.mubr.msk.bf16.vlgmr.msra.gmra.mxu0 %vm783_vm3, %v7322_v35 }
0x285b   :  { %11573 = vmatpush3.bf16.msra.mxu0 %v7475_v48  ;;  %11574 = vmatprep.mubr.msk.bf16.mxu0 %vm12527_vm0, %v12526_v14 }
0x285c   :  { %11584 = vmatprep.subr.bf16.mxu0 %v12526_v14 }
0x285d   :  { %v12216_v55 = vpop.eup %12215 }
0x285e   :  { %v7320_v4 = vmul.f32 %v12216_v55, %v12208_v7  ;;  %v7637_v7 = vpop.permute.xlu1 %7636 }
0x285f   :  { %v7642_v12 = vsel %vm594_vm1, %v7637_v7, 0 }
0x2860   :  { %v7324_v18 = vpack.c.bf16 %v7320_v4, %v7320_v4 }
0x2862   :  { %11575 = vmatmul.mubr.msk.bf16.vlgmr.msra.gmra.mxu0 %vm783_vm3, %v7324_v18  ;;  %v7635_v57 = vpop.permute.xlu1 %7634 }
0x2863   :  { %11585 = vmatpush3.bf16.xpose.msra.mxu0 %v7592_v62  ;;  %11586 = vmatprep.mubr.msk.bf16.mxu0 %vm12527_vm0, %v12526_v14 }
0x2864   :  { %11596 = vmatprep.subr.bf16.mxu0 %v12526_v14 }
0x2866   :  { %v7737_v6 = vpop.permute.xlu1 %7736 }
0x2867   :  { %v7742_v32 = vsel %vm594_vm1, %v7737_v6, 0 }
0x286a   :  { %11587 = vmatmul.mubr.msk.bf16.vlgmr.msra.gmra.mxu0 %vm594_vm1, %v7585_v43  ;;  %v7735_v18 = vpop.permute.xlu1 %7734 }
0x286b   :  { %11597 = vmatpush3.bf16.xpose.msra.mxu0 %v7692_v19  ;;  %11598 = vmatprep.mubr.msk.bf16.mxu0 %vm12527_vm0, %v12526_v14 }
0x286c   :  { %11608 = vmatprep.subr.bf16.mxu0 %v12526_v14 }
0x2872   :  { %11599 = vmatmul.mubr.msk.bf16.vlgmr.msra.gmra.mxu0 %vm594_vm1, %v7685_v28 }
0x2873   :  { %11610 = vmatprep.mubr.msk.bf16.mxu0 %vm12527_vm0, %v12526_v14 }
0x288a   :  { %v7367_v50 = vpop.f32.mrf.mxu1 }
0x288c   :  { %v11558_v47 = vpop.f32.mrf.mxu1 }
0x288e   :  { %v7370_v46 = vpop.f32.mrf.mxu1 }
0x2890   :  { %v11559_v63 = vpop.f32.mrf.mxu1 }
0x2892   :  { %v7463_v24 = vpop.f32.mrf.mxu1 }
0x2894   :  { %v11570_v0 = vpop.f32.mrf.mxu1 }
0x2895   :  { %v6551_v0 = vadd.f32 %v13779_v59, %v13795_v38 }
0x2896   :  { %v7466_v27 = vpop.f32.mrf.mxu1 }
0x2898   :  { %v11571_v29 = vpop.f32.mrf.mxu1 }
0x291a   :  { %v7415_v5 = vpop.f32.mrf.mxu0 }
0x291b   :  { %v7517_v44 = vpack.c.bf16 %v7415_v5, %v7367_v50 }
0x291c   :  { %v11564_v33 = vpop.f32.mrf.mxu0 }
0x291d   :  { %11580 = vmatprep.mubr.msk.bf16.mxu1 %vm594_vm1, %v7517_v44  ;;  %v7070_v44 = vadd.f32 %v13884_v3, %v6551_v0 }
0x291e   :  { %v7418_v8 = vpop.f32.mrf.mxu0 }
0x2920   :  { %v11565_v49 = vpop.f32.mrf.mxu0 }
0x2922   :  { %v7511_v61 = vpop.f32.mrf.mxu0 }
0x2923   :  { %v7518_v17 = vpack.c.bf16 %v7511_v61, %v7463_v24 }
0x2924   :  { %v11576_v41 = vpop.f32.mrf.mxu0 }
0x2925   :  { %11581 = vmatmul.mubr.msk.bf16.vlgmr.msra.gmra.mxu1 %vm594_vm1, %v7518_v17 }
0x2926   :  { %11591 = vmatpush3.bf16.xpose.msra.mxu1 %v7642_v12  ;;  %v7514_v20 = vpop.f32.mrf.mxu0  ;;  %11592 = vmatprep.mubr.msk.bf16.mxu1 %vm12527_vm0, %v12526_v14 }
0x2927   :  { %11602 = vmatprep.subr.bf16.mxu1 %v12526_v14 }
0x2928   :  { %v11577_v9 = vpop.f32.mrf.mxu0 }
0x292a   :  { %v7628_v13 = vpop.f32.mrf.mxu0 }
0x292b   :  { %v7784_v42 = vmul.f32 0.25, %v7628_v13 }
0x292c   :  { %v11588_v56 = vpop.f32.mrf.mxu0 }
0x292d   :  { %11593 = vmatmul.mubr.msk.bf16.vlgmr.msra.gmra.mxu1 %vm594_vm1, %v7635_v57  ;;  %v7788_v35 = vsel %vm783_vm3, %v7784_v42, -inf }
0x292e   :  { %11603 = vmatpush3.bf16.xpose.msra.mxu1 %v7742_v32  ;;  %7789 = vmax.xlane.f32.xlu0 %v7788_v35  ;;  %v7631_v48 = vpop.f32.mrf.mxu0 }
0x292f   :  { %11604 = vmatprep.mubr.msk.bf16.mxu1 %vm12527_vm0, %v12526_v14  ;;  %11614 = vmatprep.subr.bf16.mxu1 %v12526_v14 }
0x2930   :  { %v11589_v30 = vpop.f32.mrf.mxu0 }
0x2932   :  { %v7728_v55 = vpop.f32.mrf.mxu0 }
0x2933   :  { %v7786_v4 = vmul.f32 0.25, %v7728_v55 }
0x2934   :  { %v11600_v43 = vpop.f32.mrf.mxu0 }
0x2935   :  { %11605 = vmatmul.mubr.msk.bf16.vlgmr.msra.gmra.mxu1 %vm594_vm1, %v7735_v18  ;;  %v7794_v62 = vsel %vm783_vm3, %v7786_v4, -inf }
0x2936   :  { %7795 = vmax.xlane.f32.xlu0 %v7794_v62  ;;  %v7731_v45 = vpop.f32.mrf.mxu0  ;;  %11616 = vmatprep.mubr.msk.bf16.mxu1 %vm12527_vm0, %v12526_v14 }
0x2938   :  { %v11601_v19 = vpop.f32.mrf.mxu0 }
0x29b7   :  { %v7790_v28 = vpop.xlane.xlu0 %7789 }
0x29b8   :  { %v7800_v50 = vsub.f32 %v7784_v42, %v7790_v28 }
0x29ba   :  { %v7804_v27 = vmul.f32 1.442695, %v7800_v50 }
0x29bc   :  { %12217 = vpow2.f32 %v7804_v27 }
0x29bf   :  { %v7796_v47 = vpop.xlane.xlu0 %7795 }
0x29c0   :  { %v7802_v29 = vsub.f32 %v7786_v4, %v7796_v47 }
0x29c2   :  { %v7808_v8 = vmul.f32 1.442695, %v7802_v29 }
0x29c4   :  { %12219 = vpow2.f32 %v7808_v8 }
0x29c9   :  { %v12218_v12 = vpop.eup %12217 }
0x29ca   :  { %v7812_v6 = vsel %vm783_vm3, %v12218_v12, 0.0 }
0x29d1   :  { %v12220_v13 = vpop.eup %12219 }
0x29d2   :  { %v7818_v42 = vsel %vm783_vm3, %v12220_v13, 0.0 }
0x29e5   :  { %v11582_v46 = vpop.f32.mrf.mxu1 }
0x29e6   :  { %v13961_v63 = vadd.f32 %v11582_v46, %v13876_v26 }
0x29e7   :  { %v7565_v24 = vpop.f32.mrf.mxu1 }
0x29e8   :  { %v13966_v15 = vadd.f32 %v7565_v24, %v13880_v36 }
0x29e9   :  { %v11583_v5 = vpop.f32.mrf.mxu1 }
0x29ea   :  { %v13970_v33 = vadd.f32 %v11583_v5, %v13882_v52 }
0x29eb   :  { %v7568_v7 = vpop.f32.mrf.mxu1 }
0x29ec   :  { %v13972_v26 = vadd.f32 %v7568_v7, %v7070_v44 }
0x29ed   :  { %v7678_v49 = vpop.f32.mrf.mxu1 }
0x29ee   :  { %v7785_v61 = vmul.f32 0.25, %v7678_v49 }
0x29ef   :  { %v11594_v17 = vpop.f32.mrf.mxu1 }
0x29f0   :  { %v7791_v59 = vsel %vm783_vm3, %v7785_v61, -inf }
0x29f1   :  { %7792 = vmax.xlane.f32.xlu1 %v7791_v59  ;;  %v7681_v38 = vpop.f32.mrf.mxu1 }
0x29f3   :  { %v11595_v36 = vpop.f32.mrf.mxu1 }
0x29f5   :  { %v7778_v57 = vpop.f32.mrf.mxu1 }
0x29f6   :  { %v7787_v41 = vmul.f32 0.25, %v7778_v57 }
0x29f7   :  { %v11606_v3 = vpop.f32.mrf.mxu1 }
0x29f8   :  { %v7797_v52 = vsel %vm783_vm3, %v7787_v41, -inf }
0x29f9   :  { %v7781_v20 = vpop.f32.mrf.mxu1  ;;  %7798 = vmax.xlane.f32.xlu0 %v7797_v52 }
0x29fb   :  { %v11607_v9 = vpop.f32.mrf.mxu1 }
0x29fd   :  { %7813 = vadd.xlane.f32.xlu0 %v7812_v6 }
0x2a01   :  { %7819 = vadd.xlane.f32.xlu0 %v7818_v42 }
0x2a02   :  { %7884 = vrot.lane.b32.xlu1 %v13594_v25, %s12521_s1 }
0x2a06   :  { %7932 = vrot.lane.b32.xlu1 %v13638_v11, %s12521_s1 }
0x2a17   :  { %7836 = vrot.lane.b32.xlu0 %v13585_v21, %s12521_s1 }
0x2a1b   :  { %8097 = vrot.lane.b32.xlu0 %v13552_v54, %s12531_s18 }
0x2a1f   :  { %8095 = vrot.lane.b32.xlu0 %v13565_v1, %s12531_s18 }
0x2a23   :  { %8197 = vrot.lane.b32.xlu0 %v13567_v31, %s12531_s18 }
0x2a27   :  { %8195 = vrot.lane.b32.xlu0 %v13591_v2, %s12531_s18 }
0x2a7a   :  { %v7793_v56 = vpop.xlane.xlu1 %7792 }
0x2a7b   :  { %v7801_v32 = vsub.f32 %v7785_v61, %v7793_v56 }
0x2a7d   :  { %v7806_v35 = vmul.f32 1.442695, %v7801_v32 }
0x2a7e   :  { %v7885_v48 = vpop.permute.xlu1 %7884 }
0x2a7f   :  { %12221 = vpow2.f32 %v7806_v35  ;;  %v7890_v30 = vsel %vm835_vm2, %v7885_v48, 0 }
0x2a80   :  { %11615 = vmatpush3.bf16.msra.mxu1 %v7890_v30 }
0x2a81   :  { %11626 = vmatprep.subr.bf16.mxu1 %v12526_v14 }
0x2a82   :  { %v7799_v55 = vpop.xlane.xlu0 %7798  ;;  %v7933_v27 = vpop.permute.xlu1 %7932 }
0x2a83   :  { %v7803_v4 = vsub.f32 %v7787_v41, %v7799_v55  ;;  %v7938_v44 = vsel %vm835_vm2, %v7933_v27, 0 }
0x2a85   :  { %v7810_v18 = vmul.f32 1.442695, %v7803_v4 }
0x2a86   :  { %v7814_v43 = vpop.xlane.xlu0 %7813 }
0x2a87   :  { %12223 = vpow2.f32 %v7810_v18 }
0x2a88   :  { %12225 = vrcp.f32 %v7814_v43  ;;  %v11941_v43 = vld [vmem:[#allocation10 + $0x60] sm:$0xff]  }
0x2a8a   :  { %v7820_v62 = vpop.xlane.xlu0 %7819 }
0x2a8b   :  { %12227 = vrcp.f32 %v7820_v62 }
0x2a8c   :  { %v12222_v45 = vpop.eup %12221 }
0x2a8d   :  { %v7815_v19 = vsel %vm783_vm3, %v12222_v45, 0.0 }
0x2a8e   :  { %7816 = vadd.xlane.f32.xlu1 %v7815_v19  ;;  %v7837_v28 = vpop.permute.xlu0 %7836 }
0x2a8f   :  { %v7842_v50 = vsel %vm835_vm2, %v7837_v28, 0 }
0x2a90   :  { %11609 = vmatpush3.bf16.msra.mxu0 %v7842_v50 }
0x2a91   :  { %11620 = vmatprep.subr.bf16.mxu0 %v12526_v14 }
0x2a92   :  { %v8098_v41 = vpop.permute.xlu0 %8097 }
0x2a93   :  { %v8103_v9 = vsel %vm594_vm1, %v8098_v41, 0 }
0x2a94   :  { %v12224_v47 = vpop.eup %12223 }
0x2a95   :  { %v12226_v46 = vpop.eup %12225  ;;  %v7821_v24 = vsel %vm783_vm3, %v12224_v47, 0.0 }
0x2a96   :  { %v7825_v0 = vmul.f32 %v12226_v46, %v12218_v12  ;;  %7822 = vadd.xlane.f32.xlu1 %v7821_v24  ;;  %v8096_v20 = vpop.permute.xlu0 %8095 }
0x2a98   :  { %v7832_v29 = vpack.c.bf16 %v7825_v0, %v7825_v0  ;;  %v12228_v5 = vpop.eup %12227 }
0x2a99   :  { %v7829_v7 = vmul.f32 %v12228_v5, %v12220_v13 }
0x2a9a   :  { %11611 = vmatmul.mubr.msk.bf16.vlgmr.msra.gmra.mxu0 %vm783_vm3, %v7832_v29  ;;  %v8198_v6 = vpop.permute.xlu0 %8197 }
0x2a9b   :  { %11621 = vmatpush3.bf16.msra.mxu0 %v7938_v44  ;;  %11622 = vmatprep.mubr.msk.bf16.mxu0 %vm12527_vm0, %v12526_v14  ;;  %v7834_v8 = vpack.c.bf16 %v7829_v7, %v7829_v7  ;;  %v8203_v13 = vsel %vm594_vm1, %v8198_v6, 0 }
0x2a9c   :  { %11632 = vmatprep.subr.bf16.mxu0 %v11941_v43 }
0x2a9e   :  { %v8196_v42 = vpop.permute.xlu0 %8195 }
0x2aa2   :  { %11623 = vmatmul.mubr.msk.bf16.vlgmr.msra.gmra.mxu0 %vm783_vm3, %v7834_v8 }
0x2aa3   :  { %11633 = vmatpush3.bf16.msra.mxu0 %v11941_v43 }
0x2aa4   :  { %11644 = vmatprep.subr.bf16.mxu0 %v12526_v14 }
0x2aa7   :  { %7980 = vrot.lane.b32.xlu1 %v13645_v51, %s12521_s1 }
0x2aab   :  { %8147 = vrot.lane.b32.xlu1 %v13558_v40, %s12531_s18 }
0x2aaf   :  { %8145 = vrot.lane.b32.xlu1 %v13580_v10, %s12531_s18 }
0x2ab3   :  { %8247 = vrot.lane.b32.xlu1 %v13578_v58, %s12531_s18 }
0x2ab7   :  { %8245 = vrot.lane.b32.xlu1 %v13602_v34, %s12531_s18 }
0x2b17   :  { %v7817_v49 = vpop.xlane.xlu1 %7816 }
0x2b18   :  { %12229 = vrcp.f32 %v7817_v49 }
0x2b1f   :  { %v7823_v61 = vpop.xlane.xlu1 %7822 }
0x2b20   :  { %12231 = vrcp.f32 %v7823_v61 }
0x2b23   :  { %v7981_v38 = vpop.permute.xlu1 %7980 }
0x2b24   :  { %v7986_v57 = vsel %vm835_vm2, %v7981_v38, 0 }
0x2b25   :  { %v12230_v17 = vpop.eup %12229 }
0x2b26   :  { %v7827_v59 = vmul.f32 %v12230_v17, %v12222_v45 }
0x2b27   :  { %v8148_v28 = vpop.permute.xlu1 %8147 }
0x2b28   :  { %v7833_v36 = vpack.c.bf16 %v7827_v59, %v7827_v59  ;;  %v8153_v29 = vsel %vm594_vm1, %v8148_v28, 0 }
0x2b2a   :  { %11617 = vmatmul.mubr.msk.bf16.vlgmr.msra.gmra.mxu1 %vm783_vm3, %v7833_v36 }
0x2b2b   :  { %11627 = vmatpush3.bf16.msra.mxu1 %v7986_v57  ;;  %11628 = vmatprep.mubr.msk.bf16.mxu1 %vm12527_vm0, %v12526_v14  ;;  %v8146_v0 = vpop.permute.xlu1 %8145 }
0x2b2c   :  { %11638 = vmatprep.subr.bf16.mxu1 %v12526_v14 }
0x2b2d   :  { %v12232_v3 = vpop.eup %12231 }
0x2b2e   :  { %v7831_v52 = vmul.f32 %v12232_v3, %v12224_v47 }
0x2b2f   :  { %v8248_v7 = vpop.permute.xlu1 %8247 }
0x2b30   :  { %v7835_v12 = vpack.c.bf16 %v7831_v52, %v7831_v52  ;;  %v8253_v17 = vsel %vm594_vm1, %v8248_v7, 0 }
0x2b32   :  { %11629 = vmatmul.mubr.msk.bf16.vlgmr.msra.gmra.mxu1 %vm783_vm3, %v7835_v12 }
0x2b33   :  { %11639 = vmatpush3.bf16.xpose.msra.mxu1 %v8103_v9  ;;  %11640 = vmatprep.mubr.msk.bf16.mxu1 %vm12527_vm0, %v12526_v14  ;;  %v8246_v3 = vpop.permute.xlu1 %8245 }
0x2b34   :  { %11650 = vmatprep.subr.bf16.mxu1 %v12526_v14 }
0x2b3a   :  { %11641 = vmatmul.mubr.msk.bf16.vlgmr.msra.gmra.mxu1 %vm594_vm1, %v8096_v20 }
0x2b3b   :  { %11651 = vmatpush3.bf16.xpose.msra.mxu1 %v8203_v13  ;;  %11652 = vmatprep.mubr.msk.bf16.mxu1 %vm12527_vm0, %v12526_v14 }
0x2b3c   :  { %11662 = vmatprep.subr.bf16.mxu1 %v12526_v14 }
0x2b42   :  { %11653 = vmatmul.mubr.msk.bf16.vlgmr.msra.gmra.mxu1 %vm594_vm1, %v8196_v42 }
0x2b43   :  { %11664 = vmatprep.mubr.msk.bf16.mxu1 %vm12527_vm0, %v12526_v14 }
0x2b5a   :  { %v7878_v56 = vpop.f32.mrf.mxu0 }
0x2b5c   :  { %v11612_v32 = vpop.f32.mrf.mxu0 }
0x2b5e   :  { %v7881_v35 = vpop.f32.mrf.mxu0 }
0x2b60   :  { %v11613_v48 = vpop.f32.mrf.mxu0 }
0x2b62   :  { %v7974_v30 = vpop.f32.mrf.mxu0 }
0x2b64   :  { %v11624_v55 = vpop.f32.mrf.mxu0 }
0x2b66   :  { %v7977_v4 = vpop.f32.mrf.mxu0 }
0x2b68   :  { %v11625_v18 = vpop.f32.mrf.mxu0 }
0x2bea   :  { %v7926_v62 = vpop.f32.mrf.mxu1 }
0x2beb   :  { %v8028_v45 = vpack.c.bf16 %v7926_v62, %v7878_v56 }
0x2bec   :  { %v11618_v19 = vpop.f32.mrf.mxu1 }
0x2bed   :  { %11634 = vmatprep.mubr.msk.bf16.mxu0 %vm594_vm1, %v8028_v45 }
0x2bee   :  { %v7929_v50 = vpop.f32.mrf.mxu1 }
0x2bf0   :  { %v11619_v47 = vpop.f32.mrf.mxu1 }
0x2bf2   :  { %v8022_v46 = vpop.f32.mrf.mxu1 }
0x2bf3   :  { %v8029_v24 = vpack.c.bf16 %v8022_v46, %v7974_v30 }
0x2bf4   :  { %v11630_v27 = vpop.f32.mrf.mxu1 }
0x2bf5   :  { %11635 = vmatmul.mubr.msk.bf16.vlgmr.msra.gmra.mxu0 %vm594_vm1, %v8029_v24 }
0x2bf6   :  { %11645 = vmatpush3.bf16.xpose.msra.mxu0 %v8153_v29  ;;  %v8025_v5 = vpop.f32.mrf.mxu1  ;;  %11646 = vmatprep.mubr.msk.bf16.mxu0 %vm12527_vm0, %v12526_v14 }
0x2bf7   :  { %11656 = vmatprep.subr.bf16.mxu0 %v12526_v14 }
0x2bf8   :  { %v11631_v44 = vpop.f32.mrf.mxu1 }
0x2bfa   :  { %v8139_v8 = vpop.f32.mrf.mxu1 }
0x2bfb   :  { %v8295_v49 = vmul.f32 0.25, %v8139_v8 }
0x2bfc   :  { %v11642_v61 = vpop.f32.mrf.mxu1 }
0x2bfd   :  { %11647 = vmatmul.mubr.msk.bf16.vlgmr.msra.gmra.mxu0 %vm594_vm1, %v8146_v0  ;;  %v8299_v59 = vsel %vm783_vm3, %v8295_v49, -inf }
0x2bfe   :  { %11657 = vmatpush3.bf16.xpose.msra.mxu0 %v8253_v17  ;;  %8300 = vmax.xlane.f32.xlu0 %v8299_v59  ;;  %v8142_v38 = vpop.f32.mrf.mxu1 }
0x2bff   :  { %11658 = vmatprep.mubr.msk.bf16.mxu0 %vm12527_vm0, %v12526_v14  ;;  %11668 = vmatprep.subr.bf16.mxu0 %v12526_v14 }
0x2c00   :  { %v11643_v36 = vpop.f32.mrf.mxu1 }
0x2c02   :  { %v8239_v57 = vpop.f32.mrf.mxu1 }
0x2c03   :  { %v8297_v41 = vmul.f32 0.25, %v8239_v57 }
0x2c04   :  { %v11654_v52 = vpop.f32.mrf.mxu1 }
0x2c05   :  { %11659 = vmatmul.mubr.msk.bf16.vlgmr.msra.gmra.mxu0 %vm594_vm1, %v8246_v3  ;;  %v8305_v12 = vsel %vm783_vm3, %v8297_v41, -inf }
0x2c06   :  { %8306 = vmax.xlane.f32.xlu0 %v8305_v12  ;;  %v8242_v20 = vpop.f32.mrf.mxu1  ;;  %11670 = vmatprep.mubr.msk.bf16.mxu0 %vm12527_vm0, %v12526_v14 }
0x2c08   :  { %v11655_v9 = vpop.f32.mrf.mxu1 }
0x2c87   :  { %v8301_v6 = vpop.xlane.xlu0 %8300 }
0x2c88   :  { %v8311_v13 = vsub.f32 %v8295_v49, %v8301_v6 }
0x2c8a   :  { %v8315_v48 = vmul.f32 1.442695, %v8311_v13 }
0x2c8c   :  { %12233 = vpow2.f32 %v8315_v48 }
0x2c8f   :  { %v8307_v42 = vpop.xlane.xlu0 %8306 }
0x2c90   :  { %v8313_v30 = vsub.f32 %v8297_v41, %v8307_v42 }
0x2c92   :  { %v8319_v62 = vmul.f32 1.442695, %v8313_v30 }
0x2c94   :  { %12235 = vpow2.f32 %v8319_v62 }
0x2c99   :  { %v12234_v27 = vpop.eup %12233 }
0x2ca1   :  { %v12236_v44 = vpop.eup %12235 }
0x2ca2   :  { %v8329_v7 = vsel %vm783_vm3, %v12236_v44, 0.0 }
0x2cb5   :  { %v11636_v56 = vpop.f32.mrf.mxu0 }
0x2cb6   :  { %v14049_v32 = vadd.f32 %v11636_v56, %v13961_v63 }
0x2cb7   :  { %v8076_v35 = vpop.f32.mrf.mxu0 }
0x2cb8   :  { %v14052_v55 = vadd.f32 %v8076_v35, %v13966_v15 }
0x2cb9   :  { %v11637_v4 = vpop.f32.mrf.mxu0 }
0x2cba   :  { %v14055_v18 = vadd.f32 %v11637_v4, %v13970_v33 }
0x2cbb   :  { %v8079_v43 = vpop.f32.mrf.mxu0 }
0x2cbc   :  { %v14058_v45 = vadd.f32 %v8079_v43, %v13972_v26  ;;  %v8323_v26 = vsel %vm783_vm3, %v12234_v27, 0.0 }
0x2cbd   :  { %v8189_v19 = vpop.f32.mrf.mxu0 }
0x2cbe   :  { %v8296_v28 = vmul.f32 0.25, %v8189_v19 }
0x2cbf   :  { %v11648_v63 = vpop.f32.mrf.mxu0 }
0x2cc0   :  { %v8302_v50 = vsel %vm783_vm3, %v8296_v28, -inf }
0x2cc1   :  { %8303 = vmax.xlane.f32.xlu1 %v8302_v50  ;;  %v8192_v47 = vpop.f32.mrf.mxu0 }
0x2cc3   :  { %v11649_v15 = vpop.f32.mrf.mxu0 }
0x2cc5   :  { %v8289_v46 = vpop.f32.mrf.mxu0 }
0x2cc6   :  { %v8298_v24 = vmul.f32 0.25, %v8289_v46 }
0x2cc7   :  { %v11660_v0 = vpop.f32.mrf.mxu0 }
0x2cc8   :  { %v8308_v33 = vsel %vm783_vm3, %v8298_v24, -inf }
0x2cc9   :  { %8309 = vmax.xlane.f32.xlu0 %v8308_v33  ;;  %v8292_v29 = vpop.f32.mrf.mxu0 }
0x2ccb   :  { %v11661_v5 = vpop.f32.mrf.mxu0 }
0x2ccd   :  { %8324 = vadd.xlane.f32.xlu0 %v8323_v26 }
0x2cd1   :  { %8330 = vadd.xlane.f32.xlu0 %v8329_v7 }
0x2cd2   :  { %8395 = vrot.lane.b32.xlu1 %v13594_v25, %s12531_s18 }
0x2cd6   :  { %8443 = vrot.lane.b32.xlu1 %v13638_v11, %s12531_s18 }
0x2ce7   :  { %8347 = vrot.lane.b32.xlu0 %v13585_v21, %s12531_s18 }
0x2ceb   :  { %8608 = vrot.lane.b32.xlu0 %v13552_v54, %s12532_s20 }
0x2cef   :  { %8606 = vrot.lane.b32.xlu0 %v13565_v1, %s12532_s20 }
0x2cf3   :  { %8708 = vrot.lane.b32.xlu0 %v13567_v31, %s12532_s20 }
0x2cf7   :  { %8706 = vrot.lane.b32.xlu0 %v13591_v2, %s12532_s20 }
0x2d4a   :  { %v8304_v8 = vpop.xlane.xlu1 %8303 }
0x2d4b   :  { %v8312_v49 = vsub.f32 %v8296_v28, %v8304_v8 }
0x2d4d   :  { %v8317_v61 = vmul.f32 1.442695, %v8312_v49 }
0x2d4e   :  { %v8396_v17 = vpop.permute.xlu1 %8395 }
0x2d4f   :  { %12237 = vpow2.f32 %v8317_v61  ;;  %v8401_v59 = vsel %vm835_vm2, %v8396_v17, 0 }
0x2d50   :  { %11669 = vmatpush3.bf16.msra.mxu0 %v8401_v59 }
0x2d51   :  { %11680 = vmatprep.subr.bf16.mxu0 %v12526_v14 }
0x2d52   :  { %v8310_v38 = vpop.xlane.xlu0 %8309  ;;  %v8444_v35 = vpop.permute.xlu1 %8443 }
0x2d53   :  { %v8314_v36 = vsub.f32 %v8298_v24, %v8310_v38  ;;  %v8449_v4 = vsel %vm835_vm2, %v8444_v35, 0 }
0x2d55   :  { %v8321_v57 = vmul.f32 1.442695, %v8314_v36 }
0x2d56   :  { %v8325_v41 = vpop.xlane.xlu0 %8324 }
0x2d57   :  { %12239 = vpow2.f32 %v8321_v57 }
0x2d58   :  { %12241 = vrcp.f32 %v8325_v41  ;;  %v11942_v41 = vld [vmem:[#allocation10 + $0x68] sm:$0xff]  }
0x2d5a   :  { %v8331_v3 = vpop.xlane.xlu0 %8330 }
0x2d5b   :  { %12243 = vrcp.f32 %v8331_v3 }
0x2d5c   :  { %v12238_v52 = vpop.eup %12237 }
0x2d5d   :  { %v8326_v12 = vsel %vm783_vm3, %v12238_v52, 0.0 }
0x2d5e   :  { %8327 = vadd.xlane.f32.xlu1 %v8326_v12  ;;  %v8348_v20 = vpop.permute.xlu0 %8347 }
0x2d5f   :  { %v8353_v9 = vsel %vm835_vm2, %v8348_v20, 0 }
0x2d60   :  { %11663 = vmatpush3.bf16.msra.mxu1 %v8353_v9 }
0x2d61   :  { %11674 = vmatprep.subr.bf16.mxu1 %v12526_v14 }
0x2d62   :  { %v8609_v24 = vpop.permute.xlu0 %8608 }
0x2d63   :  { %v8614_v5 = vsel %vm594_vm1, %v8609_v24, 0 }
0x2d64   :  { %v12240_v6 = vpop.eup %12239 }
0x2d65   :  { %v12242_v13 = vpop.eup %12241  ;;  %v8332_v42 = vsel %vm783_vm3, %v12240_v6, 0.0 }
0x2d66   :  { %v8336_v56 = vmul.f32 %v12242_v13, %v12234_v27  ;;  %8333 = vadd.xlane.f32.xlu1 %v8332_v42  ;;  %v8607_v29 = vpop.permute.xlu0 %8606 }
0x2d68   :  { %v8343_v48 = vpack.c.bf16 %v8336_v56, %v8336_v56  ;;  %v12244_v30 = vpop.eup %12243 }
0x2d69   :  { %v8340_v43 = vmul.f32 %v12244_v30, %v12236_v44 }
0x2d6a   :  { %11665 = vmatmul.mubr.msk.bf16.vlgmr.msra.gmra.mxu1 %vm783_vm3, %v8343_v48  ;;  %v8709_v26 = vpop.permute.xlu0 %8708 }
0x2d6b   :  { %11675 = vmatpush3.bf16.msra.mxu1 %v8449_v4  ;;  %11676 = vmatprep.mubr.msk.bf16.mxu1 %vm12527_vm0, %v12526_v14  ;;  %v8345_v62 = vpack.c.bf16 %v8340_v43, %v8340_v43  ;;  %v8714_v44 = vsel %vm594_vm1, %v8709_v26, 0 }
0x2d6c   :  { %11686 = vmatprep.subr.bf16.mxu1 %v11942_v41 }
0x2d6e   :  { %v8707_v7 = vpop.permute.xlu0 %8706 }
0x2d72   :  { %11677 = vmatmul.mubr.msk.bf16.vlgmr.msra.gmra.mxu1 %vm783_vm3, %v8345_v62 }
0x2d73   :  { %11687 = vmatpush3.bf16.msra.mxu1 %v11942_v41 }
0x2d74   :  { %11698 = vmatprep.subr.bf16.mxu1 %v12526_v14 }
0x2d77   :  { %8491 = vrot.lane.b32.xlu1 %v13645_v51, %s12531_s18 }
0x2d7b   :  { %8658 = vrot.lane.b32.xlu1 %v13558_v40, %s12532_s20 }
0x2d7f   :  { %8656 = vrot.lane.b32.xlu1 %v13580_v10, %s12532_s20 }
0x2d83   :  { %8758 = vrot.lane.b32.xlu1 %v13578_v58, %s12532_s20 }
0x2d87   :  { %8756 = vrot.lane.b32.xlu1 %v13602_v34, %s12532_s20 }
0x2de7   :  { %v8328_v19 = vpop.xlane.xlu1 %8327 }
0x2de8   :  { %12245 = vrcp.f32 %v8328_v19 }
0x2def   :  { %v8334_v28 = vpop.xlane.xlu1 %8333 }
0x2df0   :  { %12247 = vrcp.f32 %v8334_v28 }
0x2df3   :  { %v8492_v47 = vpop.permute.xlu1 %8491 }
0x2df4   :  { %v8497_v46 = vsel %vm835_vm2, %v8492_v47, 0 }
0x2df5   :  { %v12246_v63 = vpop.eup %12245 }
0x2df6   :  { %v8338_v50 = vmul.f32 %v12246_v63, %v12238_v52 }
0x2df7   :  { %v8659_v20 = vpop.permute.xlu1 %8658 }
0x2df8   :  { %v8344_v15 = vpack.c.bf16 %v8338_v50, %v8338_v50  ;;  %v8664_v48 = vsel %vm594_vm1, %v8659_v20, 0 }
0x2dfa   :  { %11671 = vmatmul.mubr.msk.bf16.vlgmr.msra.gmra.mxu0 %vm783_vm3, %v8344_v15 }
0x2dfb   :  { %11681 = vmatpush3.bf16.msra.mxu0 %v8497_v46  ;;  %11682 = vmatprep.mubr.msk.bf16.mxu0 %vm12527_vm0, %v12526_v14  ;;  %v8657_v56 = vpop.permute.xlu1 %8656 }
0x2dfc   :  { %11692 = vmatprep.subr.bf16.mxu0 %v12526_v14 }
0x2dfd   :  { %v12248_v0 = vpop.eup %12247 }
0x2dfe   :  { %v8342_v33 = vmul.f32 %v12248_v0, %v12240_v6 }
0x2dff   :  { %v8759_v43 = vpop.permute.xlu1 %8758 }
0x2e00   :  { %v8346_v27 = vpack.c.bf16 %v8342_v33, %v8342_v33  ;;  %v8764_v63 = vsel %vm594_vm1, %v8759_v43, 0 }
0x2e02   :  { %11683 = vmatmul.mubr.msk.bf16.vlgmr.msra.gmra.mxu0 %vm783_vm3, %v8346_v27 }
0x2e03   :  { %11693 = vmatpush3.bf16.xpose.msra.mxu0 %v8614_v5  ;;  %11694 = vmatprep.mubr.msk.bf16.mxu0 %vm12527_vm0, %v12526_v14  ;;  %v8757_v0 = vpop.permute.xlu1 %8756 }
0x2e04   :  { %11704 = vmatprep.subr.bf16.mxu0 %v12526_v14 }
0x2e0a   :  { %11695 = vmatmul.mubr.msk.bf16.vlgmr.msra.gmra.mxu0 %vm594_vm1, %v8607_v29 }
0x2e0b   :  { %11705 = vmatpush3.bf16.xpose.msra.mxu0 %v8714_v44  ;;  %11706 = vmatprep.mubr.msk.bf16.mxu0 %vm12527_vm0, %v12526_v14 }
0x2e0c   :  { %11716 = vmatprep.subr.bf16.mxu0 %v12526_v14 }
0x2e12   :  { %11707 = vmatmul.mubr.msk.bf16.vlgmr.msra.gmra.mxu0 %vm594_vm1, %v8707_v7 }
0x2e13   :  { %11718 = vmatprep.mubr.msk.bf16.mxu0 %vm12527_vm0, %v12526_v14 }
0x2e2a   :  { %v8389_v8 = vpop.f32.mrf.mxu1 }
0x2e2c   :  { %v11666_v49 = vpop.f32.mrf.mxu1 }
0x2e2e   :  { %v8392_v61 = vpop.f32.mrf.mxu1 }
0x2e30   :  { %v11667_v17 = vpop.f32.mrf.mxu1 }
0x2e32   :  { %v8485_v59 = vpop.f32.mrf.mxu1 }
0x2e34   :  { %v11678_v38 = vpop.f32.mrf.mxu1 }
0x2e36   :  { %v8488_v36 = vpop.f32.mrf.mxu1 }
0x2e38   :  { %v11679_v57 = vpop.f32.mrf.mxu1 }
0x2eba   :  { %v8437_v3 = vpop.f32.mrf.mxu0 }
0x2ebb   :  { %v8539_v52 = vpack.c.bf16 %v8437_v3, %v8389_v8 }
0x2ebc   :  { %v11672_v12 = vpop.f32.mrf.mxu0 }
0x2ebd   :  { %11688 = vmatprep.mubr.msk.bf16.mxu1 %vm594_vm1, %v8539_v52 }
0x2ebe   :  { %v8440_v9 = vpop.f32.mrf.mxu0 }
0x2ec0   :  { %v11673_v6 = vpop.f32.mrf.mxu0 }
0x2ec2   :  { %v8533_v13 = vpop.f32.mrf.mxu0 }
0x2ec3   :  { %v8540_v42 = vpack.c.bf16 %v8533_v13, %v8485_v59 }
0x2ec4   :  { %v11684_v35 = vpop.f32.mrf.mxu0 }
0x2ec5   :  { %11689 = vmatmul.mubr.msk.bf16.vlgmr.msra.gmra.mxu1 %vm594_vm1, %v8540_v42 }
0x2ec6   :  { %11699 = vmatpush3.bf16.xpose.msra.mxu1 %v8664_v48  ;;  %v8536_v30 = vpop.f32.mrf.mxu0  ;;  %11700 = vmatprep.mubr.msk.bf16.mxu1 %vm12527_vm0, %v12526_v14 }
0x2ec7   :  { %11710 = vmatprep.subr.bf16.mxu1 %v12526_v14 }
0x2ec8   :  { %v11685_v4 = vpop.f32.mrf.mxu0 }
0x2eca   :  { %v8650_v62 = vpop.f32.mrf.mxu0 }
0x2ecb   :  { %v8806_v19 = vmul.f32 0.25, %v8650_v62 }
0x2ecc   :  { %v11696_v28 = vpop.f32.mrf.mxu0 }
0x2ecd   :  { %11701 = vmatmul.mubr.msk.bf16.vlgmr.msra.gmra.mxu1 %vm594_vm1, %v8657_v56  ;;  %v8810_v50 = vsel %vm783_vm3, %v8806_v19, -inf }
0x2ece   :  { %11711 = vmatpush3.bf16.xpose.msra.mxu1 %v8764_v63  ;;  %8811 = vmax.xlane.f32.xlu0 %v8810_v50  ;;  %v8653_v47 = vpop.f32.mrf.mxu0 }
0x2ecf   :  { %11712 = vmatprep.mubr.msk.bf16.mxu1 %vm12527_vm0, %v12526_v14  ;;  %11722 = vmatprep.subr.bf16.mxu1 %v12526_v14 }
0x2ed0   :  { %v11697_v15 = vpop.f32.mrf.mxu0 }
0x2ed2   :  { %v8750_v46 = vpop.f32.mrf.mxu0 }
0x2ed3   :  { %v8808_v24 = vmul.f32 0.25, %v8750_v46 }
0x2ed4   :  { %v11708_v33 = vpop.f32.mrf.mxu0 }
0x2ed5   :  { %11713 = vmatmul.mubr.msk.bf16.vlgmr.msra.gmra.mxu1 %vm594_vm1, %v8757_v0  ;;  %v8816_v27 = vsel %vm783_vm3, %v8808_v24, -inf }
0x2ed6   :  { %8817 = vmax.xlane.f32.xlu0 %v8816_v27  ;;  %v8753_v29 = vpop.f32.mrf.mxu0  ;;  %11724 = vmatprep.mubr.msk.bf16.mxu1 %vm12527_vm0, %v12526_v14 }
0x2ed8   :  { %v11709_v5 = vpop.f32.mrf.mxu0 }
0x2f57   :  { %v8812_v26 = vpop.xlane.xlu0 %8811 }
0x2f58   :  { %v8822_v44 = vsub.f32 %v8806_v19, %v8812_v26 }
0x2f5a   :  { %v8826_v17 = vmul.f32 1.442695, %v8822_v44 }
0x2f5c   :  { %12249 = vpow2.f32 %v8826_v17 }
0x2f5f   :  { %v8818_v7 = vpop.xlane.xlu0 %8817 }
0x2f60   :  { %v8824_v59 = vsub.f32 %v8808_v24, %v8818_v7 }
0x2f62   :  { %v8830_v3 = vmul.f32 1.442695, %v8824_v59 }
0x2f64   :  { %12251 = vpow2.f32 %v8830_v3 }
0x2f69   :  { %v12250_v35 = vpop.eup %12249 }
0x2f71   :  { %v12252_v4 = vpop.eup %12251 }
0x2f72   :  { %v8840_v43 = vsel %vm783_vm3, %v12252_v4, 0.0 }
0x2f85   :  { %v11690_v8 = vpop.f32.mrf.mxu1 }
0x2f86   :  { %v14135_v49 = vadd.f32 %v11690_v8, %v14049_v32 }
0x2f87   :  { %v8587_v61 = vpop.f32.mrf.mxu1 }
0x2f88   :  { %v14138_v38 = vadd.f32 %v8587_v61, %v14052_v55 }
0x2f89   :  { %v11691_v36 = vpop.f32.mrf.mxu1 }
0x2f8a   :  { %v14141_v57 = vadd.f32 %v11691_v36, %v14055_v18 }
0x2f8b   :  { %v8590_v41 = vpop.f32.mrf.mxu1 }
0x2f8c   :  { %v14144_v52 = vadd.f32 %v8590_v41, %v14058_v45  ;;  %v8834_v45 = vsel %vm783_vm3, %v12250_v35, 0.0 }
0x2f8d   :  { %v8700_v12 = vpop.f32.mrf.mxu1 }
0x2f8e   :  { %v8807_v20 = vmul.f32 0.25, %v8700_v12 }
0x2f8f   :  { %v11702_v32 = vpop.f32.mrf.mxu1 }
0x2f90   :  { %v8813_v9 = vsel %vm783_vm3, %v8807_v20, -inf }
0x2f91   :  { %8814 = vmax.xlane.f32.xlu1 %v8813_v9  ;;  %v8703_v6 = vpop.f32.mrf.mxu1 }
0x2f93   :  { %v11703_v55 = vpop.f32.mrf.mxu1 }
0x2f95   :  { %v8800_v13 = vpop.f32.mrf.mxu1 }
0x2f96   :  { %v8809_v42 = vmul.f32 0.25, %v8800_v13 }
0x2f97   :  { %v11714_v56 = vpop.f32.mrf.mxu1 }
0x2f98   :  { %v8819_v18 = vsel %vm783_vm3, %v8809_v42, -inf }
0x2f99   :  { %v8803_v48 = vpop.f32.mrf.mxu1  ;;  %8820 = vmax.xlane.f32.xlu0 %v8819_v18 }
0x2f9b   :  { %v11715_v30 = vpop.f32.mrf.mxu1 }
0x2f9d   :  { %8835 = vadd.xlane.f32.xlu0 %v8834_v45 }
0x2fa1   :  { %8841 = vadd.xlane.f32.xlu0 %v8840_v43 }
0x2fa2   :  { %8906 = vrot.lane.b32.xlu1 %v13594_v25, %s12532_s20 }
0x2fa6   :  { %8954 = vrot.lane.b32.xlu1 %v13638_v11, %s12532_s20 }
0x2fb7   :  { %8858 = vrot.lane.b32.xlu0 %v13585_v21, %s12532_s20 }
0x2fbb   :  { %9119 = vrot.lane.b32.xlu0 %v13552_v54, %s12510_s21 }
0x2fbf   :  { %9117 = vrot.lane.b32.xlu0 %v13565_v1, %s12510_s21 }
0x2fc3   :  { %9219 = vrot.lane.b32.xlu0 %v13567_v31, %s12510_s21 }
0x2fc7   :  { %9217 = vrot.lane.b32.xlu0 %v13591_v2, %s12510_s21 }
0x301a   :  { %v8815_v62 = vpop.xlane.xlu1 %8814 }
0x301b   :  { %v8823_v19 = vsub.f32 %v8807_v20, %v8815_v62  ;;  %v11943_v62 = vld [vmem:[#allocation10 + $0x70] sm:$0xff]  }
0x301d   :  { %v8828_v28 = vmul.f32 1.442695, %v8823_v19 }
0x301e   :  { %v8907_v63 = vpop.permute.xlu1 %8906 }
0x301f   :  { %12253 = vpow2.f32 %v8828_v28  ;;  %v8912_v50 = vsel %vm835_vm2, %v8907_v63, 0 }
0x3020   :  { %11723 = vmatpush3.bf16.msra.mxu1 %v8912_v50 }
0x3021   :  { %11734 = vmatprep.subr.bf16.mxu1 %v12526_v14 }
0x3022   :  { %v8821_v54 = vpop.xlane.xlu0 %8820  ;;  %v8955_v26 = vpop.permute.xlu1 %8954 }
0x3023   :  { %v8825_v47 = vsub.f32 %v8809_v42, %v8821_v54  ;;  %v8960_v8 = vsel %vm835_vm2, %v8955_v26, 0 }
0x3025   :  { %v8832_v15 = vmul.f32 1.442695, %v8825_v47 }
0x3026   :  { %v8836_v1 = vpop.xlane.xlu0 %8835 }
0x3027   :  { %12255 = vpow2.f32 %v8832_v15 }
0x3028   :  { %12257 = vrcp.f32 %v8836_v1 }
0x302a   :  { %v8842_v31 = vpop.xlane.xlu0 %8841 }
0x302b   :  { %12259 = vrcp.f32 %v8842_v31 }
0x302c   :  { %v12254_v46 = vpop.eup %12253 }
0x302d   :  { %v8837_v2 = vsel %vm783_vm3, %v12254_v46, 0.0 }
0x302e   :  { %8838 = vadd.xlane.f32.xlu1 %v8837_v2  ;;  %v8859_v24 = vpop.permute.xlu0 %8858 }
0x302f   :  { %v8864_v0 = vsel %vm835_vm2, %v8859_v24, 0 }
0x3030   :  { %11717 = vmatpush3.bf16.msra.mxu0 %v8864_v0 }
0x3031   :  { %11728 = vmatprep.subr.bf16.mxu0 %v12526_v14 }
0x3034   :  { %v12256_v33 = vpop.eup %12255 }
0x3035   :  { %v12258_v27 = vpop.eup %12257  ;;  %v8843_v29 = vsel %vm783_vm3, %v12256_v33, 0.0 }
0x3036   :  { %v8847_v5 = vmul.f32 %v12258_v27, %v12250_v35  ;;  %8844 = vadd.xlane.f32.xlu1 %v8843_v29 }
0x3038   :  { %v8854_v44 = vpack.c.bf16 %v8847_v5, %v8847_v5  ;;  %v12260_v7 = vpop.eup %12259 }
0x3039   :  { %v8851_v61 = vmul.f32 %v12260_v7, %v12252_v4 }
0x303a   :  { %11719 = vmatmul.mubr.msk.bf16.vlgmr.msra.gmra.mxu0 %vm783_vm3, %v8854_v44 }
0x303b   :  { %11729 = vmatpush3.bf16.msra.mxu0 %v8960_v8  ;;  %11730 = vmatprep.mubr.msk.bf16.mxu0 %vm12527_vm0, %v12526_v14  ;;  %v8856_v17 = vpack.c.bf16 %v8851_v61, %v8851_v61 }
0x303c   :  { %11740 = vmatprep.subr.bf16.mxu0 %v11943_v62 }
0x3042   :  { %11731 = vmatmul.mubr.msk.bf16.vlgmr.msra.gmra.mxu0 %vm783_vm3, %v8856_v17 }
0x3043   :  { %11741 = vmatpush3.bf16.msra.mxu0 %v11943_v62 }
0x3044   :  { %11752 = vmatprep.subr.bf16.mxu0 %v12526_v14 }
0x3047   :  { %9002 = vrot.lane.b32.xlu1 %v13645_v51, %s12532_s20 }
0x304b   :  { %9169 = vrot.lane.b32.xlu1 %v13558_v40, %s12510_s21  ;;  %v9120_v40 = vpop.permute.xlu0 %9119 }
0x304c   :  { %v9125_v6 = vsel %vm594_vm1, %v9120_v40, 0 }
0x304f   :  { %9167 = vrot.lane.b32.xlu1 %v13580_v10, %s12510_s21  ;;  %v9118_v9 = vpop.permute.xlu0 %9117 }
0x3053   :  { %9269 = vrot.lane.b32.xlu1 %v13578_v58, %s12510_s21  ;;  %v9220_v55 = vpop.permute.xlu0 %9219 }
0x3054   :  { %v9225_v13 = vsel %vm594_vm1, %v9220_v55, 0 }
0x3057   :  { %9267 = vrot.lane.b32.xlu1 %v13602_v34, %s12510_s21  ;;  %v9218_v42 = vpop.permute.xlu0 %9217 }
0x30b7   :  { %v8839_v59 = vpop.xlane.xlu1 %8838 }
0x30b8   :  { %12261 = vrcp.f32 %v8839_v59 }
0x30bf   :  { %v8845_v36 = vpop.xlane.xlu1 %8844 }
0x30c0   :  { %12263 = vrcp.f32 %v8845_v36 }
0x30c3   :  { %v9003_v12 = vpop.permute.xlu1 %9002 }
0x30c4   :  { %v9008_v32 = vsel %vm835_vm2, %v9003_v12, 0 }
0x30c5   :  { %v12262_v41 = vpop.eup %12261 }
0x30c6   :  { %v8849_v3 = vmul.f32 %v12262_v41, %v12254_v46 }
0x30c7   :  { %v9170_v50 = vpop.permute.xlu1 %9169 }
0x30c8   :  { %v8855_v20 = vpack.c.bf16 %v8849_v3, %v8849_v3  ;;  %v9175_v2 = vsel %vm594_vm1, %v9170_v50, 0 }
0x30ca   :  { %11725 = vmatmul.mubr.msk.bf16.vlgmr.msra.gmra.mxu1 %vm783_vm3, %v8855_v20 }
0x30cb   :  { %11735 = vmatpush3.bf16.msra.mxu1 %v9008_v32  ;;  %11736 = vmatprep.mubr.msk.bf16.mxu1 %vm12527_vm0, %v12526_v14  ;;  %v9168_v31 = vpop.permute.xlu1 %9167 }
0x30cc   :  { %11746 = vmatprep.subr.bf16.mxu1 %v12526_v14 }
0x30cd   :  { %v12264_v58 = vpop.eup %12263 }
0x30ce   :  { %v8853_v10 = vmul.f32 %v12264_v58, %v12256_v33 }
0x30cf   :  { %v9270_v33 = vpop.permute.xlu1 %9269 }
0x30d0   :  { %v8857_v34 = vpack.c.bf16 %v8853_v10, %v8853_v10  ;;  %v9275_v26 = vsel %vm594_vm1, %v9270_v33, 0 }
0x30d2   :  { %11737 = vmatmul.mubr.msk.bf16.vlgmr.msra.gmra.mxu1 %vm783_vm3, %v8857_v34 }
0x30d3   :  { %11747 = vmatpush3.bf16.xpose.msra.mxu1 %v9125_v6  ;;  %11748 = vmatprep.mubr.msk.bf16.mxu1 %vm12527_vm0, %v12526_v14  ;;  %v9268_v59 = vpop.permute.xlu1 %9267 }
0x30d4   :  { %11758 = vmatprep.subr.bf16.mxu1 %v12526_v14 }
0x30da   :  { %11749 = vmatmul.mubr.msk.bf16.vlgmr.msra.gmra.mxu1 %vm594_vm1, %v9118_v9 }
0x30db   :  { %11759 = vmatpush3.bf16.xpose.msra.mxu1 %v9225_v13  ;;  %11760 = vmatprep.mubr.msk.bf16.mxu1 %vm12527_vm0, %v12526_v14 }
0x30dc   :  { %11770 = vmatprep.subr.bf16.mxu1 %v12526_v14 }
0x30e2   :  { %11761 = vmatmul.mubr.msk.bf16.vlgmr.msra.gmra.mxu1 %vm594_vm1, %v9218_v42 }
0x30e3   :  { %11772 = vmatprep.mubr.msk.bf16.mxu1 %vm12527_vm0, %v12526_v14 }
0x30fa   :  { %v8900_v56 = vpop.f32.mrf.mxu0 }
0x30fc   :  { %v11720_v18 = vpop.f32.mrf.mxu0 }
0x30fe   :  { %v8903_v35 = vpop.f32.mrf.mxu0 }
0x3100   :  { %v11721_v48 = vpop.f32.mrf.mxu0 }
0x3102   :  { %v8996_v30 = vpop.f32.mrf.mxu0 }
0x3104   :  { %v11732_v45 = vpop.f32.mrf.mxu0 }
0x3106   :  { %v8999_v4 = vpop.f32.mrf.mxu0 }
0x3108   :  { %v11733_v43 = vpop.f32.mrf.mxu0 }
0x318a   :  { %v8948_v19 = vpop.f32.mrf.mxu1 }
0x318b   :  { %v9050_v28 = vpack.c.bf16 %v8948_v19, %v8900_v56 }
0x318c   :  { %v11726_v63 = vpop.f32.mrf.mxu1 }
0x318d   :  { %11742 = vmatprep.mubr.msk.bf16.mxu0 %vm594_vm1, %v9050_v28 }
0x318e   :  { %v8951_v54 = vpop.f32.mrf.mxu1 }
0x3190   :  { %v11727_v47 = vpop.f32.mrf.mxu1 }
0x3192   :  { %v9044_v15 = vpop.f32.mrf.mxu1 }
0x3193   :  { %v9051_v1 = vpack.c.bf16 %v9044_v15, %v8996_v30 }
0x3194   :  { %v11738_v46 = vpop.f32.mrf.mxu1 }
0x3195   :  { %11743 = vmatmul.mubr.msk.bf16.vlgmr.msra.gmra.mxu0 %vm594_vm1, %v9051_v1 }
0x3196   :  { %11753 = vmatpush3.bf16.xpose.msra.mxu0 %v9175_v2  ;;  %v9047_v24 = vpop.f32.mrf.mxu1  ;;  %11754 = vmatprep.mubr.msk.bf16.mxu0 %vm12527_vm0, %v12526_v14 }
0x3197   :  { %11764 = vmatprep.subr.bf16.mxu0 %v12526_v14 }
0x3198   :  { %v11739_v0 = vpop.f32.mrf.mxu1 }
0x319a   :  { %v9161_v27 = vpop.f32.mrf.mxu1 }
0x319b   :  { %v9317_v29 = vmul.f32 0.25, %v9161_v27 }
0x319c   :  { %v11750_v5 = vpop.f32.mrf.mxu1 }
0x319d   :  { %11755 = vmatmul.mubr.msk.bf16.vlgmr.msra.gmra.mxu0 %vm594_vm1, %v9168_v31  ;;  %v9321_v44 = vsel %vm783_vm3, %v9317_v29, -inf }
0x319e   :  { %11765 = vmatpush3.bf16.xpose.msra.mxu0 %v9275_v26  ;;  %9322 = vmax.xlane.f32.xlu0 %v9321_v44  ;;  %v9164_v7 = vpop.f32.mrf.mxu1 }
0x319f   :  { %11766 = vmatprep.mubr.msk.bf16.mxu0 %vm12527_vm0, %v12526_v14  ;;  %11776 = vmatprep.subr.bf16.mxu0 %v12526_v14 }
0x31a0   :  { %v11751_v8 = vpop.f32.mrf.mxu1 }
0x31a2   :  { %v9261_v61 = vpop.f32.mrf.mxu1 }
0x31a3   :  { %v9319_v17 = vmul.f32 0.25, %v9261_v61 }
0x31a4   :  { %v11762_v36 = vpop.f32.mrf.mxu1 }
0x31a5   :  { %11767 = vmatmul.mubr.msk.bf16.vlgmr.msra.gmra.mxu0 %vm594_vm1, %v9268_v59  ;;  %v9327_v41 = vsel %vm783_vm3, %v9319_v17, -inf }
0x31a6   :  { %9328 = vmax.xlane.f32.xlu0 %v9327_v41  ;;  %v9264_v3 = vpop.f32.mrf.mxu1  ;;  %11778 = vmatprep.mubr.msk.bf16.mxu0 %vm12527_vm0, %v12526_v14 }
0x31a8   :  { %v11763_v12 = vpop.f32.mrf.mxu1 }
0x3227   :  { %v9323_v20 = vpop.xlane.xlu0 %9322 }
0x3228   :  { %v9333_v32 = vsub.f32 %v9317_v29, %v9323_v20 }
0x322a   :  { %v9337_v9 = vmul.f32 1.442695, %v9333_v32 }
0x322c   :  { %12265 = vpow2.f32 %v9337_v9 }
0x322f   :  { %v9329_v40 = vpop.xlane.xlu0 %9328 }
0x3230   :  { %v9335_v6 = vsub.f32 %v9319_v17, %v9329_v40 }
0x3232   :  { %v9341_v18 = vmul.f32 1.442695, %v9335_v6 }
0x3234   :  { %12267 = vpow2.f32 %v9341_v18 }
0x3239   :  { %v12266_v28 = vpop.eup %12265 }
0x3241   :  { %v12268_v54 = vpop.eup %12267 }
0x3242   :  { %v9351_v47 = vsel %vm783_vm3, %v12268_v54, 0.0 }
0x3255   :  { %v11744_v58 = vpop.f32.mrf.mxu0 }
0x3256   :  { %v14221_v10 = vadd.f32 %v11744_v58, %v14135_v49 }
0x3257   :  { %v9098_v34 = vpop.f32.mrf.mxu0 }
0x3258   :  { %v14224_v55 = vadd.f32 %v9098_v34, %v14138_v38 }
0x3259   :  { %v11745_v13 = vpop.f32.mrf.mxu0 }
0x325a   :  { %v14227_v42 = vadd.f32 %v11745_v13, %v14141_v57 }
0x325b   :  { %v9101_v56 = vpop.f32.mrf.mxu0 }
0x325c   :  { %v14230_v35 = vadd.f32 %v9101_v56, %v14144_v52  ;;  %v9345_v52 = vsel %vm783_vm3, %v12266_v28, 0.0 }
0x325d   :  { %v9211_v48 = vpop.f32.mrf.mxu0 }
0x325e   :  { %v9318_v30 = vmul.f32 0.25, %v9211_v48 }
0x325f   :  { %v11756_v49 = vpop.f32.mrf.mxu0 }
0x3260   :  { %v9324_v45 = vsel %vm783_vm3, %v9318_v30, -inf }
0x3261   :  { %9325 = vmax.xlane.f32.xlu1 %v9324_v45  ;;  %v9214_v4 = vpop.f32.mrf.mxu0 }
0x3263   :  { %v11757_v38 = vpop.f32.mrf.mxu0 }
0x3265   :  { %v9311_v43 = vpop.f32.mrf.mxu0 }
0x3266   :  { %v9320_v62 = vmul.f32 0.25, %v9311_v43  ;;  %v11944_v43 = vld [vmem:[#allocation10 + $0x78] sm:$0xff]  }
0x3267   :  { %v11768_v19 = vpop.f32.mrf.mxu0 }
0x3268   :  { %v9330_v57 = vsel %vm783_vm3, %v9320_v62, -inf }
0x3269   :  { %9331 = vmax.xlane.f32.xlu0 %v9330_v57  ;;  %v9314_v63 = vpop.f32.mrf.mxu0 }
0x326b   :  { %v11769_v50 = vpop.f32.mrf.mxu0 }
0x326d   :  { %9346 = vadd.xlane.f32.xlu0 %v9345_v52 }
0x3271   :  { %9352 = vadd.xlane.f32.xlu0 %v9351_v47 }
0x3272   :  { %9417 = vrot.lane.b32.xlu1 %v13594_v25, %s12510_s21 }
0x3276   :  { %9465 = vrot.lane.b32.xlu1 %v13638_v11, %s12510_s21 }
0x3287   :  { %9369 = vrot.lane.b32.xlu0 %v13585_v21, %s12510_s21 }
0x32ea   :  { %v9326_v15 = vpop.xlane.xlu1 %9325 }
0x32eb   :  { %v9334_v1 = vsub.f32 %v9318_v30, %v9326_v15 }
0x32ed   :  { %v9339_v31 = vmul.f32 1.442695, %v9334_v1 }
0x32ee   :  { %v9418_v46 = vpop.permute.xlu1 %9417 }
0x32ef   :  { %12269 = vpow2.f32 %v9339_v31  ;;  %v9423_v2 = vsel %vm835_vm2, %v9418_v46, 0 }
0x32f0   :  { %11777 = vmatpush3.bf16.msra.mxu0 %v9423_v2 }
0x32f1   :  { %11788 = vmatprep.subr.bf16.mxu0 %v12526_v14 }
0x32f2   :  { %v9332_v24 = vpop.xlane.xlu0 %9331  ;;  %v9466_v61 = vpop.permute.xlu1 %9465 }
0x32f3   :  { %v9336_v0 = vsub.f32 %v9320_v62, %v9332_v24  ;;  %v9471_v36 = vsel %vm835_vm2, %v9466_v61, 0 }
0x32f5   :  { %v9343_v33 = vmul.f32 1.442695, %v9336_v0 }
0x32f6   :  { %v9347_v25 = vpop.xlane.xlu0 %9346 }
0x32f7   :  { %12271 = vpow2.f32 %v9343_v33  ;;  %v10459_v33 = vld [vmem:[#allocation11 + $0x1] ss:$0 sm:$0xff] }
0x32f8   :  { %12273 = vrcp.f32 %v9347_v25 }
0x32fa   :  { %v9353_v11 = vpop.xlane.xlu0 %9352 }
0x32fb   :  { %12275 = vrcp.f32 %v9353_v11 }
0x32fc   :  { %v12270_v27 = vpop.eup %12269 }
0x32fd   :  { %v9348_v21 = vsel %vm783_vm3, %v12270_v27, 0.0 }
0x32fe   :  { %9349 = vadd.xlane.f32.xlu1 %v9348_v21  ;;  %v9370_v29 = vpop.permute.xlu0 %9369 }
0x32ff   :  { %v9375_v5 = vsel %vm835_vm2, %v9370_v29, 0 }
0x3300   :  { %11771 = vmatpush3.bf16.msra.mxu1 %v9375_v5 }
0x3301   :  { %11782 = vmatprep.subr.bf16.mxu1 %v12526_v14 }
0x3304   :  { %v12272_v26 = vpop.eup %12271 }
0x3305   :  { %v12274_v44 = vpop.eup %12273  ;;  %v9354_v7 = vsel %vm783_vm3, %v12272_v26, 0.0 }
0x3306   :  { %v9358_v8 = vmul.f32 %v12274_v44, %v12266_v28  ;;  %9355 = vadd.xlane.f32.xlu1 %v9354_v7 }
0x3308   :  { %v9365_v17 = vpack.c.bf16 %v9358_v8, %v9358_v8  ;;  %v12276_v59 = vpop.eup %12275 }
0x3309   :  { %v9362_v41 = vmul.f32 %v12276_v59, %v12268_v54 }
0x330a   :  { %11773 = vmatmul.mubr.msk.bf16.vlgmr.msra.gmra.mxu1 %vm783_vm3, %v9365_v17 }
0x330b   :  { %11783 = vmatpush3.bf16.msra.mxu1 %v9471_v36  ;;  %11784 = vmatprep.mubr.msk.bf16.mxu1 %vm12527_vm0, %v12526_v14  ;;  %v9367_v3 = vpack.c.bf16 %v9362_v41, %v9362_v41 }
0x330c   :  { %11794 = vmatprep.subr.bf16.mxu1 %v11944_v43 }
0x3312   :  { %11785 = vmatmul.mubr.msk.bf16.vlgmr.msra.gmra.mxu1 %vm783_vm3, %v9367_v3 }
0x3313   :  { %11795 = vmatpush3.bf16.msra.mxu1 %v11944_v43 }
0x3317   :  { %9513 = vrot.lane.b32.xlu1 %v13645_v51, %s12510_s21 }
0x3387   :  { %v9350_v12 = vpop.xlane.xlu1 %9349 }
0x3388   :  { %12277 = vrcp.f32 %v9350_v12 }
0x338f   :  { %v9356_v20 = vpop.xlane.xlu1 %9355 }
0x3390   :  { %12279 = vrcp.f32 %v9356_v20 }
0x3393   :  { %v9514_v58 = vpop.permute.xlu1 %9513 }
0x3394   :  { %v9519_v9 = vsel %vm835_vm2, %v9514_v58, 0  ;;  %v11948_v58 = vld [vmem:[#allocation13 + $0xe0] ss:$8 sps:$4 sm:$0xff]  }
0x3395   :  { %v12278_v32 = vpop.eup %12277 }
0x3396   :  { %v9360_v40 = vmul.f32 %v12278_v32, %v12270_v27 }
0x3398   :  { %v9366_v34 = vpack.c.bf16 %v9360_v40, %v9360_v40  ;;  %v11950_v40 = vld [vmem:[#allocation13 + $0xe4] ss:$8 sps:$4 sm:$0xff]  }
0x339a   :  { %11779 = vmatmul.mubr.msk.bf16.vlgmr.msra.gmra.mxu0 %vm783_vm3, %v9366_v34  ;;  %v11953_v34 = vld [vmem:[#allocation13 + $0xd4] ss:$8 sps:$4 sm:$0xff]  }
0x339b   :  { %11789 = vmatpush3.bf16.msra.mxu0 %v9519_v9  ;;  %11790 = vmatprep.mubr.msk.bf16.mxu0 %vm12527_vm0, %v12526_v14  ;;  %v11951_v9 = vld [vmem:[#allocation13 + $0xd0] ss:$8 sps:$4 sm:$0xff]  }
0x339d   :  { %v12280_v6 = vpop.eup %12279 }
0x339e   :  { %v9364_v13 = vmul.f32 %v12280_v6, %v12272_v26  ;;  %v11956_v6 = vld [vmem:[#allocation13 + $0xc4] ss:$8 sps:$4 sm:$0xff]  }
0x33a0   :  { %v9368_v56 = vpack.c.bf16 %v9364_v13, %v9364_v13  ;;  %v11954_v13 = vld [vmem:[#allocation13 + $0xc0] ss:$8 sps:$4 sm:$0xff]  }
0x33a2   :  { %11791 = vmatmul.mubr.msk.bf16.vlgmr.msra.gmra.mxu0 %vm783_vm3, %v9368_v56  ;;  %v11959_v56 = vld [vmem:[#allocation13 + $0xb4] ss:$8 sps:$4 sm:$0xff]  }
0x33a3   :  { %9831 = vmatprep.mubr.bf16.mxu0 %v12525_v39 }
0x33ca   :  { %v9411_v51 = vpop.f32.mrf.mxu1 }
0x33cc   :  { %v11774_v18 = vpop.f32.mrf.mxu1 }
0x33cd   :  { %v11962_v18 = vld [vmem:[#allocation13 + $0xa4] ss:$8 sps:$4 sm:$0xff]  }
0x33ce   :  { %v9414_v48 = vpop.f32.mrf.mxu1 }
0x33cf   :  { %v11960_v48 = vld [vmem:[#allocation13 + $0xa0] ss:$8 sps:$4 sm:$0xff]  }
0x33d0   :  { %v11775_v30 = vpop.f32.mrf.mxu1 }
0x33d1   :  { %v11965_v30 = vld [vmem:[#allocation13 + $0x94] ss:$8 sps:$4 sm:$0xff]  }
0x33d2   :  { %v9507_v49 = vpop.f32.mrf.mxu1 }
0x33d4   :  { %v11786_v45 = vpop.f32.mrf.mxu1 }
0x33d5   :  { %v11968_v45 = vld [vmem:[#allocation13 + $0x84] ss:$8 sps:$4 sm:$0xff]  }
0x33d6   :  { %v9510_v4 = vpop.f32.mrf.mxu1 }
0x33d7   :  { %v11966_v4 = vld [vmem:[#allocation13 + $0x80] ss:$8 sps:$4 sm:$0xff]  }
0x33d8   :  { %v11787_v38 = vpop.f32.mrf.mxu1 }
0x345a   :  { %v9459_v62 = vpop.f32.mrf.mxu0 }
0x345b   :  { %v9561_v14 = vpack.c.bf16 %v9459_v62, %v9411_v51  ;;  %v11957_v51 = vld [vmem:[#allocation13 + $0xb0] ss:$8 sps:$4 sm:$0xff]  }
0x345c   :  { %v11780_v19 = vpop.f32.mrf.mxu0 }
0x345d   :  { %11796 = vmatprep.mubr.msk.bf16.mxu1 %vm594_vm1, %v9561_v14 }
0x345e   :  { %v9462_v57 = vpop.f32.mrf.mxu0 }
0x3460   :  { %v11781_v28 = vpop.f32.mrf.mxu0 }
0x3462   :  { %v9555_v63 = vpop.f32.mrf.mxu0 }
0x3463   :  { %v9562_v50 = vpack.c.bf16 %v9555_v63, %v9507_v49  ;;  %v11963_v49 = vld [vmem:[#allocation13 + $0x90] ss:$8 sps:$4 sm:$0xff]  }
0x3464   :  { %v11792_v52 = vpop.f32.mrf.mxu0 }
0x3465   :  { %11797 = vmatmul.mubr.msk.bf16.vlgmr.msra.gmra.mxu1 %vm594_vm1, %v9562_v50 }
0x3466   :  { %v9558_v54 = vpop.f32.mrf.mxu0 }
0x3468   :  { %v11793_v47 = vpop.f32.mrf.mxu0 }
0x3525   :  { %v11798_v15 = vpop.f32.mrf.mxu1 }
0x3526   :  { %v9626_v31 = vadd.f32 %v11798_v15, %v14221_v10 }
0x3527   :  { %v9609_v1 = vpop.f32.mrf.mxu1 }
0x3528   :  { %v9624_v46 = vadd.f32 %v9609_v1, %v14224_v55  ;;  %v9630_v25 = vadd.f32 %v9626_v31, %v13509_v23  ;;  %v11945_v23 = vld [vmem:[#allocation13 + $0xf0] ss:$8 sps:$4 sm:$0xff]  }
0x3529   :  { %v11799_v2 = vpop.f32.mrf.mxu1  ;;  %v10460_v31 = vld [vmem:[%s14377_s7 + $0x1] ss:$0 sm:$0xff] }
0x352a   :  { %v9628_v24 = vadd.f32 %v9624_v46, %v13501_v53  ;;  %v9627_v11 = vadd.f32 %v11799_v2, %v14227_v42  ;;  %v14274_v55 = vadd.f32 %v10459_v33, %v9630_v25  ;;  %v11947_v42 = vld [vmem:[#allocation13 + $0xf4] ss:$8 sps:$4 sm:$0xff]  }
0x352b   :  { %v9612_v0 = vpop.f32.mrf.mxu1  ;;  %9799 = vmatprep.subr.bf16.mxu0 %v11947_v42 }
0x352c   :  { %v9625_v27 = vadd.f32 %v9612_v0, %v14230_v35  ;;  %v14269_v21 = vadd.f32 %v10459_v33, %v9628_v24  ;;  %v9631_v10 = vadd.f32 %v9627_v11, %v13513_v60  ;;  %9800 = vmatpush1.bf16.msra.mxu0 %v11945_v23 }
0x352d   :  { %9801 = vmatprep.subr.bf16.mxu0 %v11950_v40  ;;  %v11981_v40 = vld [vmem:[#allocation14 + $0xc8] sm:$0xff]  }
0x352e   :  { %v9629_v29 = vadd.f32 %v9625_v27, %v13505_v37  ;;  %9642 = vadd.xlane.f32.xlu0 %v14269_v21  ;;  %v14280_v53 = vadd.f32 %v10459_v33, %v9631_v10 }
0x3530   :  { %v14276_v5 = vadd.f32 %v10459_v33, %v9629_v29  ;;  %9802 = vmatpush1.bf16.msra.mxu0 %v11948_v58  ;;  %v10461_v33 = vld [vmem:[%s14378_s8 + $0x1] ss:$0 sm:$0xff]  ;;  %v11982_v58 = vld [vmem:[#allocation14 + $0x88] sm:$0xff]  }
0x3531   :  { %9803 = vmatprep.subr.bf16.mxu0 %v11953_v34  ;;  %v11983_v34 = vld [vmem:[#allocation14 + $0xc0] sm:$0xff]  }
0x3532   :  { %9646 = vadd.xlane.f32.xlu0 %v14274_v55  ;;  %9644 = vadd.xlane.f32.xlu1 %v14276_v5 }
0x3534   :  { %9804 = vmatpush1.bf16.msra.mxu0 %v11951_v9  ;;  %v11984_v9 = vld [vmem:[#allocation14 + $0x80] sm:$0xff]  }
0x3535   :  { %9805 = vmatprep.subr.bf16.mxu0 %v11956_v6  ;;  %v10343_v6 = vld [vmem:[%s14380_s10 + $0x2] sm:$0x3] }
0x3536   :  { %9648 = vadd.xlane.f32.xlu0 %v14280_v53 }
0x3538   :  { %9806 = vmatpush1.bf16.msra.mxu0 %v11954_v13  ;;  %v9712_v13 = vrot.slane %v10343_v6, %v12700_v22 }
0x3539   :  { %9807 = vmatprep.subr.bf16.mxu0 %v11959_v56  ;;  %v9716_v56 = vrot.slane %v10343_v6, %v12690_v16 }
0x353c   :  { %9808 = vmatpush1.bf16.msra.mxu0 %v11957_v51 }
0x353d   :  { %9809 = vmatprep.subr.bf16.mxu0 %v11962_v18 }
0x3540   :  { %9810 = vmatpush1.bf16.msra.mxu0 %v11960_v48 }
0x3541   :  { %9811 = vmatprep.subr.bf16.mxu0 %v11965_v30 }
0x3544   :  { %9812 = vmatpush1.bf16.msra.mxu0 %v11963_v49 }
0x3545   :  { %9813 = vmatprep.subr.bf16.mxu0 %v11968_v45 }
0x3548   :  { %9814 = vmatpush1.bf16.msra.mxu0 %v11966_v4 }
0x35b7   :  { %v9643_v37 = vpop.xlane.xlu0 %9642 }
0x35b8   :  { %v9650_v35 = vmul.f32 0.0078125, %v9643_v37 }
0x35ba   :  { %v14284_v60 = vsub.f32 %v14269_v21, %v9650_v35 }
0x35bb   :  { %v9647_v26 = vpop.xlane.xlu0 %9646  ;;  %v9645_v44 = vpop.xlane.xlu1 %9644 }
0x35bc   :  { %v9652_v7 = vmul.f32 0.0078125, %v9647_v26  ;;  %v9651_v8 = vmul.f32 0.0078125, %v9645_v44  ;;  %v9658_v61 = vmul.f32 %v14284_v60, %v14284_v60 }
0x35be   :  { %v14289_v17 = vsub.f32 %v14274_v55, %v9652_v7  ;;  %v9655_v59 = vsub.f32 %v14276_v5, %v9651_v8  ;;  %9662 = vadd.xlane.f32.xlu0 %v9658_v61  ;;  %v11969_v7 = vld [vmem:[#allocation14 + $0xf8] sm:$0xff]   ;;  %v11971_v61 = vld [vmem:[#allocation14 + $0xf0] sm:$0xff]  }
0x35bf   :  { %v9649_v36 = vpop.xlane.xlu0 %9648  ;;  %v11970_v8 = vld [vmem:[#allocation14 + $0xb8] sm:$0xff]   ;;  %10868 = vmatprep.subr.bf16.mxu1 %v11969_v7 }
0x35c0   :  { %v9653_v41 = vmul.f32 0.0078125, %v9649_v36  ;;  %v9660_v3 = vmul.f32 %v14289_v17, %v14289_v17  ;;  %v9659_v12 = vmul.f32 %v9655_v59, %v9655_v59  ;;  %10869 = vmatpush3.bf16.msra.mxu1 %v11970_v8  ;;  %v11973_v36 = vld [vmem:[#allocation14 + $0xe8] sm:$0xff]  }
0x35c1   :  { %10870 = vmatprep.subr.bf16.mxu1 %v11971_v61 }
0x35c2   :  { %v9657_v20 = vsub.f32 %v14280_v53, %v9653_v41  ;;  %9666 = vadd.xlane.f32.xlu0 %v9660_v3  ;;  %9664 = vadd.xlane.f32.xlu1 %v9659_v12  ;;  %v11975_v41 = vld [vmem:[#allocation14 + $0xe0] sm:$0xff]   ;;  %v11978_v12 = vld [vmem:[#allocation14 + $0x98] sm:$0xff]  }
0x35c3   :  { %v11976_v3 = vld [vmem:[#allocation14 + $0xa0] sm:$0xff]  }
0x35c4   :  { %v9661_v32 = vmul.f32 %v9657_v20, %v9657_v20 }
0x35c6   :  { %9668 = vadd.xlane.f32.xlu1 %v9661_v32  ;;  %v11980_v32 = vld [vmem:[#allocation14 + $0x90] sm:$0xff]  }
0x3647   :  { %v9663_v38 = vpop.xlane.xlu0 %9662 }
0x3648   :  { %v9670_v43 = vmul.f32 0.0078125, %v9663_v38 }
0x364a   :  { %v9674_v62 = vadd.f32 1e-05, %v9670_v43 }
0x364b   :  { %v9667_v14 = vpop.xlane.xlu0 %9666  ;;  %v9665_v19 = vpop.xlane.xlu1 %9664 }
0x364c   :  { %12281 = vrsqrt.f32 %v9674_v62  ;;  %v9672_v57 = vmul.f32 0.0078125, %v9667_v14  ;;  %v9671_v28 = vmul.f32 0.0078125, %v9665_v19 }
0x364e   :  { %v9675_v63 = vadd.f32 1e-05, %v9671_v28  ;;  %v9676_v50 = vadd.f32 1e-05, %v9672_v57 }
0x364f   :  { %v9669_v52 = vpop.xlane.xlu1 %9668 }
0x3650   :  { %v9673_v54 = vmul.f32 0.0078125, %v9669_v52  ;;  %12283 = vrsqrt.f32 %v9675_v63 }
0x3651   :  { %12285 = vrsqrt.f32 %v9676_v50 }
0x3652   :  { %v9677_v47 = vadd.f32 1e-05, %v9673_v54 }
0x3654   :  { %12287 = vrsqrt.f32 %v9677_v47 }
0x3659   :  { %v12282_v15 = vpop.eup %12281 }
0x365a   :  { %v9682_v1 = vmul.f32 %v12282_v15, %v14284_v60 }
0x365c   :  { %v9692_v24 = vmul.f32 %v10460_v31, %v9682_v1 }
0x365d   :  { %v12284_v46 = vpop.eup %12283 }
0x365e   :  { %v9683_v2 = vmul.f32 %v12284_v46, %v9655_v59  ;;  %v12286_v0 = vpop.eup %12285  ;;  %v9702_v29 = vadd.f32 %v10461_v33, %v9692_v24  ;;  %v11972_v59 = vld [vmem:[#allocation14 + $0xb0] sm:$0xff]  }
0x365f   :  { %v9684_v23 = vmul.f32 %v12286_v0, %v14289_v17  ;;  %10871 = vmatpush3.bf16.msra.mxu1 %v11972_v59  ;;  %v11974_v17 = vld [vmem:[#allocation14 + $0xa8] sm:$0xff]  }
0x3660   :  { %v9693_v11 = vmul.f32 %v10460_v31, %v9683_v2  ;;  %10872 = vmatprep.subr.bf16.mxu1 %v11973_v36 }
0x3661   :  { %v12288_v25 = vpop.eup %12287  ;;  %v9694_v35 = vmul.f32 %v10460_v31, %v9684_v23 }
0x3662   :  { %v9685_v27 = vmul.f32 %v12288_v25, %v9657_v20  ;;  %v9703_v10 = vadd.f32 %v10461_v33, %v9693_v11  ;;  %v11979_v20 = vld [vmem:[#allocation14 + $0xd0] sm:$0xff]  }
0x3663   :  { %v9704_v26 = vadd.f32 %v10461_v33, %v9694_v35  ;;  %10873 = vmatpush3.bf16.msra.mxu1 %v11974_v17 }
0x3664   :  { %v9706_v42 = vpack.c.bf16 %v9703_v10, %v9702_v29  ;;  %v9695_v37 = vmul.f32 %v10460_v31, %v9685_v27  ;;  %10874 = vmatprep.subr.bf16.mxu1 %v11975_v41 }
0x3666   :  { %9832 = vmatmul.mubr.bf16.vlgmr.msra.gmra.mxu0 %v9706_v42  ;;  %v9705_v60 = vadd.f32 %v10461_v33, %v9695_v37 }
0x3667   :  { %9841 = vmatprep.mubr.bf16.mxu0 %v12525_v39  ;;  %10875 = vmatpush3.bf16.msra.mxu1 %v11976_v3  ;;  %v11977_v39 = vld [vmem:[#allocation14 + $0xd8] sm:$0xff]  }
0x3668   :  { %v9707_v44 = vpack.c.bf16 %v9705_v60, %v9704_v26  ;;  %10876 = vmatprep.subr.bf16.mxu1 %v11977_v39 }
0x366b   :  { %10877 = vmatpush3.bf16.msra.mxu1 %v11978_v12 }
0x366c   :  { %10878 = vmatprep.subr.bf16.mxu1 %v11979_v20 }
0x366e   :  { %9842 = vmatmul.mubr.bf16.gmra.mxu0 %v9707_v44 }
0x366f   :  { %10879 = vmatpush3.bf16.msra.mxu1 %v11980_v32 }
0x3670   :  { %10880 = vmatprep.subr.bf16.mxu1 %v11981_v40 }
0x3673   :  { %10881 = vmatpush3.bf16.msra.mxu1 %v11982_v58 }
0x3674   :  { %10882 = vmatprep.subr.bf16.mxu1 %v11983_v34 }
0x3677   :  { %10883 = vmatpush3.bf16.msra.mxu1 %v11984_v9 }
0x3726   :  { %v9833_v51 = vpop.f32.mrf.mxu0 }
0x3727   :  { %v14309_v18 = vadd.f32 %v9833_v51, %v9712_v13 }
0x3728   :  { %v9835_v48 = vpop.f32.mrf.mxu0 }
0x3729   :  { %v9852_v30 = vmul.f32 %v14309_v18, %v14309_v18  ;;  %v14313_v49 = vadd.f32 %v9835_v48, %v9716_v56 }
0x372a   :  { %v9837_v45 = vpop.f32.mrf.mxu0 }
0x372b   :  { %v9860_v4 = vmul.f32 %v9852_v30, %v14309_v18  ;;  %v9853_v38 = vmul.f32 %v14313_v49, %v14313_v49  ;;  %v14318_v43 = vadd.f32 %v9837_v45, %v9712_v13 }
0x372c   :  { %v9839_v22 = vpop.f32.mrf.mxu0 }
0x372d   :  { %v9868_v62 = vmul.f32 0.044715, %v9860_v4  ;;  %v9861_v16 = vmul.f32 %v9853_v38, %v14313_v49  ;;  %v9854_v14 = vmul.f32 %v14318_v43, %v14318_v43  ;;  %v14323_v19 = vadd.f32 %v9839_v22, %v9716_v56 }
0x372e   :  { %v9843_v57 = vpop.f32.mrf.mxu0 }
0x372f   :  { %v9876_v28 = vadd.f32 %v9868_v62, %v14309_v18  ;;  %v9869_v63 = vmul.f32 0.044715, %v9861_v16  ;;  %v9862_v50 = vmul.f32 %v9854_v14, %v14318_v43  ;;  %v9855_v52 = vmul.f32 %v14323_v19, %v14323_v19 }
0x3730   :  { %v14329_v54 = vadd.f32 %v9843_v57, %v9712_v13  ;;  %v9845_v47 = vpop.f32.mrf.mxu0 }
0x3731   :  { %v9884_v15 = vmul.f32 0.7978846, %v9876_v28  ;;  %v9877_v1 = vadd.f32 %v9869_v63, %v14313_v49  ;;  %v9870_v31 = vmul.f32 0.044715, %v9862_v50  ;;  %v9863_v46 = vmul.f32 %v9855_v52, %v14323_v19 }
0x3732   :  { %v9856_v2 = vmul.f32 %v14329_v54, %v14329_v54  ;;  %v14335_v24 = vadd.f32 %v9845_v47, %v9716_v56  ;;  %v9847_v0 = vpop.f32.mrf.mxu0 }
0x3733   :  { %v9885_v33 = vmul.f32 0.7978846, %v9877_v1  ;;  %v9878_v25 = vadd.f32 %v9870_v31, %v14318_v43  ;;  %v9871_v11 = vmul.f32 0.044715, %v9863_v46  ;;  %12289 = vtanh.f32 %v9884_v15 }
0x3734   :  { %v9864_v27 = vmul.f32 %v9856_v2, %v14329_v54  ;;  %v9857_v29 = vmul.f32 %v14335_v24, %v14335_v24  ;;  %v9848_v10 = vadd.f32 %v9847_v0, %v9712_v13  ;;  %v9849_v23 = vpop.f32.mrf.mxu0 }
0x3735   :  { %12291 = vtanh.f32 %v9885_v33  ;;  %v9886_v42 = vmul.f32 0.7978846, %v9878_v25  ;;  %v9879_v37 = vadd.f32 %v9871_v11, %v14323_v19  ;;  %v9850_v35 = vadd.f32 %v9849_v23, %v9716_v56 }
0x3736   :  { %v9872_v60 = vmul.f32 0.044715, %v9864_v27  ;;  %v9865_v26 = vmul.f32 %v9857_v29, %v14335_v24  ;;  %v9858_v44 = vmul.f32 %v9848_v10, %v9848_v10 }
0x3737   :  { %12293 = vtanh.f32 %v9886_v42  ;;  %v9887_v7 = vmul.f32 0.7978846, %v9879_v37  ;;  %v9859_v8 = vmul.f32 %v9850_v35, %v9850_v35  ;;  %v10478_v37 = vld [vmem:[%s14382_s12 + $0x1] ss:$0 sm:$0xff] }
0x3738   :  { %v9880_v61 = vadd.f32 %v9872_v60, %v14329_v54  ;;  %v9873_v59 = vmul.f32 0.044715, %v9865_v26  ;;  %v9866_v36 = vmul.f32 %v9858_v44, %v9848_v10 }
0x3739   :  { %12295 = vtanh.f32 %v9887_v7  ;;  %v9867_v17 = vmul.f32 %v9859_v8, %v9850_v35 }
0x373a   :  { %v9888_v41 = vmul.f32 0.7978846, %v9880_v61  ;;  %v9881_v3 = vadd.f32 %v9873_v59, %v14335_v24  ;;  %v9874_v39 = vmul.f32 0.044715, %v9866_v36 }
0x373b   :  { %v9875_v12 = vmul.f32 0.044715, %v9867_v17 }
0x373c   :  { %12297 = vtanh.f32 %v9888_v41  ;;  %v9889_v20 = vmul.f32 0.7978846, %v9881_v3  ;;  %v9882_v32 = vadd.f32 %v9874_v39, %v9848_v10 }
0x373d   :  { %v9883_v40 = vadd.f32 %v9875_v12, %v9850_v35 }
0x373e   :  { %12299 = vtanh.f32 %v9889_v20  ;;  %v9890_v58 = vmul.f32 0.7978846, %v9882_v32 }
0x373f   :  { %v9891_v34 = vmul.f32 0.7978846, %v9883_v40 }
0x3740   :  { %12301 = vtanh.f32 %v9890_v58  ;;  %v12290_v9 = vpop.eup %12289 }
0x3741   :  { %12303 = vtanh.f32 %v9891_v34  ;;  %v9900_v51 = vadd.f32 1.0, %v12290_v9 }
0x3742   :  { %v12292_v6 = vpop.eup %12291 }
0x3743   :  { %v9901_v13 = vadd.f32 1.0, %v12292_v6  ;;  %v9908_v22 = vmul.f32 0.5, %v9900_v51 }
0x3744   :  { %v12294_v56 = vpop.eup %12293 }
0x3745   :  { %v9902_v48 = vadd.f32 1.0, %v12294_v56  ;;  %v9909_v38 = vmul.f32 0.5, %v9901_v13  ;;  %v9916_v50 = vmul.f32 %v9908_v22, %v14309_v18 }
0x3746   :  { %v12296_v30 = vpop.eup %12295 }
0x3747   :  { %v9910_v45 = vmul.f32 0.5, %v9902_v48  ;;  %v9903_v4 = vadd.f32 1.0, %v12296_v30  ;;  %v9917_v28 = vmul.f32 %v9909_v38, %v14313_v49 }
0x3749   :  { %v12298_v62 = vpop.eup %12297  ;;  %v9911_v16 = vmul.f32 0.5, %v9903_v4  ;;  %v9918_v14 = vmul.f32 %v9910_v45, %v14318_v43 }
0x374a   :  { %v9904_v52 = vadd.f32 1.0, %v12298_v62 }
0x374b   :  { %v12300_v57 = vpop.eup %12299  ;;  %v9919_v63 = vmul.f32 %v9911_v16, %v14323_v19  ;;  %v9924_v46 = vpack.c.bf16 %v9918_v14, %v9916_v50 }
0x374c   :  { %v9905_v47 = vadd.f32 1.0, %v12300_v57  ;;  %v9912_v25 = vmul.f32 0.5, %v9904_v52 }
0x374d   :  { %v12302_v15 = vpop.eup %12301  ;;  %v9925_v1 = vpack.c.bf16 %v9919_v63, %v9917_v28 }
0x374e   :  { %v12304_v31 = vpop.eup %12303  ;;  %v9906_v2 = vadd.f32 1.0, %v12302_v15  ;;  %v9913_v33 = vmul.f32 0.5, %v9905_v47  ;;  %v9920_v18 = vmul.f32 %v9912_v25, %v14329_v54  ;;  %v10496_v25 = vld [vmem:[%s14384_s14] ss:$0 sm:$0xff] }
0x374f   :  { %10062 = vmatprep.mubr.bf16.mxu1 %v9925_v1  ;;  %v9907_v0 = vadd.f32 1.0, %v12304_v31 }
0x3750   :  { %v9914_v11 = vmul.f32 0.5, %v9906_v2  ;;  %10063 = vmatmul.mubr.bf16.vlgmr.msra.gmra.mxu1 %v9924_v46  ;;  %v9921_v49 = vmul.f32 %v9913_v33, %v14335_v24  ;;  %v10495_v46 = vld [vmem:[%s14383_s13] ss:$0 sm:$0xff]  ;;  %s10174_s13 = sshll.u32 %s12533_s26, 4  ;;  %s10175_s13 = int_to_ptr.vmem [resolvable:$true] %s10174_s13 }
0x3751   :  { %v9915_v43 = vmul.f32 0.5, %v9907_v0  ;;  %s12477_s17 = scalar_lea.vmem %s10175_s13, 256  ;;  %p12482_p13 = scmp.lt.s32.totalorder %s10175_s13, %s10175_s13 }
0x3752   :  { %v9922_v27 = vmul.f32 %v9914_v11, %v9848_v10  ;;  %p12478_p12 = scmp.ne.s32.totalorder %s10175_s13, %s12477_s17  ;;  %p12483_p0 = scmp.lt.s32.totalorder %s12477_s17, %s12477_s17 }
0x3753   :  { %v9923_v19 = vmul.f32 %v9915_v43, %v9850_v35 }
0x3754   :  { %v9926_v23 = vpack.c.bf16 %v9922_v27, %v9920_v18  ;;  %p12484_p1 = por %p12483_p0, %p12482_p13 }
0x3755   :  { %v9927_v29 = vpack.c.bf16 %v9923_v19, %v9921_v49 }
0x3756   :  { %p12485_p2 = pnand %p12484_p1, %p12478_p12 }
0x3757   :  { %10070 = vmatprep.mubr.bf16.mxu1 %v9927_v29 }
0x3758   :  { %10071 = vmatmul.mubr.bf16.gmra.mxu1 %v9926_v23 }
0x3810   :  { %v10884_v42 = vpop.f32.mrf.mxu1 }
0x3812   :  { %v10885_v60 = vpop.f32.mrf.mxu1 }
0x3813   :  { %v10886_v26 = vadd.f32 %v10885_v60, %v10884_v42 }
0x3814   :  { %v10887_v44 = vpop.f32.mrf.mxu1 }
0x3815   :  { %v10065_v7 = vadd.f32 %v10886_v26, %v10478_v37 }
0x3816   :  { %v10888_v8 = vpop.f32.mrf.mxu1 }
0x3817   :  { %v10889_v10 = vadd.f32 %v10888_v8, %v10887_v44  ;;  %v10079_v24 = vadd.f32 %v10065_v7, %v14269_v21 }
0x3818   :  { %v10890_v35 = vpop.f32.mrf.mxu1 }
0x3819   :  { %v10068_v61 = vadd.f32 %v10889_v10, %v10478_v37  ;;  %10085 = vadd.xlane.f32.xlu0 %v10079_v24 }
0x381a   :  { %v10891_v54 = vpop.f32.mrf.mxu1 }
0x381b   :  { %v10892_v59 = vadd.f32 %v10891_v54, %v10890_v35  ;;  %v10080_v36 = vadd.f32 %v10068_v61, %v14276_v5 }
0x381c   :  { %v10893_v17 = vpop.f32.mrf.mxu1 }
0x381d   :  { %v10073_v41 = vadd.f32 %v10892_v59, %v10478_v37  ;;  %10087 = vadd.xlane.f32.xlu1 %v10080_v36 }
0x381e   :  { %v10894_v3 = vpop.f32.mrf.mxu1 }
0x381f   :  { %v10895_v39 = vadd.f32 %v10894_v3, %v10893_v17  ;;  %v10081_v12 = vadd.f32 %v10073_v41, %v14274_v55 }
0x3821   :  { %v10076_v20 = vadd.f32 %v10895_v39, %v10478_v37  ;;  %10089 = vadd.xlane.f32.xlu0 %v10081_v12 }
0x3823   :  { %v10082_v32 = vadd.f32 %v10076_v20, %v14280_v53 }
0x3825   :  { %10091 = vadd.xlane.f32.xlu1 %v10082_v32 }
0x38a2   :  { %v10086_v21 = vpop.xlane.xlu0 %10085 }
0x38a3   :  { %v10093_v40 = vmul.f32 0.0078125, %v10086_v21 }
0x38a5   :  { %v10097_v58 = vsub.f32 %v10079_v24, %v10093_v40 }
0x38a6   :  { %v10088_v34 = vpop.xlane.xlu1 %10087 }
0x38a7   :  { %v10094_v9 = vmul.f32 0.0078125, %v10088_v34  ;;  %v10101_v6 = vmul.f32 %v10097_v58, %v10097_v58 }
0x38a9   :  { %v10098_v13 = vsub.f32 %v10080_v36, %v10094_v9  ;;  %10105 = vadd.xlane.f32.xlu0 %v10101_v6 }
0x38aa   :  { %v10090_v5 = vpop.xlane.xlu0 %10089 }
0x38ab   :  { %v10095_v56 = vmul.f32 0.0078125, %v10090_v5  ;;  %v10102_v51 = vmul.f32 %v10098_v13, %v10098_v13 }
0x38ad   :  { %v10099_v48 = vsub.f32 %v10081_v12, %v10095_v56  ;;  %10107 = vadd.xlane.f32.xlu1 %v10102_v51 }
0x38ae   :  { %v10092_v30 = vpop.xlane.xlu1 %10091 }
0x38af   :  { %v10096_v55 = vmul.f32 0.0078125, %v10092_v30  ;;  %v10103_v45 = vmul.f32 %v10099_v48, %v10099_v48 }
0x38b1   :  { %v10100_v4 = vsub.f32 %v10082_v32, %v10096_v55  ;;  %10109 = vadd.xlane.f32.xlu0 %v10103_v45 }
0x38b3   :  { %v10104_v53 = vmul.f32 %v10100_v4, %v10100_v4 }
0x38b5   :  { %10111 = vadd.xlane.f32.xlu1 %v10104_v53 }
0x3932   :  { %v10106_v38 = vpop.xlane.xlu0 %10105 }
0x3933   :  { %v10113_v22 = vmul.f32 0.0078125, %v10106_v38 }
0x3935   :  { %v10117_v62 = vadd.f32 1e-05, %v10113_v22 }
0x3936   :  { %v10108_v16 = vpop.xlane.xlu1 %10107 }
0x3937   :  { %12305 = vrsqrt.f32 %v10117_v62  ;;  %v10114_v14 = vmul.f32 0.0078125, %v10108_v16 }
0x3939   :  { %v10118_v57 = vadd.f32 1e-05, %v10114_v14 }
0x393a   :  { %v10110_v28 = vpop.xlane.xlu0 %10109 }
0x393b   :  { %12307 = vrsqrt.f32 %v10118_v57  ;;  %v10115_v63 = vmul.f32 0.0078125, %v10110_v28 }
0x393d   :  { %v10119_v50 = vadd.f32 1e-05, %v10115_v63 }
0x393e   :  { %v10112_v52 = vpop.xlane.xlu1 %10111 }
0x393f   :  { %12309 = vrsqrt.f32 %v10119_v50  ;;  %v10116_v47 = vmul.f32 0.0078125, %v10112_v52 }
0x3941   :  { %v10120_v15 = vadd.f32 1e-05, %v10116_v47 }
0x3943   :  { %12311 = vrsqrt.f32 %v10120_v15 }
0x3944   :  { %v12306_v1 = vpop.eup %12305 }
0x3945   :  { %v10125_v31 = vmul.f32 %v12306_v1, %v10097_v58 }
0x3947   :  { %v10135_v33 = vmul.f32 %v10495_v46, %v10125_v31 }
0x3948   :  { %v12308_v2 = vpop.eup %12307 }
0x3949   :  { %v10126_v0 = vmul.f32 %v12308_v2, %v10098_v13  ;;  %v10145_v49 = vadd.f32 %v10496_v25, %v10135_v33 }
0x394b   :  { %v10136_v11 = vmul.f32 %v10495_v46, %v10126_v0 }
0x394c   :  { %v12310_v43 = vpop.eup %12309 }
0x394d   :  { %v10127_v27 = vmul.f32 %v12310_v43, %v10099_v48  ;;  %v10146_v19 = vadd.f32 %v10496_v25, %v10136_v11 }
0x394f   :  { %v10508_v18 = vpack.c.bf16 %v10146_v19, %v10145_v49  ;;  %v10137_v42 = vmul.f32 %v10495_v46, %v10127_v27 }
0x3950   :  { %v12312_v29 = vpop.eup %12311 }
0x3951   :  { %v10128_v23 = vmul.f32 %v12312_v29, %v10100_v4  ;;  %10509 = vst [vmem:[#allocation16] sm:$0xff] %v10508_v18   ;;  %v10147_v60 = vadd.f32 %v10496_v25, %v10137_v42 }
0x3953   :  { %v10138_v37 = vmul.f32 %v10495_v46, %v10128_v23 }
0x3955   :  { %v10148_v26 = vadd.f32 %v10496_v25, %v10138_v37 }
0x3957   :  { %v10513_v44 = vpack.c.bf16 %v10148_v26, %v10147_v60 }
0x3959   :  { %10515 = vst [vmem:[#allocation16 + $0x8] sm:$0xff] %v10513_v44  }
0x395a   :  { %12488 = shalt.err (!%p12485_p2)
}
0x395b   :  { %10180 = dma.vmem_to_hbm [thread:$0]  %s10175_s13, 256, %s14385_s15, [#allocation4], %s12521_s1, %s12521_s1, %s12522_s19  }
0x395c   :  { %12507 = dma.done.wait [#allocation4], 256  }
0x395d   :  { %12508 = vsyncadd [#allocation4], 4294967040 }
0x395e   :  { %10184 = vsyncpa [#allocation3], 1 }
0x395f   :  { %10185 = vsyncpa [#allocation6], 1 }
0x3960   :  { %10186 = vsyncpa [#allocation9], 1 }
0x3961   :  { %10187 = vsyncpa [#allocation12], 1 }
0x3962   :  { %10188 = vsyncpa [#allocation15], 1 }
0x3963   :  { %10189 = vsyncpa [#allocation4], 1 }

</bundles_post_ra>
